<compile_context>
chip_gen: v7x
topology: tpu7x:2x2x1
jax: 0.10.0
libtpu: 0.0.40
codegen_flags: <defaults>
</compile_context>

<pallas_src>
import jax
import jax.numpy as jnp
from jax.experimental import pallas as pl
from jax.experimental.pallas import tpu as pltpu

VMEM_SPEC = pl.BlockSpec(memory_space=pltpu.MemorySpace.VMEM)
BN_EPS = 1e-5


# ----------------------------------------------------------------------------
# In-kernel helpers (operate on traced values / VMEM refs)
# ----------------------------------------------------------------------------
def _conv1x1(x, w):
    """1x1 conv, no bias: (N,H,W,Cin) @ (Cin,Cout) -> (N,H,W,Cout)."""
    N, H, W, Cin = x.shape
    Cout = w.shape[-1]
    y = jnp.dot(x.reshape(N * H * W, Cin), w, preferred_element_type=jnp.float32)
    return y.reshape(N, H, W, Cout)


def _pool3x3_from_pad(pad_ref, H, W):
    """Separable AvgPool2d(3, stride=1, pad=1, count_include_pad=True).

    pad_ref is (N, H+2, W+2, C) with a zero border and the current x in its
    interior. Returns (pooled (N,H,W,C), interior x (N,H,W,C)).
    """
    rm = pad_ref[:, 1:H + 1, :, :]                                   # (N,H,W+2,C)
    r = pad_ref[:, 0:H, :, :] + rm + pad_ref[:, 2:H + 2, :, :]       # row sum
    p = (r[:, :, 0:W, :] + r[:, :, 1:W + 1, :] + r[:, :, 2:W + 2, :]) * (1.0 / 9.0)
    return p, rm[:, :, 1:W + 1, :]


def _repeat_block(pad_ref, w, repeat, H, W):
    """GLOM Repeat: x = conv1x1(avgpool3(x)) + x, `repeat` times.

    The running x lives in the interior of pad_ref (border stays zero)."""
    def body(_, carry):
        p, xc = _pool3x3_from_pad(pad_ref, H, W)
        pad_ref[:, 1:H + 1, 1:W + 1, :] = _conv1x1(p, w) + xc
        return carry

    jax.lax.fori_loop(0, repeat, body, 0)
    return pad_ref[:, 1:H + 1, 1:W + 1, :]


def _down_block(pad_ref, w, rows_buf, cols_buf, H, W):
    """GLOM stride-2 block: stride-1 pool sampled at even (h,w), then 1x1 conv.

    Even-row / even-col gathers are done with static slices through small VMEM
    scratch buffers (no strided slices, no XLA round trip)."""
    p, _ = _pool3x3_from_pad(pad_ref, H, W)
    Ho, Wo = H // 2, W // 2
    for i in range(Ho):                                   # even rows (major dim)
        rows_buf[:, i:i + 1, :, :] = p[:, 2 * i:2 * i + 1, :, :]
    rh = rows_buf[...]                                    # (N, Ho, W, C)
    for j in range(Wo):                                   # even cols (sublane dim)
        cols_buf[:, :, j:j + 1, :] = rh[:, :, 2 * j:2 * j + 1, :]
    return _conv1x1(cols_buf[...], w)                     # (N, Ho, Wo, C)


def _batchnorm(x, gamma, beta):
    """BatchNorm2d, training mode: per-channel batch mean / biased variance."""
    mean = jnp.mean(x, axis=(0, 1, 2), keepdims=True)
    var = jnp.mean(jnp.square(x - mean), axis=(0, 1, 2), keepdims=True)
    return (x - mean) * jax.lax.rsqrt(var + BN_EPS) * gamma + beta


# ----------------------------------------------------------------------------
# The single fused kernel
# ----------------------------------------------------------------------------
def resnet56_kernel(x_ref, w1_ref, w11_ref, bng_ref, bnb_ref, fcw_ref, fcb_ref,
                    o_ref,
                    pad0, pad1, pad2, pad3, d1_rows, d1_cols, d2_rows, d2_cols):
    N, H, W, CIN = x_ref.shape          # (N, H, W, 8)  (channels 3..7 are zero)
    C = w11_ref.shape[-1]               # 64
    H2, W2, H4, W4 = H // 2, W // 2, H // 4, W // 4

    # Zero the padded scratch buffers once; afterwards only their interiors are
    # written, so the 1-pixel zero borders provide conv1 / AvgPool zero padding.
    pad0[...] = jnp.zeros_like(pad0)
    pad1[...] = jnp.zeros_like(pad1)
    pad2[...] = jnp.zeros_like(pad2)
    pad3[...] = jnp.zeros_like(pad3)

    # --- conv1: 3x3, stride 1, pad 1, no bias (Cin zero-padded 3 -> 8, exact) --
    pad0[:, 1:H + 1, 1:W + 1, :] = x_ref[...]
    acc = jnp.zeros((N * H * W, C), jnp.float32)
    for kh in range(3):
        for kw in range(3):
            patch = pad0[:, kh:kh + H, kw:kw + W, :].reshape(N * H * W, CIN)
            acc = acc + jnp.dot(patch, w1_ref[kh, kw],
                                preferred_element_type=jnp.float32)
    x = acc.reshape(N, H, W, C)

    # --- layer1: Repeat(64, 9) + BatchNorm2d -----------------------------------
    pad1[:, 1:H + 1, 1:W + 1, :] = x
    x = _repeat_block(pad1, w11_ref[0], 9, H, W)
    x = _batchnorm(x, bng_ref[0], bnb_ref[0])

    # --- down1: AvgPool(3, s=2, p=1) -> 1x1 conv --------------------------------
    pad1[:, 1:H + 1, 1:W + 1, :] = x
    x = _down_block(pad1, w11_ref[1], d1_rows, d1_cols, H, W)

    # --- layer2 + BN -------------------------------------------------------------
    pad2[:, 1:H2 + 1, 1:W2 + 1, :] = x
    x = _repeat_block(pad2, w11_ref[2], 9, H2, W2)
    x = _batchnorm(x, bng_ref[1], bnb_ref[1])

    # --- down2 -------------------------------------------------------------------
    pad2[:, 1:H2 + 1, 1:W2 + 1, :] = x
    x = _down_block(pad2, w11_ref[3], d2_rows, d2_cols, H2, W2)

    # --- layer3 + BN -------------------------------------------------------------
    pad3[:, 1:H4 + 1, 1:W4 + 1, :] = x
    x = _repeat_block(pad3, w11_ref[4], 9, H4, W4)
    x = _batchnorm(x, bng_ref[2], bnb_ref[2])

    # --- head: AdaptiveAvgPool2d((1,1)) + flatten + Linear(64, 10) ---------------
    pooled = jnp.mean(x, axis=(1, 2))                      # (N, C)
    o_ref[...] = jnp.dot(pooled, fcw_ref[...],
                         preferred_element_type=jnp.float32) + fcb_ref[...]


# ----------------------------------------------------------------------------
# JAX glue
# ----------------------------------------------------------------------------
def init_params(key):
    ks = jax.random.split(key, 4)

    def nrm(k, shape, scale):
        return scale * jax.random.normal(k, shape, jnp.float32)

    w1 = nrm(ks[0], (3, 3, 3, 64), 0.08)                         # (kh, kw, cin, cout)
    return {
        "conv1": jnp.pad(w1, ((0, 0), (0, 0), (0, 5), (0, 0))),  # cin 3 -> 8 (zeros)
        # 1x1 conv weights [Cin, Cout] (transposed torch weight), stacked as
        # [layer1, down1, layer2, down2, layer3]:
        "w1x1": nrm(ks[1], (5, 64, 64), 0.04),
        "bn_g": jnp.ones((3, 1, 1, 1, 64), jnp.float32),
        "bn_b": jnp.zeros((3, 1, 1, 1, 64), jnp.float32),
        "fc_w": nrm(ks[2], (64, 10), 0.1),
        "fc_b": nrm(ks[3], (1, 10), 0.01),
    }


@jax.jit
def resnet56_forward(x_nchw, params):
    # NCHW -> NHWC plus zero channel-pad 3 -> 8 (single fused XLA preamble op).
    x = jnp.transpose(x_nchw, (0, 2, 3, 1)).astype(jnp.float32)
    x = jnp.pad(x, ((0, 0), (0, 0), (0, 0), (0, 8 - x.shape[-1])))
    N, H, W, _ = x.shape
    C = 64
    H2, W2, H4, W4 = H // 2, W // 2, H // 4, W // 4

    scratch = [
        pltpu.VMEM((N, H + 2, W + 2, 8), jnp.float32),     # pad0: conv1 input (padded)
        pltpu.VMEM((N, H + 2, W + 2, C), jnp.float32),     # pad1: full-res GLOM buffer
        pltpu.VMEM((N, H2 + 2, W2 + 2, C), jnp.float32),   # pad2: half-res
        pltpu.VMEM((N, H4 + 2, W4 + 2, C), jnp.float32),   # pad3: quarter-res
        pltpu.VMEM((N, H2, W, C), jnp.float32),            # down1 even-row gather
        pltpu.VMEM((N, H2, W2, C), jnp.float32),           # down1 even-col gather
        pltpu.VMEM((N, H4, W2, C), jnp.float32),           # down2 even-row gather
        pltpu.VMEM((N, H4, W4, C), jnp.float32),           # down2 even-col gather
    ]
    return pl.pallas_call(
        resnet56_kernel,
        out_shape=jax.ShapeDtypeStruct((N, 10), jnp.float32),
        in_specs=[VMEM_SPEC] * 7,
        out_specs=VMEM_SPEC,
        scratch_shapes=scratch,
    )(x, params["conv1"], params["w1x1"], params["bn_g"], params["bn_b"],
      params["fc_w"], params["fc_b"])


if __name__ == "__main__":
    x = jax.random.normal(jax.random.PRNGKey(0), (2, 3, 16, 16), jnp.float32)  # NCHW
    params = init_params(jax.random.PRNGKey(1))
    out = resnet56_forward(x, params)
    jax.block_until_ready(out)
    assert out.shape == (2, 10) and out.dtype == jnp.float32
    print("KERNEL_OK")
</pallas_src>

<mosaic_0001>
module attributes {stable_mosaic.version = 11 : i64} {
  func.func @resnet56_kernel(%arg0: memref<2x16x16x8xf32, #tpu.memory_space<vmem>>, %arg1: memref<3x3x8x64xf32, #tpu.memory_space<vmem>>, %arg2: memref<5x64x64xf32, #tpu.memory_space<vmem>>, %arg3: memref<3x1x1x1x64xf32, #tpu.memory_space<vmem>>, %arg4: memref<3x1x1x1x64xf32, #tpu.memory_space<vmem>>, %arg5: memref<64x10xf32, #tpu.memory_space<vmem>>, %arg6: memref<1x10xf32, #tpu.memory_space<vmem>>, %arg7: memref<2x10xf32, #tpu.memory_space<vmem>>, %arg8: memref<2x18x18x8xf32, #tpu.memory_space<vmem>>, %arg9: memref<2x18x18x64xf32, #tpu.memory_space<vmem>>, %arg10: memref<2x10x10x64xf32, #tpu.memory_space<vmem>>, %arg11: memref<2x6x6x64xf32, #tpu.memory_space<vmem>>, %arg12: memref<2x8x16x64xf32, #tpu.memory_space<vmem>>, %arg13: memref<2x8x8x64xf32, #tpu.memory_space<vmem>>, %arg14: memref<2x4x8x64xf32, #tpu.memory_space<vmem>>, %arg15: memref<2x4x4x64xf32, #tpu.memory_space<vmem>>) attributes {dimension_semantics = [], scalar_prefetch = 0 : i64, scratch_operands = 8 : i64, tpu.core_type = #tpu.core_type<tc>} {
    %cst = arith.constant 0.000000e+00 : f32
    %0 = vector.broadcast %cst : f32 to vector<2x18x18x8xf32>
    %c0 = arith.constant 0 : index
    %c0_0 = arith.constant 0 : index
    %c0_1 = arith.constant 0 : index
    %c0_2 = arith.constant 0 : index
    %1 = vector.load %arg8[%c0, %c0_0, %c0_1, %c0_2] : memref<2x18x18x8xf32, #tpu.memory_space<vmem>>, vector<2x18x18x8xf32>
    tpu.vector_store %arg8[%c0, %c0_0, %c0_1, %c0_2], %0 {strides = array<i32>} : memref<2x18x18x8xf32, #tpu.memory_space<vmem>>, vector<2x18x18x8xf32>,
    %cst_3 = arith.constant 0.000000e+00 : f32
    %2 = vector.broadcast %cst_3 : f32 to vector<2x18x18x64xf32>
    %c0_4 = arith.constant 0 : index
    %c0_5 = arith.constant 0 : index
    %c0_6 = arith.constant 0 : index
    %c0_7 = arith.constant 0 : index
    %3 = vector.load %arg9[%c0_4, %c0_5, %c0_6, %c0_7] : memref<2x18x18x64xf32, #tpu.memory_space<vmem>>, vector<2x18x18x64xf32>
    tpu.vector_store %arg9[%c0_4, %c0_5, %c0_6, %c0_7], %2 {strides = array<i32>} : memref<2x18x18x64xf32, #tpu.memory_space<vmem>>, vector<2x18x18x64xf32>,
    %cst_8 = arith.constant 0.000000e+00 : f32
    %4 = vector.broadcast %cst_8 : f32 to vector<2x10x10x64xf32>
    %c0_9 = arith.constant 0 : index
    %c0_10 = arith.constant 0 : index
    %c0_11 = arith.constant 0 : index
    %c0_12 = arith.constant 0 : index
    %5 = vector.load %arg10[%c0_9, %c0_10, %c0_11, %c0_12] : memref<2x10x10x64xf32, #tpu.memory_space<vmem>>, vector<2x10x10x64xf32>
    tpu.vector_store %arg10[%c0_9, %c0_10, %c0_11, %c0_12], %4 {strides = array<i32>} : memref<2x10x10x64xf32, #tpu.memory_space<vmem>>, vector<2x10x10x64xf32>,
    %cst_13 = arith.constant 0.000000e+00 : f32
    %6 = vector.broadcast %cst_13 : f32 to vector<2x6x6x64xf32>
    %c0_14 = arith.constant 0 : index
    %c0_15 = arith.constant 0 : index
    %c0_16 = arith.constant 0 : index
    %c0_17 = arith.constant 0 : index
    %7 = vector.load %arg11[%c0_14, %c0_15, %c0_16, %c0_17] : memref<2x6x6x64xf32, #tpu.memory_space<vmem>>, vector<2x6x6x64xf32>
    tpu.vector_store %arg11[%c0_14, %c0_15, %c0_16, %c0_17], %6 {strides = array<i32>} : memref<2x6x6x64xf32, #tpu.memory_space<vmem>>, vector<2x6x6x64xf32>,
    %c0_18 = arith.constant 0 : index
    %c0_19 = arith.constant 0 : index
    %c0_20 = arith.constant 0 : index
    %c0_21 = arith.constant 0 : index
    %8 = vector.load %arg0[%c0_18, %c0_19, %c0_20, %c0_21] : memref<2x16x16x8xf32, #tpu.memory_space<vmem>>, vector<2x16x16x8xf32>
    %c0_22 = arith.constant 0 : index
    %c1 = arith.constant 1 : index
    %c1_23 = arith.constant 1 : index
    %c0_24 = arith.constant 0 : index
    %9 = vector.load %arg8[%c0_22, %c1, %c1_23, %c0_24] : memref<2x18x18x8xf32, #tpu.memory_space<vmem>>, vector<2x16x16x8xf32>
    tpu.vector_store %arg8[%c0_22, %c1, %c1_23, %c0_24], %8 {strides = array<i32>} : memref<2x18x18x8xf32, #tpu.memory_space<vmem>>, vector<2x16x16x8xf32>,
    %cst_25 = arith.constant 0.000000e+00 : f32
    %10 = vector.broadcast %cst_25 : f32 to vector<512x64xf32>
    %c0_26 = arith.constant 0 : index
    %c0_27 = arith.constant 0 : index
    %c0_28 = arith.constant 0 : index
    %c0_29 = arith.constant 0 : index
    %11 = vector.load %arg8[%c0_26, %c0_27, %c0_28, %c0_29] : memref<2x18x18x8xf32, #tpu.memory_space<vmem>>, vector<2x16x16x8xf32>
    %12 = vector.shape_cast %11 : vector<2x16x16x8xf32> to vector<512x8xf32>
    %c0_30 = arith.constant 0 : index
    %c0_31 = arith.constant 0 : index
    %c0_32 = arith.constant 0 : index
    %c0_33 = arith.constant 0 : index
    %13 = vector.load %arg1[%c0_30, %c0_31, %c0_32, %c0_33] : memref<3x3x8x64xf32, #tpu.memory_space<vmem>>, vector<1x1x8x64xf32>
    %14 = vector.shape_cast %13 : vector<1x1x8x64xf32> to vector<8x64xf32>
    %cst_34 = arith.constant dense<0.000000e+00> : vector<512x64xf32>
    %15 = tpu.matmul %12, %14, %cst_34 {dimension_numbers = #tpu.dot_dimension_numbers<[1], [0], [0], [1], [0, 0, 1, 1], [], []>} : vector<512x8xf32>, vector<8x64xf32>, vector<512x64xf32> -> vector<512x64xf32>
    %16 = arith.addf %10, %15 : vector<512x64xf32>
    %c0_35 = arith.constant 0 : index
    %c0_36 = arith.constant 0 : index
    %c1_37 = arith.constant 1 : index
    %c0_38 = arith.constant 0 : index
    %17 = vector.load %arg8[%c0_35, %c0_36, %c1_37, %c0_38] : memref<2x18x18x8xf32, #tpu.memory_space<vmem>>, vector<2x16x16x8xf32>
    %18 = vector.shape_cast %17 : vector<2x16x16x8xf32> to vector<512x8xf32>
    %c0_39 = arith.constant 0 : index
    %c1_40 = arith.constant 1 : index
    %c0_41 = arith.constant 0 : index
    %c0_42 = arith.constant 0 : index
    %19 = vector.load %arg1[%c0_39, %c1_40, %c0_41, %c0_42] : memref<3x3x8x64xf32, #tpu.memory_space<vmem>>, vector<1x1x8x64xf32>
    %20 = vector.shape_cast %19 : vector<1x1x8x64xf32> to vector<8x64xf32>
    %cst_43 = arith.constant dense<0.000000e+00> : vector<512x64xf32>
    %21 = tpu.matmul %18, %20, %cst_43 {dimension_numbers = #tpu.dot_dimension_numbers<[1], [0], [0], [1], [0, 0, 1, 1], [], []>} : vector<512x8xf32>, vector<8x64xf32>, vector<512x64xf32> -> vector<512x64xf32>
    %22 = arith.addf %16, %21 : vector<512x64xf32>
    %c0_44 = arith.constant 0 : index
    %c0_45 = arith.constant 0 : index
    %c2 = arith.constant 2 : index
    %c0_46 = arith.constant 0 : index
    %23 = vector.load %arg8[%c0_44, %c0_45, %c2, %c0_46] : memref<2x18x18x8xf32, #tpu.memory_space<vmem>>, vector<2x16x16x8xf32>
    %24 = vector.shape_cast %23 : vector<2x16x16x8xf32> to vector<512x8xf32>
    %c0_47 = arith.constant 0 : index
    %c2_48 = arith.constant 2 : index
    %c0_49 = arith.constant 0 : index
    %c0_50 = arith.constant 0 : index
    %25 = vector.load %arg1[%c0_47, %c2_48, %c0_49, %c0_50] : memref<3x3x8x64xf32, #tpu.memory_space<vmem>>, vector<1x1x8x64xf32>
    %26 = vector.shape_cast %25 : vector<1x1x8x64xf32> to vector<8x64xf32>
    %cst_51 = arith.constant dense<0.000000e+00> : vector<512x64xf32>
    %27 = tpu.matmul %24, %26, %cst_51 {dimension_numbers = #tpu.dot_dimension_numbers<[1], [0], [0], [1], [0, 0, 1, 1], [], []>} : vector<512x8xf32>, vector<8x64xf32>, vector<512x64xf32> -> vector<512x64xf32>
    %28 = arith.addf %22, %27 : vector<512x64xf32>
    %c0_52 = arith.constant 0 : index
    %c1_53 = arith.constant 1 : index
    %c0_54 = arith.constant 0 : index
    %c0_55 = arith.constant 0 : index
    %29 = vector.load %arg8[%c0_52, %c1_53, %c0_54, %c0_55] : memref<2x18x18x8xf32, #tpu.memory_space<vmem>>, vector<2x16x16x8xf32>
    %30 = vector.shape_cast %29 : vector<2x16x16x8xf32> to vector<512x8xf32>
    %c1_56 = arith.constant 1 : index
    %c0_57 = arith.constant 0 : index
    %c0_58 = arith.constant 0 : index
    %c0_59 = arith.constant 0 : index
    %31 = vector.load %arg1[%c1_56, %c0_57, %c0_58, %c0_59] : memref<3x3x8x64xf32, #tpu.memory_space<vmem>>, vector<1x1x8x64xf32>
    %32 = vector.shape_cast %31 : vector<1x1x8x64xf32> to vector<8x64xf32>
    %cst_60 = arith.constant dense<0.000000e+00> : vector<512x64xf32>
    %33 = tpu.matmul %30, %32, %cst_60 {dimension_numbers = #tpu.dot_dimension_numbers<[1], [0], [0], [1], [0, 0, 1, 1], [], []>} : vector<512x8xf32>, vector<8x64xf32>, vector<512x64xf32> -> vector<512x64xf32>
    %34 = arith.addf %28, %33 : vector<512x64xf32>
    %c0_61 = arith.constant 0 : index
    %c1_62 = arith.constant 1 : index
    %c1_63 = arith.constant 1 : index
    %c0_64 = arith.constant 0 : index
    %35 = vector.load %arg8[%c0_61, %c1_62, %c1_63, %c0_64] : memref<2x18x18x8xf32, #tpu.memory_space<vmem>>, vector<2x16x16x8xf32>
    %36 = vector.shape_cast %35 : vector<2x16x16x8xf32> to vector<512x8xf32>
    %c1_65 = arith.constant 1 : index
    %c1_66 = arith.constant 1 : index
    %c0_67 = arith.constant 0 : index
    %c0_68 = arith.constant 0 : index
    %37 = vector.load %arg1[%c1_65, %c1_66, %c0_67, %c0_68] : memref<3x3x8x64xf32, #tpu.memory_space<vmem>>, vector<1x1x8x64xf32>
    %38 = vector.shape_cast %37 : vector<1x1x8x64xf32> to vector<8x64xf32>
    %cst_69 = arith.constant dense<0.000000e+00> : vector<512x64xf32>
    %39 = tpu.matmul %36, %38, %cst_69 {dimension_numbers = #tpu.dot_dimension_numbers<[1], [0], [0], [1], [0, 0, 1, 1], [], []>} : vector<512x8xf32>, vector<8x64xf32>, vector<512x64xf32> -> vector<512x64xf32>
    %40 = arith.addf %34, %39 : vector<512x64xf32>
    %c0_70 = arith.constant 0 : index
    %c1_71 = arith.constant 1 : index
    %c2_72 = arith.constant 2 : index
    %c0_73 = arith.constant 0 : index
    %41 = vector.load %arg8[%c0_70, %c1_71, %c2_72, %c0_73] : memref<2x18x18x8xf32, #tpu.memory_space<vmem>>, vector<2x16x16x8xf32>
    %42 = vector.shape_cast %41 : vector<2x16x16x8xf32> to vector<512x8xf32>
    %c1_74 = arith.constant 1 : index
    %c2_75 = arith.constant 2 : index
    %c0_76 = arith.constant 0 : index
    %c0_77 = arith.constant 0 : index
    %43 = vector.load %arg1[%c1_74, %c2_75, %c0_76, %c0_77] : memref<3x3x8x64xf32, #tpu.memory_space<vmem>>, vector<1x1x8x64xf32>
    %44 = vector.shape_cast %43 : vector<1x1x8x64xf32> to vector<8x64xf32>
    %cst_78 = arith.constant dense<0.000000e+00> : vector<512x64xf32>
    %45 = tpu.matmul %42, %44, %cst_78 {dimension_numbers = #tpu.dot_dimension_numbers<[1], [0], [0], [1], [0, 0, 1, 1], [], []>} : vector<512x8xf32>, vector<8x64xf32>, vector<512x64xf32> -> vector<512x64xf32>
    %46 = arith.addf %40, %45 : vector<512x64xf32>
    %c0_79 = arith.constant 0 : index
    %c2_80 = arith.constant 2 : index
    %c0_81 = arith.constant 0 : index
    %c0_82 = arith.constant 0 : index
    %47 = vector.load %arg8[%c0_79, %c2_80, %c0_81, %c0_82] : memref<2x18x18x8xf32, #tpu.memory_space<vmem>>, vector<2x16x16x8xf32>
    %48 = vector.shape_cast %47 : vector<2x16x16x8xf32> to vector<512x8xf32>
    %c2_83 = arith.constant 2 : index
    %c0_84 = arith.constant 0 : index
    %c0_85 = arith.constant 0 : index
    %c0_86 = arith.constant 0 : index
    %49 = vector.load %arg1[%c2_83, %c0_84, %c0_85, %c0_86] : memref<3x3x8x64xf32, #tpu.memory_space<vmem>>, vector<1x1x8x64xf32>
    %50 = vector.shape_cast %49 : vector<1x1x8x64xf32> to vector<8x64xf32>
    %cst_87 = arith.constant dense<0.000000e+00> : vector<512x64xf32>
    %51 = tpu.matmul %48, %50, %cst_87 {dimension_numbers = #tpu.dot_dimension_numbers<[1], [0], [0], [1], [0, 0, 1, 1], [], []>} : vector<512x8xf32>, vector<8x64xf32>, vector<512x64xf32> -> vector<512x64xf32>
    %52 = arith.addf %46, %51 : vector<512x64xf32>
    %c0_88 = arith.constant 0 : index
    %c2_89 = arith.constant 2 : index
    %c1_90 = arith.constant 1 : index
    %c0_91 = arith.constant 0 : index
    %53 = vector.load %arg8[%c0_88, %c2_89, %c1_90, %c0_91] : memref<2x18x18x8xf32, #tpu.memory_space<vmem>>, vector<2x16x16x8xf32>
    %54 = vector.shape_cast %53 : vector<2x16x16x8xf32> to vector<512x8xf32>
    %c2_92 = arith.constant 2 : index
    %c1_93 = arith.constant 1 : index
    %c0_94 = arith.constant 0 : index
    %c0_95 = arith.constant 0 : index
    %55 = vector.load %arg1[%c2_92, %c1_93, %c0_94, %c0_95] : memref<3x3x8x64xf32, #tpu.memory_space<vmem>>, vector<1x1x8x64xf32>
    %56 = vector.shape_cast %55 : vector<1x1x8x64xf32> to vector<8x64xf32>
    %cst_96 = arith.constant dense<0.000000e+00> : vector<512x64xf32>
    %57 = tpu.matmul %54, %56, %cst_96 {dimension_numbers = #tpu.dot_dimension_numbers<[1], [0], [0], [1], [0, 0, 1, 1], [], []>} : vector<512x8xf32>, vector<8x64xf32>, vector<512x64xf32> -> vector<512x64xf32>
    %58 = arith.addf %52, %57 : vector<512x64xf32>
    %c0_97 = arith.constant 0 : index
    %c2_98 = arith.constant 2 : index
    %c2_99 = arith.constant 2 : index
    %c0_100 = arith.constant 0 : index
    %59 = vector.load %arg8[%c0_97, %c2_98, %c2_99, %c0_100] : memref<2x18x18x8xf32, #tpu.memory_space<vmem>>, vector<2x16x16x8xf32>
    %60 = vector.shape_cast %59 : vector<2x16x16x8xf32> to vector<512x8xf32>
    %c2_101 = arith.constant 2 : index
    %c2_102 = arith.constant 2 : index
    %c0_103 = arith.constant 0 : index
    %c0_104 = arith.constant 0 : index
    %61 = vector.load %arg1[%c2_101, %c2_102, %c0_103, %c0_104] : memref<3x3x8x64xf32, #tpu.memory_space<vmem>>, vector<1x1x8x64xf32>
    %62 = vector.shape_cast %61 : vector<1x1x8x64xf32> to vector<8x64xf32>
    %cst_105 = arith.constant dense<0.000000e+00> : vector<512x64xf32>
    %63 = tpu.matmul %60, %62, %cst_105 {dimension_numbers = #tpu.dot_dimension_numbers<[1], [0], [0], [1], [0, 0, 1, 1], [], []>} : vector<512x8xf32>, vector<8x64xf32>, vector<512x64xf32> -> vector<512x64xf32>
    %64 = arith.addf %58, %63 : vector<512x64xf32>
    %65 = vector.shape_cast %64 : vector<512x64xf32> to vector<2x16x16x64xf32>
    %c0_106 = arith.constant 0 : index
    %c1_107 = arith.constant 1 : index
    %c1_108 = arith.constant 1 : index
    %c0_109 = arith.constant 0 : index
    %66 = vector.load %arg9[%c0_106, %c1_107, %c1_108, %c0_109] : memref<2x18x18x64xf32, #tpu.memory_space<vmem>>, vector<2x16x16x64xf32>
    tpu.vector_store %arg9[%c0_106, %c1_107, %c1_108, %c0_109], %65 {strides = array<i32>} : memref<2x18x18x64xf32, #tpu.memory_space<vmem>>, vector<2x16x16x64xf32>,
    %c0_110 = arith.constant 0 : index
    %c0_111 = arith.constant 0 : index
    %c0_112 = arith.constant 0 : index
    %67 = vector.load %arg2[%c0_110, %c0_111, %c0_112] : memref<5x64x64xf32, #tpu.memory_space<vmem>>, vector<1x64x64xf32>
    %68 = vector.shape_cast %67 : vector<1x64x64xf32> to vector<64x64xf32>
    %c0_i32 = arith.constant 0 : i32
    %c9_i32 = arith.constant 9 : i32
    %69 = arith.addi %c0_i32, %c9_i32 : i32
    %c1_i32 = arith.constant 1 : i32
    scf.for %arg16 = %c0_i32 to %69 step %c1_i32  : i32 {
      %c0_348 = arith.constant 0 : index
      %c1_349 = arith.constant 1 : index
      %c0_350 = arith.constant 0 : index
      %c0_351 = arith.constant 0 : index
      %256 = vector.load %arg9[%c0_348, %c1_349, %c0_350, %c0_351] : memref<2x18x18x64xf32, #tpu.memory_space<vmem>>, vector<2x16x18x64xf32>
      %c0_352 = arith.constant 0 : index
      %c0_353 = arith.constant 0 : index
      %c0_354 = arith.constant 0 : index
      %c0_355 = arith.constant 0 : index
      %257 = vector.load %arg9[%c0_352, %c0_353, %c0_354, %c0_355] : memref<2x18x18x64xf32, #tpu.memory_space<vmem>>, vector<2x16x18x64xf32>
      %258 = arith.addf %257, %256 : vector<2x16x18x64xf32>
      %c0_356 = arith.constant 0 : index
      %c2_357 = arith.constant 2 : index
      %c0_358 = arith.constant 0 : index
      %c0_359 = arith.constant 0 : index
      %259 = vector.load %arg9[%c0_356, %c2_357, %c0_358, %c0_359] : memref<2x18x18x64xf32, #tpu.memory_space<vmem>>, vector<2x16x18x64xf32>
      %260 = arith.addf %258, %259 : vector<2x16x18x64xf32>
      %261 = vector.extract_strided_slice %260 {offsets = [0, 0, 0, 0], sizes = [2, 16, 16, 64], strides = [1, 1, 1, 1]} : vector<2x16x18x64xf32> to vector<2x16x16x64xf32>
      %262 = vector.extract_strided_slice %260 {offsets = [0, 0, 1, 0], sizes = [2, 16, 16, 64], strides = [1, 1, 1, 1]} : vector<2x16x18x64xf32> to vector<2x16x16x64xf32>
      %263 = arith.addf %261, %262 : vector<2x16x16x64xf32>
      %264 = vector.extract_strided_slice %260 {offsets = [0, 0, 2, 0], sizes = [2, 16, 16, 64], strides = [1, 1, 1, 1]} : vector<2x16x18x64xf32> to vector<2x16x16x64xf32>
      %265 = arith.addf %263, %264 : vector<2x16x16x64xf32>
      %cst_360 = arith.constant 0.111111112 : f32
      %266 = vector.broadcast %cst_360 : f32 to vector<2x16x16x64xf32>
      %267 = arith.mulf %265, %266 : vector<2x16x16x64xf32>
      %268 = vector.extract_strided_slice %256 {offsets = [0, 0, 1, 0], sizes = [2, 16, 16, 64], strides = [1, 1, 1, 1]} : vector<2x16x18x64xf32> to vector<2x16x16x64xf32>
      %269 = vector.shape_cast %267 : vector<2x16x16x64xf32> to vector<512x64xf32>
      %cst_361 = arith.constant dense<0.000000e+00> : vector<512x64xf32>
      %270 = tpu.matmul %269, %68, %cst_361 {dimension_numbers = #tpu.dot_dimension_numbers<[1], [0], [0], [1], [0, 0, 1, 1], [], []>} : vector<512x64xf32>, vector<64x64xf32>, vector<512x64xf32> -> vector<512x64xf32>
      %271 = vector.shape_cast %270 : vector<512x64xf32> to vector<2x16x16x64xf32>
      %272 = arith.addf %271, %268 : vector<2x16x16x64xf32>
      %c0_362 = arith.constant 0 : index
      %c1_363 = arith.constant 1 : index
      %c1_364 = arith.constant 1 : index
      %c0_365 = arith.constant 0 : index
      %273 = vector.load %arg9[%c0_362, %c1_363, %c1_364, %c0_365] : memref<2x18x18x64xf32, #tpu.memory_space<vmem>>, vector<2x16x16x64xf32>
      tpu.vector_store %arg9[%c0_362, %c1_363, %c1_364, %c0_365], %272 {strides = array<i32>} : memref<2x18x18x64xf32, #tpu.memory_space<vmem>>, vector<2x16x16x64xf32>,
    }
    %c0_113 = arith.constant 0 : index
    %c1_114 = arith.constant 1 : index
    %c1_115 = arith.constant 1 : index
    %c0_116 = arith.constant 0 : index
    %70 = vector.load %arg9[%c0_113, %c1_114, %c1_115, %c0_116] : memref<2x18x18x64xf32, #tpu.memory_space<vmem>>, vector<2x16x16x64xf32>
    %c0_117 = arith.constant 0 : index
    %c0_118 = arith.constant 0 : index
    %c0_119 = arith.constant 0 : index
    %c0_120 = arith.constant 0 : index
    %c0_121 = arith.constant 0 : index
    %71 = vector.load %arg3[%c0_117, %c0_118, %c0_119, %c0_120, %c0_121] : memref<3x1x1x1x64xf32, #tpu.memory_space<vmem>>, vector<1x1x1x1x64xf32>
    %72 = vector.shape_cast %71 : vector<1x1x1x1x64xf32> to vector<1x1x1x64xf32>
    %c0_122 = arith.constant 0 : index
    %c0_123 = arith.constant 0 : index
    %c0_124 = arith.constant 0 : index
    %c0_125 = arith.constant 0 : index
    %c0_126 = arith.constant 0 : index
    %73 = vector.load %arg4[%c0_122, %c0_123, %c0_124, %c0_125, %c0_126] : memref<3x1x1x1x64xf32, #tpu.memory_space<vmem>>, vector<1x1x1x1x64xf32>
    %74 = vector.shape_cast %73 : vector<1x1x1x1x64xf32> to vector<1x1x1x64xf32>
    %cst_127 = arith.constant dense<0.000000e+00> : vector<64xf32>
    %75 = vector.multi_reduction <add>, %70, %cst_127 [0, 1, 2] : vector<2x16x16x64xf32> to vector<64xf32>
    %76 = vector.shape_cast %75 : vector<64xf32> to vector<1x1x1x64xf32>
    %cst_128 = arith.constant 5.120000e+02 : f32
    %77 = vector.broadcast %cst_128 : f32 to vector<1x1x1x64xf32>
    %78 = arith.divf %76, %77 : vector<1x1x1x64xf32>
    %79 = vector.broadcast %78 : vector<1x1x1x64xf32> to vector<2x16x16x64xf32>
    %80 = arith.subf %70, %79 : vector<2x16x16x64xf32>
    %81 = arith.mulf %80, %80 : vector<2x16x16x64xf32>
    %cst_129 = arith.constant dense<0.000000e+00> : vector<64xf32>
    %82 = vector.multi_reduction <add>, %81, %cst_129 [0, 1, 2] : vector<2x16x16x64xf32> to vector<64xf32>
    %83 = vector.shape_cast %82 : vector<64xf32> to vector<1x1x1x64xf32>
    %cst_130 = arith.constant 5.120000e+02 : f32
    %84 = vector.broadcast %cst_130 : f32 to vector<1x1x1x64xf32>
    %85 = arith.divf %83, %84 : vector<1x1x1x64xf32>
    %86 = vector.broadcast %78 : vector<1x1x1x64xf32> to vector<2x16x16x64xf32>
    %87 = arith.subf %70, %86 : vector<2x16x16x64xf32>
    %cst_131 = arith.constant 9.99999974E-6 : f32
    %88 = vector.broadcast %cst_131 : f32 to vector<1x1x1x64xf32>
    %89 = arith.addf %85, %88 : vector<1x1x1x64xf32>
    %90 = math.rsqrt %89 : vector<1x1x1x64xf32>
    %91 = vector.broadcast %90 : vector<1x1x1x64xf32> to vector<2x16x16x64xf32>
    %92 = arith.mulf %87, %91 : vector<2x16x16x64xf32>
    %93 = vector.broadcast %72 : vector<1x1x1x64xf32> to vector<2x16x16x64xf32>
    %94 = arith.mulf %92, %93 : vector<2x16x16x64xf32>
    %95 = vector.broadcast %74 : vector<1x1x1x64xf32> to vector<2x16x16x64xf32>
    %96 = arith.addf %94, %95 : vector<2x16x16x64xf32>
    %c0_132 = arith.constant 0 : index
    %c1_133 = arith.constant 1 : index
    %c1_134 = arith.constant 1 : index
    %c0_135 = arith.constant 0 : index
    %97 = vector.load %arg9[%c0_132, %c1_133, %c1_134, %c0_135] : memref<2x18x18x64xf32, #tpu.memory_space<vmem>>, vector<2x16x16x64xf32>
    tpu.vector_store %arg9[%c0_132, %c1_133, %c1_134, %c0_135], %96 {strides = array<i32>} : memref<2x18x18x64xf32, #tpu.memory_space<vmem>>, vector<2x16x16x64xf32>,
    %c1_136 = arith.constant 1 : index
    %c0_137 = arith.constant 0 : index
    %c0_138 = arith.constant 0 : index
    %98 = vector.load %arg2[%c1_136, %c0_137, %c0_138] : memref<5x64x64xf32, #tpu.memory_space<vmem>>, vector<1x64x64xf32>
    %99 = vector.shape_cast %98 : vector<1x64x64xf32> to vector<64x64xf32>
    %c0_139 = arith.constant 0 : index
    %c1_140 = arith.constant 1 : index
    %c0_141 = arith.constant 0 : index
    %c0_142 = arith.constant 0 : index
    %100 = vector.load %arg9[%c0_139, %c1_140, %c0_141, %c0_142] : memref<2x18x18x64xf32, #tpu.memory_space<vmem>>, vector<2x16x18x64xf32>
    %c0_143 = arith.constant 0 : index
    %c0_144 = arith.constant 0 : index
    %c0_145 = arith.constant 0 : index
    %c0_146 = arith.constant 0 : index
    %101 = vector.load %arg9[%c0_143, %c0_144, %c0_145, %c0_146] : memref<2x18x18x64xf32, #tpu.memory_space<vmem>>, vector<2x16x18x64xf32>
    %102 = arith.addf %101, %100 : vector<2x16x18x64xf32>
    %c0_147 = arith.constant 0 : index
    %c2_148 = arith.constant 2 : index
    %c0_149 = arith.constant 0 : index
    %c0_150 = arith.constant 0 : index
    %103 = vector.load %arg9[%c0_147, %c2_148, %c0_149, %c0_150] : memref<2x18x18x64xf32, #tpu.memory_space<vmem>>, vector<2x16x18x64xf32>
    %104 = arith.addf %102, %103 : vector<2x16x18x64xf32>
    %105 = vector.extract_strided_slice %104 {offsets = [0, 0, 0, 0], sizes = [2, 16, 16, 64], strides = [1, 1, 1, 1]} : vector<2x16x18x64xf32> to vector<2x16x16x64xf32>
    %106 = vector.extract_strided_slice %104 {offsets = [0, 0, 1, 0], sizes = [2, 16, 16, 64], strides = [1, 1, 1, 1]} : vector<2x16x18x64xf32> to vector<2x16x16x64xf32>
    %107 = arith.addf %105, %106 : vector<2x16x16x64xf32>
    %108 = vector.extract_strided_slice %104 {offsets = [0, 0, 2, 0], sizes = [2, 16, 16, 64], strides = [1, 1, 1, 1]} : vector<2x16x18x64xf32> to vector<2x16x16x64xf32>
    %109 = arith.addf %107, %108 : vector<2x16x16x64xf32>
    %cst_151 = arith.constant 0.111111112 : f32
    %110 = vector.broadcast %cst_151 : f32 to vector<2x16x16x64xf32>
    %111 = arith.mulf %109, %110 : vector<2x16x16x64xf32>
    %112 = vector.extract_strided_slice %111 {offsets = [0, 0, 0, 0], sizes = [2, 1, 16, 64], strides = [1, 1, 1, 1]} : vector<2x16x16x64xf32> to vector<2x1x16x64xf32>
    %c0_152 = arith.constant 0 : index
    %c0_153 = arith.constant 0 : index
    %c0_154 = arith.constant 0 : index
    %c0_155 = arith.constant 0 : index
    %113 = vector.load %arg12[%c0_152, %c0_153, %c0_154, %c0_155] : memref<2x8x16x64xf32, #tpu.memory_space<vmem>>, vector<2x1x16x64xf32>
    tpu.vector_store %arg12[%c0_152, %c0_153, %c0_154, %c0_155], %112 {strides = array<i32>} : memref<2x8x16x64xf32, #tpu.memory_space<vmem>>, vector<2x1x16x64xf32>,
    %114 = vector.extract_strided_slice %111 {offsets = [0, 2, 0, 0], sizes = [2, 1, 16, 64], strides = [1, 1, 1, 1]} : vector<2x16x16x64xf32> to vector<2x1x16x64xf32>
    %c0_156 = arith.constant 0 : index
    %c1_157 = arith.constant 1 : index
    %c0_158 = arith.constant 0 : index
    %c0_159 = arith.constant 0 : index
    %115 = vector.load %arg12[%c0_156, %c1_157, %c0_158, %c0_159] : memref<2x8x16x64xf32, #tpu.memory_space<vmem>>, vector<2x1x16x64xf32>
    tpu.vector_store %arg12[%c0_156, %c1_157, %c0_158, %c0_159], %114 {strides = array<i32>} : memref<2x8x16x64xf32, #tpu.memory_space<vmem>>, vector<2x1x16x64xf32>,
    %116 = vector.extract_strided_slice %111 {offsets = [0, 4, 0, 0], sizes = [2, 1, 16, 64], strides = [1, 1, 1, 1]} : vector<2x16x16x64xf32> to vector<2x1x16x64xf32>
    %c0_160 = arith.constant 0 : index
    %c2_161 = arith.constant 2 : index
    %c0_162 = arith.constant 0 : index
    %c0_163 = arith.constant 0 : index
    %117 = vector.load %arg12[%c0_160, %c2_161, %c0_162, %c0_163] : memref<2x8x16x64xf32, #tpu.memory_space<vmem>>, vector<2x1x16x64xf32>
    tpu.vector_store %arg12[%c0_160, %c2_161, %c0_162, %c0_163], %116 {strides = array<i32>} : memref<2x8x16x64xf32, #tpu.memory_space<vmem>>, vector<2x1x16x64xf32>,
    %118 = vector.extract_strided_slice %111 {offsets = [0, 6, 0, 0], sizes = [2, 1, 16, 64], strides = [1, 1, 1, 1]} : vector<2x16x16x64xf32> to vector<2x1x16x64xf32>
    %c0_164 = arith.constant 0 : index
    %c3 = arith.constant 3 : index
    %c0_165 = arith.constant 0 : index
    %c0_166 = arith.constant 0 : index
    %119 = vector.load %arg12[%c0_164, %c3, %c0_165, %c0_166] : memref<2x8x16x64xf32, #tpu.memory_space<vmem>>, vector<2x1x16x64xf32>
    tpu.vector_store %arg12[%c0_164, %c3, %c0_165, %c0_166], %118 {strides = array<i32>} : memref<2x8x16x64xf32, #tpu.memory_space<vmem>>, vector<2x1x16x64xf32>,
    %120 = vector.extract_strided_slice %111 {offsets = [0, 8, 0, 0], sizes = [2, 1, 16, 64], strides = [1, 1, 1, 1]} : vector<2x16x16x64xf32> to vector<2x1x16x64xf32>
    %c0_167 = arith.constant 0 : index
    %c4 = arith.constant 4 : index
    %c0_168 = arith.constant 0 : index
    %c0_169 = arith.constant 0 : index
    %121 = vector.load %arg12[%c0_167, %c4, %c0_168, %c0_169] : memref<2x8x16x64xf32, #tpu.memory_space<vmem>>, vector<2x1x16x64xf32>
    tpu.vector_store %arg12[%c0_167, %c4, %c0_168, %c0_169], %120 {strides = array<i32>} : memref<2x8x16x64xf32, #tpu.memory_space<vmem>>, vector<2x1x16x64xf32>,
    %122 = vector.extract_strided_slice %111 {offsets = [0, 10, 0, 0], sizes = [2, 1, 16, 64], strides = [1, 1, 1, 1]} : vector<2x16x16x64xf32> to vector<2x1x16x64xf32>
    %c0_170 = arith.constant 0 : index
    %c5 = arith.constant 5 : index
    %c0_171 = arith.constant 0 : index
    %c0_172 = arith.constant 0 : index
    %123 = vector.load %arg12[%c0_170, %c5, %c0_171, %c0_172] : memref<2x8x16x64xf32, #tpu.memory_space<vmem>>, vector<2x1x16x64xf32>
    tpu.vector_store %arg12[%c0_170, %c5, %c0_171, %c0_172], %122 {strides = array<i32>} : memref<2x8x16x64xf32, #tpu.memory_space<vmem>>, vector<2x1x16x64xf32>,
    %124 = vector.extract_strided_slice %111 {offsets = [0, 12, 0, 0], sizes = [2, 1, 16, 64], strides = [1, 1, 1, 1]} : vector<2x16x16x64xf32> to vector<2x1x16x64xf32>
    %c0_173 = arith.constant 0 : index
    %c6 = arith.constant 6 : index
    %c0_174 = arith.constant 0 : index
    %c0_175 = arith.constant 0 : index
    %125 = vector.load %arg12[%c0_173, %c6, %c0_174, %c0_175] : memref<2x8x16x64xf32, #tpu.memory_space<vmem>>, vector<2x1x16x64xf32>
    tpu.vector_store %arg12[%c0_173, %c6, %c0_174, %c0_175], %124 {strides = array<i32>} : memref<2x8x16x64xf32, #tpu.memory_space<vmem>>, vector<2x1x16x64xf32>,
    %126 = vector.extract_strided_slice %111 {offsets = [0, 14, 0, 0], sizes = [2, 1, 16, 64], strides = [1, 1, 1, 1]} : vector<2x16x16x64xf32> to vector<2x1x16x64xf32>
    %c0_176 = arith.constant 0 : index
    %c7 = arith.constant 7 : index
    %c0_177 = arith.constant 0 : index
    %c0_178 = arith.constant 0 : index
    %127 = vector.load %arg12[%c0_176, %c7, %c0_177, %c0_178] : memref<2x8x16x64xf32, #tpu.memory_space<vmem>>, vector<2x1x16x64xf32>
    tpu.vector_store %arg12[%c0_176, %c7, %c0_177, %c0_178], %126 {strides = array<i32>} : memref<2x8x16x64xf32, #tpu.memory_space<vmem>>, vector<2x1x16x64xf32>,
    %c0_179 = arith.constant 0 : index
    %c0_180 = arith.constant 0 : index
    %c0_181 = arith.constant 0 : index
    %c0_182 = arith.constant 0 : index
    %128 = vector.load %arg12[%c0_179, %c0_180, %c0_181, %c0_182] : memref<2x8x16x64xf32, #tpu.memory_space<vmem>>, vector<2x8x16x64xf32>
    %129 = vector.extract_strided_slice %128 {offsets = [0, 0, 0, 0], sizes = [2, 8, 1, 64], strides = [1, 1, 1, 1]} : vector<2x8x16x64xf32> to vector<2x8x1x64xf32>
    %c0_183 = arith.constant 0 : index
    %c0_184 = arith.constant 0 : index
    %c0_185 = arith.constant 0 : index
    %c0_186 = arith.constant 0 : index
    %130 = vector.load %arg13[%c0_183, %c0_184, %c0_185, %c0_186] : memref<2x8x8x64xf32, #tpu.memory_space<vmem>>, vector<2x8x1x64xf32>
    tpu.vector_store %arg13[%c0_183, %c0_184, %c0_185, %c0_186], %129 {strides = array<i32>} : memref<2x8x8x64xf32, #tpu.memory_space<vmem>>, vector<2x8x1x64xf32>,
    %131 = vector.extract_strided_slice %128 {offsets = [0, 0, 2, 0], sizes = [2, 8, 1, 64], strides = [1, 1, 1, 1]} : vector<2x8x16x64xf32> to vector<2x8x1x64xf32>
    %c0_187 = arith.constant 0 : index
    %c0_188 = arith.constant 0 : index
    %c1_189 = arith.constant 1 : index
    %c0_190 = arith.constant 0 : index
    %132 = vector.load %arg13[%c0_187, %c0_188, %c1_189, %c0_190] : memref<2x8x8x64xf32, #tpu.memory_space<vmem>>, vector<2x8x1x64xf32>
    tpu.vector_store %arg13[%c0_187, %c0_188, %c1_189, %c0_190], %131 {strides = array<i32>} : memref<2x8x8x64xf32, #tpu.memory_space<vmem>>, vector<2x8x1x64xf32>,
    %133 = vector.extract_strided_slice %128 {offsets = [0, 0, 4, 0], sizes = [2, 8, 1, 64], strides = [1, 1, 1, 1]} : vector<2x8x16x64xf32> to vector<2x8x1x64xf32>
    %c0_191 = arith.constant 0 : index
    %c0_192 = arith.constant 0 : index
    %c2_193 = arith.constant 2 : index
    %c0_194 = arith.constant 0 : index
    %134 = vector.load %arg13[%c0_191, %c0_192, %c2_193, %c0_194] : memref<2x8x8x64xf32, #tpu.memory_space<vmem>>, vector<2x8x1x64xf32>
    tpu.vector_store %arg13[%c0_191, %c0_192, %c2_193, %c0_194], %133 {strides = array<i32>} : memref<2x8x8x64xf32, #tpu.memory_space<vmem>>, vector<2x8x1x64xf32>,
    %135 = vector.extract_strided_slice %128 {offsets = [0, 0, 6, 0], sizes = [2, 8, 1, 64], strides = [1, 1, 1, 1]} : vector<2x8x16x64xf32> to vector<2x8x1x64xf32>
    %c0_195 = arith.constant 0 : index
    %c0_196 = arith.constant 0 : index
    %c3_197 = arith.constant 3 : index
    %c0_198 = arith.constant 0 : index
    %136 = vector.load %arg13[%c0_195, %c0_196, %c3_197, %c0_198] : memref<2x8x8x64xf32, #tpu.memory_space<vmem>>, vector<2x8x1x64xf32>
    tpu.vector_store %arg13[%c0_195, %c0_196, %c3_197, %c0_198], %135 {strides = array<i32>} : memref<2x8x8x64xf32, #tpu.memory_space<vmem>>, vector<2x8x1x64xf32>,
    %137 = vector.extract_strided_slice %128 {offsets = [0, 0, 8, 0], sizes = [2, 8, 1, 64], strides = [1, 1, 1, 1]} : vector<2x8x16x64xf32> to vector<2x8x1x64xf32>
    %c0_199 = arith.constant 0 : index
    %c0_200 = arith.constant 0 : index
    %c4_201 = arith.constant 4 : index
    %c0_202 = arith.constant 0 : index
    %138 = vector.load %arg13[%c0_199, %c0_200, %c4_201, %c0_202] : memref<2x8x8x64xf32, #tpu.memory_space<vmem>>, vector<2x8x1x64xf32>
    tpu.vector_store %arg13[%c0_199, %c0_200, %c4_201, %c0_202], %137 {strides = array<i32>} : memref<2x8x8x64xf32, #tpu.memory_space<vmem>>, vector<2x8x1x64xf32>,
    %139 = vector.extract_strided_slice %128 {offsets = [0, 0, 10, 0], sizes = [2, 8, 1, 64], strides = [1, 1, 1, 1]} : vector<2x8x16x64xf32> to vector<2x8x1x64xf32>
    %c0_203 = arith.constant 0 : index
    %c0_204 = arith.constant 0 : index
    %c5_205 = arith.constant 5 : index
    %c0_206 = arith.constant 0 : index
    %140 = vector.load %arg13[%c0_203, %c0_204, %c5_205, %c0_206] : memref<2x8x8x64xf32, #tpu.memory_space<vmem>>, vector<2x8x1x64xf32>
    tpu.vector_store %arg13[%c0_203, %c0_204, %c5_205, %c0_206], %139 {strides = array<i32>} : memref<2x8x8x64xf32, #tpu.memory_space<vmem>>, vector<2x8x1x64xf32>,
    %141 = vector.extract_strided_slice %128 {offsets = [0, 0, 12, 0], sizes = [2, 8, 1, 64], strides = [1, 1, 1, 1]} : vector<2x8x16x64xf32> to vector<2x8x1x64xf32>
    %c0_207 = arith.constant 0 : index
    %c0_208 = arith.constant 0 : index
    %c6_209 = arith.constant 6 : index
    %c0_210 = arith.constant 0 : index
    %142 = vector.load %arg13[%c0_207, %c0_208, %c6_209, %c0_210] : memref<2x8x8x64xf32, #tpu.memory_space<vmem>>, vector<2x8x1x64xf32>
    tpu.vector_store %arg13[%c0_207, %c0_208, %c6_209, %c0_210], %141 {strides = array<i32>} : memref<2x8x8x64xf32, #tpu.memory_space<vmem>>, vector<2x8x1x64xf32>,
    %143 = vector.extract_strided_slice %128 {offsets = [0, 0, 14, 0], sizes = [2, 8, 1, 64], strides = [1, 1, 1, 1]} : vector<2x8x16x64xf32> to vector<2x8x1x64xf32>
    %c0_211 = arith.constant 0 : index
    %c0_212 = arith.constant 0 : index
    %c7_213 = arith.constant 7 : index
    %c0_214 = arith.constant 0 : index
    %144 = vector.load %arg13[%c0_211, %c0_212, %c7_213, %c0_214] : memref<2x8x8x64xf32, #tpu.memory_space<vmem>>, vector<2x8x1x64xf32>
    tpu.vector_store %arg13[%c0_211, %c0_212, %c7_213, %c0_214], %143 {strides = array<i32>} : memref<2x8x8x64xf32, #tpu.memory_space<vmem>>, vector<2x8x1x64xf32>,
    %c0_215 = arith.constant 0 : index
    %c0_216 = arith.constant 0 : index
    %c0_217 = arith.constant 0 : index
    %c0_218 = arith.constant 0 : index
    %145 = vector.load %arg13[%c0_215, %c0_216, %c0_217, %c0_218] : memref<2x8x8x64xf32, #tpu.memory_space<vmem>>, vector<2x8x8x64xf32>
    %146 = vector.shape_cast %145 : vector<2x8x8x64xf32> to vector<128x64xf32>
    %cst_219 = arith.constant dense<0.000000e+00> : vector<128x64xf32>
    %147 = tpu.matmul %146, %99, %cst_219 {dimension_numbers = #tpu.dot_dimension_numbers<[1], [0], [0], [1], [0, 0, 1, 1], [], []>} : vector<128x64xf32>, vector<64x64xf32>, vector<128x64xf32> -> vector<128x64xf32>
    %148 = vector.shape_cast %147 : vector<128x64xf32> to vector<2x8x8x64xf32>
    %c0_220 = arith.constant 0 : index
    %c1_221 = arith.constant 1 : index
    %c1_222 = arith.constant 1 : index
    %c0_223 = arith.constant 0 : index
    %149 = vector.load %arg10[%c0_220, %c1_221, %c1_222, %c0_223] : memref<2x10x10x64xf32, #tpu.memory_space<vmem>>, vector<2x8x8x64xf32>
    tpu.vector_store %arg10[%c0_220, %c1_221, %c1_222, %c0_223], %148 {strides = array<i32>} : memref<2x10x10x64xf32, #tpu.memory_space<vmem>>, vector<2x8x8x64xf32>,
    %c2_224 = arith.constant 2 : index
    %c0_225 = arith.constant 0 : index
    %c0_226 = arith.constant 0 : index
    %150 = vector.load %arg2[%c2_224, %c0_225, %c0_226] : memref<5x64x64xf32, #tpu.memory_space<vmem>>, vector<1x64x64xf32>
    %151 = vector.shape_cast %150 : vector<1x64x64xf32> to vector<64x64xf32>
    %c0_i32_227 = arith.constant 0 : i32
    %c9_i32_228 = arith.constant 9 : i32
    %152 = arith.addi %c0_i32_227, %c9_i32_228 : i32
    %c1_i32_229 = arith.constant 1 : i32
    scf.for %arg16 = %c0_i32_227 to %152 step %c1_i32_229  : i32 {
      %c0_348 = arith.constant 0 : index
      %c1_349 = arith.constant 1 : index
      %c0_350 = arith.constant 0 : index
      %c0_351 = arith.constant 0 : index
      %256 = vector.load %arg10[%c0_348, %c1_349, %c0_350, %c0_351] : memref<2x10x10x64xf32, #tpu.memory_space<vmem>>, vector<2x8x10x64xf32>
      %c0_352 = arith.constant 0 : index
      %c0_353 = arith.constant 0 : index
      %c0_354 = arith.constant 0 : index
      %c0_355 = arith.constant 0 : index
      %257 = vector.load %arg10[%c0_352, %c0_353, %c0_354, %c0_355] : memref<2x10x10x64xf32, #tpu.memory_space<vmem>>, vector<2x8x10x64xf32>
      %258 = arith.addf %257, %256 : vector<2x8x10x64xf32>
      %c0_356 = arith.constant 0 : index
      %c2_357 = arith.constant 2 : index
      %c0_358 = arith.constant 0 : index
      %c0_359 = arith.constant 0 : index
      %259 = vector.load %arg10[%c0_356, %c2_357, %c0_358, %c0_359] : memref<2x10x10x64xf32, #tpu.memory_space<vmem>>, vector<2x8x10x64xf32>
      %260 = arith.addf %258, %259 : vector<2x8x10x64xf32>
      %261 = vector.extract_strided_slice %260 {offsets = [0, 0, 0, 0], sizes = [2, 8, 8, 64], strides = [1, 1, 1, 1]} : vector<2x8x10x64xf32> to vector<2x8x8x64xf32>
      %262 = vector.extract_strided_slice %260 {offsets = [0, 0, 1, 0], sizes = [2, 8, 8, 64], strides = [1, 1, 1, 1]} : vector<2x8x10x64xf32> to vector<2x8x8x64xf32>
      %263 = arith.addf %261, %262 : vector<2x8x8x64xf32>
      %264 = vector.extract_strided_slice %260 {offsets = [0, 0, 2, 0], sizes = [2, 8, 8, 64], strides = [1, 1, 1, 1]} : vector<2x8x10x64xf32> to vector<2x8x8x64xf32>
      %265 = arith.addf %263, %264 : vector<2x8x8x64xf32>
      %cst_360 = arith.constant 0.111111112 : f32
      %266 = vector.broadcast %cst_360 : f32 to vector<2x8x8x64xf32>
      %267 = arith.mulf %265, %266 : vector<2x8x8x64xf32>
      %268 = vector.extract_strided_slice %256 {offsets = [0, 0, 1, 0], sizes = [2, 8, 8, 64], strides = [1, 1, 1, 1]} : vector<2x8x10x64xf32> to vector<2x8x8x64xf32>
      %269 = vector.shape_cast %267 : vector<2x8x8x64xf32> to vector<128x64xf32>
      %cst_361 = arith.constant dense<0.000000e+00> : vector<128x64xf32>
      %270 = tpu.matmul %269, %151, %cst_361 {dimension_numbers = #tpu.dot_dimension_numbers<[1], [0], [0], [1], [0, 0, 1, 1], [], []>} : vector<128x64xf32>, vector<64x64xf32>, vector<128x64xf32> -> vector<128x64xf32>
      %271 = vector.shape_cast %270 : vector<128x64xf32> to vector<2x8x8x64xf32>
      %272 = arith.addf %271, %268 : vector<2x8x8x64xf32>
      %c0_362 = arith.constant 0 : index
      %c1_363 = arith.constant 1 : index
      %c1_364 = arith.constant 1 : index
      %c0_365 = arith.constant 0 : index
      %273 = vector.load %arg10[%c0_362, %c1_363, %c1_364, %c0_365] : memref<2x10x10x64xf32, #tpu.memory_space<vmem>>, vector<2x8x8x64xf32>
      tpu.vector_store %arg10[%c0_362, %c1_363, %c1_364, %c0_365], %272 {strides = array<i32>} : memref<2x10x10x64xf32, #tpu.memory_space<vmem>>, vector<2x8x8x64xf32>,
    }
    %c0_230 = arith.constant 0 : index
    %c1_231 = arith.constant 1 : index
    %c1_232 = arith.constant 1 : index
    %c0_233 = arith.constant 0 : index
    %153 = vector.load %arg10[%c0_230, %c1_231, %c1_232, %c0_233] : memref<2x10x10x64xf32, #tpu.memory_space<vmem>>, vector<2x8x8x64xf32>
    %c1_234 = arith.constant 1 : index
    %c0_235 = arith.constant 0 : index
    %c0_236 = arith.constant 0 : index
    %c0_237 = arith.constant 0 : index
    %c0_238 = arith.constant 0 : index
    %154 = vector.load %arg3[%c1_234, %c0_235, %c0_236, %c0_237, %c0_238] : memref<3x1x1x1x64xf32, #tpu.memory_space<vmem>>, vector<1x1x1x1x64xf32>
    %155 = vector.shape_cast %154 : vector<1x1x1x1x64xf32> to vector<1x1x1x64xf32>
    %c1_239 = arith.constant 1 : index
    %c0_240 = arith.constant 0 : index
    %c0_241 = arith.constant 0 : index
    %c0_242 = arith.constant 0 : index
    %c0_243 = arith.constant 0 : index
    %156 = vector.load %arg4[%c1_239, %c0_240, %c0_241, %c0_242, %c0_243] : memref<3x1x1x1x64xf32, #tpu.memory_space<vmem>>, vector<1x1x1x1x64xf32>
    %157 = vector.shape_cast %156 : vector<1x1x1x1x64xf32> to vector<1x1x1x64xf32>
    %cst_244 = arith.constant dense<0.000000e+00> : vector<64xf32>
    %158 = vector.multi_reduction <add>, %153, %cst_244 [0, 1, 2] : vector<2x8x8x64xf32> to vector<64xf32>
    %159 = vector.shape_cast %158 : vector<64xf32> to vector<1x1x1x64xf32>
    %cst_245 = arith.constant 1.280000e+02 : f32
    %160 = vector.broadcast %cst_245 : f32 to vector<1x1x1x64xf32>
    %161 = arith.divf %159, %160 : vector<1x1x1x64xf32>
    %162 = vector.broadcast %161 : vector<1x1x1x64xf32> to vector<2x8x8x64xf32>
    %163 = arith.subf %153, %162 : vector<2x8x8x64xf32>
    %164 = arith.mulf %163, %163 : vector<2x8x8x64xf32>
    %cst_246 = arith.constant dense<0.000000e+00> : vector<64xf32>
    %165 = vector.multi_reduction <add>, %164, %cst_246 [0, 1, 2] : vector<2x8x8x64xf32> to vector<64xf32>
    %166 = vector.shape_cast %165 : vector<64xf32> to vector<1x1x1x64xf32>
    %cst_247 = arith.constant 1.280000e+02 : f32
    %167 = vector.broadcast %cst_247 : f32 to vector<1x1x1x64xf32>
    %168 = arith.divf %166, %167 : vector<1x1x1x64xf32>
    %169 = vector.broadcast %161 : vector<1x1x1x64xf32> to vector<2x8x8x64xf32>
    %170 = arith.subf %153, %169 : vector<2x8x8x64xf32>
    %cst_248 = arith.constant 9.99999974E-6 : f32
    %171 = vector.broadcast %cst_248 : f32 to vector<1x1x1x64xf32>
    %172 = arith.addf %168, %171 : vector<1x1x1x64xf32>
    %173 = math.rsqrt %172 : vector<1x1x1x64xf32>
    %174 = vector.broadcast %173 : vector<1x1x1x64xf32> to vector<2x8x8x64xf32>
    %175 = arith.mulf %170, %174 : vector<2x8x8x64xf32>
    %176 = vector.broadcast %155 : vector<1x1x1x64xf32> to vector<2x8x8x64xf32>
    %177 = arith.mulf %175, %176 : vector<2x8x8x64xf32>
    %178 = vector.broadcast %157 : vector<1x1x1x64xf32> to vector<2x8x8x64xf32>
    %179 = arith.addf %177, %178 : vector<2x8x8x64xf32>
    %c0_249 = arith.constant 0 : index
    %c1_250 = arith.constant 1 : index
    %c1_251 = arith.constant 1 : index
    %c0_252 = arith.constant 0 : index
    %180 = vector.load %arg10[%c0_249, %c1_250, %c1_251, %c0_252] : memref<2x10x10x64xf32, #tpu.memory_space<vmem>>, vector<2x8x8x64xf32>
    tpu.vector_store %arg10[%c0_249, %c1_250, %c1_251, %c0_252], %179 {strides = array<i32>} : memref<2x10x10x64xf32, #tpu.memory_space<vmem>>, vector<2x8x8x64xf32>,
    %c3_253 = arith.constant 3 : index
    %c0_254 = arith.constant 0 : index
    %c0_255 = arith.constant 0 : index
    %181 = vector.load %arg2[%c3_253, %c0_254, %c0_255] : memref<5x64x64xf32, #tpu.memory_space<vmem>>, vector<1x64x64xf32>
    %182 = vector.shape_cast %181 : vector<1x64x64xf32> to vector<64x64xf32>
    %c0_256 = arith.constant 0 : index
    %c1_257 = arith.constant 1 : index
    %c0_258 = arith.constant 0 : index
    %c0_259 = arith.constant 0 : index
    %183 = vector.load %arg10[%c0_256, %c1_257, %c0_258, %c0_259] : memref<2x10x10x64xf32, #tpu.memory_space<vmem>>, vector<2x8x10x64xf32>
    %c0_260 = arith.constant 0 : index
    %c0_261 = arith.constant 0 : index
    %c0_262 = arith.constant 0 : index
    %c0_263 = arith.constant 0 : index
    %184 = vector.load %arg10[%c0_260, %c0_261, %c0_262, %c0_263] : memref<2x10x10x64xf32, #tpu.memory_space<vmem>>, vector<2x8x10x64xf32>
    %185 = arith.addf %184, %183 : vector<2x8x10x64xf32>
    %c0_264 = arith.constant 0 : index
    %c2_265 = arith.constant 2 : index
    %c0_266 = arith.constant 0 : index
    %c0_267 = arith.constant 0 : index
    %186 = vector.load %arg10[%c0_264, %c2_265, %c0_266, %c0_267] : memref<2x10x10x64xf32, #tpu.memory_space<vmem>>, vector<2x8x10x64xf32>
    %187 = arith.addf %185, %186 : vector<2x8x10x64xf32>
    %188 = vector.extract_strided_slice %187 {offsets = [0, 0, 0, 0], sizes = [2, 8, 8, 64], strides = [1, 1, 1, 1]} : vector<2x8x10x64xf32> to vector<2x8x8x64xf32>
    %189 = vector.extract_strided_slice %187 {offsets = [0, 0, 1, 0], sizes = [2, 8, 8, 64], strides = [1, 1, 1, 1]} : vector<2x8x10x64xf32> to vector<2x8x8x64xf32>
    %190 = arith.addf %188, %189 : vector<2x8x8x64xf32>
    %191 = vector.extract_strided_slice %187 {offsets = [0, 0, 2, 0], sizes = [2, 8, 8, 64], strides = [1, 1, 1, 1]} : vector<2x8x10x64xf32> to vector<2x8x8x64xf32>
    %192 = arith.addf %190, %191 : vector<2x8x8x64xf32>
    %cst_268 = arith.constant 0.111111112 : f32
    %193 = vector.broadcast %cst_268 : f32 to vector<2x8x8x64xf32>
    %194 = arith.mulf %192, %193 : vector<2x8x8x64xf32>
    %195 = vector.extract_strided_slice %194 {offsets = [0, 0, 0, 0], sizes = [2, 1, 8, 64], strides = [1, 1, 1, 1]} : vector<2x8x8x64xf32> to vector<2x1x8x64xf32>
    %c0_269 = arith.constant 0 : index
    %c0_270 = arith.constant 0 : index
    %c0_271 = arith.constant 0 : index
    %c0_272 = arith.constant 0 : index
    %196 = vector.load %arg14[%c0_269, %c0_270, %c0_271, %c0_272] : memref<2x4x8x64xf32, #tpu.memory_space<vmem>>, vector<2x1x8x64xf32>
    tpu.vector_store %arg14[%c0_269, %c0_270, %c0_271, %c0_272], %195 {strides = array<i32>} : memref<2x4x8x64xf32, #tpu.memory_space<vmem>>, vector<2x1x8x64xf32>,
    %197 = vector.extract_strided_slice %194 {offsets = [0, 2, 0, 0], sizes = [2, 1, 8, 64], strides = [1, 1, 1, 1]} : vector<2x8x8x64xf32> to vector<2x1x8x64xf32>
    %c0_273 = arith.constant 0 : index
    %c1_274 = arith.constant 1 : index
    %c0_275 = arith.constant 0 : index
    %c0_276 = arith.constant 0 : index
    %198 = vector.load %arg14[%c0_273, %c1_274, %c0_275, %c0_276] : memref<2x4x8x64xf32, #tpu.memory_space<vmem>>, vector<2x1x8x64xf32>
    tpu.vector_store %arg14[%c0_273, %c1_274, %c0_275, %c0_276], %197 {strides = array<i32>} : memref<2x4x8x64xf32, #tpu.memory_space<vmem>>, vector<2x1x8x64xf32>,
    %199 = vector.extract_strided_slice %194 {offsets = [0, 4, 0, 0], sizes = [2, 1, 8, 64], strides = [1, 1, 1, 1]} : vector<2x8x8x64xf32> to vector<2x1x8x64xf32>
    %c0_277 = arith.constant 0 : index
    %c2_278 = arith.constant 2 : index
    %c0_279 = arith.constant 0 : index
    %c0_280 = arith.constant 0 : index
    %200 = vector.load %arg14[%c0_277, %c2_278, %c0_279, %c0_280] : memref<2x4x8x64xf32, #tpu.memory_space<vmem>>, vector<2x1x8x64xf32>
    tpu.vector_store %arg14[%c0_277, %c2_278, %c0_279, %c0_280], %199 {strides = array<i32>} : memref<2x4x8x64xf32, #tpu.memory_space<vmem>>, vector<2x1x8x64xf32>,
    %201 = vector.extract_strided_slice %194 {offsets = [0, 6, 0, 0], sizes = [2, 1, 8, 64], strides = [1, 1, 1, 1]} : vector<2x8x8x64xf32> to vector<2x1x8x64xf32>
    %c0_281 = arith.constant 0 : index
    %c3_282 = arith.constant 3 : index
    %c0_283 = arith.constant 0 : index
    %c0_284 = arith.constant 0 : index
    %202 = vector.load %arg14[%c0_281, %c3_282, %c0_283, %c0_284] : memref<2x4x8x64xf32, #tpu.memory_space<vmem>>, vector<2x1x8x64xf32>
    tpu.vector_store %arg14[%c0_281, %c3_282, %c0_283, %c0_284], %201 {strides = array<i32>} : memref<2x4x8x64xf32, #tpu.memory_space<vmem>>, vector<2x1x8x64xf32>,
    %c0_285 = arith.constant 0 : index
    %c0_286 = arith.constant 0 : index
    %c0_287 = arith.constant 0 : index
    %c0_288 = arith.constant 0 : index
    %203 = vector.load %arg14[%c0_285, %c0_286, %c0_287, %c0_288] : memref<2x4x8x64xf32, #tpu.memory_space<vmem>>, vector<2x4x8x64xf32>
    %204 = vector.extract_strided_slice %203 {offsets = [0, 0, 0, 0], sizes = [2, 4, 1, 64], strides = [1, 1, 1, 1]} : vector<2x4x8x64xf32> to vector<2x4x1x64xf32>
    %c0_289 = arith.constant 0 : index
    %c0_290 = arith.constant 0 : index
    %c0_291 = arith.constant 0 : index
    %c0_292 = arith.constant 0 : index
    %205 = vector.load %arg15[%c0_289, %c0_290, %c0_291, %c0_292] : memref<2x4x4x64xf32, #tpu.memory_space<vmem>>, vector<2x4x1x64xf32>
    tpu.vector_store %arg15[%c0_289, %c0_290, %c0_291, %c0_292], %204 {strides = array<i32>} : memref<2x4x4x64xf32, #tpu.memory_space<vmem>>, vector<2x4x1x64xf32>,
    %206 = vector.extract_strided_slice %203 {offsets = [0, 0, 2, 0], sizes = [2, 4, 1, 64], strides = [1, 1, 1, 1]} : vector<2x4x8x64xf32> to vector<2x4x1x64xf32>
    %c0_293 = arith.constant 0 : index
    %c0_294 = arith.constant 0 : index
    %c1_295 = arith.constant 1 : index
    %c0_296 = arith.constant 0 : index
    %207 = vector.load %arg15[%c0_293, %c0_294, %c1_295, %c0_296] : memref<2x4x4x64xf32, #tpu.memory_space<vmem>>, vector<2x4x1x64xf32>
    tpu.vector_store %arg15[%c0_293, %c0_294, %c1_295, %c0_296], %206 {strides = array<i32>} : memref<2x4x4x64xf32, #tpu.memory_space<vmem>>, vector<2x4x1x64xf32>,
    %208 = vector.extract_strided_slice %203 {offsets = [0, 0, 4, 0], sizes = [2, 4, 1, 64], strides = [1, 1, 1, 1]} : vector<2x4x8x64xf32> to vector<2x4x1x64xf32>
    %c0_297 = arith.constant 0 : index
    %c0_298 = arith.constant 0 : index
    %c2_299 = arith.constant 2 : index
    %c0_300 = arith.constant 0 : index
    %209 = vector.load %arg15[%c0_297, %c0_298, %c2_299, %c0_300] : memref<2x4x4x64xf32, #tpu.memory_space<vmem>>, vector<2x4x1x64xf32>
    tpu.vector_store %arg15[%c0_297, %c0_298, %c2_299, %c0_300], %208 {strides = array<i32>} : memref<2x4x4x64xf32, #tpu.memory_space<vmem>>, vector<2x4x1x64xf32>,
    %210 = vector.extract_strided_slice %203 {offsets = [0, 0, 6, 0], sizes = [2, 4, 1, 64], strides = [1, 1, 1, 1]} : vector<2x4x8x64xf32> to vector<2x4x1x64xf32>
    %c0_301 = arith.constant 0 : index
    %c0_302 = arith.constant 0 : index
    %c3_303 = arith.constant 3 : index
    %c0_304 = arith.constant 0 : index
    %211 = vector.load %arg15[%c0_301, %c0_302, %c3_303, %c0_304] : memref<2x4x4x64xf32, #tpu.memory_space<vmem>>, vector<2x4x1x64xf32>
    tpu.vector_store %arg15[%c0_301, %c0_302, %c3_303, %c0_304], %210 {strides = array<i32>} : memref<2x4x4x64xf32, #tpu.memory_space<vmem>>, vector<2x4x1x64xf32>,
    %c0_305 = arith.constant 0 : index
    %c0_306 = arith.constant 0 : index
    %c0_307 = arith.constant 0 : index
    %c0_308 = arith.constant 0 : index
    %212 = vector.load %arg15[%c0_305, %c0_306, %c0_307, %c0_308] : memref<2x4x4x64xf32, #tpu.memory_space<vmem>>, vector<2x4x4x64xf32>
    %213 = vector.shape_cast %212 : vector<2x4x4x64xf32> to vector<32x64xf32>
    %cst_309 = arith.constant dense<0.000000e+00> : vector<32x64xf32>
    %214 = tpu.matmul %213, %182, %cst_309 {dimension_numbers = #tpu.dot_dimension_numbers<[1], [0], [0], [1], [0, 0, 1, 1], [], []>} : vector<32x64xf32>, vector<64x64xf32>, vector<32x64xf32> -> vector<32x64xf32>
    %215 = vector.shape_cast %214 : vector<32x64xf32> to vector<2x4x4x64xf32>
    %c0_310 = arith.constant 0 : index
    %c1_311 = arith.constant 1 : index
    %c1_312 = arith.constant 1 : index
    %c0_313 = arith.constant 0 : index
    %216 = vector.load %arg11[%c0_310, %c1_311, %c1_312, %c0_313] : memref<2x6x6x64xf32, #tpu.memory_space<vmem>>, vector<2x4x4x64xf32>
    tpu.vector_store %arg11[%c0_310, %c1_311, %c1_312, %c0_313], %215 {strides = array<i32>} : memref<2x6x6x64xf32, #tpu.memory_space<vmem>>, vector<2x4x4x64xf32>,
    %c4_314 = arith.constant 4 : index
    %c0_315 = arith.constant 0 : index
    %c0_316 = arith.constant 0 : index
    %217 = vector.load %arg2[%c4_314, %c0_315, %c0_316] : memref<5x64x64xf32, #tpu.memory_space<vmem>>, vector<1x64x64xf32>
    %218 = vector.shape_cast %217 : vector<1x64x64xf32> to vector<64x64xf32>
    %c0_i32_317 = arith.constant 0 : i32
    %c9_i32_318 = arith.constant 9 : i32
    %219 = arith.addi %c0_i32_317, %c9_i32_318 : i32
    %c1_i32_319 = arith.constant 1 : i32
    scf.for %arg16 = %c0_i32_317 to %219 step %c1_i32_319  : i32 {
      %c0_348 = arith.constant 0 : index
      %c1_349 = arith.constant 1 : index
      %c0_350 = arith.constant 0 : index
      %c0_351 = arith.constant 0 : index
      %256 = vector.load %arg11[%c0_348, %c1_349, %c0_350, %c0_351] : memref<2x6x6x64xf32, #tpu.memory_space<vmem>>, vector<2x4x6x64xf32>
      %c0_352 = arith.constant 0 : index
      %c0_353 = arith.constant 0 : index
      %c0_354 = arith.constant 0 : index
      %c0_355 = arith.constant 0 : index
      %257 = vector.load %arg11[%c0_352, %c0_353, %c0_354, %c0_355] : memref<2x6x6x64xf32, #tpu.memory_space<vmem>>, vector<2x4x6x64xf32>
      %258 = arith.addf %257, %256 : vector<2x4x6x64xf32>
      %c0_356 = arith.constant 0 : index
      %c2_357 = arith.constant 2 : index
      %c0_358 = arith.constant 0 : index
      %c0_359 = arith.constant 0 : index
      %259 = vector.load %arg11[%c0_356, %c2_357, %c0_358, %c0_359] : memref<2x6x6x64xf32, #tpu.memory_space<vmem>>, vector<2x4x6x64xf32>
      %260 = arith.addf %258, %259 : vector<2x4x6x64xf32>
      %261 = vector.extract_strided_slice %260 {offsets = [0, 0, 0, 0], sizes = [2, 4, 4, 64], strides = [1, 1, 1, 1]} : vector<2x4x6x64xf32> to vector<2x4x4x64xf32>
      %262 = vector.extract_strided_slice %260 {offsets = [0, 0, 1, 0], sizes = [2, 4, 4, 64], strides = [1, 1, 1, 1]} : vector<2x4x6x64xf32> to vector<2x4x4x64xf32>
      %263 = arith.addf %261, %262 : vector<2x4x4x64xf32>
      %264 = vector.extract_strided_slice %260 {offsets = [0, 0, 2, 0], sizes = [2, 4, 4, 64], strides = [1, 1, 1, 1]} : vector<2x4x6x64xf32> to vector<2x4x4x64xf32>
      %265 = arith.addf %263, %264 : vector<2x4x4x64xf32>
      %cst_360 = arith.constant 0.111111112 : f32
      %266 = vector.broadcast %cst_360 : f32 to vector<2x4x4x64xf32>
      %267 = arith.mulf %265, %266 : vector<2x4x4x64xf32>
      %268 = vector.extract_strided_slice %256 {offsets = [0, 0, 1, 0], sizes = [2, 4, 4, 64], strides = [1, 1, 1, 1]} : vector<2x4x6x64xf32> to vector<2x4x4x64xf32>
      %269 = vector.shape_cast %267 : vector<2x4x4x64xf32> to vector<32x64xf32>
      %cst_361 = arith.constant dense<0.000000e+00> : vector<32x64xf32>
      %270 = tpu.matmul %269, %218, %cst_361 {dimension_numbers = #tpu.dot_dimension_numbers<[1], [0], [0], [1], [0, 0, 1, 1], [], []>} : vector<32x64xf32>, vector<64x64xf32>, vector<32x64xf32> -> vector<32x64xf32>
      %271 = vector.shape_cast %270 : vector<32x64xf32> to vector<2x4x4x64xf32>
      %272 = arith.addf %271, %268 : vector<2x4x4x64xf32>
      %c0_362 = arith.constant 0 : index
      %c1_363 = arith.constant 1 : index
      %c1_364 = arith.constant 1 : index
      %c0_365 = arith.constant 0 : index
      %273 = vector.load %arg11[%c0_362, %c1_363, %c1_364, %c0_365] : memref<2x6x6x64xf32, #tpu.memory_space<vmem>>, vector<2x4x4x64xf32>
      tpu.vector_store %arg11[%c0_362, %c1_363, %c1_364, %c0_365], %272 {strides = array<i32>} : memref<2x6x6x64xf32, #tpu.memory_space<vmem>>, vector<2x4x4x64xf32>,
    }
    %c0_320 = arith.constant 0 : index
    %c1_321 = arith.constant 1 : index
    %c1_322 = arith.constant 1 : index
    %c0_323 = arith.constant 0 : index
    %220 = vector.load %arg11[%c0_320, %c1_321, %c1_322, %c0_323] : memref<2x6x6x64xf32, #tpu.memory_space<vmem>>, vector<2x4x4x64xf32>
    %c2_324 = arith.constant 2 : index
    %c0_325 = arith.constant 0 : index
    %c0_326 = arith.constant 0 : index
    %c0_327 = arith.constant 0 : index
    %c0_328 = arith.constant 0 : index
    %221 = vector.load %arg3[%c2_324, %c0_325, %c0_326, %c0_327, %c0_328] : memref<3x1x1x1x64xf32, #tpu.memory_space<vmem>>, vector<1x1x1x1x64xf32>
    %222 = vector.shape_cast %221 : vector<1x1x1x1x64xf32> to vector<1x1x1x64xf32>
    %c2_329 = arith.constant 2 : index
    %c0_330 = arith.constant 0 : index
    %c0_331 = arith.constant 0 : index
    %c0_332 = arith.constant 0 : index
    %c0_333 = arith.constant 0 : index
    %223 = vector.load %arg4[%c2_329, %c0_330, %c0_331, %c0_332, %c0_333] : memref<3x1x1x1x64xf32, #tpu.memory_space<vmem>>, vector<1x1x1x1x64xf32>
    %224 = vector.shape_cast %223 : vector<1x1x1x1x64xf32> to vector<1x1x1x64xf32>
    %cst_334 = arith.constant dense<0.000000e+00> : vector<64xf32>
    %225 = vector.multi_reduction <add>, %220, %cst_334 [0, 1, 2] : vector<2x4x4x64xf32> to vector<64xf32>
    %226 = vector.shape_cast %225 : vector<64xf32> to vector<1x1x1x64xf32>
    %cst_335 = arith.constant 3.200000e+01 : f32
    %227 = vector.broadcast %cst_335 : f32 to vector<1x1x1x64xf32>
    %228 = arith.divf %226, %227 : vector<1x1x1x64xf32>
    %229 = vector.broadcast %228 : vector<1x1x1x64xf32> to vector<2x4x4x64xf32>
    %230 = arith.subf %220, %229 : vector<2x4x4x64xf32>
    %231 = arith.mulf %230, %230 : vector<2x4x4x64xf32>
    %cst_336 = arith.constant dense<0.000000e+00> : vector<64xf32>
    %232 = vector.multi_reduction <add>, %231, %cst_336 [0, 1, 2] : vector<2x4x4x64xf32> to vector<64xf32>
    %233 = vector.shape_cast %232 : vector<64xf32> to vector<1x1x1x64xf32>
    %cst_337 = arith.constant 3.200000e+01 : f32
    %234 = vector.broadcast %cst_337 : f32 to vector<1x1x1x64xf32>
    %235 = arith.divf %233, %234 : vector<1x1x1x64xf32>
    %236 = vector.broadcast %228 : vector<1x1x1x64xf32> to vector<2x4x4x64xf32>
    %237 = arith.subf %220, %236 : vector<2x4x4x64xf32>
    %cst_338 = arith.constant 9.99999974E-6 : f32
    %238 = vector.broadcast %cst_338 : f32 to vector<1x1x1x64xf32>
    %239 = arith.addf %235, %238 : vector<1x1x1x64xf32>
    %240 = math.rsqrt %239 : vector<1x1x1x64xf32>
    %241 = vector.broadcast %240 : vector<1x1x1x64xf32> to vector<2x4x4x64xf32>
    %242 = arith.mulf %237, %241 : vector<2x4x4x64xf32>
    %243 = vector.broadcast %222 : vector<1x1x1x64xf32> to vector<2x4x4x64xf32>
    %244 = arith.mulf %242, %243 : vector<2x4x4x64xf32>
    %245 = vector.broadcast %224 : vector<1x1x1x64xf32> to vector<2x4x4x64xf32>
    %246 = arith.addf %244, %245 : vector<2x4x4x64xf32>
    %cst_339 = arith.constant dense<0.000000e+00> : vector<2x64xf32>
    %247 = vector.multi_reduction <add>, %246, %cst_339 [1, 2] : vector<2x4x4x64xf32> to vector<2x64xf32>
    %cst_340 = arith.constant 1.600000e+01 : f32
    %248 = vector.broadcast %cst_340 : f32 to vector<2x64xf32>
    %249 = arith.divf %247, %248 : vector<2x64xf32>
    %c0_341 = arith.constant 0 : index
    %c0_342 = arith.constant 0 : index
    %250 = vector.load %arg5[%c0_341, %c0_342] : memref<64x10xf32, #tpu.memory_space<vmem>>, vector<64x10xf32>
    %cst_343 = arith.constant dense<0.000000e+00> : vector<2x10xf32>
    %251 = tpu.matmul %249, %250, %cst_343 {dimension_numbers = #tpu.dot_dimension_numbers<[1], [0], [0], [1], [0, 0, 1, 1], [], []>} : vector<2x64xf32>, vector<64x10xf32>, vector<2x10xf32> -> vector<2x10xf32>
    %c0_344 = arith.constant 0 : index
    %c0_345 = arith.constant 0 : index
    %252 = vector.load %arg6[%c0_344, %c0_345] : memref<1x10xf32, #tpu.memory_space<vmem>>, vector<1x10xf32>
    %253 = vector.broadcast %252 : vector<1x10xf32> to vector<2x10xf32>
    %254 = arith.addf %251, %253 : vector<2x10xf32>
    %c0_346 = arith.constant 0 : index
    %c0_347 = arith.constant 0 : index
    %255 = vector.load %arg7[%c0_346, %c0_347] : memref<2x10xf32, #tpu.memory_space<vmem>>, vector<2x10xf32>
    tpu.vector_store %arg7[%c0_346, %c0_347], %254 {strides = array<i32>} : memref<2x10xf32, #tpu.memory_space<vmem>>, vector<2x10xf32>,
    return
  }
}

</mosaic_0001>

<bundles_post_ra>
// kernel: resnet56_forward.1
= control target key start
LH: loop header
LB: loop body
LE: loop exit
PB: predicated region body
PF: predicated region fallthrough
CT: control target
= control target key end

     0   :  { %12 = vsyncpa [#allocation11], 0  ;;  %vm287_vm0 = vcmask 521216   ;;  %vm27_vm1 = vcmask 64512   ;;  %vm30_vm2 = vcmask 58368   ;;  %v21239_v5 = vmov 0.0   ;;  %s21231_s0 = inlined_call_operand.vmem [shape: f32[2,16,16,8], index: 0, kind: input, shape index: {}]   ;;  %s21232_s1 = inlined_call_operand.vmem [shape: f32[3,3,8,64], index: 1, kind: input, shape index: {}]   ;;  %s21233_s2 = inlined_call_operand.vmem [shape: f32[5,64,64], index: 2, kind: input, shape index: {}]   ;;  %s21234_s3 = inlined_call_operand.vmem [shape: f32[3,1,1,1,64], index: 3, kind: input, shape index: {}]   ;;  %s21235_s4 = inlined_call_operand.vmem [shape: f32[3,1,1,1,64], index: 4, kind: input, shape index: {}]   ;;  %s21236_s5 = inlined_call_operand.vmem [shape: f32[64,10], index: 5, kind: input, shape index: {}]   ;;  %s21237_s6 = inlined_call_operand.vmem [shape: f32[1,10], index: 6, kind: input, shape index: {}]   ;;  %s21238_s7 = inlined_call_operand.hbm [shape: f32[2,10], index: 7, kind: output, shape index: {}]  }
   0x1   :  { %v12635_v0 = vld [vmem:[%s21232_s1 + $0x8] sm:$0xff]  ;;  %v16118_v1 = vld [vmem:[%s21232_s1 + $0x20] sm:$0xff]  ;;  %28 = vst.msk [vmem:[#allocation2] sm:$0xff] %vm27_vm1, %v21239_v5  ;;  %29 = vst.msk [vmem:[#allocation2 + $0x8] sm:$0xff] %vm27_vm1, %v21239_v5  ;;  %vm137_vm3 = vcmask 523264   ;;  %vm140_vm4 = vcmask 517120  }
   0x2   :  { %14113 = vmatprep.subr.mxu1 %v12635_v0  ;;  %14505 = vmatprep.subr.mxu0 %v16118_v1  ;;  %v16124_v2 = vld [vmem:[%s21232_s1] sm:$0xff]  ;;  %v16134_v4 = vld [vmem:[%s21232_s1 + $0x28] sm:$0xff]  ;;  %288 = vst.msk [vmem:[#allocation5] sm:$0x3f] %vm287_vm0, %v21239_v5  ;;  %289 = vst.msk [vmem:[#allocation5 + $0x8] sm:$0x3f] %vm287_vm0, %v21239_v5 }
   0x3   :  { %v16129_v3 = vld [vmem:[%s21231_s0] sm:$0xff]  ;;  %14114 = vmatpush3.msra.mxu1 %v12635_v0  ;;  %290 = vst.msk [vmem:[#allocation5 + $0x10] sm:$0x3f] %vm287_vm0, %v21239_v5  ;;  %291 = vst.msk [vmem:[#allocation5 + $0x18] sm:$0x3f] %vm287_vm0, %v21239_v5  ;;  %14506 = vmatpush3.msra.mxu0 %v16118_v1  ;;  %v301_v6 = vld [vmem:[%s21231_s0 + $0x8] sm:$0xff] }
   0x4   :  { %292 = vst.msk [vmem:[#allocation5 + $0x20] sm:$0x3f] %vm287_vm0, %v21239_v5  ;;  %293 = vst.msk [vmem:[#allocation5 + $0x28] sm:$0x3f] %vm287_vm0, %v21239_v5  ;;  %v302_v7 = vld [vmem:[%s21231_s0 + $0x10] sm:$0xff]  ;;  %v303_v8 = vld [vmem:[%s21231_s0 + $0x18] sm:$0xff]  ;;  %14211 = vmatprep.subr.mxu1 %v16124_v2  ;;  %14603 = vmatprep.subr.mxu0 %v16134_v4 }
   0x5   :  { %294 = vst.msk [vmem:[#allocation5 + $0x30] sm:$0x3f] %vm287_vm0, %v21239_v5  ;;  %295 = vst.msk [vmem:[#allocation5 + $0x38] sm:$0x3f] %vm287_vm0, %v21239_v5  ;;  %v304_v9 = vld [vmem:[%s21231_s0 + $0x20] sm:$0xff]  ;;  %v305_v10 = vld [vmem:[%s21231_s0 + $0x28] sm:$0xff] }
   0x6   :  { %296 = vst.msk [vmem:[#allocation5 + $0x40] sm:$0x3f] %vm287_vm0, %v21239_v5  ;;  %297 = vst.msk [vmem:[#allocation5 + $0x48] sm:$0x3f] %vm287_vm0, %v21239_v5  ;;  %v306_v11 = vld [vmem:[%s21231_s0 + $0x30] sm:$0xff]  ;;  %v307_v12 = vld [vmem:[%s21231_s0 + $0x38] sm:$0xff] }
   0x7   :  { %298 = vst.msk [vmem:[#allocation5 + $0x50] sm:$0x3f] %vm287_vm0, %v21239_v5  ;;  %299 = vst.msk [vmem:[#allocation5 + $0x58] sm:$0x3f] %vm287_vm0, %v21239_v5  ;;  %v308_v13 = vld [vmem:[%s21231_s0 + $0x40] sm:$0xff]  ;;  %v309_v14 = vld [vmem:[%s21231_s0 + $0x48] sm:$0xff] }
   0x8   :  { %32 = vst.msk [vmem:[#allocation2 + $0x18] sm:$0xff] %vm27_vm1, %v21239_v5  ;;  %33 = vst.msk [vmem:[#allocation2 + $0x20] sm:$0xff] %vm27_vm1, %v21239_v5  ;;  %v310_v15 = vld [vmem:[%s21231_s0 + $0x50] sm:$0xff]  ;;  %v311_v16 = vld [vmem:[%s21231_s0 + $0x58] sm:$0xff]  ;;  %s18352_s25 = smov 0  }
   0x9   :  { %35 = vst.msk [vmem:[#allocation2 + $0x30] sm:$0xff] %vm27_vm1, %v21239_v5  ;;  %36 = vst.msk [vmem:[#allocation2 + $0x38] sm:$0xff] %vm27_vm1, %v21239_v5  ;;  %v312_v17 = vld [vmem:[%s21231_s0 + $0x60] sm:$0xff]  ;;  %v313_v18 = vld [vmem:[%s21231_s0 + $0x68] sm:$0xff] }
   0xa   :  { %38 = vst.msk [vmem:[#allocation2 + $0x48] sm:$0xff] %vm27_vm1, %v21239_v5  ;;  %39 = vst.msk [vmem:[#allocation2 + $0x50] sm:$0xff] %vm27_vm1, %v21239_v5  ;;  %v314_v19 = vld [vmem:[%s21231_s0 + $0x70] sm:$0xff]  ;;  %v315_v20 = vld [vmem:[%s21231_s0 + $0x78] sm:$0xff] }
   0xb   :  { %41 = vst.msk [vmem:[#allocation2 + $0x60] sm:$0xff] %vm27_vm1, %v21239_v5  ;;  %42 = vst.msk [vmem:[#allocation2 + $0x68] sm:$0xff] %vm27_vm1, %v21239_v5  ;;  %v316_v21 = vld [vmem:[%s21231_s0 + $0x80] sm:$0xff]  ;;  %v317_v22 = vld [vmem:[%s21231_s0 + $0x88] sm:$0xff] }
   0xc   :  { %44 = vst.msk [vmem:[#allocation2 + $0x78] sm:$0xff] %vm27_vm1, %v21239_v5  ;;  %45 = vst.msk [vmem:[#allocation2 + $0x80] sm:$0xff] %vm27_vm1, %v21239_v5  ;;  %v318_v23 = vld [vmem:[%s21231_s0 + $0x90] sm:$0xff]  ;;  %v319_v24 = vld [vmem:[%s21231_s0 + $0x98] sm:$0xff] }
   0xd   :  { %47 = vst.msk [vmem:[#allocation2 + $0x90] sm:$0xff] %vm27_vm1, %v21239_v5  ;;  %48 = vst.msk [vmem:[#allocation2 + $0x98] sm:$0xff] %vm27_vm1, %v21239_v5  ;;  %v320_v25 = vld [vmem:[%s21231_s0 + $0xa0] sm:$0xff]  ;;  %v321_v26 = vld [vmem:[%s21231_s0 + $0xa8] sm:$0xff] }
   0xe   :  { %50 = vst.msk [vmem:[#allocation2 + $0xa8] sm:$0xff] %vm27_vm1, %v21239_v5  ;;  %51 = vst.msk [vmem:[#allocation2 + $0xb0] sm:$0xff] %vm27_vm1, %v21239_v5  ;;  %v494_v27 = vld [vmem:[#allocation2 + $0x1] sm:$0xff]  ;;  %v322_v29 = vld [vmem:[%s21231_s0 + $0xb0] sm:$0xff] }
   0xf   :  { %53 = vst.msk [vmem:[#allocation2 + $0xc0] sm:$0xff] %vm27_vm1, %v21239_v5  ;;  %54 = vst.msk [vmem:[#allocation2 + $0xc8] sm:$0xff] %vm27_vm1, %v21239_v5  ;;  %14115 = vmatprep.mubr.msk.f32.mxu1 %vm27_vm1, %v494_v27  ;;  %v323_v37 = vld [vmem:[%s21231_s0 + $0xb8] sm:$0xff]  ;;  %v324_v38 = vld [vmem:[%s21231_s0 + $0xc0] sm:$0xff] }
  0x10   :  { %56 = vst.msk [vmem:[#allocation2 + $0xd8] sm:$0xff] %vm27_vm1, %v21239_v5  ;;  %57 = vst.msk [vmem:[#allocation2 + $0xe0] sm:$0xff] %vm27_vm1, %v21239_v5  ;;  %v325_v39 = vld [vmem:[%s21231_s0 + $0xc8] sm:$0xff]  ;;  %v326_v40 = vld [vmem:[%s21231_s0 + $0xd0] sm:$0xff] }
  0x11   :  { %59 = vst.msk [vmem:[#allocation2 + $0xf0] sm:$0xff] %vm27_vm1, %v21239_v5  ;;  %60 = vst.msk [vmem:[#allocation2 + $0xf8] sm:$0xff] %vm27_vm1, %v21239_v5  ;;  %v327_v41 = vld [vmem:[%s21231_s0 + $0xd8] sm:$0xff]  ;;  %v328_v42 = vld [vmem:[%s21231_s0 + $0xe0] sm:$0xff] }
  0x12   :  { %62 = vst.msk [vmem:[#allocation2 + $0x108] sm:$0xff] %vm27_vm1, %v21239_v5  ;;  %63 = vst.msk [vmem:[#allocation2 + $0x110] sm:$0xff] %vm27_vm1, %v21239_v5  ;;  %v329_v43 = vld [vmem:[%s21231_s0 + $0xe8] sm:$0xff]  ;;  %v330_v44 = vld [vmem:[%s21231_s0 + $0xf0] sm:$0xff] }
  0x13   :  { %65 = vst.msk [vmem:[#allocation2 + $0x120] sm:$0xff] %vm27_vm1, %v21239_v5  ;;  %66 = vst.msk [vmem:[#allocation2 + $0x128] sm:$0xff] %vm27_vm1, %v21239_v5  ;;  %v331_v45 = vld [vmem:[%s21231_s0 + $0xf8] sm:$0xff]  ;;  %v16524_v47 = vld [vmem:[%s21232_s1 + $0x30] sm:$0xff] }
  0x14   :  { %68 = vst.msk [vmem:[#allocation2 + $0x138] sm:$0xff] %vm27_vm1, %v21239_v5  ;;  %69 = vst.msk [vmem:[#allocation2 + $0x140] sm:$0xff] %vm27_vm1, %v21239_v5  ;;  %v332_v49 = vld [vmem:[%s21231_s0 + $0x100] sm:$0xff]  ;;  %v333_v50 = vld [vmem:[%s21231_s0 + $0x108] sm:$0xff] }
  0x15   :  { %71 = vst.msk [vmem:[#allocation2 + $0x150] sm:$0xff] %vm27_vm1, %v21239_v5  ;;  %72 = vst.msk [vmem:[#allocation2 + $0x158] sm:$0xff] %vm27_vm1, %v21239_v5  ;;  %v334_v51 = vld [vmem:[%s21231_s0 + $0x110] sm:$0xff]  ;;  %v335_v52 = vld [vmem:[%s21231_s0 + $0x118] sm:$0xff] }
  0x16   :  { %74 = vst.msk [vmem:[#allocation2 + $0x168] sm:$0xff] %vm27_vm1, %v21239_v5  ;;  %75 = vst.msk [vmem:[#allocation2 + $0x170] sm:$0xff] %vm27_vm1, %v21239_v5  ;;  %v336_v54 = vld [vmem:[%s21231_s0 + $0x120] sm:$0xff]  ;;  %v337_v55 = vld [vmem:[%s21231_s0 + $0x128] sm:$0xff] }
  0x17   :  { %77 = vst.msk [vmem:[#allocation2 + $0x180] sm:$0xff] %vm27_vm1, %v21239_v5  ;;  %78 = vst.msk [vmem:[#allocation2 + $0x188] sm:$0xff] %vm27_vm1, %v21239_v5  ;;  %v338_v58 = vld [vmem:[%s21231_s0 + $0x130] sm:$0xff]  ;;  %v339_v59 = vld [vmem:[%s21231_s0 + $0x138] sm:$0xff] }
  0x18   :  { %80 = vst.msk [vmem:[#allocation2 + $0x198] sm:$0xff] %vm27_vm1, %v21239_v5  ;;  %81 = vst.msk [vmem:[#allocation2 + $0x1a0] sm:$0xff] %vm27_vm1, %v21239_v5  ;;  %v340_v61 = vld [vmem:[%s21231_s0 + $0x140] sm:$0xff]  ;;  %v341_v62 = vld [vmem:[%s21231_s0 + $0x148] sm:$0xff] }
  0x19   :  { %83 = vst.msk [vmem:[#allocation2 + $0x1b0] sm:$0xff] %vm27_vm1, %v21239_v5  ;;  %84 = vst.msk [vmem:[#allocation2 + $0x1b8] sm:$0xff] %vm27_vm1, %v21239_v5  ;;  %v342_v1 = vld [vmem:[%s21231_s0 + $0x150] sm:$0xff] }
  0x1a   :  { %86 = vst.msk [vmem:[#allocation2 + $0x1c8] sm:$0xff] %vm27_vm1, %v21239_v5  ;;  %87 = vst.msk [vmem:[#allocation2 + $0x1d0] sm:$0xff] %vm27_vm1, %v21239_v5 }
  0x1b   :  { %89 = vst.msk [vmem:[#allocation2 + $0x1e0] sm:$0xff] %vm27_vm1, %v21239_v5  ;;  %90 = vst.msk [vmem:[#allocation2 + $0x1e8] sm:$0xff] %vm27_vm1, %v21239_v5 }
  0x1c   :  { %92 = vst.msk [vmem:[#allocation2 + $0x1f8] sm:$0xff] %vm27_vm1, %v21239_v5  ;;  %93 = vst.msk [vmem:[#allocation2 + $0x200] sm:$0xff] %vm27_vm1, %v21239_v5 }
  0x1d   :  { %95 = vst.msk [vmem:[#allocation2 + $0x210] sm:$0xff] %vm27_vm1, %v21239_v5  ;;  %96 = vst.msk [vmem:[#allocation2 + $0x218] sm:$0xff] %vm27_vm1, %v21239_v5 }
  0x1e   :  { %98 = vst.msk [vmem:[#allocation2 + $0x228] sm:$0xff] %vm27_vm1, %v21239_v5  ;;  %99 = vst.msk [vmem:[#allocation2 + $0x230] sm:$0xff] %vm27_vm1, %v21239_v5 }
  0x1f   :  { %101 = vst.msk [vmem:[#allocation2 + $0x240] sm:$0xff] %vm27_vm1, %v21239_v5  ;;  %102 = vst.msk [vmem:[#allocation2 + $0x248] sm:$0xff] %vm27_vm1, %v21239_v5 }
  0x20   :  { %104 = vst.msk [vmem:[#allocation2 + $0x258] sm:$0xff] %vm27_vm1, %v21239_v5  ;;  %105 = vst.msk [vmem:[#allocation2 + $0x260] sm:$0xff] %vm27_vm1, %v21239_v5 }
  0x21   :  { %107 = vst.msk [vmem:[#allocation2 + $0x270] sm:$0xff] %vm27_vm1, %v21239_v5  ;;  %108 = vst.msk [vmem:[#allocation2 + $0x278] sm:$0xff] %vm27_vm1, %v21239_v5 }
  0x22   :  { %110 = vst.msk [vmem:[#allocation2 + $0x288] sm:$0xff] %vm27_vm1, %v21239_v5  ;;  %111 = vst.msk [vmem:[#allocation2 + $0x290] sm:$0xff] %vm27_vm1, %v21239_v5 }
  0x23   :  { %113 = vst.msk [vmem:[#allocation2 + $0x2a0] sm:$0xff] %vm27_vm1, %v21239_v5  ;;  %114 = vst.msk [vmem:[#allocation2 + $0x2a8] sm:$0xff] %vm27_vm1, %v21239_v5 }
  0x24   :  { %116 = vst.msk [vmem:[#allocation2 + $0x2b8] sm:$0xff] %vm27_vm1, %v21239_v5  ;;  %117 = vst.msk [vmem:[#allocation2 + $0x2c0] sm:$0xff] %vm27_vm1, %v21239_v5 }
  0x25   :  { %119 = vst.msk [vmem:[#allocation2 + $0x2d0] sm:$0xff] %vm27_vm1, %v21239_v5  ;;  %120 = vst.msk [vmem:[#allocation2 + $0x2d8] sm:$0xff] %vm27_vm1, %v21239_v5 }
  0x26   :  { %122 = vst.msk [vmem:[#allocation2 + $0x2e8] sm:$0xff] %vm27_vm1, %v21239_v5  ;;  %123 = vst.msk [vmem:[#allocation2 + $0x2f0] sm:$0xff] %vm27_vm1, %v21239_v5 }
  0x27   :  { %125 = vst.msk [vmem:[#allocation2 + $0x300] sm:$0xff] %vm27_vm1, %v21239_v5  ;;  %126 = vst.msk [vmem:[#allocation2 + $0x308] sm:$0xff] %vm27_vm1, %v21239_v5 }
  0x28   :  { %128 = vst.msk [vmem:[#allocation2 + $0x318] sm:$0xff] %vm27_vm1, %v21239_v5  ;;  %129 = vst.msk [vmem:[#allocation2 + $0x320] sm:$0xff] %vm27_vm1, %v21239_v5 }
  0x29   :  { %131 = vst.msk [vmem:[#allocation2 + $0x330] sm:$0xff] %vm27_vm1, %v21239_v5  ;;  %132 = vst.msk [vmem:[#allocation2 + $0x338] sm:$0xff] %vm27_vm1, %v21239_v5 }
  0x2a   :  { %134 = vst.msk [vmem:[#allocation2 + $0x348] sm:$0xff] %vm27_vm1, %v21239_v5  ;;  %135 = vst.msk [vmem:[#allocation2 + $0x350] sm:$0xff] %vm27_vm1, %v21239_v5 }
  0x2b   :  { %31 = vst.msk [vmem:[#allocation2 + $0x10] sm:$0x3] %vm30_vm2, %v21239_v5  ;;  %34 = vst.msk [vmem:[#allocation2 + $0x28] sm:$0x3] %vm30_vm2, %v21239_v5 }
  0x2c   :  { %37 = vst.msk [vmem:[#allocation2 + $0x40] sm:$0x3] %vm30_vm2, %v21239_v5  ;;  %40 = vst.msk [vmem:[#allocation2 + $0x58] sm:$0x3] %vm30_vm2, %v21239_v5 }
  0x2d   :  { %43 = vst.msk [vmem:[#allocation2 + $0x70] sm:$0x3] %vm30_vm2, %v21239_v5  ;;  %46 = vst.msk [vmem:[#allocation2 + $0x88] sm:$0x3] %vm30_vm2, %v21239_v5 }
  0x2e   :  { %49 = vst.msk [vmem:[#allocation2 + $0xa0] sm:$0x3] %vm30_vm2, %v21239_v5  ;;  %52 = vst.msk [vmem:[#allocation2 + $0xb8] sm:$0x3] %vm30_vm2, %v21239_v5 }
  0x2f   :  { %55 = vst.msk [vmem:[#allocation2 + $0xd0] sm:$0x3] %vm30_vm2, %v21239_v5  ;;  %58 = vst.msk [vmem:[#allocation2 + $0xe8] sm:$0x3] %vm30_vm2, %v21239_v5 }
  0x30   :  { %61 = vst.msk [vmem:[#allocation2 + $0x100] sm:$0x3] %vm30_vm2, %v21239_v5  ;;  %64 = vst.msk [vmem:[#allocation2 + $0x118] sm:$0x3] %vm30_vm2, %v21239_v5 }
  0x31   :  { %67 = vst.msk [vmem:[#allocation2 + $0x130] sm:$0x3] %vm30_vm2, %v21239_v5  ;;  %70 = vst.msk [vmem:[#allocation2 + $0x148] sm:$0x3] %vm30_vm2, %v21239_v5 }
  0x32   :  { %73 = vst.msk [vmem:[#allocation2 + $0x160] sm:$0x3] %vm30_vm2, %v21239_v5  ;;  %76 = vst.msk [vmem:[#allocation2 + $0x178] sm:$0x3] %vm30_vm2, %v21239_v5  ;;  %v495_v28 = vld [vmem:[#allocation2 + $0x9] sm:$0xff] }
  0x33   :  { %79 = vst.msk [vmem:[#allocation2 + $0x190] sm:$0x3] %vm30_vm2, %v21239_v5  ;;  %82 = vst.msk [vmem:[#allocation2 + $0x1a8] sm:$0x3] %vm30_vm2, %v21239_v5  ;;  %14116 = vmatmul.mubr.msk.f32.vlgmr.msra.gmra.mrb[0].mxu1 %vm27_vm1, %v495_v28  ;;  %v360_v28 = vld [vmem:[%s21231_s0 + $0x1e0] sm:$0xff] }
  0x34   :  { %85 = vst.msk [vmem:[#allocation2 + $0x1c0] sm:$0x3] %vm30_vm2, %v21239_v5  ;;  %88 = vst.msk [vmem:[#allocation2 + $0x1d8] sm:$0x3] %vm30_vm2, %v21239_v5  ;;  %14212 = vmatpush3.msra.mxu1 %v16124_v2  ;;  %v343_v2 = vld [vmem:[%s21231_s0 + $0x158] sm:$0xff] }
  0x35   :  { %91 = vst.msk [vmem:[#allocation2 + $0x1f0] sm:$0x3] %vm30_vm2, %v21239_v5  ;;  %94 = vst.msk [vmem:[#allocation2 + $0x208] sm:$0x3] %vm30_vm2, %v21239_v5 }
  0x36   :  { %97 = vst.msk [vmem:[#allocation2 + $0x220] sm:$0x3] %vm30_vm2, %v21239_v5  ;;  %100 = vst.msk [vmem:[#allocation2 + $0x238] sm:$0x3] %vm30_vm2, %v21239_v5 }
  0x37   :  { %103 = vst.msk [vmem:[#allocation2 + $0x250] sm:$0x3] %vm30_vm2, %v21239_v5  ;;  %106 = vst.msk [vmem:[#allocation2 + $0x268] sm:$0x3] %vm30_vm2, %v21239_v5 }
  0x38   :  { %109 = vst.msk [vmem:[#allocation2 + $0x280] sm:$0x3] %vm30_vm2, %v21239_v5  ;;  %112 = vst.msk [vmem:[#allocation2 + $0x298] sm:$0x3] %vm30_vm2, %v21239_v5 }
  0x39   :  { %115 = vst.msk [vmem:[#allocation2 + $0x2b0] sm:$0x3] %vm30_vm2, %v21239_v5  ;;  %118 = vst.msk [vmem:[#allocation2 + $0x2c8] sm:$0x3] %vm30_vm2, %v21239_v5 }
  0x3a   :  { %121 = vst.msk [vmem:[#allocation2 + $0x2e0] sm:$0x3] %vm30_vm2, %v21239_v5  ;;  %124 = vst.msk [vmem:[#allocation2 + $0x2f8] sm:$0x3] %vm30_vm2, %v21239_v5 }
  0x3b   :  { %127 = vst.msk [vmem:[#allocation2 + $0x310] sm:$0x3] %vm30_vm2, %v21239_v5  ;;  %130 = vst.msk [vmem:[#allocation2 + $0x328] sm:$0x3] %vm30_vm2, %v21239_v5 }
  0x3c   :  { %133 = vst.msk [vmem:[#allocation2 + $0x340] sm:$0x3] %vm30_vm2, %v21239_v5  ;;  %136 = vst.msk [vmem:[#allocation2 + $0x358] sm:$0x3] %vm30_vm2, %v21239_v5 }
  0x3d   :  { %365 = vst.msk [vmem:[#allocation2 + $0x19] sm:$0xff] %vm27_vm1, %v16129_v3  ;;  %366 = vst.msk [vmem:[#allocation2 + $0x21] sm:$0xff] %vm27_vm1, %v301_v6  ;;  %v344_v3 = vld [vmem:[%s21231_s0 + $0x160] sm:$0xff]  ;;  %v346_v6 = vld [vmem:[%s21231_s0 + $0x170] sm:$0xff] }
  0x3e   :  { %367 = vst.msk [vmem:[#allocation2 + $0x31] sm:$0xff] %vm27_vm1, %v302_v7  ;;  %368 = vst.msk [vmem:[#allocation2 + $0x39] sm:$0xff] %vm27_vm1, %v303_v8  ;;  %v347_v8 = vld [vmem:[%s21231_s0 + $0x178] sm:$0xff] }
  0x3f   :  { %369 = vst.msk [vmem:[#allocation2 + $0x49] sm:$0xff] %vm27_vm1, %v304_v9  ;;  %370 = vst.msk [vmem:[#allocation2 + $0x51] sm:$0xff] %vm27_vm1, %v305_v10  ;;  %v348_v10 = vld [vmem:[%s21231_s0 + $0x180] sm:$0xff] }
  0x40   :  { %371 = vst.msk [vmem:[#allocation2 + $0x61] sm:$0xff] %vm27_vm1, %v306_v11  ;;  %372 = vst.msk [vmem:[#allocation2 + $0x69] sm:$0xff] %vm27_vm1, %v307_v12  ;;  %v349_v11 = vld [vmem:[%s21231_s0 + $0x188] sm:$0xff]  ;;  %v350_v12 = vld [vmem:[%s21231_s0 + $0x190] sm:$0xff] }
  0x41   :  { %373 = vst.msk [vmem:[#allocation2 + $0x79] sm:$0xff] %vm27_vm1, %v308_v13  ;;  %374 = vst.msk [vmem:[#allocation2 + $0x81] sm:$0xff] %vm27_vm1, %v309_v14  ;;  %v351_v14 = vld [vmem:[%s21231_s0 + $0x198] sm:$0xff] }
  0x42   :  { %375 = vst.msk [vmem:[#allocation2 + $0x91] sm:$0xff] %vm27_vm1, %v310_v15  ;;  %376 = vst.msk [vmem:[#allocation2 + $0x99] sm:$0xff] %vm27_vm1, %v311_v16  ;;  %v352_v16 = vld [vmem:[%s21231_s0 + $0x1a0] sm:$0xff] }
  0x43   :  { %377 = vst.msk [vmem:[#allocation2 + $0xa9] sm:$0xff] %vm27_vm1, %v312_v17  ;;  %378 = vst.msk [vmem:[#allocation2 + $0xb1] sm:$0xff] %vm27_vm1, %v313_v18  ;;  %v353_v17 = vld [vmem:[%s21231_s0 + $0x1a8] sm:$0xff] }
  0x44   :  { %379 = vst.msk [vmem:[#allocation2 + $0xc1] sm:$0xff] %vm27_vm1, %v314_v19  ;;  %380 = vst.msk [vmem:[#allocation2 + $0xc9] sm:$0xff] %vm27_vm1, %v315_v20  ;;  %v3128_v30 = vld [vmem:[#allocation2 + $0x19] sm:$0xff]  ;;  %v3129_v31 = vld [vmem:[#allocation2 + $0x21] sm:$0xff] }
  0x45   :  { %381 = vst.msk [vmem:[#allocation2 + $0xd9] sm:$0xff] %vm27_vm1, %v316_v21  ;;  %382 = vst.msk [vmem:[#allocation2 + $0xe1] sm:$0xff] %vm27_vm1, %v317_v22  ;;  %14507 = vmatprep.mubr.msk.f32.mxu0 %vm27_vm1, %v3128_v30  ;;  %v3130_v32 = vld [vmem:[#allocation2 + $0x31] sm:$0xff]  ;;  %14118 = vmatprep.mubr.msk.f32.mxu1 %vm27_vm1, %v3128_v30  ;;  %v3131_v33 = vld [vmem:[#allocation2 + $0x39] sm:$0xff] }
  0x46   :  { %383 = vst.msk [vmem:[#allocation2 + $0xf1] sm:$0xff] %vm27_vm1, %v318_v23  ;;  %384 = vst.msk [vmem:[#allocation2 + $0xf9] sm:$0xff] %vm27_vm1, %v319_v24  ;;  %14508 = vmatmul.mubr.msk.f32.vlgmr.msra.gmra.mrb[0].mxu0 %vm27_vm1, %v3129_v31  ;;  %v3132_v34 = vld [vmem:[#allocation2 + $0x49] sm:$0xff]  ;;  %14119 = vmatmul.mubr.msk.f32.gmra.mrb[2].mxu1 %vm27_vm1, %v3129_v31  ;;  %v3133_v35 = vld [vmem:[#allocation2 + $0x51] sm:$0xff] }
  0x47   :  { %385 = vst.msk [vmem:[#allocation2 + $0x109] sm:$0xff] %vm27_vm1, %v320_v25  ;;  %386 = vst.msk [vmem:[#allocation2 + $0x111] sm:$0xff] %vm27_vm1, %v321_v26  ;;  %14604 = vmatpush3.msra.mxu0 %v16134_v4  ;;  %14510 = vmatprep.mubr.msk.f32.mxu0 %vm27_vm1, %v3130_v32  ;;  %v3134_v36 = vld [vmem:[#allocation2 + $0x61] sm:$0xff]  ;;  %v3135_v46 = vld [vmem:[#allocation2 + $0x69] sm:$0xff] }
  0x48   :  { %387 = vst.msk [vmem:[#allocation2 + $0x121] sm:$0xff] %vm27_vm1, %v322_v29  ;;  %14121 = vmatprep.mubr.msk.f32.mxu1 %vm27_vm1, %v3130_v32  ;;  %388 = vst.msk [vmem:[#allocation2 + $0x129] sm:$0xff] %vm27_vm1, %v323_v37  ;;  %v3136_v48 = vld [vmem:[#allocation2 + $0x79] sm:$0xff]  ;;  %14701 = vmatprep.subr.mxu0 %v16524_v47  ;;  %v3137_v53 = vld [vmem:[#allocation2 + $0x81] sm:$0xff] }
  0x49   :  { %389 = vst.msk [vmem:[#allocation2 + $0x139] sm:$0xff] %vm27_vm1, %v324_v38  ;;  %390 = vst.msk [vmem:[#allocation2 + $0x141] sm:$0xff] %vm27_vm1, %v325_v39  ;;  %v3138_v56 = vld [vmem:[#allocation2 + $0x91] sm:$0xff]  ;;  %v3139_v57 = vld [vmem:[#allocation2 + $0x99] sm:$0xff] }
  0x4a   :  { %14511 = vmatmul.mubr.msk.f32.gmra.mrb[2].mxu0 %vm27_vm1, %v3131_v33  ;;  %14122 = vmatmul.mubr.msk.f32.gmra.mrb[4].mxu1 %vm27_vm1, %v3131_v33  ;;  %391 = vst.msk [vmem:[#allocation2 + $0x151] sm:$0xff] %vm27_vm1, %v326_v40  ;;  %392 = vst.msk [vmem:[#allocation2 + $0x159] sm:$0xff] %vm27_vm1, %v327_v41  ;;  %v3140_v60 = vld [vmem:[#allocation2 + $0xa9] sm:$0xff]  ;;  %v3141_v63 = vld [vmem:[#allocation2 + $0xb1] sm:$0xff] }
  0x4b   :  { %14513 = vmatprep.mubr.msk.f32.mxu0 %vm27_vm1, %v3132_v34  ;;  %14124 = vmatprep.mubr.msk.f32.mxu1 %vm27_vm1, %v3132_v34  ;;  %393 = vst.msk [vmem:[#allocation2 + $0x169] sm:$0xff] %vm27_vm1, %v328_v42  ;;  %394 = vst.msk [vmem:[#allocation2 + $0x171] sm:$0xff] %vm27_vm1, %v329_v43  ;;  %v3142_v0 = vld [vmem:[#allocation2 + $0xc1] sm:$0xff]  ;;  %v3143_v7 = vld [vmem:[#allocation2 + $0xc9] sm:$0xff] }
  0x4c   :  { %395 = vst.msk [vmem:[#allocation2 + $0x181] sm:$0xff] %vm27_vm1, %v330_v44  ;;  %396 = vst.msk [vmem:[#allocation2 + $0x189] sm:$0xff] %vm27_vm1, %v331_v45  ;;  %v345_v4 = vld [vmem:[%s21231_s0 + $0x168] sm:$0xff]  ;;  %v3144_v9 = vld [vmem:[#allocation2 + $0xd9] sm:$0xff] }
  0x4d   :  { %397 = vst.msk [vmem:[#allocation2 + $0x1c9] sm:$0xff] %vm27_vm1, %v332_v49  ;;  %398 = vst.msk [vmem:[#allocation2 + $0x1d1] sm:$0xff] %vm27_vm1, %v333_v50  ;;  %v3145_v13 = vld [vmem:[#allocation2 + $0xe1] sm:$0xff]  ;;  %v3146_v15 = vld [vmem:[#allocation2 + $0xf1] sm:$0xff] }
  0x4e   :  { %14514 = vmatmul.mubr.msk.f32.gmra.mrb[4].mxu0 %vm27_vm1, %v3133_v35  ;;  %14125 = vmatmul.mubr.msk.f32.gmra.mrb[6].mxu1 %vm27_vm1, %v3133_v35  ;;  %399 = vst.msk [vmem:[#allocation2 + $0x1e1] sm:$0xff] %vm27_vm1, %v334_v51  ;;  %400 = vst.msk [vmem:[#allocation2 + $0x1e9] sm:$0xff] %vm27_vm1, %v335_v52  ;;  %v3147_v18 = vld [vmem:[#allocation2 + $0xf9] sm:$0xff]  ;;  %v354_v19 = vld [vmem:[%s21231_s0 + $0x1b0] sm:$0xff] }
  0x4f   :  { %14516 = vmatprep.mubr.msk.f32.mxu0 %vm27_vm1, %v3134_v36  ;;  %14127 = vmatprep.mubr.msk.f32.mxu1 %vm27_vm1, %v3134_v36  ;;  %401 = vst.msk [vmem:[#allocation2 + $0x1f9] sm:$0xff] %vm27_vm1, %v336_v54  ;;  %402 = vst.msk [vmem:[#allocation2 + $0x201] sm:$0xff] %vm27_vm1, %v337_v55  ;;  %v355_v20 = vld [vmem:[%s21231_s0 + $0x1b8] sm:$0xff]  ;;  %v3148_v21 = vld [vmem:[#allocation2 + $0x109] sm:$0xff] }
  0x50   :  { %403 = vst.msk [vmem:[#allocation2 + $0x211] sm:$0xff] %vm27_vm1, %v338_v58  ;;  %404 = vst.msk [vmem:[#allocation2 + $0x219] sm:$0xff] %vm27_vm1, %v339_v59  ;;  %v356_v22 = vld [vmem:[%s21231_s0 + $0x1c0] sm:$0xff]  ;;  %v357_v23 = vld [vmem:[%s21231_s0 + $0x1c8] sm:$0xff] }
  0x51   :  { %405 = vst.msk [vmem:[#allocation2 + $0x229] sm:$0xff] %vm27_vm1, %v340_v61  ;;  %406 = vst.msk [vmem:[#allocation2 + $0x231] sm:$0xff] %vm27_vm1, %v341_v62  ;;  %v3149_v24 = vld [vmem:[#allocation2 + $0x111] sm:$0xff]  ;;  %v3150_v27 = vld [vmem:[#allocation2 + $0x121] sm:$0xff] }
  0x52   :  { %14517 = vmatmul.mubr.msk.f32.gmra.mrb[6].mxu0 %vm27_vm1, %v3135_v46  ;;  %14128 = vmatmul.mubr.msk.f32.gmra.mrb[8].mxu1 %vm27_vm1, %v3135_v46  ;;  %407 = vst.msk [vmem:[#allocation2 + $0x241] sm:$0xff] %vm27_vm1, %v342_v1  ;;  %408 = vst.msk [vmem:[#allocation2 + $0x249] sm:$0xff] %vm27_vm1, %v343_v2  ;;  %v358_v25 = vld [vmem:[%s21231_s0 + $0x1d0] sm:$0xff]  ;;  %v359_v26 = vld [vmem:[%s21231_s0 + $0x1d8] sm:$0xff] }
  0x53   :  { %14519 = vmatprep.mubr.msk.f32.mxu0 %vm27_vm1, %v3136_v48  ;;  %14130 = vmatprep.mubr.msk.f32.mxu1 %vm27_vm1, %v3136_v48  ;;  %409 = vst.msk [vmem:[#allocation2 + $0x259] sm:$0xff] %vm27_vm1, %v344_v3  ;;  %410 = vst.msk [vmem:[#allocation2 + $0x261] sm:$0xff] %vm27_vm1, %v345_v4  ;;  %v361_v29 = vld [vmem:[%s21231_s0 + $0x1e8] sm:$0xff]  ;;  %v3152_v31 = vld [vmem:[#allocation2 + $0x139] sm:$0xff] }
  0x54   :  { %411 = vst.msk [vmem:[#allocation2 + $0x271] sm:$0xff] %vm27_vm1, %v346_v6  ;;  %412 = vst.msk [vmem:[#allocation2 + $0x279] sm:$0xff] %vm27_vm1, %v347_v8  ;;  %v3151_v30 = vld [vmem:[#allocation2 + $0x129] sm:$0xff]  ;;  %v3153_v33 = vld [vmem:[#allocation2 + $0x141] sm:$0xff] }
  0x55   :  { %413 = vst.msk [vmem:[#allocation2 + $0x289] sm:$0xff] %vm27_vm1, %v348_v10  ;;  %414 = vst.msk [vmem:[#allocation2 + $0x291] sm:$0xff] %vm27_vm1, %v349_v11  ;;  %v16682_v32 = vld [vmem:[%s21232_s1 + $0x10] sm:$0xff]  ;;  %v3155_v35 = vld [vmem:[#allocation2 + $0x159] sm:$0xff] }
  0x56   :  { %14520 = vmatmul.mubr.msk.f32.gmra.mrb[8].mxu0 %vm27_vm1, %v3137_v53  ;;  %14131 = vmatmul.mubr.msk.f32.gmra.mrb[10].mxu1 %vm27_vm1, %v3137_v53  ;;  %415 = vst.msk [vmem:[#allocation2 + $0x2a1] sm:$0xff] %vm27_vm1, %v350_v12  ;;  %416 = vst.msk [vmem:[#allocation2 + $0x2a9] sm:$0xff] %vm27_vm1, %v351_v14  ;;  %v3154_v34 = vld [vmem:[#allocation2 + $0x151] sm:$0xff]  ;;  %v3156_v36 = vld [vmem:[#allocation2 + $0x169] sm:$0xff] }
  0x57   :  { %14522 = vmatprep.mubr.msk.f32.mxu0 %vm27_vm1, %v3138_v56  ;;  %14133 = vmatprep.mubr.msk.f32.mxu1 %vm27_vm1, %v3138_v56  ;;  %417 = vst.msk [vmem:[#allocation2 + $0x2b9] sm:$0xff] %vm27_vm1, %v352_v16  ;;  %418 = vst.msk [vmem:[#allocation2 + $0x2c1] sm:$0xff] %vm27_vm1, %v353_v17  ;;  %v3157_v37 = vld [vmem:[#allocation2 + $0x171] sm:$0xff]  ;;  %v3158_v38 = vld [vmem:[#allocation2 + $0x181] sm:$0xff] }
  0x58   :  { %419 = vst.msk [vmem:[#allocation2 + $0x2d1] sm:$0xff] %vm27_vm1, %v354_v19  ;;  %420 = vst.msk [vmem:[#allocation2 + $0x2d9] sm:$0xff] %vm27_vm1, %v355_v20  ;;  %14309 = vmatprep.subr.mxu1 %v16682_v32  ;;  %v3159_v39 = vld [vmem:[#allocation2 + $0x189] sm:$0xff]  ;;  %v526_v40 = vld [vmem:[#allocation2 + $0x1b1] sm:$0xff] }
  0x59   :  { %421 = vst.msk [vmem:[#allocation2 + $0x2e9] sm:$0xff] %vm27_vm1, %v356_v22  ;;  %422 = vst.msk [vmem:[#allocation2 + $0x2f1] sm:$0xff] %vm27_vm1, %v357_v23  ;;  %v16701_v41 = vld [vmem:[#allocation2 + $0x1a] sm:$0xff]  ;;  %v16708_v43 = vld [vmem:[#allocation2 + $0x22] sm:$0xff] }
  0x5a   :  { %14523 = vmatmul.mubr.msk.f32.gmra.mrb[10].mxu0 %vm27_vm1, %v3139_v57  ;;  %14134 = vmatmul.mubr.msk.f32.gmra.mrb[12].mxu1 %vm27_vm1, %v3139_v57  ;;  %423 = vst.msk [vmem:[#allocation2 + $0x301] sm:$0xff] %vm27_vm1, %v358_v25  ;;  %424 = vst.msk [vmem:[#allocation2 + $0x309] sm:$0xff] %vm27_vm1, %v359_v26  ;;  %v527_v42 = vld [vmem:[#allocation2 + $0x1b9] sm:$0xff]  ;;  %v528_v44 = vld [vmem:[#allocation2 + $0x1c9] sm:$0xff] }
  0x5b   :  { %14525 = vmatprep.mubr.msk.f32.mxu0 %vm27_vm1, %v3140_v60  ;;  %14136 = vmatprep.mubr.msk.f32.mxu1 %vm27_vm1, %v3140_v60  ;;  %425 = vst.msk [vmem:[#allocation2 + $0x319] sm:$0xff] %vm27_vm1, %v360_v28  ;;  %426 = vst.msk [vmem:[#allocation2 + $0x321] sm:$0xff] %vm27_vm1, %v361_v29  ;;  %v16710_v45 = vld [vmem:[#allocation2 + $0x32] sm:$0xff]  ;;  %v16725_v50 = vld [vmem:[#allocation2 + $0x3a] sm:$0xff] }
  0x5c   :  { %v529_v46 = vld [vmem:[#allocation2 + $0x1d1] sm:$0xff]  ;;  %v530_v51 = vld [vmem:[#allocation2 + $0x1e1] sm:$0xff]  ;;  %v532_v55 = vld [vmem:[#allocation2 + $0x1f9] sm:$0xff] }
  0x5d   :  { %v362_v48 = vld [vmem:[%s21231_s0 + $0x1f0] sm:$0xff]  ;;  %v363_v49 = vld [vmem:[%s21231_s0 + $0x1f8] sm:$0xff]  ;;  %v16745_v56 = vld [vmem:[#allocation2 + $0x62] sm:$0xff] }
  0x5e   :  { %14526 = vmatmul.mubr.msk.f32.gmra.mrb[12].mxu0 %vm27_vm1, %v3141_v63  ;;  %14137 = vmatmul.mubr.msk.f32.gmra.mrb[14].mxu1 %vm27_vm1, %v3141_v63  ;;  %427 = vst.msk [vmem:[#allocation2 + $0x331] sm:$0xff] %vm27_vm1, %v362_v48  ;;  %428 = vst.msk [vmem:[#allocation2 + $0x339] sm:$0xff] %vm27_vm1, %v363_v49  ;;  %v16732_v52 = vld [vmem:[%s21232_s1 + $0x38] sm:$0xff]  ;;  %v16734_v53 = vld [vmem:[#allocation2 + $0x4a] sm:$0xff] }
  0x5f   :  { %14528 = vmatprep.mubr.msk.f32.mxu0 %vm27_vm1, %v3142_v0  ;;  %14139 = vmatprep.mubr.msk.f32.mxu1 %vm27_vm1, %v3142_v0  ;;  %v16743_v54 = vld [vmem:[#allocation2 + $0x52] sm:$0xff]  ;;  %v533_v57 = vld [vmem:[#allocation2 + $0x201] sm:$0xff]  ;;  %v16753_v58 = vld [vmem:[#allocation2 + $0x6a] sm:$0xff] }
  0x60   :  { %v534_v59 = vld [vmem:[#allocation2 + $0x211] sm:$0xff]  ;;  %v16755_v60 = vld [vmem:[#allocation2 + $0x7a] sm:$0xff]  ;;  %v16763_v62 = vld [vmem:[#allocation2 + $0x82] sm:$0xff] }
  0x61   :  { %v535_v61 = vld [vmem:[#allocation2 + $0x219] sm:$0xff]  ;;  %v536_v63 = vld [vmem:[#allocation2 + $0x229] sm:$0xff]  ;;  %v537_v1 = vld [vmem:[#allocation2 + $0x231] sm:$0xff] }
  0x62   :  { %14529 = vmatmul.mubr.msk.f32.gmra.mrb[14].mxu0 %vm27_vm1, %v3143_v7  ;;  %14140 = vmatmul.mubr.msk.f32.gmra.mrb[16].mxu1 %vm27_vm1, %v3143_v7  ;;  %v16765_v0 = vld [vmem:[#allocation2 + $0x92] sm:$0xff]  ;;  %v16773_v2 = vld [vmem:[#allocation2 + $0x9a] sm:$0xff]  ;;  %v16775_v4 = vld [vmem:[#allocation2 + $0xaa] sm:$0xff] }
  0x63   :  { %14531 = vmatprep.mubr.msk.f32.mxu0 %vm27_vm1, %v3144_v9  ;;  %14142 = vmatprep.mubr.msk.f32.mxu1 %vm27_vm1, %v3144_v9  ;;  %v538_v3 = vld [vmem:[#allocation2 + $0x241] sm:$0xff]  ;;  %v539_v6 = vld [vmem:[#allocation2 + $0x249] sm:$0xff]  ;;  %v16783_v7 = vld [vmem:[#allocation2 + $0xb2] sm:$0xff] }
  0x64   :  { %v540_v8 = vld [vmem:[#allocation2 + $0x259] sm:$0xff]  ;;  %v16785_v9 = vld [vmem:[#allocation2 + $0xc2] sm:$0xff]  ;;  %v16793_v11 = vld [vmem:[#allocation2 + $0xca] sm:$0xff] }
  0x65   :  { %v541_v10 = vld [vmem:[#allocation2 + $0x261] sm:$0xff]  ;;  %v542_v12 = vld [vmem:[#allocation2 + $0x271] sm:$0xff]  ;;  %v543_v14 = vld [vmem:[#allocation2 + $0x279] sm:$0xff] }
  0x66   :  { %14532 = vmatmul.mubr.msk.f32.gmra.mrb[16].mxu0 %vm27_vm1, %v3145_v13  ;;  %14143 = vmatmul.mubr.msk.f32.gmra.mrb[18].mxu1 %vm27_vm1, %v3145_v13  ;;  %v16795_v13 = vld [vmem:[#allocation2 + $0xda] sm:$0xff]  ;;  %v544_v16 = vld [vmem:[#allocation2 + $0x289] sm:$0xff]  ;;  %v16805_v17 = vld [vmem:[#allocation2 + $0xf2] sm:$0xff] }
  0x67   :  { %14534 = vmatprep.mubr.msk.f32.mxu0 %vm27_vm1, %v3146_v15  ;;  %14145 = vmatprep.mubr.msk.f32.mxu1 %vm27_vm1, %v3146_v15  ;;  %v16803_v15 = vld [vmem:[#allocation2 + $0xe2] sm:$0xff]  ;;  %v16813_v19 = vld [vmem:[#allocation2 + $0xfa] sm:$0xff]  ;;  %v16823_v23 = vld [vmem:[#allocation2 + $0x112] sm:$0xff] }
  0x68   :  { %v546_v20 = vld [vmem:[#allocation2 + $0x2a1] sm:$0xff]  ;;  %v547_v22 = vld [vmem:[#allocation2 + $0x2a9] sm:$0xff]  ;;  %v550_v28 = vld [vmem:[#allocation2 + $0x2d1] sm:$0xff] }
  0x69   :  { %v16825_v25 = vld [vmem:[#allocation2 + $0x122] sm:$0xff]  ;;  %v16835_v29 = vld [vmem:[#allocation2 + $0x13a] sm:$0xff]  ;;  %v3866_v48 = vld [vmem:[#allocation2 + $0x18a] sm:$0xff] }
  0x6a   :  { %14535 = vmatmul.mubr.msk.f32.gmra.mrb[18].mxu0 %vm27_vm1, %v3147_v18  ;;  %14146 = vmatmul.mubr.msk.f32.gmra.mrb[20].mxu1 %vm27_vm1, %v3147_v18  ;;  %v545_v18 = vld [vmem:[#allocation2 + $0x291] sm:$0xff]  ;;  %v549_v26 = vld [vmem:[#allocation2 + $0x2c1] sm:$0xff] }
  0x6b   :  { %14537 = vmatprep.mubr.msk.f32.mxu0 %vm27_vm1, %v3148_v21  ;;  %14148 = vmatprep.mubr.msk.f32.mxu1 %vm27_vm1, %v3148_v21  ;;  %v16815_v21 = vld [vmem:[#allocation2 + $0x10a] sm:$0xff]  ;;  %v429_v49 = vld [vmem:[#allocation2] sm:$0xff]  ;;  %v17005_v5 = vld [vmem:[#allocation2 + $0x292] sm:$0xff] }
  0x6c   :  { %21333 = vst [vmem:[#allocation31_spill] sm:$0xff] %v17005_v5 }
  0x6e   :  { %14538 = vmatmul.mubr.msk.f32.gmra.mrb[20].mxu0 %vm27_vm1, %v3149_v24  ;;  %14149 = vmatmul.mubr.msk.f32.gmra.mrb[22].mxu1 %vm27_vm1, %v3149_v24  ;;  %v548_v24 = vld [vmem:[#allocation2 + $0x2b9] sm:$0xff] }
  0x6f   :  { %14540 = vmatprep.mubr.msk.f32.mxu0 %vm27_vm1, %v3150_v27  ;;  %14151 = vmatprep.mubr.msk.f32.mxu1 %vm27_vm1, %v3150_v27  ;;  %v16833_v27 = vld [vmem:[#allocation2 + $0x12a] sm:$0xff] }
  0x72   :  { %14541 = vmatmul.mubr.msk.f32.gmra.mrb[22].mxu0 %vm27_vm1, %v3151_v30  ;;  %14152 = vmatmul.mubr.msk.f32.gmra.mrb[24].mxu1 %vm27_vm1, %v3151_v30  ;;  %v551_v30 = vld [vmem:[#allocation2 + $0x2d9] sm:$0xff] }
  0x73   :  { %14543 = vmatprep.mubr.msk.f32.mxu0 %vm27_vm1, %v3152_v31  ;;  %14154 = vmatprep.mubr.msk.f32.mxu1 %vm27_vm1, %v3152_v31  ;;  %v16843_v31 = vld [vmem:[#allocation2 + $0x142] sm:$0xff] }
  0x76   :  { %14544 = vmatmul.mubr.msk.f32.gmra.mrb[24].mxu0 %vm27_vm1, %v3153_v33  ;;  %14155 = vmatmul.mubr.msk.f32.gmra.mrb[26].mxu1 %vm27_vm1, %v3153_v33  ;;  %v552_v33 = vld [vmem:[#allocation2 + $0x2e9] sm:$0xff] }
  0x77   :  { %14546 = vmatprep.mubr.msk.f32.mxu0 %vm27_vm1, %v3154_v34  ;;  %14157 = vmatprep.mubr.msk.f32.mxu1 %vm27_vm1, %v3154_v34  ;;  %v16845_v34 = vld [vmem:[#allocation2 + $0x152] sm:$0xff] }
  0x7a   :  { %14547 = vmatmul.mubr.msk.f32.gmra.mrb[26].mxu0 %vm27_vm1, %v3155_v35  ;;  %14158 = vmatmul.mubr.msk.f32.gmra.mrb[28].mxu1 %vm27_vm1, %v3155_v35  ;;  %v553_v35 = vld [vmem:[#allocation2 + $0x2f1] sm:$0xff] }
  0x7b   :  { %14549 = vmatprep.mubr.msk.f32.mxu0 %vm27_vm1, %v3156_v36  ;;  %14160 = vmatprep.mubr.msk.f32.mxu1 %vm27_vm1, %v3156_v36  ;;  %v16853_v36 = vld [vmem:[#allocation2 + $0x15a] sm:$0xff] }
  0x7e   :  { %14550 = vmatmul.mubr.msk.f32.gmra.mrb[28].mxu0 %vm27_vm1, %v3157_v37  ;;  %14161 = vmatmul.mubr.msk.f32.gmra.mrb[30].mxu1 %vm27_vm1, %v3157_v37  ;;  %v554_v37 = vld [vmem:[#allocation2 + $0x301] sm:$0xff] }
  0x7f   :  { %14552 = vmatprep.mubr.msk.f32.mxu0 %vm27_vm1, %v3158_v38  ;;  %14163 = vmatprep.mubr.msk.f32.mxu1 %vm27_vm1, %v526_v40  ;;  %v16855_v38 = vld [vmem:[#allocation2 + $0x16a] sm:$0xff]  ;;  %v16863_v40 = vld [vmem:[#allocation2 + $0x172] sm:$0xff] }
  0x80   :  { %21315 = vst [vmem:[#allocation13_spill] sm:$0xff] %v16863_v40 }
  0x82   :  { %14553 = vmatmul.mubr.msk.f32.gmra.mrb[30].mxu0 %vm27_vm1, %v3159_v39  ;;  %14164 = vmatmul.mubr.msk.f32.gmra.mrb[32].mxu1 %vm27_vm1, %v527_v42  ;;  %v555_v39 = vld [vmem:[#allocation2 + $0x309] sm:$0xff]  ;;  %v556_v42 = vld [vmem:[#allocation2 + $0x319] sm:$0xff] }
  0x83   :  { %14605 = vmatprep.mubr.msk.f32.mxu0 %vm27_vm1, %v16701_v41  ;;  %14166 = vmatprep.mubr.msk.f32.mxu1 %vm27_vm1, %v528_v44  ;;  %v3865_v44 = vld [vmem:[#allocation2 + $0x182] sm:$0xff] }
  0x86   :  { %14606 = vmatmul.mubr.msk.f32.vlgmr.msra.gmra.mrb[0].mxu0 %vm27_vm1, %v16708_v43  ;;  %14167 = vmatmul.mubr.msk.f32.gmra.mrb[34].mxu1 %vm27_vm1, %v529_v46  ;;  %v557_v46 = vld [vmem:[#allocation2 + $0x321] sm:$0xff] }
  0x87   :  { %14702 = vmatpush3.msra.mxu0 %v16524_v47  ;;  %14608 = vmatprep.mubr.msk.f32.mxu0 %vm27_vm1, %v16710_v45  ;;  %v531_v47 = vld [vmem:[#allocation2 + $0x1e9] sm:$0xff] }
  0x88   :  { %14799 = vmatprep.subr.mxu0 %v16732_v52  ;;  %14169 = vmatprep.mubr.msk.f32.mxu1 %vm27_vm1, %v530_v51  ;;  %v16870_v51 = vld [vmem:[#allocation2 + $0x1ca] sm:$0xff] }
  0x89   :  { %21316 = vst [vmem:[#allocation14_spill] sm:$0xff] %v16870_v51 }
  0x8a   :  { %14609 = vmatmul.mubr.msk.f32.gmra.mrb[2].mxu0 %vm27_vm1, %v16725_v50  ;;  %14170 = vmatmul.mubr.msk.f32.gmra.mrb[36].mxu1 %vm27_vm1, %v531_v47  ;;  %v430_v47 = vld [vmem:[#allocation2 + $0x8] sm:$0xff] }
  0x8b   :  { %14611 = vmatprep.mubr.msk.f32.mxu0 %vm27_vm1, %v16734_v53  ;;  %14172 = vmatprep.mubr.msk.f32.mxu1 %vm27_vm1, %v532_v55  ;;  %v16877_v55 = vld [vmem:[#allocation2 + $0x1d2] sm:$0xff] }
  0x8c   :  { %21317 = vst [vmem:[#allocation15_spill] sm:$0xff] %v16877_v55 }
  0x8e   :  { %14612 = vmatmul.mubr.msk.f32.gmra.mrb[4].mxu0 %vm27_vm1, %v16743_v54  ;;  %14173 = vmatmul.mubr.msk.f32.gmra.mrb[38].mxu1 %vm27_vm1, %v533_v57  ;;  %v431_v57 = vld [vmem:[#allocation2 + $0x18] sm:$0xff] }
  0x8f   :  { %14614 = vmatprep.mubr.msk.f32.mxu0 %vm27_vm1, %v16745_v56  ;;  %14175 = vmatprep.mubr.msk.f32.mxu1 %vm27_vm1, %v534_v59  ;;  %v16879_v59 = vld [vmem:[#allocation2 + $0x1e2] sm:$0xff] }
  0x90   :  { %21318 = vst [vmem:[#allocation16_spill] sm:$0xff] %v16879_v59 }
  0x92   :  { %14615 = vmatmul.mubr.msk.f32.gmra.mrb[6].mxu0 %vm27_vm1, %v16753_v58  ;;  %14176 = vmatmul.mubr.msk.f32.gmra.mrb[40].mxu1 %vm27_vm1, %v535_v61  ;;  %v16885_v61 = vld [vmem:[%s21232_s1 + $0x18] sm:$0xff] }
  0x93   :  { %14617 = vmatprep.mubr.msk.f32.mxu0 %vm27_vm1, %v16755_v60  ;;  %14178 = vmatprep.mubr.msk.f32.mxu1 %vm27_vm1, %v536_v63  ;;  %v432_v63 = vld [vmem:[#allocation2 + $0x20] sm:$0xff] }
  0x96   :  { %14618 = vmatmul.mubr.msk.f32.gmra.mrb[8].mxu0 %vm27_vm1, %v16763_v62  ;;  %14179 = vmatmul.mubr.msk.f32.gmra.mrb[42].mxu1 %vm27_vm1, %v537_v1  ;;  %v16893_v1 = vld [vmem:[#allocation2 + $0x1ea] sm:$0xff] }
  0x97   :  { %14620 = vmatprep.mubr.msk.f32.mxu0 %vm27_vm1, %v16765_v0  ;;  %14181 = vmatprep.mubr.msk.f32.mxu1 %vm27_vm1, %v538_v3  ;;  %21319 = vst [vmem:[#allocation17_spill] sm:$0xff] %v16893_v1  ;;  %v16895_v3 = vld [vmem:[#allocation2 + $0x30] sm:$0xff] }
  0x9a   :  { %14621 = vmatmul.mubr.msk.f32.gmra.mrb[10].mxu0 %vm27_vm1, %v16773_v2  ;;  %14182 = vmatmul.mubr.msk.f32.gmra.mrb[44].mxu1 %vm27_vm1, %v539_v6  ;;  %v16897_v6 = vld [vmem:[#allocation2 + $0x1fa] sm:$0xff] }
  0x9b   :  { %14623 = vmatprep.mubr.msk.f32.mxu0 %vm27_vm1, %v16775_v4  ;;  %14184 = vmatprep.mubr.msk.f32.mxu1 %vm27_vm1, %v540_v8  ;;  %21320 = vst [vmem:[#allocation18_spill] sm:$0xff] %v16897_v6  ;;  %v16909_v8 = vld [vmem:[#allocation2 + $0x202] sm:$0xff] }
  0x9c   :  { %21321 = vst [vmem:[#allocation19_spill] sm:$0xff] %v16909_v8 }
  0x9e   :  { %14624 = vmatmul.mubr.msk.f32.gmra.mrb[12].mxu0 %vm27_vm1, %v16783_v7  ;;  %14185 = vmatmul.mubr.msk.f32.gmra.mrb[46].mxu1 %vm27_vm1, %v541_v10  ;;  %v16911_v10 = vld [vmem:[#allocation2 + $0x48] sm:$0xff] }
  0x9f   :  { %14626 = vmatprep.mubr.msk.f32.mxu0 %vm27_vm1, %v16785_v9  ;;  %14187 = vmatprep.mubr.msk.f32.mxu1 %vm27_vm1, %v542_v12  ;;  %v16913_v12 = vld [vmem:[#allocation2 + $0x212] sm:$0xff] }
  0xa0   :  { %21322 = vst [vmem:[#allocation20_spill] sm:$0xff] %v16913_v12 }
  0xa2   :  { %14627 = vmatmul.mubr.msk.f32.gmra.mrb[14].mxu0 %vm27_vm1, %v16793_v11  ;;  %14188 = vmatmul.mubr.msk.f32.gmra.mrb[48].mxu1 %vm27_vm1, %v543_v14  ;;  %v16921_v14 = vld [vmem:[#allocation2 + $0x50] sm:$0xff] }
  0xa3   :  { %14629 = vmatprep.mubr.msk.f32.mxu0 %vm27_vm1, %v16795_v13  ;;  %14190 = vmatprep.mubr.msk.f32.mxu1 %vm27_vm1, %v544_v16  ;;  %v16925_v16 = vld [vmem:[#allocation2 + $0x21a] sm:$0xff] }
  0xa4   :  { %21323 = vst [vmem:[#allocation21_spill] sm:$0xff] %v16925_v16 }
  0xa6   :  { %14630 = vmatmul.mubr.msk.f32.gmra.mrb[16].mxu0 %vm27_vm1, %v16803_v15  ;;  %14191 = vmatmul.mubr.msk.f32.gmra.mrb[50].mxu1 %vm27_vm1, %v545_v18  ;;  %v16927_v18 = vld [vmem:[#allocation2 + $0x60] sm:$0xff] }
  0xa7   :  { %14632 = vmatprep.mubr.msk.f32.mxu0 %vm27_vm1, %v16805_v17  ;;  %14193 = vmatprep.mubr.msk.f32.mxu1 %vm27_vm1, %v546_v20  ;;  %v16929_v20 = vld [vmem:[#allocation2 + $0x22a] sm:$0xff] }
  0xa8   :  { %21324 = vst [vmem:[#allocation22_spill] sm:$0xff] %v16929_v20 }
  0xaa   :  { %14633 = vmatmul.mubr.msk.f32.gmra.mrb[18].mxu0 %vm27_vm1, %v16813_v19  ;;  %14194 = vmatmul.mubr.msk.f32.gmra.mrb[52].mxu1 %vm27_vm1, %v547_v22  ;;  %v16937_v22 = vld [vmem:[#allocation2 + $0x68] sm:$0xff] }
  0xab   :  { %14635 = vmatprep.mubr.msk.f32.mxu0 %vm27_vm1, %v16815_v21  ;;  %14196 = vmatprep.mubr.msk.f32.mxu1 %vm27_vm1, %v548_v24  ;;  %v16941_v24 = vld [vmem:[#allocation2 + $0x232] sm:$0xff] }
  0xac   :  { %21325 = vst [vmem:[#allocation23_spill] sm:$0xff] %v16941_v24 }
  0xae   :  { %14636 = vmatmul.mubr.msk.f32.gmra.mrb[20].mxu0 %vm27_vm1, %v16823_v23  ;;  %14197 = vmatmul.mubr.msk.f32.gmra.mrb[54].mxu1 %vm27_vm1, %v549_v26  ;;  %v16943_v26 = vld [vmem:[#allocation2 + $0x78] sm:$0xff] }
  0xaf   :  { %14638 = vmatprep.mubr.msk.f32.mxu0 %vm27_vm1, %v16825_v25  ;;  %14199 = vmatprep.mubr.msk.f32.mxu1 %vm27_vm1, %v550_v28  ;;  %v16945_v28 = vld [vmem:[#allocation2 + $0x242] sm:$0xff] }
  0xb0   :  { %21326 = vst [vmem:[#allocation24_spill] sm:$0xff] %v16945_v28 }
  0xb2   :  { %14639 = vmatmul.mubr.msk.f32.gmra.mrb[22].mxu0 %vm27_vm1, %v16833_v27  ;;  %14200 = vmatmul.mubr.msk.f32.gmra.mrb[56].mxu1 %vm27_vm1, %v551_v30  ;;  %v16953_v30 = vld [vmem:[#allocation2 + $0x80] sm:$0xff] }
  0xb3   :  { %14641 = vmatprep.mubr.msk.f32.mxu0 %vm27_vm1, %v16835_v29  ;;  %14202 = vmatprep.mubr.msk.f32.mxu1 %vm27_vm1, %v552_v33  ;;  %v16957_v33 = vld [vmem:[#allocation2 + $0x24a] sm:$0xff] }
  0xb4   :  { %21327 = vst [vmem:[#allocation25_spill] sm:$0xff] %v16957_v33 }
  0xb6   :  { %14642 = vmatmul.mubr.msk.f32.gmra.mrb[24].mxu0 %vm27_vm1, %v16843_v31  ;;  %14203 = vmatmul.mubr.msk.f32.gmra.mrb[58].mxu1 %vm27_vm1, %v553_v35  ;;  %v16959_v35 = vld [vmem:[#allocation2 + $0x90] sm:$0xff] }
  0xb7   :  { %14644 = vmatprep.mubr.msk.f32.mxu0 %vm27_vm1, %v16845_v34  ;;  %14205 = vmatprep.mubr.msk.f32.mxu1 %vm27_vm1, %v554_v37  ;;  %v16961_v37 = vld [vmem:[#allocation2 + $0x25a] sm:$0xff] }
  0xb8   :  { %21328 = vst [vmem:[#allocation26_spill] sm:$0xff] %v16961_v37 }
  0xba   :  { %14645 = vmatmul.mubr.msk.f32.gmra.mrb[26].mxu0 %vm27_vm1, %v16853_v36  ;;  %14206 = vmatmul.mubr.msk.f32.gmra.mrb[60].mxu1 %vm27_vm1, %v555_v39  ;;  %v16969_v39 = vld [vmem:[#allocation2 + $0x98] sm:$0xff] }
  0xbb   :  { %14647 = vmatprep.mubr.msk.f32.mxu0 %vm27_vm1, %v16855_v38  ;;  %14208 = vmatprep.mubr.msk.f32.mxu1 %vm27_vm1, %v556_v42  ;;  %v16973_v42 = vld [vmem:[#allocation2 + $0x262] sm:$0xff] }
  0xbc   :  { %21329 = vst [vmem:[#allocation27_spill] sm:$0xff] %v16973_v42 }
  0xbe   :  { %14648 = vmatmul.mubr.msk.f32.gmra.mrb[28].mxu0 %vm27_vm1, %v16863_v40  ;;  %14209 = vmatmul.mubr.msk.f32.gmra.mrb[62].mxu1 %vm27_vm1, %v557_v46  ;;  %v16977_v46 = vld [vmem:[#allocation2 + $0x272] sm:$0xff] }
  0xbf   :  { %14650 = vmatprep.mubr.msk.f32.mxu0 %vm27_vm1, %v3865_v44  ;;  %14213 = vmatprep.mubr.msk.f32.mxu1 %vm27_vm1, %v429_v49  ;;  %v16975_v44 = vld [vmem:[#allocation2 + $0xa8] sm:$0xff]  ;;  %21330 = vst [vmem:[#allocation28_spill] sm:$0xff] %v16977_v46  ;;  %v16989_v49 = vld [vmem:[#allocation2 + $0x27a] sm:$0xff] }
  0xc0   :  { %21331 = vst [vmem:[#allocation29_spill] sm:$0xff] %v16989_v49  ;;  %v462_v40 = vld [vmem:[#allocation2 + $0x1b8] sm:$0xff] }
  0xc2   :  { %14651 = vmatmul.mubr.msk.f32.gmra.mrb[30].mxu0 %vm27_vm1, %v3866_v48  ;;  %14214 = vmatmul.mubr.msk.f32.vlgmr.msra.gmra.mrb[0].mxu1 %vm27_vm1, %v430_v47  ;;  %v16985_v48 = vld [vmem:[#allocation2 + $0xb0] sm:$0xff]  ;;  %v16991_v47 = vld [vmem:[#allocation2 + $0xc0] sm:$0xff] }
  0xc3   :  { %14653 = vmatprep.mubr.msk.f32.mxu0 %vm27_vm1, %v16870_v51  ;;  %14310 = vmatpush3.msra.mxu1 %v16682_v32  ;;  %v16905_v32 = vld [vmem:[#allocation2 + $0x38] sm:$0xff] }
  0xc4   :  { %14216 = vmatprep.mubr.msk.f32.mxu1 %vm27_vm1, %v431_v57  ;;  %14407 = vmatprep.subr.mxu1 %v16885_v61  ;;  %v16993_v57 = vld [vmem:[#allocation2 + $0x28a] sm:$0xff]  ;;  %v3898_v51 = vld [vmem:[#allocation2 + $0x33a] sm:$0xff] }
  0xc5   :  { %21332 = vst [vmem:[#allocation30_spill] sm:$0xff] %v16993_v57 }
  0xc6   :  { %14654 = vmatmul.mubr.msk.f32.gmra.mrb[32].mxu0 %vm27_vm1, %v16877_v55  ;;  %14217 = vmatmul.mubr.msk.f32.gmra.mrb[2].mxu1 %vm27_vm1, %v432_v63  ;;  %v17001_v63 = vld [vmem:[#allocation2 + $0xc8] sm:$0xff]  ;;  %v3897_v55 = vld [vmem:[#allocation2 + $0x332] sm:$0xff] }
  0xc7   :  { %14656 = vmatprep.mubr.msk.f32.mxu0 %vm27_vm1, %v16879_v59  ;;  %14219 = vmatprep.mubr.msk.f32.mxu1 %vm27_vm1, %v16895_v3  ;;  %v17103_v59 = vld [vmem:[#allocation2 + $0x168] sm:$0xff] }
  0xca   :  { %14657 = vmatmul.mubr.msk.f32.gmra.mrb[34].mxu0 %vm27_vm1, %v16893_v1  ;;  %14220 = vmatmul.mubr.msk.f32.gmra.mrb[4].mxu1 %vm27_vm1, %v16905_v32  ;;  %v17089_v1 = vld [vmem:[#allocation2 + $0x31a] sm:$0xff] }
  0xcb   :  { %14659 = vmatprep.mubr.msk.f32.mxu0 %vm27_vm1, %v16897_v6  ;;  %14222 = vmatprep.mubr.msk.f32.mxu1 %vm27_vm1, %v16911_v10  ;;  %v17087_v6 = vld [vmem:[#allocation2 + $0x150] sm:$0xff]  ;;  %21344 = vst [vmem:[#allocation42_spill] sm:$0xff] %v17089_v1 }
  0xce   :  { %14660 = vmatmul.mubr.msk.f32.gmra.mrb[36].mxu0 %vm27_vm1, %v16909_v8  ;;  %14223 = vmatmul.mubr.msk.f32.gmra.mrb[6].mxu1 %vm27_vm1, %v16921_v14  ;;  %v17073_v8 = vld [vmem:[#allocation2 + $0x302] sm:$0xff] }
  0xcf   :  { %14662 = vmatprep.mubr.msk.f32.mxu0 %vm27_vm1, %v16913_v12  ;;  %14225 = vmatprep.mubr.msk.f32.mxu1 %vm27_vm1, %v16927_v18  ;;  %v17071_v12 = vld [vmem:[#allocation2 + $0x138] sm:$0xff]  ;;  %21342 = vst [vmem:[#allocation40_spill] sm:$0xff] %v17073_v8 }
  0xd2   :  { %14663 = vmatmul.mubr.msk.f32.gmra.mrb[38].mxu0 %vm27_vm1, %v16925_v16  ;;  %14226 = vmatmul.mubr.msk.f32.gmra.mrb[8].mxu1 %vm27_vm1, %v16937_v22  ;;  %v17057_v16 = vld [vmem:[#allocation2 + $0x2ea] sm:$0xff] }
  0xd3   :  { %14665 = vmatprep.mubr.msk.f32.mxu0 %vm27_vm1, %v16929_v20  ;;  %14228 = vmatprep.mubr.msk.f32.mxu1 %vm27_vm1, %v16943_v26  ;;  %v17055_v20 = vld [vmem:[#allocation2 + $0x120] sm:$0xff]  ;;  %21340 = vst [vmem:[#allocation38_spill] sm:$0xff] %v17057_v16 }
  0xd6   :  { %14666 = vmatmul.mubr.msk.f32.gmra.mrb[40].mxu0 %vm27_vm1, %v16941_v24  ;;  %14229 = vmatmul.mubr.msk.f32.gmra.mrb[10].mxu1 %vm27_vm1, %v16953_v30  ;;  %v17041_v24 = vld [vmem:[#allocation2 + $0x2d2] sm:$0xff] }
  0xd7   :  { %14668 = vmatprep.mubr.msk.f32.mxu0 %vm27_vm1, %v16945_v28  ;;  %14231 = vmatprep.mubr.msk.f32.mxu1 %vm27_vm1, %v16959_v35  ;;  %v17039_v28 = vld [vmem:[#allocation2 + $0x108] sm:$0xff]  ;;  %21338 = vst [vmem:[#allocation36_spill] sm:$0xff] %v17041_v24 }
  0xda   :  { %14669 = vmatmul.mubr.msk.f32.gmra.mrb[42].mxu0 %vm27_vm1, %v16957_v33  ;;  %14232 = vmatmul.mubr.msk.f32.gmra.mrb[12].mxu1 %vm27_vm1, %v16969_v39  ;;  %v17025_v33 = vld [vmem:[#allocation2 + $0x2ba] sm:$0xff] }
  0xdb   :  { %14671 = vmatprep.mubr.msk.f32.mxu0 %vm27_vm1, %v16961_v37  ;;  %14234 = vmatprep.mubr.msk.f32.mxu1 %vm27_vm1, %v16975_v44  ;;  %v17023_v37 = vld [vmem:[#allocation2 + $0xf0] sm:$0xff]  ;;  %21336 = vst [vmem:[#allocation34_spill] sm:$0xff] %v17025_v33 }
  0xde   :  { %14672 = vmatmul.mubr.msk.f32.gmra.mrb[44].mxu0 %vm27_vm1, %v16973_v42  ;;  %14235 = vmatmul.mubr.msk.f32.gmra.mrb[14].mxu1 %vm27_vm1, %v16985_v48  ;;  %v17009_v42 = vld [vmem:[#allocation2 + $0x2a2] sm:$0xff] }
  0xdf   :  { %14674 = vmatprep.mubr.msk.f32.mxu0 %vm27_vm1, %v16977_v46  ;;  %14237 = vmatprep.mubr.msk.f32.mxu1 %vm27_vm1, %v16991_v47  ;;  %v17007_v46 = vld [vmem:[#allocation2 + $0xd8] sm:$0xff]  ;;  %21334 = vst [vmem:[#allocation32_spill] sm:$0xff] %v17009_v42 }
  0xe2   :  { %14675 = vmatmul.mubr.msk.f32.gmra.mrb[46].mxu0 %vm27_vm1, %v16989_v49  ;;  %14238 = vmatmul.mubr.msk.f32.gmra.mrb[16].mxu1 %vm27_vm1, %v17001_v63  ;;  %v17017_v49 = vld [vmem:[#allocation2 + $0xe0] sm:$0xff] }
  0xe3   :  { %14677 = vmatprep.mubr.msk.f32.mxu0 %vm27_vm1, %v16993_v57  ;;  %14240 = vmatprep.mubr.msk.f32.mxu1 %vm27_vm1, %v17007_v46  ;;  %v17021_v57 = vld [vmem:[#allocation2 + $0x2aa] sm:$0xff] }
  0xe4   :  { %21335 = vst [vmem:[#allocation33_spill] sm:$0xff] %v17021_v57 }
  0xe6   :  { %14678 = vmatmul.mubr.msk.f32.gmra.mrb[48].mxu0 %vm27_vm1, %v17005_v5  ;;  %14241 = vmatmul.mubr.msk.f32.gmra.mrb[18].mxu1 %vm27_vm1, %v17017_v49  ;;  %v17033_v5 = vld [vmem:[#allocation2 + $0xf8] sm:$0xff] }
  0xe7   :  { %14680 = vmatprep.mubr.msk.f32.mxu0 %vm27_vm1, %v17009_v42  ;;  %14243 = vmatprep.mubr.msk.f32.mxu1 %vm27_vm1, %v17023_v37  ;;  %v17037_v42 = vld [vmem:[#allocation2 + $0x2c2] sm:$0xff] }
  0xe8   :  { %21337 = vst [vmem:[#allocation35_spill] sm:$0xff] %v17037_v42 }
  0xea   :  { %14681 = vmatmul.mubr.msk.f32.gmra.mrb[50].mxu0 %vm27_vm1, %v17021_v57  ;;  %14244 = vmatmul.mubr.msk.f32.gmra.mrb[20].mxu1 %vm27_vm1, %v17033_v5  ;;  %v17049_v57 = vld [vmem:[#allocation2 + $0x110] sm:$0xff] }
  0xeb   :  { %14683 = vmatprep.mubr.msk.f32.mxu0 %vm27_vm1, %v17025_v33  ;;  %14246 = vmatprep.mubr.msk.f32.mxu1 %vm27_vm1, %v17039_v28  ;;  %v17053_v33 = vld [vmem:[#allocation2 + $0x2da] sm:$0xff] }
  0xec   :  { %21339 = vst [vmem:[#allocation37_spill] sm:$0xff] %v17053_v33 }
  0xee   :  { %14684 = vmatmul.mubr.msk.f32.gmra.mrb[52].mxu0 %vm27_vm1, %v17037_v42  ;;  %14247 = vmatmul.mubr.msk.f32.gmra.mrb[22].mxu1 %vm27_vm1, %v17049_v57  ;;  %v17065_v42 = vld [vmem:[#allocation2 + $0x128] sm:$0xff] }
  0xef   :  { %14686 = vmatprep.mubr.msk.f32.mxu0 %vm27_vm1, %v17041_v24  ;;  %14249 = vmatprep.mubr.msk.f32.mxu1 %vm27_vm1, %v17055_v20  ;;  %v17069_v24 = vld [vmem:[#allocation2 + $0x2f2] sm:$0xff] }
  0xf0   :  { %21341 = vst [vmem:[#allocation39_spill] sm:$0xff] %v17069_v24 }
  0xf2   :  { %14687 = vmatmul.mubr.msk.f32.gmra.mrb[54].mxu0 %vm27_vm1, %v17053_v33  ;;  %14250 = vmatmul.mubr.msk.f32.gmra.mrb[24].mxu1 %vm27_vm1, %v17065_v42  ;;  %v17081_v33 = vld [vmem:[#allocation2 + $0x140] sm:$0xff] }
  0xf3   :  { %14689 = vmatprep.mubr.msk.f32.mxu0 %vm27_vm1, %v17057_v16  ;;  %14252 = vmatprep.mubr.msk.f32.mxu1 %vm27_vm1, %v17071_v12  ;;  %v17085_v16 = vld [vmem:[#allocation2 + $0x30a] sm:$0xff] }
  0xf4   :  { %21343 = vst [vmem:[#allocation41_spill] sm:$0xff] %v17085_v16 }
  0xf6   :  { %14690 = vmatmul.mubr.msk.f32.gmra.mrb[56].mxu0 %vm27_vm1, %v17069_v24  ;;  %14253 = vmatmul.mubr.msk.f32.gmra.mrb[26].mxu1 %vm27_vm1, %v17081_v33  ;;  %v17097_v24 = vld [vmem:[#allocation2 + $0x158] sm:$0xff] }
  0xf7   :  { %14692 = vmatprep.mubr.msk.f32.mxu0 %vm27_vm1, %v17073_v8  ;;  %14255 = vmatprep.mubr.msk.f32.mxu1 %vm27_vm1, %v17087_v6  ;;  %v17101_v8 = vld [vmem:[#allocation2 + $0x322] sm:$0xff] }
  0xf8   :  { %21345 = vst [vmem:[#allocation43_spill] sm:$0xff] %v17101_v8 }
  0xfa   :  { %14693 = vmatmul.mubr.msk.f32.gmra.mrb[58].mxu0 %vm27_vm1, %v17085_v16  ;;  %14256 = vmatmul.mubr.msk.f32.gmra.mrb[28].mxu1 %vm27_vm1, %v17097_v24  ;;  %v17111_v16 = vld [vmem:[#allocation2 + $0x170] sm:$0xff] }
  0xfb   :  { %14695 = vmatprep.mubr.msk.f32.mxu0 %vm27_vm1, %v17089_v1  ;;  %14258 = vmatprep.mubr.msk.f32.mxu1 %vm27_vm1, %v17103_v59  ;;  %v461_v1 = vld [vmem:[#allocation2 + $0x1b0] sm:$0xff] }
  0xfe   :  { %14696 = vmatmul.mubr.msk.f32.gmra.mrb[60].mxu0 %vm27_vm1, %v17101_v8  ;;  %14259 = vmatmul.mubr.msk.f32.gmra.mrb[30].mxu1 %vm27_vm1, %v17111_v16  ;;  %v17120_v8 = vld [vmem:[#allocation2 + $0x1c8] sm:$0xff] }
  0xff   :  { %14698 = vmatprep.mubr.msk.f32.mxu0 %vm27_vm1, %v3897_v55  ;;  %14261 = vmatprep.mubr.msk.f32.mxu1 %vm27_vm1, %v461_v1  ;;  %21346 = vst [vmem:[#allocation44_spill] sm:$0xff] %v17120_v8  ;;  %v17126_v55 = vld [vmem:[%s21232_s1 + $0x40] sm:$0xff] }
 0x100   :  { %v17137_v1 = vld [vmem:[#allocation2 + $0x1e0] sm:$0xff] }
 0x102   :  { %14699 = vmatmul.mubr.msk.f32.gmra.mrb[62].mxu0 %vm27_vm1, %v3898_v51  ;;  %14262 = vmatmul.mubr.msk.f32.gmra.mrb[32].mxu1 %vm27_vm1, %v462_v40  ;;  %v17132_v51 = vld [vmem:[#allocation2 + $0x1d0] sm:$0xff]  ;;  %v17146_v40 = vld [vmem:[#allocation2 + $0x1e8] sm:$0xff] }
 0x103   :  { %14703 = vmatprep.mubr.msk.f32.mxu0 %vm27_vm1, %v16895_v3  ;;  %14264 = vmatprep.mubr.msk.f32.mxu1 %vm27_vm1, %v17120_v8  ;;  %21347 = vst [vmem:[#allocation45_spill] sm:$0xff] %v17132_v51  ;;  %v17158_v3 = vld [vmem:[#allocation2 + $0x200] sm:$0xff] }
 0x104   :  { %v1714_v8 = vld [vmem:[#allocation2 + $0x2] sm:$0xff] }
 0x106   :  { %14704 = vmatmul.mubr.msk.f32.vlgmr.msra.gmra.mrb[0].mxu0 %vm27_vm1, %v16905_v32  ;;  %14265 = vmatmul.mubr.msk.f32.gmra.mrb[34].mxu1 %vm27_vm1, %v17132_v51  ;;  %v17162_v32 = vld [vmem:[#allocation2 + $0x210] sm:$0xff]  ;;  %v4574_v51 = vld [vmem:[#allocation2 + $0x1a0] sm:$0xff] }
 0x107   :  { %14800 = vmatpush3.msra.mxu0 %v16732_v52  ;;  %14706 = vmatprep.mubr.msk.f32.mxu0 %vm27_vm1, %v16911_v10  ;;  %v17150_v52 = vld [vmem:[#allocation2 + $0x1f8] sm:$0xff] }
 0x108   :  { %14897 = vmatprep.subr.mxu0 %v17126_v55  ;;  %14267 = vmatprep.mubr.msk.f32.mxu1 %vm27_vm1, %v17137_v1  ;;  %v17170_v10 = vld [vmem:[#allocation2 + $0x218] sm:$0xff] }
 0x10a   :  { %14707 = vmatmul.mubr.msk.f32.gmra.mrb[2].mxu0 %vm27_vm1, %v16921_v14  ;;  %14268 = vmatmul.mubr.msk.f32.gmra.mrb[36].mxu1 %vm27_vm1, %v17146_v40  ;;  %v17174_v14 = vld [vmem:[#allocation2 + $0x228] sm:$0xff] }
 0x10b   :  { %14709 = vmatprep.mubr.msk.f32.mxu0 %vm27_vm1, %v16927_v18  ;;  %14270 = vmatprep.mubr.msk.f32.mxu1 %vm27_vm1, %v17150_v52  ;;  %v17182_v18 = vld [vmem:[#allocation2 + $0x230] sm:$0xff] }
 0x10e   :  { %14710 = vmatmul.mubr.msk.f32.gmra.mrb[4].mxu0 %vm27_vm1, %v16937_v22  ;;  %14271 = vmatmul.mubr.msk.f32.gmra.mrb[38].mxu1 %vm27_vm1, %v17158_v3  ;;  %v17186_v22 = vld [vmem:[#allocation2 + $0x240] sm:$0xff] }
 0x10f   :  { %14712 = vmatprep.mubr.msk.f32.mxu0 %vm27_vm1, %v16943_v26  ;;  %14273 = vmatprep.mubr.msk.f32.mxu1 %vm27_vm1, %v17162_v32  ;;  %v17194_v26 = vld [vmem:[#allocation2 + $0x248] sm:$0xff] }
 0x112   :  { %14713 = vmatmul.mubr.msk.f32.gmra.mrb[6].mxu0 %vm27_vm1, %v16953_v30  ;;  %14274 = vmatmul.mubr.msk.f32.gmra.mrb[40].mxu1 %vm27_vm1, %v17170_v10  ;;  %v17198_v30 = vld [vmem:[#allocation2 + $0x258] sm:$0xff] }
 0x113   :  { %14715 = vmatprep.mubr.msk.f32.mxu0 %vm27_vm1, %v16959_v35  ;;  %14276 = vmatprep.mubr.msk.f32.mxu1 %vm27_vm1, %v17174_v14  ;;  %v17206_v35 = vld [vmem:[#allocation2 + $0x260] sm:$0xff] }
 0x116   :  { %14716 = vmatmul.mubr.msk.f32.gmra.mrb[8].mxu0 %vm27_vm1, %v16969_v39  ;;  %14277 = vmatmul.mubr.msk.f32.gmra.mrb[42].mxu1 %vm27_vm1, %v17182_v18  ;;  %v17210_v39 = vld [vmem:[#allocation2 + $0x270] sm:$0xff] }
 0x117   :  { %14718 = vmatprep.mubr.msk.f32.mxu0 %vm27_vm1, %v16975_v44  ;;  %14279 = vmatprep.mubr.msk.f32.mxu1 %vm27_vm1, %v17186_v22  ;;  %v17218_v44 = vld [vmem:[#allocation2 + $0x278] sm:$0xff] }
 0x11a   :  { %14719 = vmatmul.mubr.msk.f32.gmra.mrb[10].mxu0 %vm27_vm1, %v16985_v48  ;;  %14280 = vmatmul.mubr.msk.f32.gmra.mrb[44].mxu1 %vm27_vm1, %v17194_v26  ;;  %v17222_v48 = vld [vmem:[#allocation2 + $0x288] sm:$0xff] }
 0x11b   :  { %14721 = vmatprep.mubr.msk.f32.mxu0 %vm27_vm1, %v16991_v47  ;;  %14282 = vmatprep.mubr.msk.f32.mxu1 %vm27_vm1, %v17198_v30  ;;  %v17258_v47 = vld [vmem:[#allocation2 + $0x2d0] sm:$0xff] }
 0x11e   :  { %14722 = vmatmul.mubr.msk.f32.gmra.mrb[12].mxu0 %vm27_vm1, %v17001_v63  ;;  %14283 = vmatmul.mubr.msk.f32.gmra.mrb[46].mxu1 %vm27_vm1, %v17206_v35  ;;  %v4573_v63 = vld [vmem:[#allocation2 + $0x198] sm:$0xff] }
 0x11f   :  { %14724 = vmatprep.mubr.msk.f32.mxu0 %vm27_vm1, %v17007_v46  ;;  %14285 = vmatprep.mubr.msk.f32.mxu1 %vm27_vm1, %v17210_v39  ;;  %v17230_v46 = vld [vmem:[#allocation2 + $0x290] sm:$0xff] }
 0x122   :  { %14725 = vmatmul.mubr.msk.f32.gmra.mrb[14].mxu0 %vm27_vm1, %v17017_v49  ;;  %14286 = vmatmul.mubr.msk.f32.gmra.mrb[48].mxu1 %vm27_vm1, %v17218_v44  ;;  %v17234_v49 = vld [vmem:[#allocation2 + $0x2a0] sm:$0xff] }
 0x123   :  { %14727 = vmatprep.mubr.msk.f32.mxu0 %vm27_vm1, %v17023_v37  ;;  %14288 = vmatprep.mubr.msk.f32.mxu1 %vm27_vm1, %v17222_v48  ;;  %v17246_v37 = vld [vmem:[#allocation2 + $0x2b8] sm:$0xff] }
 0x126   :  { %14728 = vmatmul.mubr.msk.f32.gmra.mrb[16].mxu0 %vm27_vm1, %v17033_v5  ;;  %14289 = vmatmul.mubr.msk.f32.gmra.mrb[50].mxu1 %vm27_vm1, %v17230_v46  ;;  %v17242_v5 = vld [vmem:[#allocation2 + $0x2a8] sm:$0xff] }
 0x127   :  { %14730 = vmatprep.mubr.msk.f32.mxu0 %vm27_vm1, %v17039_v28  ;;  %14291 = vmatprep.mubr.msk.f32.mxu1 %vm27_vm1, %v17234_v49  ;;  %v17254_v28 = vld [vmem:[#allocation2 + $0x2c0] sm:$0xff] }
 0x12a   :  { %14731 = vmatmul.mubr.msk.f32.gmra.mrb[18].mxu0 %vm27_vm1, %v17049_v57  ;;  %14292 = vmatmul.mubr.msk.f32.gmra.mrb[52].mxu1 %vm27_vm1, %v17242_v5  ;;  %v17284_v57 = vld [vmem:[#allocation2 + $0x180] sm:$0xff] }
 0x12b   :  { %14733 = vmatprep.mubr.msk.f32.mxu0 %vm27_vm1, %v17055_v20  ;;  %14294 = vmatprep.mubr.msk.f32.mxu1 %vm27_vm1, %v17246_v37  ;;  %v17266_v20 = vld [vmem:[#allocation2 + $0x2d8] sm:$0xff]  ;;  %21348 = vst [vmem:[#allocation46_spill] sm:$0xff] %v17284_v57 }
 0x12e   :  { %14734 = vmatmul.mubr.msk.f32.gmra.mrb[20].mxu0 %vm27_vm1, %v17065_v42  ;;  %14295 = vmatmul.mubr.msk.f32.gmra.mrb[54].mxu1 %vm27_vm1, %v17254_v28  ;;  %v17270_v42 = vld [vmem:[#allocation2 + $0x2e8] sm:$0xff] }
 0x12f   :  { %14736 = vmatprep.mubr.msk.f32.mxu0 %vm27_vm1, %v17071_v12  ;;  %14297 = vmatprep.mubr.msk.f32.mxu1 %vm27_vm1, %v17258_v47  ;;  %v17278_v12 = vld [vmem:[#allocation2 + $0x2f0] sm:$0xff] }
 0x132   :  { %14737 = vmatmul.mubr.msk.f32.gmra.mrb[22].mxu0 %vm27_vm1, %v17081_v33  ;;  %14298 = vmatmul.mubr.msk.f32.gmra.mrb[56].mxu1 %vm27_vm1, %v17266_v20  ;;  %v17282_v33 = vld [vmem:[#allocation2 + $0x300] sm:$0xff] }
 0x133   :  { %14739 = vmatprep.mubr.msk.f32.mxu0 %vm27_vm1, %v17087_v6  ;;  %14300 = vmatprep.mubr.msk.f32.mxu1 %vm27_vm1, %v17270_v42  ;;  %v17292_v6 = vld [vmem:[#allocation2 + $0x308] sm:$0xff] }
 0x136   :  { %14740 = vmatmul.mubr.msk.f32.gmra.mrb[24].mxu0 %vm27_vm1, %v17097_v24  ;;  %14301 = vmatmul.mubr.msk.f32.gmra.mrb[58].mxu1 %vm27_vm1, %v17278_v12  ;;  %v17296_v24 = vld [vmem:[#allocation2 + $0x188] sm:$0xff] }
 0x137   :  { %14742 = vmatprep.mubr.msk.f32.mxu0 %vm27_vm1, %v17103_v59  ;;  %14303 = vmatprep.mubr.msk.f32.mxu1 %vm27_vm1, %v17282_v33  ;;  %v17298_v59 = vld [vmem:[#allocation2 + $0x318] sm:$0xff] }
 0x13a   :  { %14743 = vmatmul.mubr.msk.f32.gmra.mrb[26].mxu0 %vm27_vm1, %v17111_v16  ;;  %14304 = vmatmul.mubr.msk.f32.gmra.mrb[60].mxu1 %vm27_vm1, %v17292_v6  ;;  %v17306_v16 = vld [vmem:[#allocation2 + $0x320] sm:$0xff] }
 0x13b   :  { %14745 = vmatprep.mubr.msk.f32.mxu0 %vm27_vm1, %v17284_v57  ;;  %14306 = vmatprep.mubr.msk.f32.mxu1 %vm27_vm1, %v17298_v59  ;;  %v1715_v57 = vld [vmem:[#allocation2 + $0xa] sm:$0xff] }
 0x13e   :  { %14746 = vmatmul.mubr.msk.f32.gmra.mrb[28].mxu0 %vm27_vm1, %v17296_v24  ;;  %14307 = vmatmul.mubr.msk.f32.gmra.mrb[62].mxu1 %vm27_vm1, %v17306_v16 }
 0x13f   :  { %14748 = vmatprep.mubr.msk.f32.mxu0 %vm27_vm1, %v4573_v63  ;;  %14311 = vmatprep.mubr.msk.f32.mxu1 %vm27_vm1, %v1714_v8  ;;  %v17326_v8 = vld [vmem:[%s21232_s1 + $0x20] sm:$0xff] }
 0x140   :  { %v21361_v63 = vld [vmem:[#allocation25_spill] sm:$0xff] }
 0x142   :  { %14749 = vmatmul.mubr.msk.f32.gmra.mrb[30].mxu0 %vm27_vm1, %v4574_v51  ;;  %14312 = vmatmul.mubr.msk.f32.vlgmr.msra.gmra.mrb[0].mxu1 %vm27_vm1, %v1715_v57  ;;  %v5263_v51 = vld [vmem:[#allocation2 + $0xc9] sm:$0xff]  ;;  %v5264_v57 = vld [vmem:[#allocation2 + $0xd9] sm:$0xff] }
 0x143   :  { %14751 = vmatprep.mubr.msk.f32.mxu0 %vm27_vm1, %v17137_v1  ;;  %14408 = vmatpush3.msra.mxu1 %v16885_v61  ;;  %v21359_v61 = vld [vmem:[#allocation23_spill] sm:$0xff] }
 0x144   :  { %14314 = vmatprep.mubr.msk.f32.mxu1 %vm27_vm1, %v16701_v41  ;;  %15342 = vmatprep.subr.mxu1 %v17326_v8  ;;  %v17425_v41 = vld [vmem:[#allocation2 + $0x330] sm:$0xff] }
 0x146   :  { %14752 = vmatmul.mubr.msk.f32.gmra.mrb[32].mxu0 %vm27_vm1, %v17146_v40  ;;  %14315 = vmatmul.mubr.msk.f32.gmra.mrb[2].mxu1 %vm27_vm1, %v16708_v43  ;;  %v17435_v43 = vld [vmem:[#allocation2 + $0x338] sm:$0xff] }
 0x147   :  { %14754 = vmatprep.mubr.msk.f32.mxu0 %vm27_vm1, %v17150_v52  ;;  %14317 = vmatprep.mubr.msk.f32.mxu1 %vm27_vm1, %v16710_v45  ;;  %v4605_v45 = vld [vmem:[#allocation2 + $0x348] sm:$0xff] }
 0x14a   :  { %14755 = vmatmul.mubr.msk.f32.gmra.mrb[34].mxu0 %vm27_vm1, %v17158_v3  ;;  %14318 = vmatmul.mubr.msk.f32.gmra.mrb[4].mxu1 %vm27_vm1, %v16725_v50  ;;  %v4606_v50 = vld [vmem:[#allocation2 + $0x350] sm:$0xff] }
 0x14b   :  { %14757 = vmatprep.mubr.msk.f32.mxu0 %vm27_vm1, %v17162_v32  ;;  %14320 = vmatprep.mubr.msk.f32.mxu1 %vm27_vm1, %v16734_v53  ;;  %v1746_v53 = vld [vmem:[#allocation2 + $0x1b2] sm:$0xff] }
 0x14e   :  { %14758 = vmatmul.mubr.msk.f32.gmra.mrb[36].mxu0 %vm27_vm1, %v17170_v10  ;;  %14321 = vmatmul.mubr.msk.f32.gmra.mrb[6].mxu1 %vm27_vm1, %v16743_v54  ;;  %v5250_v54 = vld [vmem:[#allocation2 + $0x31] sm:$0xff] }
 0x14f   :  { %14760 = vmatprep.mubr.msk.f32.mxu0 %vm27_vm1, %v17174_v14  ;;  %14323 = vmatprep.mubr.msk.f32.mxu1 %vm27_vm1, %v16745_v56  ;;  %v21349_v56 = vld [vmem:[#allocation13_spill] sm:$0xff] }
 0x152   :  { %14761 = vmatmul.mubr.msk.f32.gmra.mrb[38].mxu0 %vm27_vm1, %v17182_v18  ;;  %14324 = vmatmul.mubr.msk.f32.gmra.mrb[8].mxu1 %vm27_vm1, %v16753_v58  ;;  %v1747_v58 = vld [vmem:[#allocation2 + $0x1ba] sm:$0xff] }
 0x153   :  { %14763 = vmatprep.mubr.msk.f32.mxu0 %vm27_vm1, %v17186_v22  ;;  %14326 = vmatprep.mubr.msk.f32.mxu1 %vm27_vm1, %v16755_v60  ;;  %v5251_v60 = vld [vmem:[#allocation2 + $0x39] sm:$0xff] }
 0x156   :  { %14764 = vmatmul.mubr.msk.f32.gmra.mrb[40].mxu0 %vm27_vm1, %v17194_v26  ;;  %14327 = vmatmul.mubr.msk.f32.gmra.mrb[10].mxu1 %vm27_vm1, %v16763_v62  ;;  %v5252_v62 = vld [vmem:[#allocation2 + $0x49] sm:$0xff] }
 0x157   :  { %14766 = vmatprep.mubr.msk.f32.mxu0 %vm27_vm1, %v17198_v30  ;;  %14329 = vmatprep.mubr.msk.f32.mxu1 %vm27_vm1, %v16765_v0  ;;  %v21350_v0 = vld [vmem:[#allocation14_spill] sm:$0xff] }
 0x15a   :  { %14767 = vmatmul.mubr.msk.f32.gmra.mrb[42].mxu0 %vm27_vm1, %v17206_v35  ;;  %14330 = vmatmul.mubr.msk.f32.gmra.mrb[12].mxu1 %vm27_vm1, %v16773_v2  ;;  %v5253_v2 = vld [vmem:[#allocation2 + $0x51] sm:$0xff] }
 0x15b   :  { %14769 = vmatprep.mubr.msk.f32.mxu0 %vm27_vm1, %v17210_v39  ;;  %14332 = vmatprep.mubr.msk.f32.mxu1 %vm27_vm1, %v16775_v4  ;;  %v5254_v4 = vld [vmem:[#allocation2 + $0x61] sm:$0xff] }
 0x15e   :  { %14770 = vmatmul.mubr.msk.f32.gmra.mrb[44].mxu0 %vm27_vm1, %v17218_v44  ;;  %14333 = vmatmul.mubr.msk.f32.gmra.mrb[14].mxu1 %vm27_vm1, %v16783_v7  ;;  %v21351_v7 = vld [vmem:[#allocation15_spill] sm:$0xff] }
 0x15f   :  { %14772 = vmatprep.mubr.msk.f32.mxu0 %vm27_vm1, %v17222_v48  ;;  %14335 = vmatprep.mubr.msk.f32.mxu1 %vm27_vm1, %v16785_v9  ;;  %v21352_v9 = vld [vmem:[#allocation16_spill] sm:$0xff] }
 0x162   :  { %14773 = vmatmul.mubr.msk.f32.gmra.mrb[46].mxu0 %vm27_vm1, %v17230_v46  ;;  %14336 = vmatmul.mubr.msk.f32.gmra.mrb[16].mxu1 %vm27_vm1, %v16793_v11  ;;  %v5255_v11 = vld [vmem:[#allocation2 + $0x69] sm:$0xff] }
 0x163   :  { %14775 = vmatprep.mubr.msk.f32.mxu0 %vm27_vm1, %v17234_v49  ;;  %14338 = vmatprep.mubr.msk.f32.mxu1 %vm27_vm1, %v16795_v13  ;;  %v5256_v13 = vld [vmem:[#allocation2 + $0x79] sm:$0xff] }
 0x166   :  { %14776 = vmatmul.mubr.msk.f32.gmra.mrb[48].mxu0 %vm27_vm1, %v17242_v5  ;;  %14339 = vmatmul.mubr.msk.f32.gmra.mrb[18].mxu1 %vm27_vm1, %v16803_v15  ;;  %v21353_v15 = vld [vmem:[#allocation17_spill] sm:$0xff] }
 0x167   :  { %14778 = vmatprep.mubr.msk.f32.mxu0 %vm27_vm1, %v17246_v37  ;;  %14341 = vmatprep.mubr.msk.f32.mxu1 %vm27_vm1, %v16805_v17  ;;  %v21354_v17 = vld [vmem:[#allocation18_spill] sm:$0xff] }
 0x16a   :  { %14779 = vmatmul.mubr.msk.f32.gmra.mrb[50].mxu0 %vm27_vm1, %v17254_v28  ;;  %14342 = vmatmul.mubr.msk.f32.gmra.mrb[20].mxu1 %vm27_vm1, %v16813_v19  ;;  %v5257_v19 = vld [vmem:[#allocation2 + $0x81] sm:$0xff] }
 0x16b   :  { %14781 = vmatprep.mubr.msk.f32.mxu0 %vm27_vm1, %v17258_v47  ;;  %14344 = vmatprep.mubr.msk.f32.mxu1 %vm27_vm1, %v16815_v21  ;;  %v5258_v21 = vld [vmem:[#allocation2 + $0x91] sm:$0xff] }
 0x16e   :  { %14782 = vmatmul.mubr.msk.f32.gmra.mrb[52].mxu0 %vm27_vm1, %v17266_v20  ;;  %14345 = vmatmul.mubr.msk.f32.gmra.mrb[22].mxu1 %vm27_vm1, %v16823_v23  ;;  %v21355_v23 = vld [vmem:[#allocation19_spill] sm:$0xff] }
 0x16f   :  { %14784 = vmatprep.mubr.msk.f32.mxu0 %vm27_vm1, %v17270_v42  ;;  %14347 = vmatprep.mubr.msk.f32.mxu1 %vm27_vm1, %v16825_v25  ;;  %v21356_v25 = vld [vmem:[#allocation20_spill] sm:$0xff] }
 0x172   :  { %14785 = vmatmul.mubr.msk.f32.gmra.mrb[54].mxu0 %vm27_vm1, %v17278_v12  ;;  %14348 = vmatmul.mubr.msk.f32.gmra.mrb[24].mxu1 %vm27_vm1, %v16833_v27  ;;  %v5259_v27 = vld [vmem:[#allocation2 + $0x99] sm:$0xff] }
 0x173   :  { %14787 = vmatprep.mubr.msk.f32.mxu0 %vm27_vm1, %v17282_v33  ;;  %14350 = vmatprep.mubr.msk.f32.mxu1 %vm27_vm1, %v16835_v29  ;;  %v5260_v29 = vld [vmem:[#allocation2 + $0xa9] sm:$0xff] }
 0x176   :  { %14788 = vmatmul.mubr.msk.f32.gmra.mrb[56].mxu0 %vm27_vm1, %v17292_v6  ;;  %14351 = vmatmul.mubr.msk.f32.gmra.mrb[26].mxu1 %vm27_vm1, %v16843_v31  ;;  %v21357_v31 = vld [vmem:[#allocation21_spill] sm:$0xff] }
 0x177   :  { %14790 = vmatprep.mubr.msk.f32.mxu0 %vm27_vm1, %v17298_v59  ;;  %14353 = vmatprep.mubr.msk.f32.mxu1 %vm27_vm1, %v16845_v34  ;;  %v21358_v34 = vld [vmem:[#allocation22_spill] sm:$0xff] }
 0x17a   :  { %14791 = vmatmul.mubr.msk.f32.gmra.mrb[58].mxu0 %vm27_vm1, %v17306_v16  ;;  %14354 = vmatmul.mubr.msk.f32.gmra.mrb[28].mxu1 %vm27_vm1, %v16853_v36  ;;  %v5261_v36 = vld [vmem:[#allocation2 + $0xb1] sm:$0xff] }
 0x17b   :  { %14793 = vmatprep.mubr.msk.f32.mxu0 %vm27_vm1, %v17425_v41  ;;  %14356 = vmatprep.mubr.msk.f32.mxu1 %vm27_vm1, %v16855_v38  ;;  %v5262_v38 = vld [vmem:[#allocation2 + $0xc1] sm:$0xff] }
 0x17e   :  { %14794 = vmatmul.mubr.msk.f32.gmra.mrb[60].mxu0 %vm27_vm1, %v17435_v43  ;;  %14357 = vmatmul.mubr.msk.f32.gmra.mrb[30].mxu1 %vm27_vm1, %v21349_v56  ;;  %v21364_v56 = vld [vmem:[#allocation28_spill] sm:$0xff] }
 0x17f   :  { %14796 = vmatprep.mubr.msk.f32.mxu0 %vm27_vm1, %v4605_v45  ;;  %14359 = vmatprep.mubr.msk.f32.mxu1 %vm27_vm1, %v1746_v53  ;;  %v21362_v45 = vld [vmem:[#allocation26_spill] sm:$0xff] }
 0x180   :  { %v5266_v53 = vld [vmem:[#allocation2 + $0xf1] sm:$0xff] }
 0x182   :  { %14797 = vmatmul.mubr.msk.f32.gmra.mrb[62].mxu0 %vm27_vm1, %v4606_v50  ;;  %14360 = vmatmul.mubr.msk.f32.gmra.mrb[32].mxu1 %vm27_vm1, %v1747_v58  ;;  %v5265_v50 = vld [vmem:[#allocation2 + $0xe1] sm:$0xff]  ;;  %v5267_v58 = vld [vmem:[#allocation2 + $0xf9] sm:$0xff] }
 0x183   :  { %14801 = vmatprep.mubr.msk.f32.mxu0 %vm27_vm1, %v5250_v54  ;;  %14362 = vmatprep.mubr.msk.f32.mxu1 %vm27_vm1, %v21350_v0  ;;  %v21363_v54 = vld [vmem:[#allocation27_spill] sm:$0xff]  ;;  %v21366_v0 = vld [vmem:[#allocation30_spill] sm:$0xff] }
 0x186   :  { %14802 = vmatmul.mubr.msk.f32.vlgmr.msra.gmra.mrb[0].mxu0 %vm27_vm1, %v5251_v60  ;;  %14363 = vmatmul.mubr.msk.f32.gmra.mrb[34].mxu1 %vm27_vm1, %v21351_v7  ;;  %v5268_v60 = vld [vmem:[#allocation2 + $0x109] sm:$0xff]  ;;  %v21367_v7 = vld [vmem:[#allocation31_spill] sm:$0xff] }
 0x187   :  { %14898 = vmatpush3.msra.mxu0 %v17126_v55  ;;  %14804 = vmatprep.mubr.msk.f32.mxu0 %vm27_vm1, %v5252_v62  ;;  %v21360_v55 = vld [vmem:[#allocation24_spill] sm:$0xff]  ;;  %v21365_v62 = vld [vmem:[#allocation29_spill] sm:$0xff] }
 0x188   :  { %14365 = vmatprep.mubr.msk.f32.mxu1 %vm27_vm1, %v21352_v9  ;;  %v21368_v9 = vld [vmem:[#allocation32_spill] sm:$0xff] }
 0x18a   :  { %14805 = vmatmul.mubr.msk.f32.gmra.mrb[2].mxu0 %vm27_vm1, %v5253_v2  ;;  %14366 = vmatmul.mubr.msk.f32.gmra.mrb[36].mxu1 %vm27_vm1, %v21353_v15  ;;  %v5269_v2 = vld [vmem:[#allocation2 + $0x111] sm:$0xff]  ;;  %v21369_v15 = vld [vmem:[#allocation33_spill] sm:$0xff] }
 0x18b   :  { %14807 = vmatprep.mubr.msk.f32.mxu0 %vm27_vm1, %v5254_v4  ;;  %14368 = vmatprep.mubr.msk.f32.mxu1 %vm27_vm1, %v21354_v17  ;;  %v5270_v4 = vld [vmem:[#allocation2 + $0x121] sm:$0xff]  ;;  %v21370_v17 = vld [vmem:[#allocation34_spill] sm:$0xff] }
 0x18e   :  { %14808 = vmatmul.mubr.msk.f32.gmra.mrb[4].mxu0 %vm27_vm1, %v5255_v11  ;;  %14369 = vmatmul.mubr.msk.f32.gmra.mrb[38].mxu1 %vm27_vm1, %v21355_v23  ;;  %v5271_v11 = vld [vmem:[#allocation2 + $0x129] sm:$0xff]  ;;  %v21371_v23 = vld [vmem:[#allocation35_spill] sm:$0xff] }
 0x18f   :  { %14810 = vmatprep.mubr.msk.f32.mxu0 %vm27_vm1, %v5256_v13  ;;  %14371 = vmatprep.mubr.msk.f32.mxu1 %vm27_vm1, %v21356_v25  ;;  %v5272_v13 = vld [vmem:[#allocation2 + $0x139] sm:$0xff] }
 0x190   :  { %v21372_v25 = vld [vmem:[#allocation36_spill] sm:$0xff] }
 0x192   :  { %14811 = vmatmul.mubr.msk.f32.gmra.mrb[6].mxu0 %vm27_vm1, %v5257_v19  ;;  %14372 = vmatmul.mubr.msk.f32.gmra.mrb[40].mxu1 %vm27_vm1, %v21357_v31  ;;  %v5273_v19 = vld [vmem:[#allocation2 + $0x141] sm:$0xff] }
 0x193   :  { %14813 = vmatprep.mubr.msk.f32.mxu0 %vm27_vm1, %v5258_v21  ;;  %14374 = vmatprep.mubr.msk.f32.mxu1 %vm27_vm1, %v21358_v34  ;;  %v5274_v21 = vld [vmem:[#allocation2 + $0x151] sm:$0xff]  ;;  %v21373_v31 = vld [vmem:[#allocation37_spill] sm:$0xff] }
 0x194   :  { %v21374_v34 = vld [vmem:[#allocation38_spill] sm:$0xff] }
 0x196   :  { %14814 = vmatmul.mubr.msk.f32.gmra.mrb[8].mxu0 %vm27_vm1, %v5259_v27  ;;  %14375 = vmatmul.mubr.msk.f32.gmra.mrb[42].mxu1 %vm27_vm1, %v21359_v61  ;;  %v5275_v27 = vld [vmem:[#allocation2 + $0x159] sm:$0xff] }
 0x197   :  { %14816 = vmatprep.mubr.msk.f32.mxu0 %vm27_vm1, %v5260_v29  ;;  %14377 = vmatprep.mubr.msk.f32.mxu1 %vm27_vm1, %v21360_v55  ;;  %v5276_v29 = vld [vmem:[#allocation2 + $0x169] sm:$0xff]  ;;  %v21375_v61 = vld [vmem:[#allocation39_spill] sm:$0xff]  ;;  %v21376_v55 = vld [vmem:[#allocation40_spill] sm:$0xff] }
 0x19a   :  { %14817 = vmatmul.mubr.msk.f32.gmra.mrb[10].mxu0 %vm27_vm1, %v5261_v36  ;;  %14378 = vmatmul.mubr.msk.f32.gmra.mrb[44].mxu1 %vm27_vm1, %v21361_v63  ;;  %v5277_v36 = vld [vmem:[#allocation2 + $0x171] sm:$0xff]  ;;  %v21377_v63 = vld [vmem:[#allocation41_spill] sm:$0xff] }
 0x19b   :  { %14819 = vmatprep.mubr.msk.f32.mxu0 %vm27_vm1, %v5262_v38  ;;  %14380 = vmatprep.mubr.msk.f32.mxu1 %vm27_vm1, %v21362_v45  ;;  %v5278_v38 = vld [vmem:[#allocation2 + $0x181] sm:$0xff]  ;;  %v21378_v45 = vld [vmem:[#allocation42_spill] sm:$0xff] }
 0x19e   :  { %14820 = vmatmul.mubr.msk.f32.gmra.mrb[12].mxu0 %vm27_vm1, %v5263_v51  ;;  %14381 = vmatmul.mubr.msk.f32.gmra.mrb[46].mxu1 %vm27_vm1, %v21363_v54  ;;  %v5279_v51 = vld [vmem:[#allocation2 + $0x189] sm:$0xff]  ;;  %v17539_v54 = vld [vmem:[#allocation2 + $0x1e1] sm:$0xff] }
 0x19f   :  { %14822 = vmatprep.mubr.msk.f32.mxu0 %vm27_vm1, %v5264_v57  ;;  %14383 = vmatprep.mubr.msk.f32.mxu1 %vm27_vm1, %v21364_v56  ;;  %v5280_v57 = vld [vmem:[#allocation2 + $0x199] sm:$0xff] }
 0x1a0   :  { %v21379_v56 = vld [vmem:[#allocation43_spill] sm:$0xff] }
 0x1a2   :  { %14823 = vmatmul.mubr.msk.f32.gmra.mrb[14].mxu0 %vm27_vm1, %v5265_v50  ;;  %14384 = vmatmul.mubr.msk.f32.gmra.mrb[48].mxu1 %vm27_vm1, %v21365_v62  ;;  %v5281_v50 = vld [vmem:[#allocation2 + $0x1a1] sm:$0xff]  ;;  %v2423_v62 = vld [vmem:[#allocation2 + $0x30] sm:$0xff] }
 0x1a3   :  { %14825 = vmatprep.mubr.msk.f32.mxu0 %vm27_vm1, %v5266_v53  ;;  %14386 = vmatprep.mubr.msk.f32.mxu1 %vm27_vm1, %v21366_v0  ;;  %v2421_v53 = vld [vmem:[#allocation2 + $0x18] sm:$0xff] }
 0x1a4   :  { %v17549_v0 = vld [vmem:[#allocation2 + $0x1f9] sm:$0xff] }
 0x1a6   :  { %14826 = vmatmul.mubr.msk.f32.gmra.mrb[16].mxu0 %vm27_vm1, %v5267_v58  ;;  %14387 = vmatmul.mubr.msk.f32.gmra.mrb[50].mxu1 %vm27_vm1, %v21367_v7  ;;  %v2422_v58 = vld [vmem:[#allocation2 + $0x20] sm:$0xff]  ;;  %v2425_v7 = vld [vmem:[#allocation2 + $0x48] sm:$0xff] }
 0x1a7   :  { %14828 = vmatprep.mubr.msk.f32.mxu0 %vm27_vm1, %v5268_v60  ;;  %14389 = vmatprep.mubr.msk.f32.mxu1 %vm27_vm1, %v21368_v9  ;;  %v17547_v60 = vld [vmem:[#allocation2 + $0x1e9] sm:$0xff]  ;;  %v17560_v9 = vld [vmem:[#allocation2 + $0x211] sm:$0xff] }
 0x1aa   :  { %14829 = vmatmul.mubr.msk.f32.gmra.mrb[18].mxu0 %vm27_vm1, %v5269_v2  ;;  %14390 = vmatmul.mubr.msk.f32.gmra.mrb[52].mxu1 %vm27_vm1, %v21369_v15  ;;  %v2424_v2 = vld [vmem:[#allocation2 + $0x38] sm:$0xff]  ;;  %v17570_v15 = vld [vmem:[#allocation2 + $0x229] sm:$0xff] }
 0x1ab   :  { %14831 = vmatprep.mubr.msk.f32.mxu0 %vm27_vm1, %v5270_v4  ;;  %14392 = vmatprep.mubr.msk.f32.mxu1 %vm27_vm1, %v21370_v17  ;;  %v17558_v4 = vld [vmem:[#allocation2 + $0x201] sm:$0xff] }
 0x1ac   :  { %v2428_v17 = vld [vmem:[#allocation2 + $0x68] sm:$0xff] }
 0x1ae   :  { %14832 = vmatmul.mubr.msk.f32.gmra.mrb[20].mxu0 %vm27_vm1, %v5271_v11  ;;  %14393 = vmatmul.mubr.msk.f32.gmra.mrb[54].mxu1 %vm27_vm1, %v21371_v23  ;;  %v17568_v11 = vld [vmem:[#allocation2 + $0x219] sm:$0xff]  ;;  %v17580_v23 = vld [vmem:[#allocation2 + $0x241] sm:$0xff] }
 0x1af   :  { %14834 = vmatprep.mubr.msk.f32.mxu0 %vm27_vm1, %v5272_v13  ;;  %14395 = vmatprep.mubr.msk.f32.mxu1 %vm27_vm1, %v21372_v25  ;;  %v2427_v13 = vld [vmem:[#allocation2 + $0x60] sm:$0xff] }
 0x1b0   :  { %v2430_v25 = vld [vmem:[#allocation2 + $0x80] sm:$0xff] }
 0x1b2   :  { %14835 = vmatmul.mubr.msk.f32.gmra.mrb[22].mxu0 %vm27_vm1, %v5273_v19  ;;  %14396 = vmatmul.mubr.msk.f32.gmra.mrb[56].mxu1 %vm27_vm1, %v21373_v31  ;;  %v17578_v19 = vld [vmem:[#allocation2 + $0x231] sm:$0xff]  ;;  %v17590_v31 = vld [vmem:[#allocation2 + $0x259] sm:$0xff] }
 0x1b3   :  { %14837 = vmatprep.mubr.msk.f32.mxu0 %vm27_vm1, %v5274_v21  ;;  %14398 = vmatprep.mubr.msk.f32.mxu1 %vm27_vm1, %v21374_v34  ;;  %v2429_v21 = vld [vmem:[#allocation2 + $0x78] sm:$0xff] }
 0x1b4   :  { %v2432_v34 = vld [vmem:[#allocation2 + $0x98] sm:$0xff] }
 0x1b6   :  { %14838 = vmatmul.mubr.msk.f32.gmra.mrb[24].mxu0 %vm27_vm1, %v5275_v27  ;;  %14399 = vmatmul.mubr.msk.f32.gmra.mrb[58].mxu1 %vm27_vm1, %v21375_v61  ;;  %v17588_v27 = vld [vmem:[#allocation2 + $0x249] sm:$0xff]  ;;  %v17600_v61 = vld [vmem:[#allocation2 + $0x271] sm:$0xff] }
 0x1b7   :  { %14840 = vmatprep.mubr.msk.f32.mxu0 %vm27_vm1, %v5276_v29  ;;  %14401 = vmatprep.mubr.msk.f32.mxu1 %vm27_vm1, %v21376_v55  ;;  %v2431_v29 = vld [vmem:[#allocation2 + $0x90] sm:$0xff] }
 0x1b8   :  { %v2434_v55 = vld [vmem:[#allocation2 + $0xb0] sm:$0xff] }
 0x1ba   :  { %14841 = vmatmul.mubr.msk.f32.gmra.mrb[26].mxu0 %vm27_vm1, %v5277_v36  ;;  %14402 = vmatmul.mubr.msk.f32.gmra.mrb[60].mxu1 %vm27_vm1, %v21377_v63  ;;  %v17598_v36 = vld [vmem:[#allocation2 + $0x261] sm:$0xff]  ;;  %v17610_v63 = vld [vmem:[#allocation2 + $0x289] sm:$0xff] }
 0x1bb   :  { %14843 = vmatprep.mubr.msk.f32.mxu0 %vm27_vm1, %v5278_v38  ;;  %14404 = vmatprep.mubr.msk.f32.mxu1 %vm27_vm1, %v21378_v45  ;;  %v2433_v38 = vld [vmem:[#allocation2 + $0xa8] sm:$0xff] }
 0x1bc   :  { %v2436_v45 = vld [vmem:[#allocation2 + $0xc8] sm:$0xff] }
 0x1be   :  { %14844 = vmatmul.mubr.msk.f32.gmra.mrb[28].mxu0 %vm27_vm1, %v5279_v51  ;;  %14405 = vmatmul.mubr.msk.f32.gmra.mrb[62].mxu1 %vm27_vm1, %v21379_v56  ;;  %v17608_v51 = vld [vmem:[#allocation2 + $0x279] sm:$0xff]  ;;  %v17620_v56 = vld [vmem:[#allocation2 + $0x2a1] sm:$0xff] }
 0x1bf   :  { %14846 = vmatprep.mubr.msk.f32.mxu0 %vm27_vm1, %v5280_v57  ;;  %14409 = vmatprep.mubr.msk.f32.mxu1 %vm27_vm1, %v2421_v53  ;;  %v2435_v57 = vld [vmem:[#allocation2 + $0xc0] sm:$0xff]  ;;  %v2437_v53 = vld [vmem:[#allocation2 + $0xd8] sm:$0xff] }
 0x1c2   :  { %14847 = vmatmul.mubr.msk.f32.gmra.mrb[30].mxu0 %vm27_vm1, %v5281_v50  ;;  %14410 = vmatmul.mubr.msk.f32.vlgmr.msra.gmra.mrb[0].mxu1 %vm27_vm1, %v2422_v58  ;;  %v17618_v50 = vld [vmem:[#allocation2 + $0x291] sm:$0xff]  ;;  %v2438_v58 = vld [vmem:[#allocation2 + $0xe0] sm:$0xff] }
 0x1c3   :  { %14849 = vmatprep.mubr.msk.f32.mxu0 %vm27_vm1, %v17539_v54  ;;  %15343 = vmatpush3.msra.mxu1 %v17326_v8  ;;  %v2426_v8 = vld [vmem:[#allocation2 + $0x50] sm:$0xff] }
 0x1c4   :  { %14412 = vmatprep.mubr.msk.f32.mxu1 %vm27_vm1, %v2423_v62  ;;  %v17628_v62 = vld [vmem:[#allocation2 + $0x2a9] sm:$0xff] }
 0x1c6   :  { %14850 = vmatmul.mubr.msk.f32.gmra.mrb[32].mxu0 %vm27_vm1, %v17547_v60  ;;  %14413 = vmatmul.mubr.msk.f32.gmra.mrb[2].mxu1 %vm27_vm1, %v2424_v2  ;;  %v2439_v2 = vld [vmem:[#allocation2 + $0xf0] sm:$0xff] }
 0x1c7   :  { %14852 = vmatprep.mubr.msk.f32.mxu0 %vm27_vm1, %v17549_v0  ;;  %14415 = vmatprep.mubr.msk.f32.mxu1 %vm27_vm1, %v2425_v7  ;;  %v17630_v7 = vld [vmem:[#allocation2 + $0x2b9] sm:$0xff] }
 0x1ca   :  { %14853 = vmatmul.mubr.msk.f32.gmra.mrb[34].mxu0 %vm27_vm1, %v17558_v4  ;;  %14416 = vmatmul.mubr.msk.f32.gmra.mrb[4].mxu1 %vm27_vm1, %v2426_v8  ;;  %v2440_v8 = vld [vmem:[#allocation2 + $0xf8] sm:$0xff] }
 0x1cb   :  { %14855 = vmatprep.mubr.msk.f32.mxu0 %vm27_vm1, %v17560_v9  ;;  %14418 = vmatprep.mubr.msk.f32.mxu1 %vm27_vm1, %v2427_v13  ;;  %v17638_v13 = vld [vmem:[#allocation2 + $0x2c1] sm:$0xff] }
 0x1ce   :  { %14856 = vmatmul.mubr.msk.f32.gmra.mrb[36].mxu0 %vm27_vm1, %v17568_v11  ;;  %14419 = vmatmul.mubr.msk.f32.gmra.mrb[6].mxu1 %vm27_vm1, %v2428_v17  ;;  %v2441_v17 = vld [vmem:[#allocation2 + $0x108] sm:$0xff] }
 0x1cf   :  { %14858 = vmatprep.mubr.msk.f32.mxu0 %vm27_vm1, %v17570_v15  ;;  %14421 = vmatprep.mubr.msk.f32.mxu1 %vm27_vm1, %v2429_v21  ;;  %v17640_v21 = vld [vmem:[#allocation2 + $0x2d1] sm:$0xff] }
 0x1d2   :  { %14859 = vmatmul.mubr.msk.f32.gmra.mrb[38].mxu0 %vm27_vm1, %v17578_v19  ;;  %14422 = vmatmul.mubr.msk.f32.gmra.mrb[8].mxu1 %vm27_vm1, %v2430_v25  ;;  %v2442_v25 = vld [vmem:[#allocation2 + $0x110] sm:$0xff] }
 0x1d3   :  { %14861 = vmatprep.mubr.msk.f32.mxu0 %vm27_vm1, %v17580_v23  ;;  %14424 = vmatprep.mubr.msk.f32.mxu1 %vm27_vm1, %v2431_v29  ;;  %v17648_v29 = vld [vmem:[#allocation2 + $0x2d9] sm:$0xff] }
 0x1d6   :  { %14862 = vmatmul.mubr.msk.f32.gmra.mrb[40].mxu0 %vm27_vm1, %v17588_v27  ;;  %14425 = vmatmul.mubr.msk.f32.gmra.mrb[10].mxu1 %vm27_vm1, %v2432_v34  ;;  %v2443_v34 = vld [vmem:[#allocation2 + $0x120] sm:$0xff] }
 0x1d7   :  { %14864 = vmatprep.mubr.msk.f32.mxu0 %vm27_vm1, %v17590_v31  ;;  %14427 = vmatprep.mubr.msk.f32.mxu1 %vm27_vm1, %v2433_v38  ;;  %v17650_v38 = vld [vmem:[#allocation2 + $0x2e9] sm:$0xff] }
 0x1da   :  { %14865 = vmatmul.mubr.msk.f32.gmra.mrb[42].mxu0 %vm27_vm1, %v17598_v36  ;;  %14428 = vmatmul.mubr.msk.f32.gmra.mrb[12].mxu1 %vm27_vm1, %v2434_v55  ;;  %v2444_v55 = vld [vmem:[#allocation2 + $0x128] sm:$0xff] }
 0x1db   :  { %14867 = vmatprep.mubr.msk.f32.mxu0 %vm27_vm1, %v17600_v61  ;;  %14430 = vmatprep.mubr.msk.f32.mxu1 %vm27_vm1, %v2435_v57  ;;  %v17658_v57 = vld [vmem:[#allocation2 + $0x2f1] sm:$0xff] }
 0x1de   :  { %14868 = vmatmul.mubr.msk.f32.gmra.mrb[44].mxu0 %vm27_vm1, %v17608_v51  ;;  %14431 = vmatmul.mubr.msk.f32.gmra.mrb[14].mxu1 %vm27_vm1, %v2436_v45  ;;  %v2445_v45 = vld [vmem:[#allocation2 + $0x138] sm:$0xff] }
 0x1df   :  { %14870 = vmatprep.mubr.msk.f32.mxu0 %vm27_vm1, %v17610_v63  ;;  %14433 = vmatprep.mubr.msk.f32.mxu1 %vm27_vm1, %v2437_v53  ;;  %v17660_v53 = vld [vmem:[#allocation2 + $0x301] sm:$0xff] }
 0x1e2   :  { %14871 = vmatmul.mubr.msk.f32.gmra.mrb[46].mxu0 %vm27_vm1, %v17618_v50  ;;  %14434 = vmatmul.mubr.msk.f32.gmra.mrb[16].mxu1 %vm27_vm1, %v2438_v58  ;;  %v2446_v58 = vld [vmem:[#allocation2 + $0x140] sm:$0xff] }
 0x1e3   :  { %14873 = vmatprep.mubr.msk.f32.mxu0 %vm27_vm1, %v17620_v56  ;;  %14436 = vmatprep.mubr.msk.f32.mxu1 %vm27_vm1, %v2439_v2  ;;  %v17668_v2 = vld [vmem:[#allocation2 + $0x309] sm:$0xff] }
 0x1e4   :  { %21380 = vst [vmem:[#allocation13_spill] sm:$0xff] %v17668_v2 }
 0x1e6   :  { %14874 = vmatmul.mubr.msk.f32.gmra.mrb[48].mxu0 %vm27_vm1, %v17628_v62  ;;  %14437 = vmatmul.mubr.msk.f32.gmra.mrb[18].mxu1 %vm27_vm1, %v2440_v8  ;;  %v2447_v8 = vld [vmem:[#allocation2 + $0x150] sm:$0xff] }
 0x1e7   :  { %14876 = vmatprep.mubr.msk.f32.mxu0 %vm27_vm1, %v17630_v7  ;;  %14439 = vmatprep.mubr.msk.f32.mxu1 %vm27_vm1, %v2441_v17  ;;  %v17670_v17 = vld [vmem:[#allocation2 + $0x319] sm:$0xff] }
 0x1e8   :  { %21381 = vst [vmem:[#allocation14_spill] sm:$0xff] %v17670_v17 }
 0x1ea   :  { %14877 = vmatmul.mubr.msk.f32.gmra.mrb[50].mxu0 %vm27_vm1, %v17638_v13  ;;  %14440 = vmatmul.mubr.msk.f32.gmra.mrb[20].mxu1 %vm27_vm1, %v2442_v25  ;;  %v2448_v25 = vld [vmem:[#allocation2 + $0x158] sm:$0xff] }
 0x1eb   :  { %14879 = vmatprep.mubr.msk.f32.mxu0 %vm27_vm1, %v17640_v21  ;;  %14442 = vmatprep.mubr.msk.f32.mxu1 %vm27_vm1, %v2443_v34  ;;  %v17678_v34 = vld [vmem:[#allocation2 + $0x321] sm:$0xff] }
 0x1ec   :  { %21382 = vst [vmem:[#allocation15_spill] sm:$0xff] %v17678_v34 }
 0x1ee   :  { %14880 = vmatmul.mubr.msk.f32.gmra.mrb[52].mxu0 %vm27_vm1, %v17648_v29  ;;  %14443 = vmatmul.mubr.msk.f32.gmra.mrb[22].mxu1 %vm27_vm1, %v2444_v55  ;;  %v2449_v55 = vld [vmem:[#allocation2 + $0x168] sm:$0xff] }
 0x1ef   :  { %14882 = vmatprep.mubr.msk.f32.mxu0 %vm27_vm1, %v17650_v38  ;;  %14445 = vmatprep.mubr.msk.f32.mxu1 %vm27_vm1, %v2445_v45  ;;  %v17680_v45 = vld [vmem:[#allocation2 + $0x331] sm:$0xff] }
 0x1f0   :  { %21383 = vst [vmem:[#allocation16_spill] sm:$0xff] %v17680_v45 }
 0x1f2   :  { %14883 = vmatmul.mubr.msk.f32.gmra.mrb[54].mxu0 %vm27_vm1, %v17658_v57  ;;  %14446 = vmatmul.mubr.msk.f32.gmra.mrb[24].mxu1 %vm27_vm1, %v2446_v58  ;;  %v2450_v58 = vld [vmem:[#allocation2 + $0x170] sm:$0xff] }
 0x1f3   :  { %14885 = vmatprep.mubr.msk.f32.mxu0 %vm27_vm1, %v17660_v53  ;;  %14448 = vmatprep.mubr.msk.f32.mxu1 %vm27_vm1, %v2447_v8  ;;  %v17688_v8 = vld [vmem:[#allocation2 + $0x339] sm:$0xff] }
 0x1f4   :  { %21384 = vst [vmem:[#allocation17_spill] sm:$0xff] %v17688_v8 }
 0x1f6   :  { %14886 = vmatmul.mubr.msk.f32.gmra.mrb[56].mxu0 %vm27_vm1, %v17668_v2  ;;  %14449 = vmatmul.mubr.msk.f32.gmra.mrb[26].mxu1 %vm27_vm1, %v2448_v25  ;;  %v5312_v2 = vld [vmem:[#allocation2 + $0x349] sm:$0xff]  ;;  %v5313_v25 = vld [vmem:[#allocation2 + $0x351] sm:$0xff] }
 0x1f7   :  { %14888 = vmatprep.mubr.msk.f32.mxu0 %vm27_vm1, %v17670_v17  ;;  %14451 = vmatprep.mubr.msk.f32.mxu1 %vm27_vm1, %v2449_v55  ;;  %v21385_v17 = vld [vmem:[#allocation46_spill] sm:$0xff]  ;;  %v21386_v55 = vld [vmem:[#allocation44_spill] sm:$0xff] }
 0x1fa   :  { %14889 = vmatmul.mubr.msk.f32.gmra.mrb[58].mxu0 %vm27_vm1, %v17678_v34  ;;  %14452 = vmatmul.mubr.msk.f32.gmra.mrb[28].mxu1 %vm27_vm1, %v2450_v58  ;;  %v5957_v34 = vld [vmem:[#allocation2 + $0x32] sm:$0xff]  ;;  %v5958_v58 = vld [vmem:[#allocation2 + $0x3a] sm:$0xff] }
 0x1fb   :  { %14891 = vmatprep.mubr.msk.f32.mxu0 %vm27_vm1, %v17680_v45  ;;  %14454 = vmatprep.mubr.msk.f32.mxu1 %vm27_vm1, %v21385_v17  ;;  %v5959_v45 = vld [vmem:[#allocation2 + $0x4a] sm:$0xff] }
 0x1fc   :  { %v5962_v17 = vld [vmem:[#allocation2 + $0x6a] sm:$0xff] }
 0x1fe   :  { %14892 = vmatmul.mubr.msk.f32.gmra.mrb[60].mxu0 %vm27_vm1, %v17688_v8  ;;  %14455 = vmatmul.mubr.msk.f32.gmra.mrb[30].mxu1 %vm27_vm1, %v17296_v24  ;;  %v21387_v8 = vld [vmem:[#allocation45_spill] sm:$0xff]  ;;  %v5960_v24 = vld [vmem:[#allocation2 + $0x52] sm:$0xff] }
 0x1ff   :  { %14894 = vmatprep.mubr.msk.f32.mxu0 %vm27_vm1, %v5312_v2  ;;  %14457 = vmatprep.mubr.msk.f32.mxu1 %vm27_vm1, %v21386_v55  ;;  %v5961_v2 = vld [vmem:[#allocation2 + $0x62] sm:$0xff]  ;;  %v5995_v55 = vld [vmem:[#allocation2 + $0x22a] sm:$0xff] }
 0x202   :  { %14895 = vmatmul.mubr.msk.f32.gmra.mrb[62].mxu0 %vm27_vm1, %v5313_v25  ;;  %14458 = vmatmul.mubr.msk.f32.gmra.mrb[32].mxu1 %vm27_vm1, %v21387_v8  ;;  %v5991_v8 = vld [vmem:[#allocation2 + $0x1fa] sm:$0xff] }
 0x203   :  { %14899 = vmatprep.mubr.msk.f32.mxu0 %vm27_vm1, %v5957_v34  ;;  %14460 = vmatprep.mubr.msk.f32.mxu1 %vm27_vm1, %v17137_v1  ;;  %v5963_v34 = vld [vmem:[#allocation2 + $0x7a] sm:$0xff]  ;;  %v5964_v1 = vld [vmem:[#allocation2 + $0x82] sm:$0xff] }
 0x204   :  { %v5994_v25 = vld [vmem:[#allocation2 + $0x21a] sm:$0xff] }
 0x206   :  { %14900 = vmatmul.mubr.msk.f32.vlgmr.msra.gmra.mrb[0].mxu0 %vm27_vm1, %v5958_v58  ;;  %14461 = vmatmul.mubr.msk.f32.gmra.mrb[34].mxu1 %vm27_vm1, %v17146_v40  ;;  %v5965_v40 = vld [vmem:[#allocation2 + $0x92] sm:$0xff]  ;;  %v6005_v58 = vld [vmem:[#allocation2 + $0x2a2] sm:$0xff] }
 0x207   :  { %14902 = vmatprep.mubr.msk.f32.mxu0 %vm27_vm1, %v5959_v45  ;;  %14463 = vmatprep.mubr.msk.f32.mxu1 %vm27_vm1, %v17150_v52  ;;  %v5966_v52 = vld [vmem:[#allocation2 + $0x9a] sm:$0xff]  ;;  %v5989_v45 = vld [vmem:[#allocation2 + $0x1e2] sm:$0xff] }
 0x20a   :  { %14903 = vmatmul.mubr.msk.f32.gmra.mrb[2].mxu0 %vm27_vm1, %v5960_v24  ;;  %14464 = vmatmul.mubr.msk.f32.gmra.mrb[36].mxu1 %vm27_vm1, %v17158_v3  ;;  %v5967_v3 = vld [vmem:[#allocation2 + $0xaa] sm:$0xff]  ;;  %v21389_v24 = vld [vmem:[#allocation13_spill] sm:$0xff] }
 0x20b   :  { %14905 = vmatprep.mubr.msk.f32.mxu0 %vm27_vm1, %v5961_v2  ;;  %14466 = vmatprep.mubr.msk.f32.mxu1 %vm27_vm1, %v17162_v32  ;;  %v5968_v32 = vld [vmem:[#allocation2 + $0xb2] sm:$0xff]  ;;  %v6019_v2 = vld [vmem:[#allocation2 + $0x34a] sm:$0xff] }
 0x20e   :  { %14906 = vmatmul.mubr.msk.f32.gmra.mrb[4].mxu0 %vm27_vm1, %v5962_v17  ;;  %14467 = vmatmul.mubr.msk.f32.gmra.mrb[38].mxu1 %vm27_vm1, %v17170_v10  ;;  %v5969_v10 = vld [vmem:[#allocation2 + $0xc2] sm:$0xff]  ;;  %v21391_v17 = vld [vmem:[#allocation15_spill] sm:$0xff] }
 0x20f   :  { %14908 = vmatprep.mubr.msk.f32.mxu0 %vm27_vm1, %v5963_v34  ;;  %14469 = vmatprep.mubr.msk.f32.mxu1 %vm27_vm1, %v17174_v14  ;;  %v5970_v14 = vld [vmem:[#allocation2 + $0xca] sm:$0xff]  ;;  %v6020_v34 = vld [vmem:[#allocation2 + $0x352] sm:$0xff] }
 0x212   :  { %14909 = vmatmul.mubr.msk.f32.gmra.mrb[6].mxu0 %vm27_vm1, %v5964_v1  ;;  %14470 = vmatmul.mubr.msk.f32.gmra.mrb[40].mxu1 %vm27_vm1, %v17182_v18  ;;  %v5971_v18 = vld [vmem:[#allocation2 + $0xda] sm:$0xff]  ;;  %v21393_v1 = vld [vmem:[#allocation17_spill] sm:$0xff] }
 0x213   :  { %14911 = vmatprep.mubr.msk.f32.mxu0 %vm27_vm1, %v5965_v40  ;;  %14472 = vmatprep.mubr.msk.f32.mxu1 %vm27_vm1, %v17186_v22  ;;  %v5972_v22 = vld [vmem:[#allocation2 + $0xe2] sm:$0xff] }
 0x216   :  { %14912 = vmatmul.mubr.msk.f32.gmra.mrb[8].mxu0 %vm27_vm1, %v5966_v52  ;;  %14473 = vmatmul.mubr.msk.f32.gmra.mrb[42].mxu1 %vm27_vm1, %v17194_v26  ;;  %v5973_v26 = vld [vmem:[#allocation2 + $0xf2] sm:$0xff] }
 0x217   :  { %14914 = vmatprep.mubr.msk.f32.mxu0 %vm27_vm1, %v5967_v3  ;;  %14475 = vmatprep.mubr.msk.f32.mxu1 %vm27_vm1, %v17198_v30  ;;  %v5974_v30 = vld [vmem:[#allocation2 + $0xfa] sm:$0xff] }
 0x21a   :  { %14915 = vmatmul.mubr.msk.f32.gmra.mrb[10].mxu0 %vm27_vm1, %v5968_v32  ;;  %14476 = vmatmul.mubr.msk.f32.gmra.mrb[44].mxu1 %vm27_vm1, %v17206_v35  ;;  %v5975_v35 = vld [vmem:[#allocation2 + $0x10a] sm:$0xff] }
 0x21b   :  { %14917 = vmatprep.mubr.msk.f32.mxu0 %vm27_vm1, %v5969_v10  ;;  %14478 = vmatprep.mubr.msk.f32.mxu1 %vm27_vm1, %v17210_v39  ;;  %v5976_v39 = vld [vmem:[#allocation2 + $0x112] sm:$0xff] }
 0x21e   :  { %14918 = vmatmul.mubr.msk.f32.gmra.mrb[12].mxu0 %vm27_vm1, %v5970_v14  ;;  %14479 = vmatmul.mubr.msk.f32.gmra.mrb[46].mxu1 %vm27_vm1, %v17218_v44  ;;  %v5977_v44 = vld [vmem:[#allocation2 + $0x122] sm:$0xff] }
 0x21f   :  { %14920 = vmatprep.mubr.msk.f32.mxu0 %vm27_vm1, %v5971_v18  ;;  %14481 = vmatprep.mubr.msk.f32.mxu1 %vm27_vm1, %v17222_v48  ;;  %v5978_v48 = vld [vmem:[#allocation2 + $0x12a] sm:$0xff] }
 0x222   :  { %14921 = vmatmul.mubr.msk.f32.gmra.mrb[14].mxu0 %vm27_vm1, %v5972_v22  ;;  %14482 = vmatmul.mubr.msk.f32.gmra.mrb[48].mxu1 %vm27_vm1, %v17230_v46  ;;  %v5979_v46 = vld [vmem:[#allocation2 + $0x13a] sm:$0xff] }
 0x223   :  { %14923 = vmatprep.mubr.msk.f32.mxu0 %vm27_vm1, %v5973_v26  ;;  %14484 = vmatprep.mubr.msk.f32.mxu1 %vm27_vm1, %v17234_v49  ;;  %v5980_v49 = vld [vmem:[#allocation2 + $0x142] sm:$0xff] }
 0x226   :  { %14924 = vmatmul.mubr.msk.f32.gmra.mrb[16].mxu0 %vm27_vm1, %v5974_v30  ;;  %14485 = vmatmul.mubr.msk.f32.gmra.mrb[50].mxu1 %vm27_vm1, %v17242_v5  ;;  %v5981_v5 = vld [vmem:[#allocation2 + $0x152] sm:$0xff] }
 0x227   :  { %14926 = vmatprep.mubr.msk.f32.mxu0 %vm27_vm1, %v5975_v35  ;;  %14487 = vmatprep.mubr.msk.f32.mxu1 %vm27_vm1, %v17246_v37  ;;  %v5982_v37 = vld [vmem:[#allocation2 + $0x15a] sm:$0xff] }
 0x22a   :  { %14927 = vmatmul.mubr.msk.f32.gmra.mrb[18].mxu0 %vm27_vm1, %v5976_v39  ;;  %14488 = vmatmul.mubr.msk.f32.gmra.mrb[52].mxu1 %vm27_vm1, %v17254_v28  ;;  %v5983_v28 = vld [vmem:[#allocation2 + $0x16a] sm:$0xff] }
 0x22b   :  { %14929 = vmatprep.mubr.msk.f32.mxu0 %vm27_vm1, %v5977_v44  ;;  %14490 = vmatprep.mubr.msk.f32.mxu1 %vm27_vm1, %v17258_v47  ;;  %v5984_v47 = vld [vmem:[#allocation2 + $0x172] sm:$0xff] }
 0x22e   :  { %14930 = vmatmul.mubr.msk.f32.gmra.mrb[20].mxu0 %vm27_vm1, %v5978_v48  ;;  %14491 = vmatmul.mubr.msk.f32.gmra.mrb[54].mxu1 %vm27_vm1, %v17266_v20  ;;  %v5985_v20 = vld [vmem:[#allocation2 + $0x182] sm:$0xff] }
 0x22f   :  { %14932 = vmatprep.mubr.msk.f32.mxu0 %vm27_vm1, %v5979_v46  ;;  %14493 = vmatprep.mubr.msk.f32.mxu1 %vm27_vm1, %v17270_v42  ;;  %v5986_v42 = vld [vmem:[#allocation2 + $0x18a] sm:$0xff] }
 0x232   :  { %14933 = vmatmul.mubr.msk.f32.gmra.mrb[22].mxu0 %vm27_vm1, %v5980_v49  ;;  %14494 = vmatmul.mubr.msk.f32.gmra.mrb[56].mxu1 %vm27_vm1, %v17278_v12  ;;  %v5987_v12 = vld [vmem:[#allocation2 + $0x19a] sm:$0xff] }
 0x233   :  { %14935 = vmatprep.mubr.msk.f32.mxu0 %vm27_vm1, %v5981_v5  ;;  %14496 = vmatprep.mubr.msk.f32.mxu1 %vm27_vm1, %v17282_v33  ;;  %v5988_v33 = vld [vmem:[#allocation2 + $0x1a2] sm:$0xff] }
 0x236   :  { %14936 = vmatmul.mubr.msk.f32.gmra.mrb[24].mxu0 %vm27_vm1, %v5982_v37  ;;  %14497 = vmatmul.mubr.msk.f32.gmra.mrb[58].mxu1 %vm27_vm1, %v17292_v6  ;;  %v3160_v6 = vld [vmem:[#allocation2 + $0x1c9] sm:$0xff] }
 0x237   :  { %14938 = vmatprep.mubr.msk.f32.mxu0 %vm27_vm1, %v5983_v28  ;;  %14499 = vmatprep.mubr.msk.f32.mxu1 %vm27_vm1, %v17298_v59  ;;  %v3161_v59 = vld [vmem:[#allocation2 + $0x1d1] sm:$0xff] }
 0x23a   :  { %14939 = vmatmul.mubr.msk.f32.gmra.mrb[26].mxu0 %vm27_vm1, %v5984_v47  ;;  %14500 = vmatmul.mubr.msk.f32.gmra.mrb[60].mxu1 %vm27_vm1, %v17306_v16  ;;  %v5990_v16 = vld [vmem:[#allocation2 + $0x1ea] sm:$0xff] }
 0x23b   :  { %14941 = vmatprep.mubr.msk.f32.mxu0 %vm27_vm1, %v5985_v20  ;;  %14502 = vmatprep.mubr.msk.f32.mxu1 %vm27_vm1, %v17425_v41  ;;  %v5992_v41 = vld [vmem:[#allocation2 + $0x202] sm:$0xff] }
 0x23e   :  { %14942 = vmatmul.mubr.msk.f32.gmra.mrb[28].mxu0 %vm27_vm1, %v5986_v42  ;;  %14503 = vmatmul.mubr.msk.f32.gmra.mrb[62].mxu1 %vm27_vm1, %v17435_v43  ;;  %v5993_v43 = vld [vmem:[#allocation2 + $0x212] sm:$0xff] }
 0x23f   :  { %14944 = vmatprep.mubr.msk.f32.mxu0 %vm27_vm1, %v5987_v12  ;;  %14555 = vmatprep.mubr.msk.f32.mxu1 %vm27_vm1, %v3160_v6 }
 0x242   :  { %14945 = vmatmul.mubr.msk.f32.gmra.mrb[30].mxu0 %vm27_vm1, %v5988_v33  ;;  %14556 = vmatmul.mubr.msk.f32.vlgmr.msra.gmra.mrb[32].mxu1 %vm27_vm1, %v3161_v59 }
 0x243   :  { %14947 = vmatprep.mubr.msk.f32.mxu0 %vm27_vm1, %v5989_v45  ;;  %14558 = vmatprep.mubr.msk.f32.mxu1 %vm27_vm1, %v17539_v54  ;;  %v5996_v54 = vld [vmem:[#allocation2 + $0x232] sm:$0xff] }
 0x246   :  { %14948 = vmatmul.mubr.msk.f32.gmra.mrb[32].mxu0 %vm27_vm1, %v5990_v16  ;;  %14559 = vmatmul.mubr.msk.f32.gmra.mrb[34].mxu1 %vm27_vm1, %v17547_v60  ;;  %v5997_v60 = vld [vmem:[#allocation2 + $0x242] sm:$0xff] }
 0x247   :  { %14950 = vmatprep.mubr.msk.f32.mxu0 %vm27_vm1, %v5991_v8  ;;  %14561 = vmatprep.mubr.msk.f32.mxu1 %vm27_vm1, %v17549_v0  ;;  %v5998_v0 = vld [vmem:[#allocation2 + $0x24a] sm:$0xff] }
 0x24a   :  { %14951 = vmatmul.mubr.msk.f32.gmra.mrb[34].mxu0 %vm27_vm1, %v5992_v41  ;;  %14562 = vmatmul.mubr.msk.f32.gmra.mrb[36].mxu1 %vm27_vm1, %v17558_v4  ;;  %v17820_v4 = vld [vmem:[#allocation2 + $0x25a] sm:$0xff] }
 0x24b   :  { %14953 = vmatprep.mubr.msk.f32.mxu0 %vm27_vm1, %v5993_v43  ;;  %14564 = vmatprep.mubr.msk.f32.mxu1 %vm27_vm1, %v17560_v9  ;;  %v21388_v9 = vmov 0.0  }
 0x24c   :  { %143 = vst.msk [vmem:[#allocation3 + $0x20] sm:$0xff] %vm137_vm3, %v21388_v9  ;;  %138 = vst.msk [vmem:[#allocation3] sm:$0xff] %vm137_vm3, %v21388_v9 }
 0x24d   :  { %144 = vst.msk [vmem:[#allocation3 + $0x28] sm:$0x3] %vm140_vm4, %v21388_v9  ;;  %141 = vst.msk [vmem:[#allocation3 + $0x10] sm:$0x3] %vm140_vm4, %v21388_v9 }
 0x24e   :  { %14954 = vmatmul.mubr.msk.f32.gmra.mrb[36].mxu0 %vm27_vm1, %v5994_v25  ;;  %14565 = vmatmul.mubr.msk.f32.gmra.mrb[38].mxu1 %vm27_vm1, %v17568_v11  ;;  %139 = vst.msk [vmem:[#allocation3 + $0x8] sm:$0xff] %vm137_vm3, %v21388_v9  ;;  %142 = vst.msk [vmem:[#allocation3 + $0x18] sm:$0xff] %vm137_vm3, %v21388_v9  ;;  %v6000_v11 = vld [vmem:[#allocation2 + $0x262] sm:$0xff] }
 0x24f   :  { %14956 = vmatprep.mubr.msk.f32.mxu0 %vm27_vm1, %v5995_v55  ;;  %14567 = vmatprep.mubr.msk.f32.mxu1 %vm27_vm1, %v17570_v15  ;;  %145 = vst.msk [vmem:[#allocation3 + $0x30] sm:$0xff] %vm137_vm3, %v21388_v9  ;;  %146 = vst.msk [vmem:[#allocation3 + $0x38] sm:$0xff] %vm137_vm3, %v21388_v9  ;;  %v6001_v15 = vld [vmem:[#allocation2 + $0x272] sm:$0xff] }
 0x250   :  { %147 = vst.msk [vmem:[#allocation3 + $0x40] sm:$0x3] %vm140_vm4, %v21388_v9  ;;  %150 = vst.msk [vmem:[#allocation3 + $0x58] sm:$0x3] %vm140_vm4, %v21388_v9 }
 0x251   :  { %148 = vst.msk [vmem:[#allocation3 + $0x48] sm:$0xff] %vm137_vm3, %v21388_v9  ;;  %149 = vst.msk [vmem:[#allocation3 + $0x50] sm:$0xff] %vm137_vm3, %v21388_v9 }
 0x252   :  { %14957 = vmatmul.mubr.msk.f32.gmra.mrb[38].mxu0 %vm27_vm1, %v5996_v54  ;;  %14568 = vmatmul.mubr.msk.f32.gmra.mrb[40].mxu1 %vm27_vm1, %v17578_v19  ;;  %151 = vst.msk [vmem:[#allocation3 + $0x60] sm:$0xff] %vm137_vm3, %v21388_v9  ;;  %152 = vst.msk [vmem:[#allocation3 + $0x68] sm:$0xff] %vm137_vm3, %v21388_v9  ;;  %v6002_v19 = vld [vmem:[#allocation2 + $0x27a] sm:$0xff] }
 0x253   :  { %14959 = vmatprep.mubr.msk.f32.mxu0 %vm27_vm1, %v5997_v60  ;;  %14570 = vmatprep.mubr.msk.f32.mxu1 %vm27_vm1, %v17580_v23  ;;  %153 = vst.msk [vmem:[#allocation3 + $0x70] sm:$0x3] %vm140_vm4, %v21388_v9  ;;  %156 = vst.msk [vmem:[#allocation3 + $0x88] sm:$0x3] %vm140_vm4, %v21388_v9  ;;  %v6003_v23 = vld [vmem:[#allocation2 + $0x28a] sm:$0xff]  ;;  %v18231_v54 = vld [vmem:[%s21233_s2] sm:$0xff] }
 0x254   :  { %154 = vst.msk [vmem:[#allocation3 + $0x78] sm:$0xff] %vm137_vm3, %v21388_v9  ;;  %155 = vst.msk [vmem:[#allocation3 + $0x80] sm:$0xff] %vm137_vm3, %v21388_v9  ;;  %v18236_v60 = vld [vmem:[%s21233_s2 + $0x8] sm:$0xff] }
 0x255   :  { %157 = vst.msk [vmem:[#allocation3 + $0x90] sm:$0xff] %vm137_vm3, %v21388_v9  ;;  %158 = vst.msk [vmem:[#allocation3 + $0x98] sm:$0xff] %vm137_vm3, %v21388_v9 }
 0x256   :  { %14960 = vmatmul.mubr.msk.f32.gmra.mrb[40].mxu0 %vm27_vm1, %v5998_v0  ;;  %159 = vst.msk [vmem:[#allocation3 + $0xa0] sm:$0x3] %vm140_vm4, %v21388_v9  ;;  %162 = vst.msk [vmem:[#allocation3 + $0xb8] sm:$0x3] %vm140_vm4, %v21388_v9  ;;  %14571 = vmatmul.mubr.msk.f32.gmra.mrb[42].mxu1 %vm27_vm1, %v17588_v27  ;;  %v6004_v27 = vld [vmem:[#allocation2 + $0x292] sm:$0xff] }
 0x257   :  { %160 = vst.msk [vmem:[#allocation3 + $0xa8] sm:$0xff] %vm137_vm3, %v21388_v9  ;;  %161 = vst.msk [vmem:[#allocation3 + $0xb0] sm:$0xff] %vm137_vm3, %v21388_v9  ;;  %14962 = vmatprep.mubr.msk.f32.mxu0 %vm27_vm1, %v17820_v4  ;;  %14573 = vmatprep.mubr.msk.f32.mxu1 %vm27_vm1, %v17590_v31  ;;  %v6006_v31 = vld [vmem:[#allocation2 + $0x2aa] sm:$0xff] }
 0x258   :  { %163 = vst.msk [vmem:[#allocation3 + $0xc0] sm:$0xff] %vm137_vm3, %v21388_v9  ;;  %164 = vst.msk [vmem:[#allocation3 + $0xc8] sm:$0xff] %vm137_vm3, %v21388_v9  ;;  %v18241_v0 = vld [vmem:[%s21233_s2 + $0x10] sm:$0xff] }
 0x259   :  { %165 = vst.msk [vmem:[#allocation3 + $0xd0] sm:$0x3] %vm140_vm4, %v21388_v9  ;;  %168 = vst.msk [vmem:[#allocation3 + $0xe8] sm:$0x3] %vm140_vm4, %v21388_v9 }
 0x25a   :  { %166 = vst.msk [vmem:[#allocation3 + $0xd8] sm:$0xff] %vm137_vm3, %v21388_v9  ;;  %167 = vst.msk [vmem:[#allocation3 + $0xe0] sm:$0xff] %vm137_vm3, %v21388_v9  ;;  %14963 = vmatmul.mubr.msk.f32.gmra.mrb[42].mxu0 %vm27_vm1, %v6000_v11  ;;  %14574 = vmatmul.mubr.msk.f32.gmra.mrb[44].mxu1 %vm27_vm1, %v17598_v36  ;;  %v6007_v36 = vld [vmem:[#allocation2 + $0x2ba] sm:$0xff] }
 0x25b   :  { %169 = vst.msk [vmem:[#allocation3 + $0xf0] sm:$0xff] %vm137_vm3, %v21388_v9  ;;  %170 = vst.msk [vmem:[#allocation3 + $0xf8] sm:$0xff] %vm137_vm3, %v21388_v9  ;;  %14965 = vmatprep.mubr.msk.f32.mxu0 %vm27_vm1, %v6001_v15  ;;  %14576 = vmatprep.mubr.msk.f32.mxu1 %vm27_vm1, %v17600_v61  ;;  %v6008_v61 = vld [vmem:[#allocation2 + $0x2c2] sm:$0xff]  ;;  %v18246_v11 = vld [vmem:[%s21233_s2 + $0x18] sm:$0xff] }
 0x25c   :  { %171 = vst.msk [vmem:[#allocation3 + $0x100] sm:$0x3] %vm140_vm4, %v21388_v9  ;;  %174 = vst.msk [vmem:[#allocation3 + $0x118] sm:$0x3] %vm140_vm4, %v21388_v9  ;;  %v18251_v15 = vld [vmem:[%s21233_s2 + $0x20] sm:$0xff] }
 0x25d   :  { %172 = vst.msk [vmem:[#allocation3 + $0x108] sm:$0xff] %vm137_vm3, %v21388_v9  ;;  %173 = vst.msk [vmem:[#allocation3 + $0x110] sm:$0xff] %vm137_vm3, %v21388_v9 }
 0x25e   :  { %175 = vst.msk [vmem:[#allocation3 + $0x120] sm:$0xff] %vm137_vm3, %v21388_v9  ;;  %176 = vst.msk [vmem:[#allocation3 + $0x128] sm:$0xff] %vm137_vm3, %v21388_v9  ;;  %14966 = vmatmul.mubr.msk.f32.gmra.mrb[44].mxu0 %vm27_vm1, %v6002_v19  ;;  %14577 = vmatmul.mubr.msk.f32.gmra.mrb[46].mxu1 %vm27_vm1, %v17608_v51  ;;  %v6009_v51 = vld [vmem:[#allocation2 + $0x2d2] sm:$0xff]  ;;  %v18256_v19 = vld [vmem:[%s21233_s2 + $0x28] sm:$0xff] }
 0x25f   :  { %177 = vst.msk [vmem:[#allocation3 + $0x130] sm:$0x3] %vm140_vm4, %v21388_v9  ;;  %180 = vst.msk [vmem:[#allocation3 + $0x148] sm:$0x3] %vm140_vm4, %v21388_v9  ;;  %14968 = vmatprep.mubr.msk.f32.mxu0 %vm27_vm1, %v6003_v23  ;;  %14579 = vmatprep.mubr.msk.f32.mxu1 %vm27_vm1, %v17610_v63  ;;  %v6010_v63 = vld [vmem:[#allocation2 + $0x2da] sm:$0xff] }
 0x260   :  { %178 = vst.msk [vmem:[#allocation3 + $0x138] sm:$0xff] %vm137_vm3, %v21388_v9  ;;  %179 = vst.msk [vmem:[#allocation3 + $0x140] sm:$0xff] %vm137_vm3, %v21388_v9 }
 0x261   :  { %181 = vst.msk [vmem:[#allocation3 + $0x150] sm:$0xff] %vm137_vm3, %v21388_v9  ;;  %182 = vst.msk [vmem:[#allocation3 + $0x158] sm:$0xff] %vm137_vm3, %v21388_v9 }
 0x262   :  { %183 = vst.msk [vmem:[#allocation3 + $0x160] sm:$0x3] %vm140_vm4, %v21388_v9  ;;  %186 = vst.msk [vmem:[#allocation3 + $0x178] sm:$0x3] %vm140_vm4, %v21388_v9  ;;  %14969 = vmatmul.mubr.msk.f32.gmra.mrb[46].mxu0 %vm27_vm1, %v6004_v27  ;;  %14580 = vmatmul.mubr.msk.f32.gmra.mrb[48].mxu1 %vm27_vm1, %v17618_v50  ;;  %v6011_v50 = vld [vmem:[#allocation2 + $0x2ea] sm:$0xff] }
 0x263   :  { %184 = vst.msk [vmem:[#allocation3 + $0x168] sm:$0xff] %vm137_vm3, %v21388_v9  ;;  %185 = vst.msk [vmem:[#allocation3 + $0x170] sm:$0xff] %vm137_vm3, %v21388_v9  ;;  %14971 = vmatprep.mubr.msk.f32.mxu0 %vm27_vm1, %v6005_v58  ;;  %14582 = vmatprep.mubr.msk.f32.mxu1 %vm27_vm1, %v17620_v56  ;;  %v6012_v56 = vld [vmem:[#allocation2 + $0x2f2] sm:$0xff] }
 0x264   :  { %187 = vst.msk [vmem:[#allocation3 + $0x180] sm:$0xff] %vm137_vm3, %v21388_v9  ;;  %188 = vst.msk [vmem:[#allocation3 + $0x188] sm:$0xff] %vm137_vm3, %v21388_v9  ;;  %v18261_v27 = vld [vmem:[%s21233_s2 + $0x30] sm:$0xff]  ;;  %v18266_v58 = vld [vmem:[%s21233_s2 + $0x38] sm:$0xff] }
 0x265   :  { %189 = vst.msk [vmem:[#allocation3 + $0x190] sm:$0x3] %vm140_vm4, %v21388_v9  ;;  %192 = vst.msk [vmem:[#allocation3 + $0x1a8] sm:$0x3] %vm140_vm4, %v21388_v9 }
 0x266   :  { %190 = vst.msk [vmem:[#allocation3 + $0x198] sm:$0xff] %vm137_vm3, %v21388_v9  ;;  %191 = vst.msk [vmem:[#allocation3 + $0x1a0] sm:$0xff] %vm137_vm3, %v21388_v9  ;;  %14972 = vmatmul.mubr.msk.f32.gmra.mrb[48].mxu0 %vm27_vm1, %v6006_v31  ;;  %14583 = vmatmul.mubr.msk.f32.gmra.mrb[50].mxu1 %vm27_vm1, %v17628_v62  ;;  %v6013_v62 = vld [vmem:[#allocation2 + $0x302] sm:$0xff] }
 0x267   :  { %193 = vst.msk [vmem:[#allocation3 + $0x1b0] sm:$0xff] %vm137_vm3, %v21388_v9  ;;  %194 = vst.msk [vmem:[#allocation3 + $0x1b8] sm:$0xff] %vm137_vm3, %v21388_v9  ;;  %14974 = vmatprep.mubr.msk.f32.mxu0 %vm27_vm1, %v6007_v36  ;;  %14585 = vmatprep.mubr.msk.f32.mxu1 %vm27_vm1, %v17630_v7  ;;  %v6014_v7 = vld [vmem:[#allocation2 + $0x30a] sm:$0xff] }
 0x268   :  { %195 = vst.msk [vmem:[#allocation3 + $0x1c0] sm:$0x3] %vm140_vm4, %v21388_v9  ;;  %198 = vst.msk [vmem:[#allocation3 + $0x1d8] sm:$0x3] %vm140_vm4, %v21388_v9 }
 0x269   :  { %196 = vst.msk [vmem:[#allocation3 + $0x1c8] sm:$0xff] %vm137_vm3, %v21388_v9  ;;  %197 = vst.msk [vmem:[#allocation3 + $0x1d0] sm:$0xff] %vm137_vm3, %v21388_v9 }
 0x26a   :  { %199 = vst.msk [vmem:[#allocation3 + $0x1e0] sm:$0xff] %vm137_vm3, %v21388_v9  ;;  %200 = vst.msk [vmem:[#allocation3 + $0x1e8] sm:$0xff] %vm137_vm3, %v21388_v9  ;;  %14975 = vmatmul.mubr.msk.f32.gmra.mrb[50].mxu0 %vm27_vm1, %v6008_v61  ;;  %14586 = vmatmul.mubr.msk.f32.gmra.mrb[52].mxu1 %vm27_vm1, %v17638_v13  ;;  %v6015_v13 = vld [vmem:[#allocation2 + $0x31a] sm:$0xff] }
 0x26b   :  { %201 = vst.msk [vmem:[#allocation3 + $0x1f0] sm:$0x3] %vm140_vm4, %v21388_v9  ;;  %204 = vst.msk [vmem:[#allocation3 + $0x208] sm:$0x3] %vm140_vm4, %v21388_v9  ;;  %14977 = vmatprep.mubr.msk.f32.mxu0 %vm27_vm1, %v6009_v51  ;;  %14588 = vmatprep.mubr.msk.f32.mxu1 %vm27_vm1, %v17640_v21  ;;  %v6016_v21 = vld [vmem:[#allocation2 + $0x322] sm:$0xff] }
 0x26c   :  { %202 = vst.msk [vmem:[#allocation3 + $0x1f8] sm:$0xff] %vm137_vm3, %v21388_v9  ;;  %203 = vst.msk [vmem:[#allocation3 + $0x200] sm:$0xff] %vm137_vm3, %v21388_v9 }
 0x26d   :  { %205 = vst.msk [vmem:[#allocation3 + $0x210] sm:$0xff] %vm137_vm3, %v21388_v9  ;;  %206 = vst.msk [vmem:[#allocation3 + $0x218] sm:$0xff] %vm137_vm3, %v21388_v9 }
 0x26e   :  { %207 = vst.msk [vmem:[#allocation3 + $0x220] sm:$0x3] %vm140_vm4, %v21388_v9  ;;  %210 = vst.msk [vmem:[#allocation3 + $0x238] sm:$0x3] %vm140_vm4, %v21388_v9  ;;  %14978 = vmatmul.mubr.msk.f32.gmra.mrb[52].mxu0 %vm27_vm1, %v6010_v63  ;;  %14589 = vmatmul.mubr.msk.f32.gmra.mrb[54].mxu1 %vm27_vm1, %v17648_v29  ;;  %v6017_v29 = vld [vmem:[#allocation2 + $0x332] sm:$0xff] }
 0x26f   :  { %208 = vst.msk [vmem:[#allocation3 + $0x228] sm:$0xff] %vm137_vm3, %v21388_v9  ;;  %209 = vst.msk [vmem:[#allocation3 + $0x230] sm:$0xff] %vm137_vm3, %v21388_v9  ;;  %14980 = vmatprep.mubr.msk.f32.mxu0 %vm27_vm1, %v6011_v50  ;;  %14591 = vmatprep.mubr.msk.f32.mxu1 %vm27_vm1, %v17650_v38  ;;  %v21390_v38 = vld [vmem:[#allocation14_spill] sm:$0xff] }
 0x270   :  { %211 = vst.msk [vmem:[#allocation3 + $0x240] sm:$0xff] %vm137_vm3, %v21388_v9  ;;  %212 = vst.msk [vmem:[#allocation3 + $0x248] sm:$0xff] %vm137_vm3, %v21388_v9 }
 0x271   :  { %213 = vst.msk [vmem:[#allocation3 + $0x250] sm:$0x3] %vm140_vm4, %v21388_v9  ;;  %216 = vst.msk [vmem:[#allocation3 + $0x268] sm:$0x3] %vm140_vm4, %v21388_v9 }
 0x272   :  { %214 = vst.msk [vmem:[#allocation3 + $0x258] sm:$0xff] %vm137_vm3, %v21388_v9  ;;  %215 = vst.msk [vmem:[#allocation3 + $0x260] sm:$0xff] %vm137_vm3, %v21388_v9  ;;  %14981 = vmatmul.mubr.msk.f32.gmra.mrb[54].mxu0 %vm27_vm1, %v6012_v56  ;;  %14592 = vmatmul.mubr.msk.f32.gmra.mrb[56].mxu1 %vm27_vm1, %v17658_v57  ;;  %v6018_v57 = vld [vmem:[#allocation2 + $0x33a] sm:$0xff] }
 0x273   :  { %217 = vst.msk [vmem:[#allocation3 + $0x270] sm:$0xff] %vm137_vm3, %v21388_v9  ;;  %218 = vst.msk [vmem:[#allocation3 + $0x278] sm:$0xff] %vm137_vm3, %v21388_v9  ;;  %14983 = vmatprep.mubr.msk.f32.mxu0 %vm27_vm1, %v6013_v62  ;;  %14594 = vmatprep.mubr.msk.f32.mxu1 %vm27_vm1, %v17660_v53  ;;  %v21392_v53 = vld [vmem:[#allocation16_spill] sm:$0xff] }
 0x274   :  { %219 = vst.msk [vmem:[#allocation3 + $0x280] sm:$0x3] %vm140_vm4, %v21388_v9  ;;  %222 = vst.msk [vmem:[#allocation3 + $0x298] sm:$0x3] %vm140_vm4, %v21388_v9 }
 0x275   :  { %220 = vst.msk [vmem:[#allocation3 + $0x288] sm:$0xff] %vm137_vm3, %v21388_v9  ;;  %221 = vst.msk [vmem:[#allocation3 + $0x290] sm:$0xff] %vm137_vm3, %v21388_v9 }
 0x276   :  { %223 = vst.msk [vmem:[#allocation3 + $0x2a0] sm:$0xff] %vm137_vm3, %v21388_v9  ;;  %224 = vst.msk [vmem:[#allocation3 + $0x2a8] sm:$0xff] %vm137_vm3, %v21388_v9  ;;  %14984 = vmatmul.mubr.msk.f32.gmra.mrb[56].mxu0 %vm27_vm1, %v6014_v7  ;;  %14595 = vmatmul.mubr.msk.f32.gmra.mrb[58].mxu1 %vm27_vm1, %v21389_v24 }
 0x277   :  { %225 = vst.msk [vmem:[#allocation3 + $0x2b0] sm:$0x3] %vm140_vm4, %v21388_v9  ;;  %228 = vst.msk [vmem:[#allocation3 + $0x2c8] sm:$0x3] %vm140_vm4, %v21388_v9  ;;  %14986 = vmatprep.mubr.msk.f32.mxu0 %vm27_vm1, %v6015_v13  ;;  %14597 = vmatprep.mubr.msk.f32.mxu1 %vm27_vm1, %v21390_v38 }
 0x278   :  { %226 = vst.msk [vmem:[#allocation3 + $0x2b8] sm:$0xff] %vm137_vm3, %v21388_v9  ;;  %227 = vst.msk [vmem:[#allocation3 + $0x2c0] sm:$0xff] %vm137_vm3, %v21388_v9 }
 0x279   :  { %229 = vst.msk [vmem:[#allocation3 + $0x2d0] sm:$0xff] %vm137_vm3, %v21388_v9  ;;  %230 = vst.msk [vmem:[#allocation3 + $0x2d8] sm:$0xff] %vm137_vm3, %v21388_v9 }
 0x27a   :  { %231 = vst.msk [vmem:[#allocation3 + $0x2e0] sm:$0x3] %vm140_vm4, %v21388_v9  ;;  %234 = vst.msk [vmem:[#allocation3 + $0x2f8] sm:$0x3] %vm140_vm4, %v21388_v9  ;;  %14987 = vmatmul.mubr.msk.f32.gmra.mrb[58].mxu0 %vm27_vm1, %v6016_v21  ;;  %14598 = vmatmul.mubr.msk.f32.gmra.mrb[60].mxu1 %vm27_vm1, %v21391_v17 }
 0x27b   :  { %232 = vst.msk [vmem:[#allocation3 + $0x2e8] sm:$0xff] %vm137_vm3, %v21388_v9  ;;  %233 = vst.msk [vmem:[#allocation3 + $0x2f0] sm:$0xff] %vm137_vm3, %v21388_v9  ;;  %14989 = vmatprep.mubr.msk.f32.mxu0 %vm27_vm1, %v6017_v29  ;;  %14600 = vmatprep.mubr.msk.f32.mxu1 %vm27_vm1, %v21392_v53 }
 0x27c   :  { %235 = vst.msk [vmem:[#allocation3 + $0x300] sm:$0xff] %vm137_vm3, %v21388_v9  ;;  %236 = vst.msk [vmem:[#allocation3 + $0x308] sm:$0xff] %vm137_vm3, %v21388_v9 }
 0x27d   :  { %237 = vst.msk [vmem:[#allocation3 + $0x310] sm:$0x3] %vm140_vm4, %v21388_v9  ;;  %240 = vst.msk [vmem:[#allocation3 + $0x328] sm:$0x3] %vm140_vm4, %v21388_v9 }
 0x27e   :  { %238 = vst.msk [vmem:[#allocation3 + $0x318] sm:$0xff] %vm137_vm3, %v21388_v9  ;;  %239 = vst.msk [vmem:[#allocation3 + $0x320] sm:$0xff] %vm137_vm3, %v21388_v9  ;;  %14990 = vmatmul.mubr.msk.f32.gmra.mrb[60].mxu0 %vm27_vm1, %v6018_v57  ;;  %14601 = vmatmul.mubr.msk.f32.gmra.mrb[62].mxu1 %vm27_vm1, %v21393_v1 }
 0x27f   :  { %241 = vst.msk [vmem:[#allocation3 + $0x330] sm:$0xff] %vm137_vm3, %v21388_v9  ;;  %242 = vst.msk [vmem:[#allocation3 + $0x338] sm:$0xff] %vm137_vm3, %v21388_v9  ;;  %14992 = vmatprep.mubr.msk.f32.mxu0 %vm27_vm1, %v6019_v2 }
 0x280   :  { %243 = vst.msk [vmem:[#allocation3 + $0x340] sm:$0x3] %vm140_vm4, %v21388_v9  ;;  %246 = vst.msk [vmem:[#allocation3 + $0x358] sm:$0x3] %vm140_vm4, %v21388_v9 }
 0x281   :  { %244 = vst.msk [vmem:[#allocation3 + $0x348] sm:$0xff] %vm137_vm3, %v21388_v9  ;;  %245 = vst.msk [vmem:[#allocation3 + $0x350] sm:$0xff] %vm137_vm3, %v21388_v9 }
 0x282   :  { %247 = vst.msk [vmem:[#allocation4] sm:$0xff] %vm137_vm3, %v21388_v9  ;;  %249 = vst.msk [vmem:[#allocation4 + $0x10] sm:$0xff] %vm137_vm3, %v21388_v9  ;;  %14993 = vmatmul.mubr.msk.f32.gmra.mrb[62].mxu0 %vm27_vm1, %v6020_v34 }
 0x283   :  { %248 = vst.msk [vmem:[#allocation4 + $0x8] sm:$0x3] %vm140_vm4, %v21388_v9  ;;  %250 = vst.msk [vmem:[#allocation4 + $0x18] sm:$0x3] %vm140_vm4, %v21388_v9 }
 0x284   :  { %251 = vst.msk [vmem:[#allocation4 + $0x20] sm:$0xff] %vm137_vm3, %v21388_v9  ;;  %253 = vst.msk [vmem:[#allocation4 + $0x30] sm:$0xff] %vm137_vm3, %v21388_v9 }
 0x285   :  { %252 = vst.msk [vmem:[#allocation4 + $0x28] sm:$0x3] %vm140_vm4, %v21388_v9  ;;  %254 = vst.msk [vmem:[#allocation4 + $0x38] sm:$0x3] %vm140_vm4, %v21388_v9 }
 0x286   :  { %255 = vst.msk [vmem:[#allocation4 + $0x40] sm:$0xff] %vm137_vm3, %v21388_v9  ;;  %257 = vst.msk [vmem:[#allocation4 + $0x50] sm:$0xff] %vm137_vm3, %v21388_v9 }
 0x287   :  { %256 = vst.msk [vmem:[#allocation4 + $0x48] sm:$0x3] %vm140_vm4, %v21388_v9  ;;  %258 = vst.msk [vmem:[#allocation4 + $0x58] sm:$0x3] %vm140_vm4, %v21388_v9 }
 0x288   :  { %259 = vst.msk [vmem:[#allocation4 + $0x60] sm:$0xff] %vm137_vm3, %v21388_v9  ;;  %261 = vst.msk [vmem:[#allocation4 + $0x70] sm:$0xff] %vm137_vm3, %v21388_v9 }
 0x289   :  { %260 = vst.msk [vmem:[#allocation4 + $0x68] sm:$0x3] %vm140_vm4, %v21388_v9  ;;  %262 = vst.msk [vmem:[#allocation4 + $0x78] sm:$0x3] %vm140_vm4, %v21388_v9 }
 0x28a   :  { %263 = vst.msk [vmem:[#allocation4 + $0x80] sm:$0xff] %vm137_vm3, %v21388_v9  ;;  %265 = vst.msk [vmem:[#allocation4 + $0x90] sm:$0xff] %vm137_vm3, %v21388_v9 }
 0x28b   :  { %264 = vst.msk [vmem:[#allocation4 + $0x88] sm:$0x3] %vm140_vm4, %v21388_v9  ;;  %266 = vst.msk [vmem:[#allocation4 + $0x98] sm:$0x3] %vm140_vm4, %v21388_v9 }
 0x28c   :  { %267 = vst.msk [vmem:[#allocation4 + $0xa0] sm:$0xff] %vm137_vm3, %v21388_v9  ;;  %269 = vst.msk [vmem:[#allocation4 + $0xb0] sm:$0xff] %vm137_vm3, %v21388_v9 }
 0x28d   :  { %268 = vst.msk [vmem:[#allocation4 + $0xa8] sm:$0x3] %vm140_vm4, %v21388_v9  ;;  %270 = vst.msk [vmem:[#allocation4 + $0xb8] sm:$0x3] %vm140_vm4, %v21388_v9 }
 0x28e   :  { %271 = vst.msk [vmem:[#allocation4 + $0xc0] sm:$0xff] %vm137_vm3, %v21388_v9  ;;  %273 = vst.msk [vmem:[#allocation4 + $0xd0] sm:$0xff] %vm137_vm3, %v21388_v9 }
 0x28f   :  { %272 = vst.msk [vmem:[#allocation4 + $0xc8] sm:$0x3] %vm140_vm4, %v21388_v9  ;;  %274 = vst.msk [vmem:[#allocation4 + $0xd8] sm:$0x3] %vm140_vm4, %v21388_v9 }
 0x290   :  { %275 = vst.msk [vmem:[#allocation4 + $0xe0] sm:$0xff] %vm137_vm3, %v21388_v9  ;;  %277 = vst.msk [vmem:[#allocation4 + $0xf0] sm:$0xff] %vm137_vm3, %v21388_v9 }
 0x291   :  { %276 = vst.msk [vmem:[#allocation4 + $0xe8] sm:$0x3] %vm140_vm4, %v21388_v9  ;;  %278 = vst.msk [vmem:[#allocation4 + $0xf8] sm:$0x3] %vm140_vm4, %v21388_v9 }
 0x292   :  { %279 = vst.msk [vmem:[#allocation4 + $0x100] sm:$0xff] %vm137_vm3, %v21388_v9  ;;  %281 = vst.msk [vmem:[#allocation4 + $0x110] sm:$0xff] %vm137_vm3, %v21388_v9 }
 0x293   :  { %280 = vst.msk [vmem:[#allocation4 + $0x108] sm:$0x3] %vm140_vm4, %v21388_v9  ;;  %282 = vst.msk [vmem:[#allocation4 + $0x118] sm:$0x3] %vm140_vm4, %v21388_v9 }
 0x294   :  { %283 = vst.msk [vmem:[#allocation4 + $0x120] sm:$0xff] %vm137_vm3, %v21388_v9  ;;  %285 = vst.msk [vmem:[#allocation4 + $0x130] sm:$0xff] %vm137_vm3, %v21388_v9 }
 0x295   :  { %284 = vst.msk [vmem:[#allocation4 + $0x128] sm:$0x3] %vm140_vm4, %v21388_v9  ;;  %286 = vst.msk [vmem:[#allocation4 + $0x138] sm:$0x3] %vm140_vm4, %v21388_v9  ;;  %v14411_v40 = vpop.f32.mrb[0].mxu1 }
 0x296   :  { %v2745_v52 = vpop.f32.mrb[1].mxu1 }
 0x299   :  { %v14414_v3 = vpop.f32.mrb[2].mxu1 }
 0x29a   :  { %v2755_v32 = vpop.f32.mrb[3].mxu1 }
 0x29d   :  { %v14417_v10 = vpop.f32.mrb[4].mxu1 }
 0x29e   :  { %v2765_v14 = vpop.f32.mrb[5].mxu1 }
 0x2a1   :  { %v14420_v18 = vpop.f32.mrb[6].mxu1 }
 0x2a2   :  { %v2775_v22 = vpop.f32.mrb[7].mxu1 }
 0x2a5   :  { %v14423_v26 = vpop.f32.mrb[8].mxu1 }
 0x2a6   :  { %v2785_v30 = vpop.f32.mrb[9].mxu1 }
 0x2a9   :  { %v14426_v35 = vpop.f32.mrb[10].mxu1 }
 0x2aa   :  { %v2795_v39 = vpop.f32.mrb[11].mxu1 }
 0x2ad   :  { %v18188_v44 = vpop.f32.mrb[12].mxu1 }
 0x2ae   :  { %v18190_v48 = vpop.f32.mrb[13].mxu1 }
 0x2b1   :  { %v18192_v46 = vpop.f32.mrb[14].mxu1 }
 0x2b2   :  { %v18194_v49 = vpop.f32.mrb[15].mxu1 }
 0x2b5   :  { %v18196_v5 = vpop.f32.mrb[16].mxu1 }
 0x2b6   :  { %v18198_v37 = vpop.f32.mrb[17].mxu1 }
 0x2b9   :  { %v18200_v28 = vpop.f32.mrb[18].mxu1 }
 0x2ba   :  { %v18202_v47 = vpop.f32.mrb[19].mxu1 }
 0x2bd   :  { %v18204_v20 = vpop.f32.mrb[20].mxu1 }
 0x2be   :  { %v18206_v42 = vpop.f32.mrb[21].mxu1 }
 0x2c1   :  { %v18208_v12 = vpop.f32.mrb[22].mxu1 }
 0x2c2   :  { %v18210_v33 = vpop.f32.mrb[23].mxu1 }
 0x2c5   :  { %v18212_v6 = vpop.f32.mrb[24].mxu1 }
 0x2c6   :  { %v18214_v45 = vpop.f32.mrb[25].mxu1 }
 0x2c9   :  { %v18216_v59 = vpop.f32.mrb[26].mxu1 }
 0x2ca   :  { %v18218_v16 = vpop.f32.mrb[27].mxu1 }
 0x2cd   :  { %v18220_v8 = vpop.f32.mrb[28].mxu1 }
 0x2ce   :  { %v18222_v41 = vpop.f32.mrb[29].mxu1 }
 0x2d1   :  { %v18224_v43 = vpop.f32.mrb[30].mxu1 }
 0x2d2   :  { %v18226_v25 = vpop.f32.mrb[31].mxu1 }
 0x2d9   :  { %v14901_v55 = vpop.f32.mrb[0].mxu0 }
 0x2da   :  { %v15344_v4 = vadd.f32 %v14901_v55, %v14411_v40  ;;  %v6281_v9 = vpop.f32.mrb[1].mxu0 }
 0x2db   :  { %v15345_v23 = vadd.f32 %v6281_v9, %v2745_v52 }
 0x2dc   :  { %6666 = vst.msk [vmem:[#allocation3 + $0x21] sm:$0xff] %vm137_vm3, %v15344_v4 }
 0x2dd   :  { %6665 = vst.msk [vmem:[#allocation3 + $0x19] sm:$0xff] %vm137_vm3, %v15345_v23  ;;  %v14904_v31 = vpop.f32.mrb[2].mxu0 }
 0x2de   :  { %v15346_v36 = vadd.f32 %v14904_v31, %v14414_v3  ;;  %v6291_v61 = vpop.f32.mrb[3].mxu0 }
 0x2df   :  { %v15347_v51 = vadd.f32 %v6291_v61, %v2755_v32 }
 0x2e0   :  { %6668 = vst.msk [vmem:[#allocation3 + $0x39] sm:$0xff] %vm137_vm3, %v15346_v36 }
 0x2e1   :  { %6667 = vst.msk [vmem:[#allocation3 + $0x31] sm:$0xff] %vm137_vm3, %v15347_v51  ;;  %v14907_v63 = vpop.f32.mrb[4].mxu0 }
 0x2e2   :  { %v15348_v50 = vadd.f32 %v14907_v63, %v14417_v10  ;;  %v6301_v56 = vpop.f32.mrb[5].mxu0 }
 0x2e3   :  { %v15349_v62 = vadd.f32 %v6301_v56, %v2765_v14 }
 0x2e4   :  { %6670 = vst.msk [vmem:[#allocation3 + $0x51] sm:$0xff] %vm137_vm3, %v15348_v50 }
 0x2e5   :  { %6669 = vst.msk [vmem:[#allocation3 + $0x49] sm:$0xff] %vm137_vm3, %v15349_v62  ;;  %v14910_v7 = vpop.f32.mrb[6].mxu0 }
 0x2e6   :  { %v15350_v13 = vadd.f32 %v14910_v7, %v14420_v18  ;;  %v6311_v21 = vpop.f32.mrb[7].mxu0 }
 0x2e7   :  { %v15351_v29 = vadd.f32 %v6311_v21, %v2775_v22 }
 0x2e8   :  { %6672 = vst.msk [vmem:[#allocation3 + $0x69] sm:$0xff] %vm137_vm3, %v15350_v13 }
 0x2e9   :  { %6671 = vst.msk [vmem:[#allocation3 + $0x61] sm:$0xff] %vm137_vm3, %v15351_v29  ;;  %v14913_v24 = vpop.f32.mrb[8].mxu0 }
 0x2ea   :  { %v15352_v38 = vadd.f32 %v14913_v24, %v14423_v26  ;;  %v6321_v57 = vpop.f32.mrb[9].mxu0 }
 0x2eb   :  { %v15353_v2 = vadd.f32 %v6321_v57, %v2785_v30 }
 0x2ec   :  { %6674 = vst.msk [vmem:[#allocation3 + $0x81] sm:$0xff] %vm137_vm3, %v15352_v38 }
 0x2ed   :  { %6673 = vst.msk [vmem:[#allocation3 + $0x79] sm:$0xff] %vm137_vm3, %v15353_v2  ;;  %v14916_v17 = vpop.f32.mrb[10].mxu0 }
 0x2ee   :  { %v15354_v53 = vadd.f32 %v14916_v17, %v14426_v35  ;;  %v6331_v34 = vpop.f32.mrb[11].mxu0 }
 0x2ef   :  { %v15355_v1 = vadd.f32 %v6331_v34, %v2795_v39 }
 0x2f0   :  { %6676 = vst.msk [vmem:[#allocation3 + $0x99] sm:$0xff] %vm137_vm3, %v15354_v53 }
 0x2f1   :  { %6675 = vst.msk [vmem:[#allocation3 + $0x91] sm:$0xff] %vm137_vm3, %v15355_v1  ;;  %v14919_v40 = vpop.f32.mrb[12].mxu0 }
 0x2f2   :  { %v15356_v52 = vadd.f32 %v14919_v40, %v18188_v44  ;;  %v6341_v3 = vpop.f32.mrb[13].mxu0 }
 0x2f3   :  { %v15357_v32 = vadd.f32 %v6341_v3, %v18190_v48 }
 0x2f4   :  { %6678 = vst.msk [vmem:[#allocation3 + $0xb1] sm:$0xff] %vm137_vm3, %v15356_v52 }
 0x2f5   :  { %6677 = vst.msk [vmem:[#allocation3 + $0xa9] sm:$0xff] %vm137_vm3, %v15357_v32  ;;  %v14922_v10 = vpop.f32.mrb[14].mxu0 }
 0x2f6   :  { %v15358_v14 = vadd.f32 %v14922_v10, %v18192_v46  ;;  %v6351_v18 = vpop.f32.mrb[15].mxu0 }
 0x2f7   :  { %v15359_v22 = vadd.f32 %v6351_v18, %v18194_v49 }
 0x2f8   :  { %6680 = vst.msk [vmem:[#allocation3 + $0xc9] sm:$0xff] %vm137_vm3, %v15358_v14 }
 0x2f9   :  { %6679 = vst.msk [vmem:[#allocation3 + $0xc1] sm:$0xff] %vm137_vm3, %v15359_v22  ;;  %v14925_v26 = vpop.f32.mrb[16].mxu0 }
 0x2fa   :  { %v15360_v30 = vadd.f32 %v14925_v26, %v18196_v5  ;;  %v6361_v35 = vpop.f32.mrb[17].mxu0 }
 0x2fb   :  { %v15361_v39 = vadd.f32 %v6361_v35, %v18198_v37 }
 0x2fc   :  { %6682 = vst.msk [vmem:[#allocation3 + $0xe1] sm:$0xff] %vm137_vm3, %v15360_v30 }
 0x2fd   :  { %6681 = vst.msk [vmem:[#allocation3 + $0xd9] sm:$0xff] %vm137_vm3, %v15361_v39  ;;  %v14928_v44 = vpop.f32.mrb[18].mxu0 }
 0x2fe   :  { %v15362_v48 = vadd.f32 %v14928_v44, %v18200_v28  ;;  %v6371_v46 = vpop.f32.mrb[19].mxu0 }
 0x2ff   :  { %v15363_v49 = vadd.f32 %v6371_v46, %v18202_v47 }
 0x300   :  { %6684 = vst.msk [vmem:[#allocation3 + $0xf9] sm:$0xff] %vm137_vm3, %v15362_v48 }
 0x301   :  { %6683 = vst.msk [vmem:[#allocation3 + $0xf1] sm:$0xff] %vm137_vm3, %v15363_v49  ;;  %v14931_v55 = vpop.f32.mrb[20].mxu0 }
 0x302   :  { %v15364_v5 = vadd.f32 %v14931_v55, %v18204_v20  ;;  %v6381_v4 = vpop.f32.mrb[21].mxu0 }
 0x303   :  { %v15365_v37 = vadd.f32 %v6381_v4, %v18206_v42 }
 0x304   :  { %6686 = vst.msk [vmem:[#allocation3 + $0x111] sm:$0xff] %vm137_vm3, %v15364_v5 }
 0x305   :  { %6685 = vst.msk [vmem:[#allocation3 + $0x109] sm:$0xff] %vm137_vm3, %v15365_v37  ;;  %v14934_v9 = vpop.f32.mrb[22].mxu0 }
 0x306   :  { %v15366_v28 = vadd.f32 %v14934_v9, %v18208_v12  ;;  %v6391_v23 = vpop.f32.mrb[23].mxu0 }
 0x307   :  { %v15367_v47 = vadd.f32 %v6391_v23, %v18210_v33 }
 0x308   :  { %6688 = vst.msk [vmem:[#allocation3 + $0x129] sm:$0xff] %vm137_vm3, %v15366_v28 }
 0x309   :  { %6687 = vst.msk [vmem:[#allocation3 + $0x121] sm:$0xff] %vm137_vm3, %v15367_v47  ;;  %v14937_v31 = vpop.f32.mrb[24].mxu0 }
 0x30a   :  { %v15368_v20 = vadd.f32 %v14937_v31, %v18212_v6  ;;  %v6401_v36 = vpop.f32.mrb[25].mxu0 }
 0x30b   :  { %v15369_v42 = vadd.f32 %v6401_v36, %v18214_v45 }
 0x30c   :  { %6690 = vst.msk [vmem:[#allocation3 + $0x141] sm:$0xff] %vm137_vm3, %v15368_v20 }
 0x30d   :  { %6689 = vst.msk [vmem:[#allocation3 + $0x139] sm:$0xff] %vm137_vm3, %v15369_v42  ;;  %v14940_v61 = vpop.f32.mrb[26].mxu0 }
 0x30e   :  { %v15370_v12 = vadd.f32 %v14940_v61, %v18216_v59  ;;  %v6411_v51 = vpop.f32.mrb[27].mxu0 }
 0x30f   :  { %v15371_v33 = vadd.f32 %v6411_v51, %v18218_v16 }
 0x310   :  { %6692 = vst.msk [vmem:[#allocation3 + $0x159] sm:$0xff] %vm137_vm3, %v15370_v12 }
 0x311   :  { %6691 = vst.msk [vmem:[#allocation3 + $0x151] sm:$0xff] %vm137_vm3, %v15371_v33  ;;  %v14943_v63 = vpop.f32.mrb[28].mxu0 }
 0x312   :  { %v15372_v6 = vadd.f32 %v14943_v63, %v18220_v8  ;;  %v6421_v50 = vpop.f32.mrb[29].mxu0 }
 0x313   :  { %v15373_v45 = vadd.f32 %v6421_v50, %v18222_v41 }
 0x314   :  { %6694 = vst.msk [vmem:[#allocation3 + $0x171] sm:$0xff] %vm137_vm3, %v15372_v6 }
 0x315   :  { %6693 = vst.msk [vmem:[#allocation3 + $0x169] sm:$0xff] %vm137_vm3, %v15373_v45  ;;  %v14946_v56 = vpop.f32.mrb[30].mxu0  ;;  %v14557_v7 = vpop.f32.mrb[32].mxu1 }
 0x316   :  { %v15374_v59 = vadd.f32 %v14946_v56, %v18224_v43  ;;  %v6431_v62 = vpop.f32.mrb[31].mxu0  ;;  %v3612_v13 = vpop.f32.mrb[33].mxu1 }
 0x317   :  { %v15375_v16 = vadd.f32 %v6431_v62, %v18226_v25 }
 0x318   :  { %6696 = vst.msk [vmem:[#allocation3 + $0x189] sm:$0xff] %vm137_vm3, %v15374_v59 }
 0x319   :  { %6695 = vst.msk [vmem:[#allocation3 + $0x181] sm:$0xff] %vm137_vm3, %v15375_v16  ;;  %v14949_v8 = vpop.f32.mrb[32].mxu0  ;;  %v14560_v24 = vpop.f32.mrb[34].mxu1 }
 0x31a   :  { %v15376_v21 = vadd.f32 %v14949_v8, %v14557_v7  ;;  %v6441_v29 = vpop.f32.mrb[33].mxu0  ;;  %v3622_v38 = vpop.f32.mrb[35].mxu1 }
 0x31b   :  { %v15377_v41 = vadd.f32 %v6441_v29, %v3612_v13 }
 0x31c   :  { %6698 = vst.msk [vmem:[#allocation3 + $0x1d1] sm:$0xff] %vm137_vm3, %v15376_v21 }
 0x31d   :  { %6697 = vst.msk [vmem:[#allocation3 + $0x1c9] sm:$0xff] %vm137_vm3, %v15377_v41  ;;  %v14952_v43 = vpop.f32.mrb[34].mxu0  ;;  %v14563_v17 = vpop.f32.mrb[36].mxu1 }
 0x31e   :  { %v15378_v57 = vadd.f32 %v14952_v43, %v14560_v24  ;;  %v6451_v2 = vpop.f32.mrb[35].mxu0  ;;  %v3632_v53 = vpop.f32.mrb[37].mxu1 }
 0x31f   :  { %v15379_v25 = vadd.f32 %v6451_v2, %v3622_v38 }
 0x320   :  { %6700 = vst.msk [vmem:[#allocation3 + $0x1e9] sm:$0xff] %vm137_vm3, %v15378_v57 }
 0x321   :  { %6699 = vst.msk [vmem:[#allocation3 + $0x1e1] sm:$0xff] %vm137_vm3, %v15379_v25  ;;  %v14955_v34 = vpop.f32.mrb[36].mxu0  ;;  %v14566_v3 = vpop.f32.mrb[38].mxu1 }
 0x322   :  { %v15380_v1 = vadd.f32 %v14955_v34, %v14563_v17  ;;  %v6461_v40 = vpop.f32.mrb[37].mxu0  ;;  %v3642_v32 = vpop.f32.mrb[39].mxu1 }
 0x323   :  { %v15381_v52 = vadd.f32 %v6461_v40, %v3632_v53 }
 0x324   :  { %6702 = vst.msk [vmem:[#allocation3 + $0x201] sm:$0xff] %vm137_vm3, %v15380_v1 }
 0x325   :  { %6701 = vst.msk [vmem:[#allocation3 + $0x1f9] sm:$0xff] %vm137_vm3, %v15381_v52  ;;  %v14958_v10 = vpop.f32.mrb[38].mxu0  ;;  %v14569_v26 = vpop.f32.mrb[40].mxu1 }
 0x326   :  { %v15382_v14 = vadd.f32 %v14958_v10, %v14566_v3  ;;  %v6471_v18 = vpop.f32.mrb[39].mxu0  ;;  %v3652_v30 = vpop.f32.mrb[41].mxu1 }
 0x327   :  { %v15383_v22 = vadd.f32 %v6471_v18, %v3642_v32 }
 0x328   :  { %6704 = vst.msk [vmem:[#allocation3 + $0x219] sm:$0xff] %vm137_vm3, %v15382_v14 }
 0x329   :  { %6703 = vst.msk [vmem:[#allocation3 + $0x211] sm:$0xff] %vm137_vm3, %v15383_v22  ;;  %v14961_v35 = vpop.f32.mrb[40].mxu0  ;;  %v14572_v46 = vpop.f32.mrb[42].mxu1 }
 0x32a   :  { %v15384_v39 = vadd.f32 %v14961_v35, %v14569_v26  ;;  %v6481_v44 = vpop.f32.mrb[41].mxu0  ;;  %v3662_v49 = vpop.f32.mrb[43].mxu1 }
 0x32b   :  { %v15385_v48 = vadd.f32 %v6481_v44, %v3652_v30 }
 0x32c   :  { %6706 = vst.msk [vmem:[#allocation3 + $0x231] sm:$0xff] %vm137_vm3, %v15384_v39 }
 0x32d   :  { %6705 = vst.msk [vmem:[#allocation3 + $0x229] sm:$0xff] %vm137_vm3, %v15385_v48  ;;  %v14964_v55 = vpop.f32.mrb[42].mxu0  ;;  %v14575_v9 = vpop.f32.mrb[44].mxu1 }
 0x32e   :  { %v15386_v5 = vadd.f32 %v14964_v55, %v14572_v46  ;;  %v6491_v4 = vpop.f32.mrb[43].mxu0  ;;  %v3672_v28 = vpop.f32.mrb[45].mxu1 }
 0x32f   :  { %v15387_v37 = vadd.f32 %v6491_v4, %v3662_v49 }
 0x330   :  { %6708 = vst.msk [vmem:[#allocation3 + $0x249] sm:$0xff] %vm137_vm3, %v15386_v5 }
 0x331   :  { %6707 = vst.msk [vmem:[#allocation3 + $0x241] sm:$0xff] %vm137_vm3, %v15387_v37  ;;  %v14967_v23 = vpop.f32.mrb[44].mxu0  ;;  %v14578_v36 = vpop.f32.mrb[46].mxu1 }
 0x332   :  { %v15388_v47 = vadd.f32 %v14967_v23, %v14575_v9  ;;  %v6501_v31 = vpop.f32.mrb[45].mxu0  ;;  %v3682_v42 = vpop.f32.mrb[47].mxu1 }
 0x333   :  { %v15389_v20 = vadd.f32 %v6501_v31, %v3672_v28 }
 0x334   :  { %6710 = vst.msk [vmem:[#allocation3 + $0x261] sm:$0xff] %vm137_vm3, %v15388_v47 }
 0x335   :  { %6709 = vst.msk [vmem:[#allocation3 + $0x259] sm:$0xff] %vm137_vm3, %v15389_v20  ;;  %v14970_v61 = vpop.f32.mrb[46].mxu0  ;;  %v14581_v63 = vpop.f32.mrb[48].mxu1 }
 0x336   :  { %v15390_v12 = vadd.f32 %v14970_v61, %v14578_v36  ;;  %v6511_v51 = vpop.f32.mrb[47].mxu0  ;;  %v3692_v6 = vpop.f32.mrb[49].mxu1 }
 0x337   :  { %v15391_v33 = vadd.f32 %v6511_v51, %v3682_v42 }
 0x338   :  { %6712 = vst.msk [vmem:[#allocation3 + $0x279] sm:$0xff] %vm137_vm3, %v15390_v12 }
 0x339   :  { %6711 = vst.msk [vmem:[#allocation3 + $0x271] sm:$0xff] %vm137_vm3, %v15391_v33  ;;  %v14973_v50 = vpop.f32.mrb[48].mxu0  ;;  %v14584_v62 = vpop.f32.mrb[50].mxu1 }
 0x33a   :  { %v15392_v45 = vadd.f32 %v14973_v50, %v14581_v63  ;;  %v6521_v56 = vpop.f32.mrb[49].mxu0  ;;  %v3702_v16 = vpop.f32.mrb[51].mxu1 }
 0x33b   :  { %v15393_v59 = vadd.f32 %v6521_v56, %v3692_v6 }
 0x33c   :  { %6714 = vst.msk [vmem:[#allocation3 + $0x291] sm:$0xff] %vm137_vm3, %v15392_v45 }
 0x33d   :  { %6713 = vst.msk [vmem:[#allocation3 + $0x289] sm:$0xff] %vm137_vm3, %v15393_v59  ;;  %v14976_v7 = vpop.f32.mrb[50].mxu0  ;;  %v14587_v29 = vpop.f32.mrb[52].mxu1 }
 0x33e   :  { %v15394_v13 = vadd.f32 %v14976_v7, %v14584_v62  ;;  %v6531_v8 = vpop.f32.mrb[51].mxu0  ;;  %v3712_v41 = vpop.f32.mrb[53].mxu1 }
 0x33f   :  { %v15395_v21 = vadd.f32 %v6531_v8, %v3702_v16 }
 0x340   :  { %6716 = vst.msk [vmem:[#allocation3 + $0x2a9] sm:$0xff] %vm137_vm3, %v15394_v13 }
 0x341   :  { %6715 = vst.msk [vmem:[#allocation3 + $0x2a1] sm:$0xff] %vm137_vm3, %v15395_v21  ;;  %v14979_v24 = vpop.f32.mrb[52].mxu0  ;;  %v14590_v2 = vpop.f32.mrb[54].mxu1 }
 0x342   :  { %v15396_v38 = vadd.f32 %v14979_v24, %v14587_v29  ;;  %v6541_v43 = vpop.f32.mrb[53].mxu0  ;;  %v3722_v25 = vpop.f32.mrb[55].mxu1 }
 0x343   :  { %v15397_v57 = vadd.f32 %v6541_v43, %v3712_v41 }
 0x344   :  { %6718 = vst.msk [vmem:[#allocation3 + $0x2c1] sm:$0xff] %vm137_vm3, %v15396_v38 }
 0x345   :  { %6717 = vst.msk [vmem:[#allocation3 + $0x2b9] sm:$0xff] %vm137_vm3, %v15397_v57  ;;  %v14982_v17 = vpop.f32.mrb[54].mxu0  ;;  %v14593_v40 = vpop.f32.mrb[56].mxu1 }
 0x346   :  { %v15398_v53 = vadd.f32 %v14982_v17, %v14590_v2  ;;  %v6551_v34 = vpop.f32.mrb[55].mxu0  ;;  %v3732_v52 = vpop.f32.mrb[57].mxu1 }
 0x347   :  { %v15399_v1 = vadd.f32 %v6551_v34, %v3722_v25 }
 0x348   :  { %6720 = vst.msk [vmem:[#allocation3 + $0x2d9] sm:$0xff] %vm137_vm3, %v15398_v53 }
 0x349   :  { %6719 = vst.msk [vmem:[#allocation3 + $0x2d1] sm:$0xff] %vm137_vm3, %v15399_v1  ;;  %v14985_v3 = vpop.f32.mrb[56].mxu0  ;;  %v14596_v18 = vpop.f32.mrb[58].mxu1 }
 0x34a   :  { %v15400_v32 = vadd.f32 %v14985_v3, %v14593_v40  ;;  %v6561_v10 = vpop.f32.mrb[57].mxu0  ;;  %v3742_v22 = vpop.f32.mrb[59].mxu1 }
 0x34b   :  { %v15401_v14 = vadd.f32 %v6561_v10, %v3732_v52 }
 0x34c   :  { %6722 = vst.msk [vmem:[#allocation3 + $0x2f1] sm:$0xff] %vm137_vm3, %v15400_v32 }
 0x34d   :  { %6721 = vst.msk [vmem:[#allocation3 + $0x2e9] sm:$0xff] %vm137_vm3, %v15401_v14  ;;  %v14988_v26 = vpop.f32.mrb[58].mxu0  ;;  %v14599_v44 = vpop.f32.mrb[60].mxu1 }
 0x34e   :  { %v15402_v30 = vadd.f32 %v14988_v26, %v14596_v18  ;;  %v6571_v35 = vpop.f32.mrb[59].mxu0  ;;  %v3752_v48 = vpop.f32.mrb[61].mxu1 }
 0x34f   :  { %v15403_v39 = vadd.f32 %v6571_v35, %v3742_v22 }
 0x350   :  { %6724 = vst.msk [vmem:[#allocation3 + $0x309] sm:$0xff] %vm137_vm3, %v15402_v30 }
 0x351   :  { %6723 = vst.msk [vmem:[#allocation3 + $0x301] sm:$0xff] %vm137_vm3, %v15403_v39  ;;  %v14991_v46 = vpop.f32.mrb[60].mxu0  ;;  %v14602_v4 = vpop.f32.mrb[62].mxu1 }
 0x352   :  { %v15404_v49 = vadd.f32 %v14991_v46, %v14599_v44  ;;  %v6581_v55 = vpop.f32.mrb[61].mxu0  ;;  %v3762_v37 = vpop.f32.mrb[63].mxu1 }
 0x353   :  { %v15405_v5 = vadd.f32 %v6581_v55, %v3752_v48 }
 0x354   :  { %6726 = vst.msk [vmem:[#allocation3 + $0x321] sm:$0xff] %vm137_vm3, %v15404_v49 }
 0x355   :  { %6725 = vst.msk [vmem:[#allocation3 + $0x319] sm:$0xff] %vm137_vm3, %v15405_v5  ;;  %v14994_v9 = vpop.f32.mrb[62].mxu0 }
 0x356   :  { %v15406_v28 = vadd.f32 %v14994_v9, %v14602_v4  ;;  %v6591_v23 = vpop.f32.mrb[63].mxu0 }
 0x357   :  { %v15407_v47 = vadd.f32 %v6591_v23, %v3762_v37 }
 0x358   :  { %6728 = vst.msk [vmem:[#allocation3 + $0x339] sm:$0xff] %vm137_vm3, %v15406_v28 }
 0x359   :  { %6727 = vst.msk [vmem:[#allocation3 + $0x331] sm:$0xff] %vm137_vm3, %v15407_v47 }
 0x35a LB: > { %v15250_v31 = vpack.c.bf16 %v18236_v60, %v18231_v54  ;;  %v15254_v20 = vpack.c.bf16 %v18246_v11, %v18241_v0  ;;  %v6743_v36 = vld [vmem:[#allocation3 + $0x18] sm:$0xff]  ;;  %v6744_v42 = vld [vmem:[#allocation3 + $0x20] sm:$0xff]  ;;  %v18363_v12 = vpack.c.bf16 %v18256_v19, %v18251_v15  ;;  %v6840_v51 = vld [vmem:[#allocation3 + $0x8] sm:$0xff]  ;;  %v18371_v50 = vpack.c.bf16 %v18266_v58, %v18261_v27  ;;  %s6742_s25 = sadd.s32 1, %s16058_s25   ;;  %s16058_s25 = sphi %s18352_s25, %s6742_s25  }
 0x35b   : > { %v6839_v61 = vld [vmem:[#allocation3] sm:$0xff]  ;;  %v18365_v63 = vld [vmem:[#allocation3 + $0x30] sm:$0xff]  ;;  %v18367_v6 = vld [vmem:[#allocation3 + $0x38] sm:$0xff]  ;;  %v6936_v45 = vadd.f32 %v6840_v51, %v6744_v42  ;;  %vm7320_vm5 = vcmask 1046528   ;;  %vm7609_vm6 = vcmask 1045504   ;;  %p6739_p0 = scmp.ge.s32.totalorder %s6742_s25, 9  }
 0x35c   : > { %v6935_v33 = vadd.f32 %v6839_v61, %v6743_v36  ;;  %15251 = vmatprep.subr.bf16.mxu0 %v15250_v31  ;;  %15856 = vmatprep.subr.bf16.mxu1 %v15250_v31  ;;  %v6791_v56 = vld [vmem:[#allocation3 + $0x1c8] sm:$0xff]  ;;  %v18373_v59 = vld [vmem:[#allocation3 + $0x1d0] sm:$0xff]  ;;  %v6938_v16 = vadd.f32 %v18365_v63, %v6743_v36  ;;  %v6888_v13 = vld [vmem:[#allocation3 + $0x1b8] sm:$0xff]  ;;  %v6939_v41 = vadd.f32 %v18367_v6, %v6744_v42  ;;  %vm10411_vm7 = vcmask (%p6739_p0), 516096   ;;  %s20536_s16 = smov (%p6739_p0), 0  }
 0x35d   : > { %v6887_v62 = vld [vmem:[#allocation3 + $0x1b0] sm:$0xff]  ;;  %15253 = vmatpush3.bf16.msra.mxu0 %v15250_v31  ;;  %15860 = vmatpush3.bf16.msra.mxu1 %v15250_v31  ;;  %v18377_v21 = vld [vmem:[#allocation3 + $0x1e0] sm:$0xff]  ;;  %v18379_v29 = vld [vmem:[#allocation3 + $0x1e8] sm:$0xff]  ;;  %v7129_v24 = vadd.f32 %v18367_v6, %v6936_v45  ;;  %v6984_v38 = vadd.f32 %v6888_v13, %v18373_v59  ;;  %vm10428_vm8 = vcmask (%p6739_p0), 518146   ;;  %vm10445_vm9 = vcmask (%p6739_p0), 520196  }
 0x35e   : > { %v7128_v7 = vadd.f32 %v18365_v63, %v6935_v33  ;;  %v6983_v8 = vadd.f32 %v6887_v62, %v6791_v56  ;;  %15255 = vmatprep.subr.bf16.mxu0 %v15254_v20  ;;  %15857 = vmatprep.subr.bf16.mxu1 %v15254_v20  ;;  %v6745_v43 = vld [vmem:[#allocation3 + $0x28] sm:$0x3]  ;;  %v6841_v57 = vld [vmem:[#allocation3 + $0x10] sm:$0x3]  ;;  %v7034_v2 = vld [vmem:[#allocation3 + $0x40] sm:$0x3]  ;;  %v18385_v25 = vadd.f32 %v18377_v21, %v6791_v56 }
 0x35f   : > { %v6937_v1 = vadd.f32 %v6841_v57, %v6745_v43  ;;  %v6793_v40 = vld [vmem:[#allocation3 + $0x1d8] sm:$0x3]  ;;  %v6889_v52 = vld [vmem:[#allocation3 + $0x1c0] sm:$0x3]  ;;  %v7322_v3 = vrot.slane %v7129_v24, 1  ;;  %v7611_v32 = vrot.slane %v7129_v24, 2  ;;  %v7177_v10 = vadd.f32 %v18379_v29, %v6984_v38 }
 0x360   : > { %v7321_v17 = vrot.slane %v7128_v7, 1  ;;  %v7610_v53 = vrot.slane %v7128_v7, 2  ;;  %v7176_v34 = vadd.f32 %v18377_v21, %v6983_v8  ;;  %v6985_v14 = vadd.f32 %v6889_v52, %v6793_v40  ;;  %v7082_v18 = vld [vmem:[#allocation3 + $0x1f0] sm:$0x3]  ;;  %v18389_v22 = vld [vmem:[#allocation3 + $0x48] sm:$0xff]  ;;  %v18411_v8 = vld [vmem:[#allocation3 + $0x1f8] sm:$0xff] }
 0x361   : > { %15257 = vmatpush3.bf16.msra.mxu0 %v15254_v20  ;;  %15861 = vmatpush3.bf16.msra.mxu1 %v15254_v20  ;;  %v7130_v35 = vadd.f32 %v7034_v2, %v6937_v1  ;;  %v18391_v39 = vld [vmem:[#allocation3 + $0x50] sm:$0xff]  ;;  %v7131_v44 = vadd.f32 %v18389_v22, %v6938_v16  ;;  %v7402_v49 = vrot.slane %v7177_v10, 1  ;;  %v7691_v55 = vrot.slane %v7177_v10, 2  ;;  %v6748_v62 = vld [vmem:[#allocation3 + $0x40] sm:$0x3]  ;;  %v13290_v60 = vld [vmem:[%s21233_s2 + $0x68] sm:$0xff] (%p6739_p0) }
 0x362   : > { %v7401_v26 = vrot.slane %v7176_v34, 1  ;;  %v7690_v30 = vrot.slane %v7176_v34, 2  ;;  %15259 = vmatprep.subr.bf16.mxu0 %v18363_v12  ;;  %15858 = vmatprep.subr.bf16.mxu1 %v18363_v12  ;;  %v7323_v48 = vsel %vm7320_vm5, %v7321_v17, %v7322_v3  ;;  %v7612_v46 = vsel %vm7609_vm6, %v7610_v53, %v7611_v32  ;;  %v18415_v2 = vld [vmem:[#allocation3 + $0x200] sm:$0xff]  ;;  %v6796_v17 = vld [vmem:[#allocation3 + $0x1f0] sm:$0x3] }
 0x363   : > { %v7545_v5 = vadd.f32 %v7323_v48, %v7128_v7  ;;  %v7324_v4 = vrot.slane %v7130_v35, 1  ;;  %v7613_v37 = vrot.slane %v7130_v35, 2  ;;  %v7178_v9 = vadd.f32 %v7082_v18, %v6985_v14  ;;  %v6892_v53 = vld [vmem:[#allocation3 + $0x1d8] sm:$0x3]  ;;  %v13289_v54 = vld [vmem:[%s21233_s2 + $0x60] sm:$0xff] (%p6739_p0) }
 0x364   : > { %v7403_v28 = vsel %vm7320_vm5, %v7401_v26, %v7402_v49  ;;  %v7692_v23 = vsel %vm7609_vm6, %v7690_v30, %v7691_v55  ;;  %v18401_v47 = vadd.f32 %v18391_v39, %v6939_v41  ;;  %v7326_v31 = vrot.slane %v7131_v44, 1  ;;  %v6844_v41 = vld [vmem:[#allocation3 + $0x28] sm:$0x3]  ;;  %v7037_v18 = vld [vmem:[#allocation3 + $0x58] sm:$0x3] }
 0x365   : > { %15261 = vmatpush3.bf16.msra.mxu0 %v18363_v12  ;;  %15862 = vmatpush3.bf16.msra.mxu1 %v18363_v12  ;;  %v7834_v20 = vadd.f32 %v7612_v46, %v7545_v5  ;;  %v7577_v36 = vadd.f32 %v7403_v28, %v7176_v34  ;;  %v7325_v42 = vsel %vm7320_vm5, %v7322_v3, %v7324_v4  ;;  %v7404_v61 = vrot.slane %v7178_v9, 1  ;;  %v7085_v26 = vld [vmem:[#allocation3 + $0x208] sm:$0x3] }
 0x366   : > { %15263 = vmatprep.subr.bf16.mxu0 %v18371_v50  ;;  %15859 = vmatprep.subr.bf16.mxu1 %v18371_v50  ;;  %v7546_v51 = vadd.f32 %v7325_v42, %v7129_v24  ;;  %v7614_v33 = vsel %vm7609_vm6, %v7611_v32, %v7613_v37  ;;  %v7693_v45 = vrot.slane %v7178_v9, 2  ;;  %v7327_v56 = vrot.slane %v18401_v47, 1  ;;  %v18433_v9 = vld [vmem:[#allocation3 + $0x68] sm:$0xff] }
 0x367   : > { %v7898_v16 = vmul.f32 0.11111111, %v7834_v20  ;;  %v7866_v7 = vadd.f32 %v7692_v23, %v7577_v36  ;;  %v7405_v12 = vsel %vm7320_vm5, %v7402_v49, %v7404_v61  ;;  %v7615_v13 = vrot.slane %v7131_v44, 2 }
 0x368   : > { %v7835_v38 = vadd.f32 %v7614_v33, %v7546_v51  ;;  %v7578_v43 = vadd.f32 %v7405_v12, %v7177_v10  ;;  %v7694_v57 = vsel %vm7609_vm6, %v7691_v55, %v7693_v45  ;;  %v7328_v24 = vsel %vm7320_vm5, %v7326_v31, %v7327_v56 }
 0x369   : > { %15265 = vmatpush3.bf16.msra.mxu0 %v18371_v50  ;;  %15863 = vmatpush3.bf16.msra.mxu1 %v18371_v50  ;;  %v7930_v34 = vmul.f32 0.11111111, %v7866_v7  ;;  %v7547_v1 = vadd.f32 %v7328_v24, %v7131_v44  ;;  %v7616_v40 = vrot.slane %v18401_v47, 2  ;;  %v6987_v52 = vadd.f32 %v18379_v29, %v18373_v59  ;;  %v18430_v44 = vld [vmem:[#allocation3 + $0x60] sm:$0xff] }
 0x36a   : > { %15011 = vmatprep.mubr.msk.f32.mxu0 %vm137_vm3, %v7898_v16  ;;  %v7899_v3 = vmul.f32 0.11111111, %v7835_v38  ;;  %v7867_v32 = vadd.f32 %v7694_v57, %v7578_v43  ;;  %v7179_v10 = vadd.f32 %v18411_v8, %v18385_v25  ;;  %v6940_v14 = vadd.f32 %v6844_v41, %v6748_v62  ;;  %v18445_v16 = vld [vmem:[#allocation3 + $0x210] sm:$0xff]  ;;  %v6847_v41 = vld [vmem:[#allocation3 + $0x40] sm:$0x3] }
 0x36b   : > { %15059 = vmatprep.mubr.msk.f32.mxu1 %vm137_vm3, %v7930_v34  ;;  %v7617_v50 = vsel %vm7609_vm6, %v7615_v13, %v7616_v40  ;;  %v7180_v30 = vadd.f32 %v18415_v2, %v6987_v52  ;;  %v6988_v35 = vadd.f32 %v6892_v53, %v6796_v17  ;;  %v6941_v59 = vadd.f32 %v18389_v22, %v18365_v63  ;;  %v6751_v13 = vld [vmem:[#allocation3 + $0x58] sm:$0x3] }
 0x36c   : > { %15012 = vmatmul.mubr.msk.f32.vlgmr.msra.gmra.mrb[0].mxu0 %vm137_vm3, %v7899_v3  ;;  %v7931_v48 = vmul.f32 0.11111111, %v7867_v32  ;;  %v7836_v46 = vadd.f32 %v7617_v50, %v7547_v1  ;;  %v7406_v25 = vrot.slane %v7179_v10, 1  ;;  %v7695_v49 = vrot.slane %v7179_v10, 2  ;;  %v18452_v17 = vld [vmem:[#allocation3 + $0x218] sm:$0xff] }
 0x36d   : > { %v7407_v55 = vrot.slane %v7180_v30, 1  ;;  %v7696_v5 = vrot.slane %v7180_v30, 2  ;;  %v7133_v4 = vadd.f32 %v7037_v18, %v6940_v14  ;;  %v7181_v37 = vadd.f32 %v7085_v26, %v6988_v35  ;;  %v6799_v50 = vld [vmem:[#allocation3 + $0x208] sm:$0x3] }
 0x36e   : > { %15060 = vmatmul.mubr.msk.f32.vlgmr.msra.gmra.mrb[0].mxu1 %vm137_vm3, %v7931_v48  ;;  %v7900_v28 = vmul.f32 0.11111111, %v7836_v46  ;;  %v6942_v63 = vadd.f32 %v18391_v39, %v18367_v6  ;;  %v7134_v23 = vadd.f32 %v18430_v44, %v6941_v59  ;;  %v6989_v31 = vadd.f32 %v18411_v8, %v18377_v21  ;;  %v18461_v46 = vld [vmem:[#allocation3 + $0x78] sm:$0xff] }
 0x36f   : > { %v7408_v20 = vsel %vm7320_vm5, %v7406_v25, %v7407_v55  ;;  %v7697_v36 = vsel %vm7609_vm6, %v7695_v49, %v7696_v5  ;;  %v7329_v42 = vrot.slane %v7133_v4, 1  ;;  %v7618_v61 = vrot.slane %v7133_v4, 2  ;;  %v7088_v4 = vld [vmem:[#allocation3 + $0x220] sm:$0x3] }
 0x370   : > { %15014 = vmatprep.mubr.msk.f32.mxu0 %vm137_vm3, %v7900_v28  ;;  %v7579_v51 = vadd.f32 %v7408_v20, %v7179_v10  ;;  %v7409_v33 = vrot.slane %v7181_v37, 1  ;;  %v7698_v45 = vrot.slane %v7181_v37, 2  ;;  %v7135_v62 = vadd.f32 %v18433_v9, %v6942_v63  ;;  %v7040_v10 = vld [vmem:[#allocation3 + $0x70] sm:$0x3] }
 0x371   : > { %v7330_v6 = vsel %vm7320_vm5, %v7327_v56, %v7329_v42  ;;  %v7619_v7 = vsel %vm7609_vm6, %v7616_v40, %v7618_v61  ;;  %v7331_v21 = vrot.slane %v7134_v23, 1  ;;  %v7620_v12 = vrot.slane %v7134_v23, 2 }
 0x372   : > { %v7868_v38 = vadd.f32 %v7697_v36, %v7579_v51  ;;  %v7548_v43 = vadd.f32 %v7330_v6, %v18401_v47  ;;  %v7410_v57 = vsel %vm7320_vm5, %v7407_v55, %v7409_v33  ;;  %v7699_v24 = vsel %vm7609_vm6, %v7696_v5, %v7698_v45 }
 0x373   : > { %v7580_v53 = vadd.f32 %v7410_v57, %v7180_v30  ;;  %v7332_v34 = vrot.slane %v7135_v62, 1  ;;  %v7621_v1 = vrot.slane %v7135_v62, 2  ;;  %v6990_v56 = vadd.f32 %v18415_v2, %v18379_v29  ;;  %v6895_v30 = vld [vmem:[#allocation3 + $0x1f0] sm:$0x3] }
 0x374   : > { %v7932_v40 = vmul.f32 0.11111111, %v7868_v38  ;;  %v7837_v52 = vadd.f32 %v7619_v7, %v7548_v43  ;;  %v7182_v3 = vadd.f32 %v18445_v16, %v6989_v31  ;;  %v6943_v32 = vadd.f32 %v6847_v41, %v6751_v13  ;;  %v18480_v43 = vld [vmem:[#allocation3 + $0x228] sm:$0xff]  ;;  %v18482_v57 = vld [vmem:[#allocation3 + $0x230] sm:$0xff] }
 0x375   : > { %v7869_v14 = vadd.f32 %v7699_v24, %v7580_v53  ;;  %v7333_v47 = vsel %vm7320_vm5, %v7331_v21, %v7332_v34  ;;  %v7622_v18 = vsel %vm7609_vm6, %v7620_v12, %v7621_v1  ;;  %v7183_v26 = vadd.f32 %v18452_v17, %v6990_v56  ;;  %v6754_v24 = vld [vmem:[#allocation3 + $0x70] sm:$0x3] }
 0x376   : > { %15062 = vmatprep.mubr.msk.f32.mxu1 %vm137_vm3, %v7932_v40  ;;  %v7901_v35 = vmul.f32 0.11111111, %v7837_v52  ;;  %v7549_v59 = vadd.f32 %v7333_v47, %v7134_v23  ;;  %v7411_v29 = vrot.slane %v7182_v3, 1  ;;  %v7700_v48 = vrot.slane %v7182_v3, 2  ;;  %v18468_v23 = vld [vmem:[#allocation3 + $0x80] sm:$0xff] }
 0x377   : > { %v7933_v25 = vmul.f32 0.11111111, %v7869_v14  ;;  %v7412_v49 = vrot.slane %v7183_v26, 1  ;;  %v7701_v55 = vrot.slane %v7183_v26, 2  ;;  %v7136_v5 = vadd.f32 %v7040_v10, %v6943_v32  ;;  %v6850_v40 = vld [vmem:[#allocation3 + $0x58] sm:$0x3] }
 0x378   : > { %15015 = vmatmul.mubr.msk.f32.gmra.mrb[2].mxu0 %vm137_vm3, %v7901_v35  ;;  %v7838_v37 = vadd.f32 %v7622_v18, %v7549_v59  ;;  %v6991_v28 = vadd.f32 %v6895_v30, %v6799_v50  ;;  %v6944_v63 = vadd.f32 %v18430_v44, %v18389_v22  ;;  %v6945_v31 = vadd.f32 %v18433_v9, %v18391_v39  ;;  %v6802_v10 = vld [vmem:[#allocation3 + $0x220] sm:$0x3]  ;;  %v7043_v30 = vld [vmem:[#allocation3 + $0x88] sm:$0x3] }
 0x379   : > { %15063 = vmatmul.mubr.msk.f32.gmra.mrb[2].mxu1 %vm137_vm3, %v7933_v25  ;;  %v7413_v20 = vsel %vm7320_vm5, %v7411_v29, %v7412_v49  ;;  %v7702_v36 = vsel %vm7609_vm6, %v7700_v48, %v7701_v55  ;;  %v7334_v42 = vrot.slane %v7136_v5, 1  ;;  %v7623_v61 = vrot.slane %v7136_v5, 2  ;;  %v7091_v25 = vld [vmem:[#allocation3 + $0x238] sm:$0x3] }
 0x37a   : > { %v7902_v51 = vmul.f32 0.11111111, %v7838_v37  ;;  %v7581_v33 = vadd.f32 %v7413_v20, %v7182_v3  ;;  %v7184_v45 = vadd.f32 %v7088_v4, %v6991_v28  ;;  %v7137_v6 = vadd.f32 %v18461_v46, %v6944_v63 }
 0x37b   : > { %v7335_v22 = vsel %vm7320_vm5, %v7332_v34, %v7334_v42  ;;  %v7624_v7 = vsel %vm7609_vm6, %v7621_v1, %v7623_v61  ;;  %v7138_v39 = vadd.f32 %v18468_v23, %v6945_v31  ;;  %v6992_v21 = vadd.f32 %v18445_v16, %v18411_v8  ;;  %v18496_v42 = vld [vmem:[#allocation3 + $0x90] sm:$0xff] }
 0x37c   : > { %15017 = vmatprep.mubr.msk.f32.mxu0 %vm137_vm3, %v7902_v51  ;;  %v7870_v12 = vadd.f32 %v7702_v36, %v7581_v33  ;;  %v7550_v13 = vadd.f32 %v7335_v22, %v7135_v62  ;;  %v7414_v41 = vrot.slane %v7184_v45, 1  ;;  %v7703_v38 = vrot.slane %v7184_v45, 2  ;;  %v6898_v62 = vld [vmem:[#allocation3 + $0x208] sm:$0x3] }
 0x37d   : > { %v7336_v53 = vrot.slane %v7137_v6, 1  ;;  %v7337_v34 = vrot.slane %v7138_v39, 1  ;;  %v7625_v56 = vrot.slane %v7137_v6, 2  ;;  %v7626_v1 = vrot.slane %v7138_v39, 2 }
 0x37e   : > { %v7934_v52 = vmul.f32 0.11111111, %v7870_v12  ;;  %v7839_v3 = vadd.f32 %v7624_v7, %v7550_v13  ;;  %v7415_v8 = vsel %vm7320_vm5, %v7412_v49, %v7414_v41  ;;  %v7704_v32 = vsel %vm7609_vm6, %v7701_v55, %v7703_v38 }
 0x37f   : > { %v7582_v14 = vadd.f32 %v7415_v8, %v7183_v26  ;;  %v7338_v47 = vsel %vm7320_vm5, %v7336_v53, %v7337_v34  ;;  %v7627_v18 = vsel %vm7609_vm6, %v7625_v56, %v7626_v1  ;;  %v6993_v50 = vadd.f32 %v18452_v17, %v18415_v2 }
 0x380   : > { %15065 = vmatprep.mubr.msk.f32.mxu1 %vm137_vm3, %v7934_v52  ;;  %v7903_v35 = vmul.f32 0.11111111, %v7839_v3  ;;  %v7551_v59 = vadd.f32 %v7338_v47, %v7137_v6  ;;  %v7185_v29 = vadd.f32 %v18480_v43, %v6992_v21  ;;  %v6946_v48 = vadd.f32 %v6850_v40, %v6754_v24  ;;  %v18500_v6 = vld [vmem:[#allocation3 + $0x98] sm:$0xff]  ;;  %v6757_v40 = vld [vmem:[#allocation3 + $0x88] sm:$0x3] }
 0x381   : > { %v7871_v49 = vadd.f32 %v7704_v32, %v7582_v14  ;;  %v7186_v55 = vadd.f32 %v18482_v57, %v6993_v50  ;;  %v6994_v26 = vadd.f32 %v6898_v62, %v6802_v10  ;;  %v6947_v5 = vadd.f32 %v18461_v46, %v18430_v44  ;;  %v6853_v52 = vld [vmem:[#allocation3 + $0x70] sm:$0x3]  ;;  %v18512_v62 = vld [vmem:[#allocation3 + $0x240] sm:$0xff]  ;;  %v18516_v47 = vld [vmem:[#allocation3 + $0x248] sm:$0xff] }
 0x382   : > { %15018 = vmatmul.mubr.msk.f32.gmra.mrb[4].mxu0 %vm137_vm3, %v7903_v35  ;;  %v7840_v4 = vadd.f32 %v7627_v18, %v7551_v59  ;;  %v7416_v2 = vrot.slane %v7185_v29, 1  ;;  %v7705_v37 = vrot.slane %v7185_v29, 2  ;;  %v7139_v28 = vadd.f32 %v7043_v30, %v6946_v48  ;;  %v7046_v18 = vld [vmem:[#allocation3 + $0xa0] sm:$0x3] }
 0x383   : > { %v7935_v63 = vmul.f32 0.11111111, %v7871_v49  ;;  %v7417_v31 = vrot.slane %v7186_v55, 1  ;;  %v7706_v20 = vrot.slane %v7186_v55, 2  ;;  %v7187_v36 = vadd.f32 %v7091_v25, %v6994_v26  ;;  %v6901_v48 = vld [vmem:[#allocation3 + $0x220] sm:$0x3] }
 0x384   : > { %v7904_v61 = vmul.f32 0.11111111, %v7840_v4  ;;  %v7339_v51 = vrot.slane %v7139_v28, 1  ;;  %v7628_v33 = vrot.slane %v7139_v28, 2  ;;  %v6948_v45 = vadd.f32 %v18468_v23, %v18433_v9  ;;  %v18525_v28 = vld [vmem:[#allocation3 + $0xa8] sm:$0xff] }
 0x385   : > { %15066 = vmatmul.mubr.msk.f32.gmra.mrb[4].mxu1 %vm137_vm3, %v7935_v63  ;;  %v7418_v44 = vsel %vm7320_vm5, %v7416_v2, %v7417_v31  ;;  %v7707_v22 = vsel %vm7609_vm6, %v7705_v37, %v7706_v20  ;;  %v7419_v7 = vrot.slane %v7187_v36, 1  ;;  %v7708_v21 = vrot.slane %v7187_v36, 2  ;;  %v7094_v37 = vld [vmem:[#allocation3 + $0x250] sm:$0x3] }
 0x386   : > { %15020 = vmatprep.mubr.msk.f32.mxu0 %vm137_vm3, %v7904_v61  ;;  %v7583_v12 = vadd.f32 %v7418_v44, %v7185_v29  ;;  %v7340_v13 = vsel %vm7320_vm5, %v7337_v34, %v7339_v51  ;;  %v7629_v41 = vsel %vm7609_vm6, %v7626_v1, %v7628_v33  ;;  %v7140_v38 = vadd.f32 %v18496_v42, %v6947_v5  ;;  %v6805_v29 = vld [vmem:[#allocation3 + $0x238] sm:$0x3] }
 0x387   : > { %v7552_v9 = vadd.f32 %v7340_v13, %v7138_v39  ;;  %v7420_v24 = vsel %vm7320_vm5, %v7417_v31, %v7419_v7  ;;  %v7709_v53 = vsel %vm7609_vm6, %v7706_v20, %v7708_v21  ;;  %v7141_v56 = vadd.f32 %v18500_v6, %v6948_v45  ;;  %v18533_v7 = vld [vmem:[#allocation3 + $0xb0] sm:$0xff] }
 0x388   : > { %v7872_v3 = vadd.f32 %v7707_v22, %v7583_v12  ;;  %v7584_v8 = vadd.f32 %v7420_v24, %v7186_v55  ;;  %v7341_v32 = vrot.slane %v7140_v38, 1  ;;  %v7630_v10 = vrot.slane %v7140_v38, 2 }
 0x389   : > { %v7841_v34 = vadd.f32 %v7629_v41, %v7552_v9  ;;  %v7342_v14 = vrot.slane %v7141_v56, 1  ;;  %v7631_v1 = vrot.slane %v7141_v56, 2  ;;  %v6995_v39 = vadd.f32 %v18480_v43, %v18445_v16 }
 0x38a   : > { %v7936_v50 = vmul.f32 0.11111111, %v7872_v3  ;;  %v7873_v30 = vadd.f32 %v7709_v53, %v7584_v8  ;;  %v6996_v35 = vadd.f32 %v18482_v57, %v18452_v17  ;;  %v6949_v59 = vadd.f32 %v6853_v52, %v6757_v40  ;;  %v18542_v8 = vld [vmem:[#allocation3 + $0x258] sm:$0xff] }
 0x38b   : > { %v7905_v25 = vmul.f32 0.11111111, %v7841_v34  ;;  %v7343_v49 = vsel %vm7320_vm5, %v7341_v32, %v7342_v14  ;;  %v7632_v55 = vsel %vm7609_vm6, %v7630_v10, %v7631_v1  ;;  %v7188_v26 = vadd.f32 %v18512_v62, %v6995_v39  ;;  %v6856_v39 = vld [vmem:[#allocation3 + $0x88] sm:$0x3] }
 0x38c   : > { %15068 = vmatprep.mubr.msk.f32.mxu1 %vm137_vm3, %v7936_v50  ;;  %v7937_v16 = vmul.f32 0.11111111, %v7873_v30  ;;  %v7553_v5 = vadd.f32 %v7343_v49, %v7140_v38  ;;  %v7189_v4 = vadd.f32 %v18516_v47, %v6996_v35  ;;  %v7142_v2 = vadd.f32 %v7046_v18, %v6949_v59  ;;  %v7049_v59 = vld [vmem:[#allocation3 + $0xb8] sm:$0x3] }
 0x38d   : > { %15021 = vmatmul.mubr.msk.f32.gmra.mrb[6].mxu0 %vm137_vm3, %v7905_v25  ;;  %v7421_v17 = vrot.slane %v7188_v26, 1  ;;  %v7710_v63 = vrot.slane %v7188_v26, 2  ;;  %v6997_v31 = vadd.f32 %v6901_v48, %v6805_v29  ;;  %v6950_v20 = vadd.f32 %v18496_v42, %v18461_v46  ;;  %v6808_v29 = vld [vmem:[#allocation3 + $0x250] sm:$0x3] }
 0x38e   : > { %15069 = vmatmul.mubr.msk.f32.gmra.mrb[6].mxu1 %vm137_vm3, %v7937_v16  ;;  %v7842_v36 = vadd.f32 %v7632_v55, %v7553_v5  ;;  %v7422_v61 = vrot.slane %v7189_v4, 1  ;;  %v7711_v51 = vrot.slane %v7189_v4, 2  ;;  %v7344_v33 = vrot.slane %v7142_v2, 1 }
 0x38f   : > { %v7633_v45 = vrot.slane %v7142_v2, 2  ;;  %v7190_v44 = vadd.f32 %v7094_v37, %v6997_v31  ;;  %v6951_v22 = vadd.f32 %v18500_v6, %v18468_v23  ;;  %v7143_v21 = vadd.f32 %v18525_v28, %v6950_v20  ;;  %v7097_v31 = vld [vmem:[#allocation3 + $0x268] sm:$0x3] }
 0x390   : > { %v7906_v12 = vmul.f32 0.11111111, %v7842_v36  ;;  %v7423_v13 = vsel %vm7320_vm5, %v7421_v17, %v7422_v61  ;;  %v7712_v46 = vsel %vm7609_vm6, %v7710_v63, %v7711_v51  ;;  %v7345_v41 = vsel %vm7320_vm5, %v7342_v14, %v7344_v33  ;;  %v18562_v33 = vld [vmem:[#allocation3 + $0xc8] sm:$0xff] }
 0x391   : > { %v7585_v38 = vadd.f32 %v7423_v13, %v7188_v26  ;;  %v7554_v9 = vadd.f32 %v7345_v41, %v7141_v56  ;;  %v7634_v24 = vsel %vm7609_vm6, %v7631_v1, %v7633_v45  ;;  %v7424_v53 = vrot.slane %v7190_v44, 1  ;;  %v18547_v56 = vld [vmem:[#allocation3 + $0x260] sm:$0xff]  ;;  %v6904_v26 = vld [vmem:[#allocation3 + $0x238] sm:$0x3] }
 0x392   : > { %15023 = vmatprep.mubr.msk.f32.mxu0 %vm137_vm3, %v7906_v12  ;;  %v7713_v40 = vrot.slane %v7190_v44, 2  ;;  %v7144_v23 = vadd.f32 %v18533_v7, %v6951_v22  ;;  %v7346_v52 = vrot.slane %v7143_v21, 1  ;;  %v7635_v3 = vrot.slane %v7143_v21, 2  ;;  %v6760_v1 = vld [vmem:[#allocation3 + $0xa0] sm:$0x3] }
 0x393   : > { %v7874_v32 = vadd.f32 %v7712_v46, %v7585_v38  ;;  %v7843_v10 = vadd.f32 %v7634_v24, %v7554_v9  ;;  %v7425_v34 = vsel %vm7320_vm5, %v7422_v61, %v7424_v53  ;;  %v6998_v14 = vadd.f32 %v18512_v62, %v18480_v43 }
 0x394   : > { %v7586_v18 = vadd.f32 %v7425_v34, %v7189_v4  ;;  %v7714_v50 = vsel %vm7609_vm6, %v7711_v51, %v7713_v40  ;;  %v7347_v30 = vrot.slane %v7144_v23, 1  ;;  %v7636_v35 = vrot.slane %v7144_v23, 2 }
 0x395   : > { %v7938_v48 = vmul.f32 0.11111111, %v7874_v32  ;;  %v7907_v25 = vmul.f32 0.11111111, %v7843_v10  ;;  %v6999_v49 = vadd.f32 %v18516_v47, %v18482_v57  ;;  %v7191_v55 = vadd.f32 %v18542_v8, %v6998_v14  ;;  %v18558_v57 = vld [vmem:[#allocation3 + $0xc0] sm:$0xff] }
 0x396   : > { %v7875_v43 = vadd.f32 %v7714_v50, %v7586_v18  ;;  %v7348_v16 = vsel %vm7320_vm5, %v7346_v52, %v7347_v30  ;;  %v7637_v5 = vsel %vm7609_vm6, %v7635_v3, %v7636_v35  ;;  %v6952_v4 = vadd.f32 %v6856_v39, %v6760_v1  ;;  %v6763_v50 = vld [vmem:[#allocation3 + $0xb8] sm:$0x3] }
 0x397   : > { %15071 = vmatprep.mubr.msk.f32.mxu1 %vm137_vm3, %v7938_v48  ;;  %15024 = vmatmul.mubr.msk.f32.gmra.mrb[8].mxu0 %vm137_vm3, %v7907_v25  ;;  %v7555_v2 = vadd.f32 %v7348_v16, %v7143_v21  ;;  %v7192_v37 = vadd.f32 %v18547_v56, %v6999_v49  ;;  %v7426_v17 = vrot.slane %v7191_v55, 1  ;;  %v7715_v63 = vrot.slane %v7191_v55, 2  ;;  %v18581_v25 = vld [vmem:[#allocation3 + $0x270] sm:$0xff] }
 0x398   : > { %v7939_v20 = vmul.f32 0.11111111, %v7875_v43  ;;  %v7145_v36 = vadd.f32 %v7049_v59, %v6952_v4  ;;  %v7000_v61 = vadd.f32 %v6904_v26, %v6808_v29  ;;  %v6953_v51 = vadd.f32 %v18525_v28, %v18496_v42  ;;  %v6859_v59 = vld [vmem:[#allocation3 + $0xa0] sm:$0x3]  ;;  %v6907_v49 = vld [vmem:[#allocation3 + $0x250] sm:$0x3] }
 0x399   : > { %v7844_v45 = vadd.f32 %v7637_v5, %v7555_v2  ;;  %v7427_v44 = vrot.slane %v7192_v37, 1  ;;  %v7716_v22 = vrot.slane %v7192_v37, 2  ;;  %v6954_v21 = vadd.f32 %v18533_v7, %v18500_v6  ;;  %v18586_v5 = vld [vmem:[#allocation3 + $0x278] sm:$0xff]  ;;  %v7052_v4 = vld [vmem:[#allocation3 + $0xd0] sm:$0x3] }
 0x39a   : > { %15072 = vmatmul.mubr.msk.f32.gmra.mrb[8].mxu1 %vm137_vm3, %v7939_v20  ;;  %v7349_v12 = vrot.slane %v7145_v36, 1  ;;  %v7638_v13 = vrot.slane %v7145_v36, 2  ;;  %v7193_v46 = vadd.f32 %v7097_v31, %v7000_v61  ;;  %v7146_v41 = vadd.f32 %v18558_v57, %v6953_v51  ;;  %v7100_v31 = vld [vmem:[#allocation3 + $0x280] sm:$0x3] }
 0x39b   : > { %v7908_v38 = vmul.f32 0.11111111, %v7844_v45  ;;  %v7428_v9 = vsel %vm7320_vm5, %v7426_v17, %v7427_v44  ;;  %v7717_v42 = vsel %vm7609_vm6, %v7715_v63, %v7716_v22  ;;  %v18571_v24 = vadd.f32 %v18562_v33, %v6954_v21  ;;  %v18600_v21 = vld [vmem:[#allocation3 + $0xe0] sm:$0xff] }
 0x39c   : > { %v7587_v53 = vadd.f32 %v7428_v9, %v7191_v55  ;;  %v7350_v40 = vsel %vm7320_vm5, %v7347_v30, %v7349_v12  ;;  %v7639_v6 = vsel %vm7609_vm6, %v7636_v35, %v7638_v13  ;;  %v7429_v52 = vrot.slane %v7193_v46, 1 }
 0x39d   : > { %15026 = vmatprep.mubr.msk.f32.mxu0 %vm137_vm3, %v7908_v38  ;;  %v7556_v3 = vadd.f32 %v7350_v40, %v7144_v23  ;;  %v7718_v32 = vrot.slane %v7193_v46, 2  ;;  %v7351_v10 = vrot.slane %v7146_v41, 1  ;;  %v7352_v34 = vrot.slane %v18571_v24, 1  ;;  %v6811_v23 = vld [vmem:[#allocation3 + $0x268] sm:$0x3] }
 0x39e   : > { %v7876_v14 = vadd.f32 %v7717_v42, %v7587_v53  ;;  %v7430_v1 = vsel %vm7320_vm5, %v7427_v44, %v7429_v52  ;;  %v7640_v39 = vrot.slane %v7146_v41, 2  ;;  %v7641_v18 = vrot.slane %v18571_v24, 2 }
 0x39f   : > { %v7845_v29 = vadd.f32 %v7639_v6, %v7556_v3  ;;  %v7588_v30 = vadd.f32 %v7430_v1, %v7192_v37  ;;  %v7719_v35 = vsel %vm7609_vm6, %v7716_v22, %v7718_v32  ;;  %v7353_v48 = vsel %vm7320_vm5, %v7351_v10, %v7352_v34  ;;  %v18598_v22 = vld [vmem:[#allocation3 + $0xd8] sm:$0xff] }
 0x3a0   : > { %v7940_v55 = vmul.f32 0.11111111, %v7876_v14  ;;  %v7557_v26 = vadd.f32 %v7353_v48, %v7146_v41  ;;  %v7642_v43 = vsel %vm7609_vm6, %v7640_v39, %v7641_v18  ;;  %v7001_v16 = vadd.f32 %v18542_v8, %v18512_v62 }
 0x3a1   : > { %v7909_v2 = vmul.f32 0.11111111, %v7845_v29  ;;  %v7877_v37 = vadd.f32 %v7719_v35, %v7588_v30  ;;  %v7002_v17 = vadd.f32 %v18547_v56, %v18516_v47  ;;  %v6955_v63 = vadd.f32 %v6859_v59, %v6763_v50  ;;  %v6766_v59 = vld [vmem:[#allocation3 + $0xd0] sm:$0x3]  ;;  %v6862_v29 = vld [vmem:[#allocation3 + $0xb8] sm:$0x3] }
 0x3a2   : > { %15074 = vmatprep.mubr.msk.f32.mxu1 %vm137_vm3, %v7940_v55  ;;  %v7846_v20 = vadd.f32 %v7642_v43, %v7557_v26  ;;  %v7194_v36 = vadd.f32 %v18581_v25, %v7001_v16  ;;  %v7003_v61 = vadd.f32 %v6907_v49, %v6811_v23  ;;  %v6956_v51 = vadd.f32 %v18558_v57, %v18525_v28  ;;  %v18617_v43 = vld [vmem:[#allocation3 + $0x290] sm:$0xff] }
 0x3a3   : > { %15027 = vmatmul.mubr.msk.f32.gmra.mrb[10].mxu0 %vm137_vm3, %v7909_v2  ;;  %v7941_v62 = vmul.f32 0.11111111, %v7877_v37  ;;  %v7195_v45 = vadd.f32 %v18586_v5, %v7002_v17  ;;  %v7148_v44 = vadd.f32 %v7052_v4, %v6955_v63  ;;  %v6957_v47 = vadd.f32 %v18562_v33, %v18533_v7  ;;  %v6814_v17 = vld [vmem:[#allocation3 + $0x280] sm:$0x3]  ;;  %v6910_v63 = vld [vmem:[#allocation3 + $0x268] sm:$0x3] }
 0x3a4   : > { %v7910_v12 = vmul.f32 0.11111111, %v7846_v20  ;;  %v7431_v13 = vrot.slane %v7194_v36, 1  ;;  %v7720_v46 = vrot.slane %v7194_v36, 2  ;;  %v7196_v41 = vadd.f32 %v7100_v31, %v7003_v61 }
 0x3a5   : > { %15075 = vmatmul.mubr.msk.f32.gmra.mrb[10].mxu1 %vm137_vm3, %v7941_v62  ;;  %v7432_v28 = vrot.slane %v7195_v45, 1  ;;  %v7721_v38 = vrot.slane %v7195_v45, 2  ;;  %v7354_v9 = vrot.slane %v7148_v44, 1  ;;  %v7643_v42 = vrot.slane %v7148_v44, 2  ;;  %v7103_v44 = vld [vmem:[#allocation3 + $0x298] sm:$0x3] }
 0x3a6   : > { %15029 = vmatprep.mubr.msk.f32.mxu0 %vm137_vm3, %v7910_v12  ;;  %v7434_v53 = vrot.slane %v7196_v41, 1  ;;  %v7723_v40 = vrot.slane %v7196_v41, 2  ;;  %v7149_v7 = vadd.f32 %v18598_v22, %v6956_v51  ;;  %v7150_v6 = vadd.f32 %v18600_v21, %v6957_v47 }
 0x3a7   : > { %v7433_v52 = vsel %vm7320_vm5, %v7431_v13, %v7432_v28  ;;  %v7722_v3 = vsel %vm7609_vm6, %v7720_v46, %v7721_v38  ;;  %v7355_v32 = vsel %vm7320_vm5, %v7352_v34, %v7354_v9  ;;  %v7644_v10 = vsel %vm7609_vm6, %v7641_v18, %v7643_v42  ;;  %v18615_v18 = vld [vmem:[#allocation3 + $0x288] sm:$0xff]  ;;  %v18629_v13 = vld [vmem:[#allocation3 + $0xf0] sm:$0xff] }
 0x3a8   : > { %v7589_v14 = vadd.f32 %v7433_v52, %v7194_v36  ;;  %v7558_v1 = vadd.f32 %v7355_v32, %v18571_v24  ;;  %v7435_v39 = vsel %vm7320_vm5, %v7432_v28, %v7434_v53  ;;  %v7724_v50 = vsel %vm7609_vm6, %v7721_v38, %v7723_v40  ;;  %v7055_v24 = vld [vmem:[#allocation3 + $0xe8] sm:$0x3] }
 0x3a9   : > { %v7590_v30 = vadd.f32 %v7435_v39, %v7195_v45  ;;  %v7356_v35 = vrot.slane %v7149_v7, 1  ;;  %v7357_v48 = vrot.slane %v7150_v6, 1  ;;  %v7645_v23 = vrot.slane %v7149_v7, 2 }
 0x3aa   : > { %v7878_v49 = vadd.f32 %v7722_v3, %v7589_v14  ;;  %v7847_v55 = vadd.f32 %v7644_v10, %v7558_v1  ;;  %v7646_v26 = vrot.slane %v7150_v6, 2  ;;  %v7004_v34 = vadd.f32 %v18581_v25, %v18542_v8 }
 0x3ab   : > { %v7879_v16 = vadd.f32 %v7724_v50, %v7590_v30  ;;  %v7358_v4 = vsel %vm7320_vm5, %v7356_v35, %v7357_v48  ;;  %v7005_v2 = vadd.f32 %v18586_v5, %v18547_v56  ;;  %v6958_v37 = vadd.f32 %v6862_v29, %v6766_v59  ;;  %v18643_v35 = vld [vmem:[#allocation3 + $0x2a0] sm:$0xff] }
 0x3ac   : > { %v7942_v31 = vmul.f32 0.11111111, %v7878_v49  ;;  %v7911_v20 = vmul.f32 0.11111111, %v7847_v55  ;;  %v7559_v36 = vadd.f32 %v7358_v4, %v7149_v7  ;;  %v7647_v61 = vsel %vm7609_vm6, %v7645_v23, %v7646_v26  ;;  %v18632_v7 = vld [vmem:[#allocation3 + $0xf8] sm:$0xff]  ;;  %v18649_v4 = vld [vmem:[#allocation3 + $0x2a8] sm:$0xff] }
 0x3ad   : > { %v7943_v8 = vmul.f32 0.11111111, %v7879_v16  ;;  %v7197_v51 = vadd.f32 %v18615_v18, %v7004_v34  ;;  %v7198_v62 = vadd.f32 %v18617_v43, %v7005_v2  ;;  %v7151_v45 = vadd.f32 %v7055_v24, %v6958_v37  ;;  %v6769_v34 = vld [vmem:[#allocation3 + $0xe8] sm:$0x3]  ;;  %v6865_v24 = vld [vmem:[#allocation3 + $0xd0] sm:$0x3] }
 0x3ae   : > { %15077 = vmatprep.mubr.msk.f32.mxu1 %vm137_vm3, %v7942_v31  ;;  %15030 = vmatmul.mubr.msk.f32.gmra.mrb[12].mxu0 %vm137_vm3, %v7911_v20  ;;  %v7848_v56 = vadd.f32 %v7647_v61, %v7559_v36  ;;  %v7006_v47 = vadd.f32 %v6910_v63, %v6814_v17  ;;  %v6959_v12 = vadd.f32 %v18598_v22, %v18558_v57  ;;  %v7058_v2 = vld [vmem:[#allocation3 + $0x100] sm:$0x3]  ;;  %v6817_v37 = vld [vmem:[#allocation3 + $0x298] sm:$0x3]  ;;  %vm10462_vm10 = vcmask (%p6739_p0), 522246  }
 0x3af   : > { %15078 = vmatmul.mubr.msk.f32.gmra.mrb[12].mxu1 %vm137_vm3, %v7943_v8  ;;  %v7436_v46 = vrot.slane %v7197_v51, 1  ;;  %v7437_v41 = vrot.slane %v7198_v62, 1  ;;  %v7725_v28 = vrot.slane %v7197_v51, 2  ;;  %v7726_v38 = vrot.slane %v7198_v62, 2  ;;  %v6913_v36 = vld [vmem:[#allocation3 + $0x280] sm:$0x3] }
 0x3b0   : > { %v7912_v9 = vmul.f32 0.11111111, %v7848_v56  ;;  %v7359_v42 = vrot.slane %v7151_v45, 1  ;;  %v7648_v53 = vrot.slane %v7151_v45, 2  ;;  %v7199_v40 = vadd.f32 %v7103_v44, %v7006_v47  ;;  %v7106_v47 = vld [vmem:[#allocation3 + $0x2b0] sm:$0x3] }
 0x3b1   : > { %v7438_v52 = vsel %vm7320_vm5, %v7436_v46, %v7437_v41  ;;  %v7727_v3 = vsel %vm7609_vm6, %v7725_v28, %v7726_v38  ;;  %v6960_v57 = vadd.f32 %v18600_v21, %v18562_v33  ;;  %v7152_v32 = vadd.f32 %v18629_v13, %v6959_v12  ;;  %v18659_v28 = vld [vmem:[#allocation3 + $0x108] sm:$0xff] }
 0x3b2   : > { %15032 = vmatprep.mubr.msk.f32.mxu0 %vm137_vm3, %v7912_v9  ;;  %v7591_v10 = vadd.f32 %v7438_v52, %v7197_v51  ;;  %v7360_v14 = vsel %vm7320_vm5, %v7357_v48, %v7359_v42  ;;  %v7649_v1 = vsel %vm7609_vm6, %v7646_v26, %v7648_v53  ;;  %v7439_v39 = vrot.slane %v7199_v40, 1 }
 0x3b3   : > { %v7560_v50 = vadd.f32 %v7360_v14, %v7150_v6  ;;  %v7728_v59 = vrot.slane %v7199_v40, 2  ;;  %v7153_v29 = vadd.f32 %v18632_v7, %v6960_v57  ;;  %v7361_v30 = vrot.slane %v7152_v32, 1 }
 0x3b4   : > { %v7880_v23 = vadd.f32 %v7727_v3, %v7591_v10  ;;  %v7440_v33 = vsel %vm7320_vm5, %v7437_v41, %v7439_v39  ;;  %v7650_v49 = vrot.slane %v7152_v32, 2  ;;  %v7007_v55 = vadd.f32 %v18615_v18, %v18581_v25 }
 0x3b5   : > { %v7849_v48 = vadd.f32 %v7649_v1, %v7560_v50  ;;  %v7592_v16 = vadd.f32 %v7440_v33, %v7198_v62  ;;  %v7729_v26 = vsel %vm7609_vm6, %v7726_v38, %v7728_v59  ;;  %v7362_v6 = vrot.slane %v7153_v29, 1 }
 0x3b6   : > { %v7944_v17 = vmul.f32 0.11111111, %v7880_v23  ;;  %v7651_v63 = vrot.slane %v7153_v29, 2  ;;  %v7008_v31 = vadd.f32 %v18617_v43, %v18586_v5  ;;  %v7200_v20 = vadd.f32 %v18643_v35, %v7007_v55  ;;  %v18675_v55 = vld [vmem:[#allocation3 + $0x2b8] sm:$0xff] }
 0x3b7   : > { %v7913_v25 = vmul.f32 0.11111111, %v7849_v48  ;;  %v7881_v61 = vadd.f32 %v7729_v26, %v7592_v16  ;;  %v7363_v8 = vsel %vm7320_vm5, %v7361_v30, %v7362_v6  ;;  %v6961_v51 = vadd.f32 %v6865_v24, %v6769_v34  ;;  %v6772_v26 = vld [vmem:[#allocation3 + $0x100] sm:$0x3] }
 0x3b8   : > { %15080 = vmatprep.mubr.msk.f32.mxu1 %vm137_vm3, %v7944_v17  ;;  %v7561_v62 = vadd.f32 %v7363_v8, %v7152_v32  ;;  %v7652_v45 = vsel %vm7609_vm6, %v7650_v49, %v7651_v63  ;;  %v7201_v44 = vadd.f32 %v18649_v4, %v7008_v31  ;;  %v7441_v56 = vrot.slane %v7200_v20, 1  ;;  %v18666_v32 = vld [vmem:[#allocation3 + $0x110] sm:$0xff]  ;;  %v7061_v31 = vld [vmem:[#allocation3 + $0x118] sm:$0x3] }
 0x3b9   : > { %15033 = vmatmul.mubr.msk.f32.gmra.mrb[14].mxu0 %vm137_vm3, %v7913_v25  ;;  %v7945_v5 = vmul.f32 0.11111111, %v7881_v61  ;;  %v7730_v12 = vrot.slane %v7200_v20, 2  ;;  %v7154_v46 = vadd.f32 %v7058_v2, %v6961_v51  ;;  %v7009_v41 = vadd.f32 %v6913_v36, %v6817_v37  ;;  %v6916_v51 = vld [vmem:[#allocation3 + $0x298] sm:$0x3] }
 0x3ba   : > { %v7850_v38 = vadd.f32 %v7652_v45, %v7561_v62  ;;  %v7442_v9 = vrot.slane %v7201_v44, 1  ;;  %v7731_v42 = vrot.slane %v7201_v44, 2  ;;  %v6962_v53 = vadd.f32 %v18629_v13, %v18598_v22 }
 0x3bb   : > { %15081 = vmatmul.mubr.msk.f32.gmra.mrb[14].mxu1 %vm137_vm3, %v7945_v5  ;;  %v7364_v40 = vrot.slane %v7154_v46, 1  ;;  %v7653_v52 = vrot.slane %v7154_v46, 2  ;;  %v7202_v3 = vadd.f32 %v7106_v47, %v7009_v41  ;;  %v6963_v57 = vadd.f32 %v18632_v7, %v18600_v21  ;;  %v7109_v46 = vld [vmem:[#allocation3 + $0x2c8] sm:$0x3] }
 0x3bc   : > { %v7914_v10 = vmul.f32 0.11111111, %v7850_v38  ;;  %v7443_v14 = vsel %vm7320_vm5, %v7441_v56, %v7442_v9  ;;  %v7732_v1 = vsel %vm7609_vm6, %v7730_v12, %v7731_v42  ;;  %v7155_v39 = vadd.f32 %v18659_v28, %v6962_v53 }
 0x3bd   : > { %v7593_v50 = vadd.f32 %v7443_v14, %v7200_v20  ;;  %v7365_v22 = vsel %vm7320_vm5, %v7362_v6, %v7364_v40  ;;  %v7654_v59 = vsel %vm7609_vm6, %v7651_v63, %v7653_v52  ;;  %v7444_v30 = vrot.slane %v7202_v3, 1  ;;  %v6868_v6 = vld [vmem:[#allocation3 + $0xe8] sm:$0x3]  ;;  %v18681_v63 = vld [vmem:[#allocation3 + $0x2c0] sm:$0xff]  ;;  %v6820_v20 = vld [vmem:[#allocation3 + $0x2b0] sm:$0x3] }
 0x3be   : > { %15035 = vmatprep.mubr.msk.f32.mxu0 %vm137_vm3, %v7914_v10  ;;  %v7562_v23 = vadd.f32 %v7365_v22, %v7153_v29  ;;  %v7733_v33 = vrot.slane %v7202_v3, 2  ;;  %v7156_v21 = vadd.f32 %v18666_v32, %v6963_v57  ;;  %v7366_v49 = vrot.slane %v7155_v39, 1 }
 0x3bf   : > { %v7882_v34 = vadd.f32 %v7732_v1, %v7593_v50  ;;  %v7445_v24 = vsel %vm7320_vm5, %v7442_v9, %v7444_v30  ;;  %v7655_v48 = vrot.slane %v7155_v39, 2  ;;  %v7010_v16 = vadd.f32 %v18643_v35, %v18615_v18 }
 0x3c0   : > { %v7851_v2 = vadd.f32 %v7654_v59, %v7562_v23  ;;  %v7594_v37 = vadd.f32 %v7445_v24, %v7201_v44  ;;  %v7734_v17 = vsel %vm7609_vm6, %v7731_v42, %v7733_v33  ;;  %v7367_v29 = vrot.slane %v7156_v21, 1  ;;  %v18691_v42 = vld [vmem:[#allocation3 + $0x120] sm:$0xff] }
 0x3c1   : > { %v7946_v36 = vmul.f32 0.11111111, %v7882_v34  ;;  %v7656_v25 = vrot.slane %v7156_v21, 2  ;;  %v7011_v61 = vadd.f32 %v18649_v4, %v18617_v43  ;;  %v7203_v8 = vadd.f32 %v18675_v55, %v7010_v16  ;;  %v18707_v16 = vld [vmem:[#allocation3 + $0x2d0] sm:$0xff] }
 0x3c2   : > { %v7915_v18 = vmul.f32 0.11111111, %v7851_v2  ;;  %v7883_v62 = vadd.f32 %v7734_v17, %v7594_v37  ;;  %v7368_v45 = vsel %vm7320_vm5, %v7366_v49, %v7367_v29  ;;  %v6964_v44 = vadd.f32 %v6868_v6, %v6772_v26  ;;  %v6775_v17 = vld [vmem:[#allocation3 + $0x118] sm:$0x3] }
 0x3c3   : > { %15083 = vmatprep.mubr.msk.f32.mxu1 %vm137_vm3, %v7946_v36  ;;  %v7563_v56 = vadd.f32 %v7368_v45, %v7155_v39  ;;  %v7657_v47 = vsel %vm7609_vm6, %v7655_v48, %v7656_v25  ;;  %v7204_v5 = vadd.f32 %v18681_v63, %v7011_v61  ;;  %v7446_v12 = vrot.slane %v7203_v8, 1  ;;  %v18698_v39 = vld [vmem:[#allocation3 + $0x128] sm:$0xff]  ;;  %v7064_v61 = vld [vmem:[#allocation3 + $0x130] sm:$0x3] }
 0x3c4   : > { %15036 = vmatmul.mubr.msk.f32.gmra.mrb[16].mxu0 %vm137_vm3, %v7915_v18  ;;  %v7947_v43 = vmul.f32 0.11111111, %v7883_v62  ;;  %v7735_v41 = vrot.slane %v7203_v8, 2  ;;  %v7157_v38 = vadd.f32 %v7061_v31, %v6964_v44  ;;  %v7012_v9 = vadd.f32 %v6916_v51, %v6820_v20  ;;  %v6919_v44 = vld [vmem:[#allocation3 + $0x2b0] sm:$0x3] }
 0x3c5   : > { %v7852_v53 = vadd.f32 %v7657_v47, %v7563_v56  ;;  %v7447_v40 = vrot.slane %v7204_v5, 1  ;;  %v7736_v52 = vrot.slane %v7204_v5, 2  ;;  %v6965_v3 = vadd.f32 %v18659_v28, %v18629_v13 }
 0x3c6   : > { %15084 = vmatmul.mubr.msk.f32.gmra.mrb[16].mxu1 %vm137_vm3, %v7947_v43  ;;  %v7369_v57 = vrot.slane %v7157_v38, 1  ;;  %v7658_v10 = vrot.slane %v7157_v38, 2  ;;  %v7205_v14 = vadd.f32 %v7109_v46, %v7012_v9  ;;  %v6966_v1 = vadd.f32 %v18666_v32, %v18632_v7  ;;  %v7112_v38 = vld [vmem:[#allocation3 + $0x2e0] sm:$0x3] }
 0x3c7   : > { %v7916_v50 = vmul.f32 0.11111111, %v7852_v53  ;;  %v7448_v22 = vsel %vm7320_vm5, %v7446_v12, %v7447_v40  ;;  %v7737_v59 = vsel %vm7609_vm6, %v7735_v41, %v7736_v52  ;;  %v7158_v30 = vadd.f32 %v18691_v42, %v6965_v3 }
 0x3c8   : > { %v7595_v23 = vadd.f32 %v7448_v22, %v7203_v8  ;;  %v7370_v13 = vsel %vm7320_vm5, %v7367_v29, %v7369_v57  ;;  %v7659_v33 = vsel %vm7609_vm6, %v7656_v25, %v7658_v10  ;;  %v7449_v49 = vrot.slane %v7205_v14, 1  ;;  %v6871_v29 = vld [vmem:[#allocation3 + $0x100] sm:$0x3]  ;;  %v18713_v25 = vld [vmem:[#allocation3 + $0x2d8] sm:$0xff]  ;;  %v6823_v8 = vld [vmem:[#allocation3 + $0x2c8] sm:$0x3] }
 0x3c9   : > { %15038 = vmatprep.mubr.msk.f32.mxu0 %vm137_vm3, %v7916_v50  ;;  %v7564_v34 = vadd.f32 %v7370_v13, %v7156_v21  ;;  %v7738_v24 = vrot.slane %v7205_v14, 2  ;;  %v7159_v7 = vadd.f32 %v18698_v39, %v6966_v1  ;;  %v7371_v48 = vrot.slane %v7158_v30, 1 }
 0x3ca   : > { %v7884_v26 = vadd.f32 %v7737_v59, %v7595_v23  ;;  %v7450_v6 = vsel %vm7320_vm5, %v7447_v40, %v7449_v49  ;;  %v7660_v2 = vrot.slane %v7158_v30, 2  ;;  %v7013_v37 = vadd.f32 %v18675_v55, %v18643_v35 }
 0x3cb   : > { %v7853_v31 = vadd.f32 %v7659_v33, %v7564_v34  ;;  %v7596_v20 = vadd.f32 %v7450_v6, %v7204_v5  ;;  %v7739_v36 = vsel %vm7609_vm6, %v7736_v52, %v7738_v24  ;;  %v7372_v21 = vrot.slane %v7159_v7, 1  ;;  %v18723_v52 = vld [vmem:[#allocation3 + $0x138] sm:$0xff] }
 0x3cc   : > { %v7948_v51 = vmul.f32 0.11111111, %v7884_v26  ;;  %v7661_v18 = vrot.slane %v7159_v7, 2  ;;  %v7014_v62 = vadd.f32 %v18681_v63, %v18649_v4  ;;  %v7206_v45 = vadd.f32 %v18707_v16, %v7013_v37  ;;  %v18739_v37 = vld [vmem:[#allocation3 + $0x2e8] sm:$0xff] }
 0x3cd   : > { %v7917_v35 = vmul.f32 0.11111111, %v7853_v31  ;;  %v7885_v56 = vadd.f32 %v7739_v36, %v7596_v20  ;;  %v7373_v47 = vsel %vm7320_vm5, %v7371_v48, %v7372_v21  ;;  %v6967_v5 = vadd.f32 %v6871_v29, %v6775_v17  ;;  %v6778_v36 = vld [vmem:[#allocation3 + $0x130] sm:$0x3] }
 0x3ce   : > { %15086 = vmatprep.mubr.msk.f32.mxu1 %vm137_vm3, %v7948_v51  ;;  %v7565_v12 = vadd.f32 %v7373_v47, %v7158_v30  ;;  %v7662_v46 = vsel %vm7609_vm6, %v7660_v2, %v7661_v18  ;;  %v7207_v43 = vadd.f32 %v18713_v25, %v7014_v62  ;;  %v7451_v41 = vrot.slane %v7206_v45, 1  ;;  %v18730_v30 = vld [vmem:[#allocation3 + $0x140] sm:$0xff]  ;;  %v7067_v62 = vld [vmem:[#allocation3 + $0x148] sm:$0x3] }
 0x3cf   : > { %15039 = vmatmul.mubr.msk.f32.gmra.mrb[18].mxu0 %vm137_vm3, %v7917_v35  ;;  %v7949_v4 = vmul.f32 0.11111111, %v7885_v56  ;;  %v7740_v9 = vrot.slane %v7206_v45, 2  ;;  %v7160_v53 = vadd.f32 %v7064_v61, %v6967_v5  ;;  %v7015_v40 = vadd.f32 %v6919_v44, %v6823_v8  ;;  %v6922_v5 = vld [vmem:[#allocation3 + $0x2c8] sm:$0x3] }
 0x3d0   : > { %v7854_v3 = vadd.f32 %v7662_v46, %v7565_v12  ;;  %v7452_v57 = vrot.slane %v7207_v43, 1  ;;  %v7741_v10 = vrot.slane %v7207_v43, 2  ;;  %v6968_v14 = vadd.f32 %v18691_v42, %v18659_v28 }
 0x3d1   : > { %15087 = vmatmul.mubr.msk.f32.gmra.mrb[18].mxu1 %vm137_vm3, %v7949_v4  ;;  %v7374_v1 = vrot.slane %v7160_v53, 1  ;;  %v7663_v50 = vrot.slane %v7160_v53, 2  ;;  %v7208_v22 = vadd.f32 %v7112_v38, %v7015_v40  ;;  %v6969_v59 = vadd.f32 %v18698_v39, %v18666_v32  ;;  %v7115_v53 = vld [vmem:[#allocation3 + $0x2f8] sm:$0x3] }
 0x3d2   : > { %v7918_v23 = vmul.f32 0.11111111, %v7854_v3  ;;  %v7453_v13 = vsel %vm7320_vm5, %v7451_v41, %v7452_v57  ;;  %v7742_v33 = vsel %vm7609_vm6, %v7740_v9, %v7741_v10  ;;  %v7161_v49 = vadd.f32 %v18723_v52, %v6968_v14 }
 0x3d3   : > { %v7597_v34 = vadd.f32 %v7453_v13, %v7206_v45  ;;  %v7375_v28 = vsel %vm7320_vm5, %v7372_v21, %v7374_v1  ;;  %v7664_v24 = vsel %vm7609_vm6, %v7661_v18, %v7663_v50  ;;  %v7454_v48 = vrot.slane %v7208_v22, 1  ;;  %v6874_v21 = vld [vmem:[#allocation3 + $0x118] sm:$0x3]  ;;  %v18745_v18 = vld [vmem:[#allocation3 + $0x2f0] sm:$0xff]  ;;  %v6826_v45 = vld [vmem:[#allocation3 + $0x2e0] sm:$0x3] }
 0x3d4   : > { %15041 = vmatprep.mubr.msk.f32.mxu0 %vm137_vm3, %v7918_v23  ;;  %v7566_v26 = vadd.f32 %v7375_v28, %v7159_v7  ;;  %v7743_v6 = vrot.slane %v7208_v22, 2  ;;  %v7162_v32 = vadd.f32 %v18730_v30, %v6969_v59  ;;  %v7376_v2 = vrot.slane %v7161_v49, 1 }
 0x3d5   : > { %v7886_v17 = vadd.f32 %v7742_v33, %v7597_v34  ;;  %v7455_v29 = vsel %vm7320_vm5, %v7452_v57, %v7454_v48  ;;  %v7665_v31 = vrot.slane %v7161_v49, 2  ;;  %v7016_v20 = vadd.f32 %v18707_v16, %v18675_v55 }
 0x3d6   : > { %v7855_v61 = vadd.f32 %v7664_v24, %v7566_v26  ;;  %v7598_v8 = vadd.f32 %v7455_v29, %v7207_v43  ;;  %v7744_v51 = vsel %vm7609_vm6, %v7741_v10, %v7743_v6  ;;  %v7377_v7 = vrot.slane %v7162_v32, 1  ;;  %v18755_v10 = vld [vmem:[#allocation3 + $0x150] sm:$0xff] }
 0x3d7   : > { %v7950_v44 = vmul.f32 0.11111111, %v7886_v17  ;;  %v7666_v35 = vrot.slane %v7162_v32, 2  ;;  %v7017_v56 = vadd.f32 %v18713_v25, %v18681_v63  ;;  %v7209_v47 = vadd.f32 %v18739_v37, %v7016_v20  ;;  %v18771_v20 = vld [vmem:[#allocation3 + $0x300] sm:$0xff] }
 0x3d8   : > { %v7919_v55 = vmul.f32 0.11111111, %v7855_v61  ;;  %v7887_v12 = vadd.f32 %v7744_v51, %v7598_v8  ;;  %v7378_v46 = vsel %vm7320_vm5, %v7376_v2, %v7377_v7  ;;  %v6970_v43 = vadd.f32 %v6874_v21, %v6778_v36  ;;  %v18776_v51 = vld [vmem:[#allocation3 + $0x148] sm:$0x3] }
 0x3d9   : > { %15089 = vmatprep.mubr.msk.f32.mxu1 %vm137_vm3, %v7950_v44  ;;  %v7567_v41 = vadd.f32 %v7378_v46, %v7161_v49  ;;  %v7667_v38 = vsel %vm7609_vm6, %v7665_v31, %v7666_v35  ;;  %v7210_v4 = vadd.f32 %v18745_v18, %v7017_v56  ;;  %v7456_v9 = vrot.slane %v7209_v47, 1  ;;  %v18762_v49 = vld [vmem:[#allocation3 + $0x158] sm:$0xff]  ;;  %v7070_v56 = vld [vmem:[#allocation3 + $0x160] sm:$0x3] }
 0x3da   : > { %15042 = vmatmul.mubr.msk.f32.gmra.mrb[20].mxu0 %vm137_vm3, %v7919_v55  ;;  %v7951_v63 = vmul.f32 0.11111111, %v7887_v12  ;;  %v7745_v40 = vrot.slane %v7209_v47, 2  ;;  %v7163_v3 = vadd.f32 %v7067_v62, %v6970_v43  ;;  %v7018_v57 = vadd.f32 %v6922_v5, %v6826_v45  ;;  %v6925_v46 = vld [vmem:[#allocation3 + $0x2e0] sm:$0x3] }
 0x3db   : > { %v7856_v14 = vadd.f32 %v7667_v38, %v7567_v41  ;;  %v7457_v1 = vrot.slane %v7210_v4, 1  ;;  %v7746_v50 = vrot.slane %v7210_v4, 2  ;;  %v6971_v22 = vadd.f32 %v18723_v52, %v18691_v42 }
 0x3dc   : > { %15090 = vmatmul.mubr.msk.f32.gmra.mrb[20].mxu1 %vm137_vm3, %v7951_v63  ;;  %v7379_v59 = vrot.slane %v7163_v3, 1  ;;  %v7668_v23 = vrot.slane %v7163_v3, 2  ;;  %v7211_v13 = vadd.f32 %v7115_v53, %v7018_v57  ;;  %v6972_v33 = vadd.f32 %v18730_v30, %v18698_v39  ;;  %v7118_v3 = vld [vmem:[#allocation3 + $0x310] sm:$0x3] }
 0x3dd   : > { %v7920_v34 = vmul.f32 0.11111111, %v7856_v14  ;;  %v7458_v28 = vsel %vm7320_vm5, %v7456_v9, %v7457_v1  ;;  %v7747_v24 = vsel %vm7609_vm6, %v7745_v40, %v7746_v50  ;;  %v7164_v48 = vadd.f32 %v18755_v10, %v6971_v22 }
 0x3de   : > { %v7599_v26 = vadd.f32 %v7458_v28, %v7209_v47  ;;  %v7380_v42 = vsel %vm7320_vm5, %v7377_v7, %v7379_v59  ;;  %v7669_v6 = vsel %vm7609_vm6, %v7666_v35, %v7668_v23  ;;  %v7459_v2 = vrot.slane %v7211_v13, 1  ;;  %v6877_v7 = vld [vmem:[#allocation3 + $0x130] sm:$0x3]  ;;  %v18779_v35 = vld [vmem:[#allocation3 + $0x308] sm:$0xff]  ;;  %v18781_v47 = vld [vmem:[#allocation3 + $0x2f8] sm:$0x3] }
 0x3df   : > { %15044 = vmatprep.mubr.msk.f32.mxu0 %vm137_vm3, %v7920_v34  ;;  %v7568_v17 = vadd.f32 %v7380_v42, %v7162_v32  ;;  %v7748_v29 = vrot.slane %v7211_v13, 2  ;;  %v7165_v39 = vadd.f32 %v18762_v49, %v6972_v33  ;;  %v7381_v31 = vrot.slane %v7164_v48, 1 }
 0x3e0   : > { %v7888_v36 = vadd.f32 %v7747_v24, %v7599_v26  ;;  %v7460_v21 = vsel %vm7320_vm5, %v7457_v1, %v7459_v2  ;;  %v7670_v61 = vrot.slane %v7164_v48, 2  ;;  %v7019_v8 = vadd.f32 %v18739_v37, %v18707_v16 }
 0x3e1   : > { %v7857_v62 = vadd.f32 %v7669_v6, %v7568_v17  ;;  %v7600_v45 = vadd.f32 %v7460_v21, %v7210_v4  ;;  %v7749_v32 = vsel %vm7609_vm6, %v7746_v50, %v7748_v29  ;;  %v7382_v44 = vrot.slane %v7165_v39, 1  ;;  %v18793_v50 = vld [vmem:[#allocation3 + $0x168] sm:$0xff] }
 0x3e2   : > { %v7952_v5 = vmul.f32 0.11111111, %v7888_v36  ;;  %v7671_v55 = vrot.slane %v7165_v39, 2  ;;  %v7020_v12 = vadd.f32 %v18745_v18, %v18713_v25  ;;  %v7212_v16 = vadd.f32 %v18771_v20, %v7019_v8  ;;  %v18809_v8 = vld [vmem:[#allocation3 + $0x318] sm:$0xff] }
 0x3e3   : > { %v7921_v43 = vmul.f32 0.11111111, %v7857_v62  ;;  %v7889_v41 = vadd.f32 %v7749_v32, %v7600_v45  ;;  %v7383_v38 = vsel %vm7320_vm5, %v7381_v31, %v7382_v44  ;;  %v6973_v4 = vadd.f32 %v6877_v7, %v18776_v51 }
 0x3e4   : > { %15092 = vmatprep.mubr.msk.f32.mxu1 %vm137_vm3, %v7952_v5  ;;  %v7569_v9 = vadd.f32 %v7383_v38, %v7164_v48  ;;  %v7672_v53 = vsel %vm7609_vm6, %v7670_v61, %v7671_v55  ;;  %v7213_v63 = vadd.f32 %v18779_v35, %v7020_v12  ;;  %v7461_v40 = vrot.slane %v7212_v16, 1  ;;  %v18800_v48 = vld [vmem:[#allocation3 + $0x170] sm:$0xff] }
 0x3e5   : > { %15045 = vmatmul.mubr.msk.f32.gmra.mrb[22].mxu0 %vm137_vm3, %v7921_v43  ;;  %v7953_v25 = vmul.f32 0.11111111, %v7889_v41  ;;  %v7750_v57 = vrot.slane %v7212_v16, 2  ;;  %v7166_v14 = vadd.f32 %v7070_v56, %v6973_v4  ;;  %v7021_v1 = vadd.f32 %v6925_v46, %v18781_v47  ;;  %v6880_v56 = vld [vmem:[#allocation3 + $0x148] sm:$0x3] }
 0x3e6   : > { %v7858_v22 = vadd.f32 %v7672_v53, %v7569_v9  ;;  %v7462_v59 = vrot.slane %v7213_v63, 1  ;;  %v7751_v23 = vrot.slane %v7213_v63, 2  ;;  %v6974_v13 = vadd.f32 %v18755_v10, %v18723_v52  ;;  %v7073_v46 = vld [vmem:[#allocation3 + $0x178] sm:$0x3]  ;;  %v18819_v43 = vld [vmem:[#allocation3 + $0x310] sm:$0x3] }
 0x3e7   : > { %15093 = vmatmul.mubr.msk.f32.gmra.mrb[22].mxu1 %vm137_vm3, %v7953_v25  ;;  %v7384_v33 = vrot.slane %v7166_v14, 1  ;;  %v7673_v34 = vrot.slane %v7166_v14, 2  ;;  %v7214_v28 = vadd.f32 %v7118_v3, %v7021_v1  ;;  %v6975_v24 = vadd.f32 %v18762_v49, %v18730_v30  ;;  %v6928_v9 = vld [vmem:[#allocation3 + $0x2f8] sm:$0x3] }
 0x3e8   : > { %v7922_v26 = vmul.f32 0.11111111, %v7858_v22  ;;  %v7463_v42 = vsel %vm7320_vm5, %v7461_v40, %v7462_v59  ;;  %v7752_v6 = vsel %vm7609_vm6, %v7750_v57, %v7751_v23  ;;  %v7167_v2 = vadd.f32 %v18793_v50, %v6974_v13  ;;  %v7121_v22 = vld [vmem:[#allocation3 + $0x328] sm:$0x3] }
 0x3e9   : > { %v7601_v17 = vadd.f32 %v7463_v42, %v7212_v16  ;;  %v7385_v52 = vsel %vm7320_vm5, %v7382_v44, %v7384_v33  ;;  %v7674_v29 = vsel %vm7609_vm6, %v7671_v55, %v7673_v34  ;;  %v7464_v31 = vrot.slane %v7214_v28, 1  ;;  %v18814_v44 = vld [vmem:[#allocation3 + $0x160] sm:$0x3] }
 0x3ea   : > { %15047 = vmatprep.mubr.msk.f32.mxu0 %vm137_vm3, %v7922_v26  ;;  %v7570_v36 = vadd.f32 %v7385_v52, %v7165_v39  ;;  %v7753_v21 = vrot.slane %v7214_v28, 2  ;;  %v7168_v30 = vadd.f32 %v18800_v48, %v6975_v24  ;;  %v7386_v61 = vrot.slane %v7167_v2, 1  ;;  %v18817_v16 = vld [vmem:[#allocation3 + $0x320] sm:$0xff]  ;;  %v18838_v52 = vld [vmem:[#allocation3 + $0x188] sm:$0xff] }
 0x3eb   : > { %v7890_v7 = vadd.f32 %v7752_v6, %v7601_v17  ;;  %v7465_v62 = vsel %vm7320_vm5, %v7462_v59, %v7464_v31  ;;  %v7675_v45 = vrot.slane %v7167_v2, 2  ;;  %v7022_v32 = vadd.f32 %v18771_v20, %v18739_v37  ;;  %v18831_v33 = vld [vmem:[#allocation3 + $0x180] sm:$0xff] }
 0x3ec   : > { %v7859_v5 = vadd.f32 %v7674_v29, %v7570_v36  ;;  %v7602_v55 = vadd.f32 %v7465_v62, %v7213_v63  ;;  %v7754_v39 = vsel %vm7609_vm6, %v7751_v23, %v7753_v21  ;;  %v7387_v12 = vrot.slane %v7168_v30, 1 }
 0x3ed   : > { %v7954_v41 = vmul.f32 0.11111111, %v7890_v7  ;;  %v7676_v38 = vrot.slane %v7168_v30, 2  ;;  %v7023_v4 = vadd.f32 %v18779_v35, %v18745_v18  ;;  %v7215_v37 = vadd.f32 %v18809_v8, %v7022_v32 }
 0x3ee   : > { %v7923_v53 = vmul.f32 0.11111111, %v7859_v5  ;;  %v7891_v40 = vadd.f32 %v7754_v39, %v7602_v55  ;;  %v7388_v63 = vsel %vm7320_vm5, %v7386_v61, %v7387_v12  ;;  %v6976_v3 = vadd.f32 %v6880_v56, %v18814_v44  ;;  %v18847_v5 = vld [vmem:[#allocation3 + $0x330] sm:$0xff] }
 0x3ef   : > { %15095 = vmatprep.mubr.msk.f32.mxu1 %vm137_vm3, %v7954_v41  ;;  %v7571_v25 = vadd.f32 %v7388_v63, %v7167_v2  ;;  %v7677_v57 = vsel %vm7609_vm6, %v7675_v45, %v7676_v38  ;;  %v7216_v14 = vadd.f32 %v18817_v16, %v7023_v4  ;;  %v7466_v1 = vrot.slane %v7215_v37, 1  ;;  %v18857_v63 = vld [vmem:[#allocation3 + $0x328] sm:$0x3] }
 0x3f0   : > { %15048 = vmatmul.mubr.msk.f32.gmra.mrb[24].mxu0 %vm137_vm3, %v7923_v53  ;;  %v7955_v18 = vmul.f32 0.11111111, %v7891_v40  ;;  %v7755_v59 = vrot.slane %v7215_v37, 2  ;;  %v7169_v23 = vadd.f32 %v7073_v46, %v6976_v3  ;;  %v7024_v13 = vadd.f32 %v6928_v9, %v18819_v43  ;;  %v18855_v53 = vld [vmem:[#allocation3 + $0x338] sm:$0xff]  ;;  %v7076_v40 = vld [vmem:[#allocation3 + $0x190] sm:$0x3] }
 0x3f1   : > { %v7860_v34 = vadd.f32 %v7677_v57, %v7571_v25  ;;  %v7467_v28 = vrot.slane %v7216_v14, 1  ;;  %v7756_v24 = vrot.slane %v7216_v14, 2  ;;  %v6977_v26 = vadd.f32 %v18793_v50, %v18755_v10 }
 0x3f2   : > { %15096 = vmatmul.mubr.msk.f32.gmra.mrb[24].mxu1 %vm137_vm3, %v7955_v18  ;;  %v7389_v42 = vrot.slane %v7169_v23, 1  ;;  %v7678_v6 = vrot.slane %v7169_v23, 2  ;;  %v7217_v2 = vadd.f32 %v7121_v22, %v7024_v13  ;;  %v6978_v17 = vadd.f32 %v18800_v48, %v18762_v49 }
 0x3f3   : > { %v7924_v29 = vmul.f32 0.11111111, %v7860_v34  ;;  %v7468_v31 = vsel %vm7320_vm5, %v7466_v1, %v7467_v28  ;;  %v7757_v36 = vsel %vm7609_vm6, %v7755_v59, %v7756_v24  ;;  %v7170_v21 = vadd.f32 %v18831_v33, %v6977_v26  ;;  %v6931_v1 = vld [vmem:[#allocation3 + $0x310] sm:$0x3] }
 0x3f4   : > { %v7603_v61 = vadd.f32 %v7468_v31, %v7215_v37  ;;  %v7390_v10 = vsel %vm7320_vm5, %v7387_v12, %v7389_v42  ;;  %v7679_v7 = vsel %vm7609_vm6, %v7676_v38, %v7678_v6  ;;  %v7469_v62 = vrot.slane %v7217_v2, 1  ;;  %v18852_v12 = vld [vmem:[#allocation3 + $0x178] sm:$0x3]  ;;  %v6883_v38 = vld [vmem:[#allocation3 + $0x160] sm:$0x3] }
 0x3f5   : > { %15050 = vmatprep.mubr.msk.f32.mxu0 %vm137_vm3, %v7924_v29  ;;  %v7572_v45 = vadd.f32 %v7390_v10, %v7168_v30  ;;  %v7758_v32 = vrot.slane %v7217_v2, 2  ;;  %v7171_v49 = vadd.f32 %v18838_v52, %v6978_v17  ;;  %v7391_v56 = vrot.slane %v7170_v21, 1  ;;  %v7077_v2 = vld [vmem:[#allocation3 + $0x198] sm:$0xff] }
 0x3f6   : > { %v7892_v55 = vadd.f32 %v7757_v36, %v7603_v61  ;;  %v7470_v39 = vsel %vm7320_vm5, %v7467_v28, %v7469_v62  ;;  %v7680_v46 = vrot.slane %v7170_v21, 2  ;;  %v7025_v41 = vadd.f32 %v18809_v8, %v18771_v20  ;;  %v7078_v62 = vld [vmem:[#allocation3 + $0x1a0] sm:$0xff] }
 0x3f7   : > { %v7861_v4 = vadd.f32 %v7679_v7, %v7572_v45  ;;  %v7604_v37 = vadd.f32 %v7470_v39, %v7216_v14  ;;  %v7759_v30 = vsel %vm7609_vm6, %v7756_v24, %v7758_v32  ;;  %v7392_v9 = vrot.slane %v7171_v49, 1  ;;  %v7124_v24 = vld [vmem:[#allocation3 + $0x340] sm:$0x3] }
 0x3f8   : > { %v7956_v3 = vmul.f32 0.11111111, %v7892_v55  ;;  %v7681_v25 = vrot.slane %v7171_v49, 2  ;;  %v7026_v57 = vadd.f32 %v18817_v16, %v18779_v35  ;;  %v7218_v20 = vadd.f32 %v18847_v5, %v7025_v41 }
 0x3f9   : > { %v7925_v22 = vmul.f32 0.11111111, %v7861_v4  ;;  %v7893_v18 = vadd.f32 %v7759_v30, %v7604_v37  ;;  %v7393_v14 = vsel %vm7320_vm5, %v7391_v56, %v7392_v9  ;;  %v6979_v59 = vadd.f32 %v6883_v38, %v18852_v12 }
 0x3fa   : > { %15098 = vmatprep.mubr.msk.f32.mxu1 %vm137_vm3, %v7956_v3  ;;  %v7573_v23 = vadd.f32 %v7393_v14, %v7170_v21  ;;  %v7682_v13 = vsel %vm7609_vm6, %v7680_v46, %v7681_v25  ;;  %v7219_v34 = vadd.f32 %v18855_v53, %v7026_v57  ;;  %v7471_v28 = vrot.slane %v7218_v20, 1 }
 0x3fb   : > { %15051 = vmatmul.mubr.msk.f32.gmra.mrb[26].mxu0 %vm137_vm3, %v7925_v22  ;;  %v7957_v35 = vmul.f32 0.11111111, %v7893_v18  ;;  %v7760_v26 = vrot.slane %v7218_v20, 2  ;;  %v7172_v42 = vadd.f32 %v7076_v40, %v6979_v59  ;;  %v7027_v6 = vadd.f32 %v6931_v1, %v18857_v63  ;;  %v7125_v40 = vld [vmem:[#allocation3 + $0x348] sm:$0xff] }
 0x3fc   : > { %v7862_v17 = vadd.f32 %v7682_v13, %v7573_v23  ;;  %v7472_v29 = vrot.slane %v7219_v34, 1  ;;  %v7761_v31 = vrot.slane %v7219_v34, 2  ;;  %v6980_v36 = vadd.f32 %v18831_v33, %v18793_v50  ;;  %v7079_v23 = vld [vmem:[#allocation3 + $0x1a8] sm:$0x3]  ;;  %v18885_v13 = vld [vmem:[#allocation3 + $0x340] sm:$0x3] }
 0x3fd   : > { %15099 = vmatmul.mubr.msk.f32.gmra.mrb[26].mxu1 %vm137_vm3, %v7957_v35  ;;  %v7394_v21 = vrot.slane %v7172_v42, 1  ;;  %v7683_v61 = vrot.slane %v7172_v42, 2  ;;  %v7220_v10 = vadd.f32 %v7124_v24, %v7027_v6  ;;  %v6981_v7 = vadd.f32 %v18838_v52, %v18800_v48  ;;  %v6934_v42 = vld [vmem:[#allocation3 + $0x328] sm:$0x3] }
 0x3fe   : > { %v7926_v45 = vmul.f32 0.11111111, %v7862_v17  ;;  %v7473_v32 = vsel %vm7320_vm5, %v7471_v28, %v7472_v29  ;;  %v7762_v56 = vsel %vm7609_vm6, %v7760_v26, %v7761_v31  ;;  %v7173_v55 = vadd.f32 %v7077_v2, %v6980_v36 }
 0x3ff   : > { %v7605_v39 = vadd.f32 %v7473_v32, %v7218_v20  ;;  %v7395_v46 = vsel %vm7320_vm5, %v7392_v9, %v7394_v21  ;;  %v7684_v50 = vsel %vm7609_vm6, %v7681_v25, %v7683_v61  ;;  %v7474_v41 = vrot.slane %v7220_v10, 1  ;;  %v18882_v20 = vld [vmem:[#allocation3 + $0x190] sm:$0x3]  ;;  %v6886_v9 = vld [vmem:[#allocation3 + $0x178] sm:$0x3] }
 0x400   : > { %15053 = vmatprep.mubr.msk.f32.mxu0 %vm137_vm3, %v7926_v45  ;;  %v7574_v38 = vadd.f32 %v7395_v46, %v7171_v49  ;;  %v7763_v4 = vrot.slane %v7220_v10, 2  ;;  %v7174_v37 = vadd.f32 %v7078_v62, %v6981_v7  ;;  %v7396_v30 = vrot.slane %v7173_v55, 1  ;;  %v7126_v49 = vld [vmem:[#allocation3 + $0x350] sm:$0xff]  ;;  %v7127_v61 = vld [vmem:[#allocation3 + $0x358] sm:$0x3] }
 0x401   : > { %v7894_v3 = vadd.f32 %v7762_v56, %v7605_v39  ;;  %v7475_v57 = vsel %vm7320_vm5, %v7472_v29, %v7474_v41  ;;  %v7685_v1 = vrot.slane %v7173_v55, 2  ;;  %v7028_v22 = vadd.f32 %v18847_v5, %v18809_v8 }
 0x402   : > { %v7863_v18 = vadd.f32 %v7684_v50, %v7574_v38  ;;  %v7606_v25 = vadd.f32 %v7475_v57, %v7219_v34  ;;  %v7764_v14 = vsel %vm7609_vm6, %v7761_v31, %v7763_v4  ;;  %v7397_v59 = vrot.slane %v7174_v37, 1 }
 0x403   : > { %v7958_v28 = vmul.f32 0.11111111, %v7894_v3  ;;  %v7686_v24 = vrot.slane %v7174_v37, 2  ;;  %v7029_v35 = vadd.f32 %v18855_v53, %v18817_v16  ;;  %v7221_v26 = vadd.f32 %v7125_v40, %v7028_v22 }
 0x404   : > { %v7927_v6 = vmul.f32 0.11111111, %v7863_v18  ;;  %v7895_v2 = vadd.f32 %v7764_v14, %v7606_v25  ;;  %v7398_v17 = vsel %vm7320_vm5, %v7396_v30, %v7397_v59  ;;  %v6982_v34 = vadd.f32 %v6886_v9, %v18882_v20 }
 0x405   : > { %15101 = vmatprep.mubr.msk.f32.mxu1 %vm137_vm3, %v7958_v28  ;;  %v7575_v29 = vadd.f32 %v7398_v17, %v7173_v55  ;;  %v7687_v31 = vsel %vm7609_vm6, %v7685_v1, %v7686_v24  ;;  %v7222_v36 = vadd.f32 %v7126_v49, %v7029_v35  ;;  %v7476_v21 = vrot.slane %v7221_v26, 1  ;;  %v15928_v17 = vld [vmem:[#allocation3 + $0x1d0] sm:$0xff] }
 0x406   : > { %15054 = vmatmul.mubr.msk.f32.gmra.mrb[28].mxu0 %vm137_vm3, %v7927_v6  ;;  %v7959_v10 = vmul.f32 0.11111111, %v7895_v2  ;;  %v7765_v7 = vrot.slane %v7221_v26, 2  ;;  %v7175_v62 = vadd.f32 %v7079_v23, %v6982_v34  ;;  %v7030_v45 = vadd.f32 %v6934_v42, %v18885_v13  ;;  %v15927_v6 = vld [vmem:[#allocation3 + $0x18] sm:$0xff] }
 0x407   : > { %v7864_v32 = vadd.f32 %v7687_v31, %v7575_v29  ;;  %v7477_v56 = vrot.slane %v7222_v36, 1  ;;  %v7766_v39 = vrot.slane %v7222_v36, 2  ;;  %v8635_v2 = vrot.slane %v15927_v6, 1  ;;  %v15929_v29 = vld [vmem:[#allocation3 + $0x1d8] sm:$0x3] }
 0x408   : > { %15102 = vmatmul.mubr.msk.f32.gmra.mrb[28].mxu1 %vm137_vm3, %v7959_v10  ;;  %v7399_v46 = vrot.slane %v7175_v62, 1  ;;  %v7688_v50 = vrot.slane %v7175_v62, 2  ;;  %v7223_v55 = vadd.f32 %v7127_v61, %v7030_v45  ;;  %v8716_v34 = vrot.slane %v15928_v17, 1 }
 0x409   : > { %v7928_v41 = vmul.f32 0.11111111, %v7864_v32  ;;  %v7478_v38 = vsel %vm7320_vm5, %v7476_v21, %v7477_v56  ;;  %v7767_v4 = vsel %vm7609_vm6, %v7765_v7, %v7766_v39  ;;  %v8718_v31 = vrot.slane %v15929_v29, 1 }
 0x40a   : > { %v7607_v30 = vadd.f32 %v7478_v38, %v7221_v26  ;;  %v7400_v40 = vsel %vm7320_vm5, %v7397_v59, %v7399_v46  ;;  %v7689_v3 = vsel %vm7609_vm6, %v7686_v24, %v7688_v50  ;;  %v7479_v57 = vrot.slane %v7223_v55, 1  ;;  %v15925_v24 = vld [vmem:[#allocation3 + $0x20] sm:$0xff]  ;;  %v15926_v26 = vld [vmem:[#allocation3 + $0x28] sm:$0x3]  ;;  %v15931_v38 = vld [vmem:[#allocation3 + $0x38] sm:$0xff] }
 0x40b   : > { %15056 = vmatprep.mubr.msk.f32.mxu0 %vm137_vm3, %v7928_v41  ;;  %v7576_v1 = vadd.f32 %v7400_v40, %v7174_v37  ;;  %v7768_v22 = vrot.slane %v7223_v55, 2  ;;  %v8636_v37 = vrot.slane %v15925_v24, 1  ;;  %v8638_v42 = vrot.slane %v15926_v26, 1 }
 0x40c   : > { %v7896_v9 = vadd.f32 %v7767_v4, %v7607_v30  ;;  %v7480_v18 = vsel %vm7320_vm5, %v7477_v56, %v7479_v57  ;;  %v8719_v62 = vsel %vm7320_vm5, %v8716_v34, %v8718_v31  ;;  %v8641_v4 = vrot.slane %v15931_v38, 1  ;;  %v15932_v30 = vld [vmem:[#allocation3 + $0x40] sm:$0x3]  ;;  %v15938_v31 = vld [vmem:[#allocation3 + $0x58] sm:$0x3] }
 0x40d   : > { %v7865_v25 = vadd.f32 %v7689_v3, %v7576_v1  ;;  %v7608_v14 = vadd.f32 %v7480_v18, %v7222_v36  ;;  %v7769_v49 = vsel %vm7609_vm6, %v7766_v39, %v7768_v22  ;;  %v15930_v36 = vld [vmem:[#allocation3 + $0x1c8] sm:$0xff]  ;;  %v8639_v61 = vsel %vm7320_vm5, %v8636_v37, %v8638_v42  ;;  %v15934_v1 = vld [vmem:[#allocation3 + $0x1f0] sm:$0x3] }
 0x40e   : > { %v7960_v23 = vmul.f32 0.11111111, %v7896_v9  ;;  %v8715_v21 = vrot.slane %v15930_v36, 1  ;;  %v8637_v10 = vsel %vm7320_vm5, %v8635_v2, %v8636_v37  ;;  %v8643_v40 = vrot.slane %v15932_v30, 1  ;;  %v15933_v3 = vld [vmem:[#allocation3 + $0x1e8] sm:$0xff]  ;;  %v15935_v9 = vld [vmem:[#allocation3 + $0x30] sm:$0xff] }
 0x40f   : > { %v7929_v28 = vmul.f32 0.11111111, %v7865_v25  ;;  %v7897_v35 = vadd.f32 %v7769_v49, %v7608_v14  ;;  %v8721_v57 = vrot.slane %v15933_v3, 1  ;;  %v8723_v22 = vrot.slane %v15934_v1, 1  ;;  %v15936_v25 = vld [vmem:[#allocation3 + $0x1e0] sm:$0xff] }
 0x410   : > { %15104 = vmatprep.mubr.msk.f32.mxu1 %vm137_vm3, %v7960_v23  ;;  %v8717_v56 = vsel %vm7320_vm5, %v8715_v21, %v8716_v34  ;;  %v8640_v18 = vrot.slane %v15935_v9, 1  ;;  %v8720_v14 = vrot.slane %v15936_v25, 1  ;;  %v8644_v49 = vsel %vm7320_vm5, %v8641_v4, %v8643_v40  ;;  %v15937_v34 = vld [vmem:[#allocation3 + $0x50] sm:$0xff]  ;;  %v15939_v21 = vld [vmem:[#allocation3 + $0x48] sm:$0xff] }
 0x411   : > { %15057 = vmatmul.mubr.msk.f32.gmra.mrb[30].mxu0 %vm137_vm3, %v7929_v28  ;;  %v7961_v59 = vmul.f32 0.11111111, %v7897_v35  ;;  %v8724_v23 = vsel %vm7320_vm5, %v8721_v57, %v8723_v22  ;;  %v8646_v29 = vrot.slane %v15937_v34, 1  ;;  %v8648_v36 = vrot.slane %v15938_v31, 1  ;;  %v15943_v22 = vld [vmem:[#allocation3 + $0x68] sm:$0xff] }
 0x412   : > { %v8642_v28 = vsel %vm7320_vm5, %v8640_v18, %v8641_v4  ;;  %v8651_v9 = vrot.slane %v15943_v22, 1  ;;  %v15944_v18 = vld [vmem:[#allocation3 + $0x70] sm:$0x3] }
 0x413   : > { %15105 = vmatmul.mubr.msk.f32.gmra.mrb[30].mxu1 %vm137_vm3, %v7961_v59  ;;  %v8722_v59 = vsel %vm7320_vm5, %v8720_v14, %v8721_v57  ;;  %v8653_v25 = vrot.slane %v15944_v18, 1  ;;  %v15945_v14 = vld [vmem:[#allocation3 + $0x218] sm:$0xff] }
 0x43f   : > { %v15013_v7 = vpop.f32.mrb[0].mxu0 }
 0x440   : > { %v8860_v45 = vadd.f32 %v15013_v7, %v8639_v61  ;;  %v8220_v32 = vpop.f32.mrb[1].mxu0  ;;  %v8645_v61 = vrot.slane %v15939_v21, 1 }
 0x441   : > { %v15061_v39 = vpop.f32.mrb[0].mxu1  ;;  %v8859_v46 = vadd.f32 %v8637_v10, %v8220_v32  ;;  %v15940_v10 = vld [vmem:[#allocation3 + $0x200] sm:$0xff]  ;;  %v8649_v32 = vsel %vm7320_vm5, %v8646_v29, %v8648_v36 }
 0x442   : > { %8924 = vst.msk [vmem:[#allocation3 + $0x21] sm:$0xff] %vm137_vm3, %v8860_v45  ;;  %v8892_v50 = vadd.f32 %v15061_v39, %v8719_v62  ;;  %v8380_v55 = vpop.f32.mrb[1].mxu1  ;;  %v8726_v7 = vrot.slane %v15940_v10, 1  ;;  %v15941_v62 = vld [vmem:[#allocation3 + $0x208] sm:$0x3] }
 0x443   : > { %8923 = vst.msk [vmem:[#allocation3 + $0x19] sm:$0xff] %vm137_vm3, %v8859_v46  ;;  %v8891_v41 = vadd.f32 %v8717_v56, %v8380_v55  ;;  %v8728_v45 = vrot.slane %v15941_v62, 1  ;;  %v15942_v56 = vld [vmem:[#allocation3 + $0x1f8] sm:$0xff]  ;;  %v8647_v46 = vsel %vm7320_vm5, %v8645_v61, %v8646_v29 }
 0x444   : > { %8956 = vst.msk [vmem:[#allocation3 + $0x1d1] sm:$0xff] %vm137_vm3, %v8892_v50  ;;  %v8725_v39 = vrot.slane %v15942_v56, 1  ;;  %v15951_v56 = vld [vmem:[#allocation3 + $0x78] sm:$0xff] }
 0x445   : > { %8955 = vst.msk [vmem:[#allocation3 + $0x1c9] sm:$0xff] %vm137_vm3, %v8891_v41  ;;  %v8729_v41 = vsel %vm7320_vm5, %v8726_v7, %v8728_v45  ;;  %v15950_v45 = vld [vmem:[#allocation3 + $0x88] sm:$0x3] }
 0x446   : > { %v8727_v30 = vsel %vm7320_vm5, %v8725_v39, %v8726_v7  ;;  %v15949_v7 = vld [vmem:[#allocation3 + $0x80] sm:$0xff]  ;;  %v8655_v39 = vrot.slane %v15951_v56, 1 }
 0x447   : > { %v8656_v62 = vrot.slane %v15949_v7, 1 }
 0x449   :  { %v19072_v11 = vld [vmem:[#allocation3 + $0x21] sm:$0xff] (%p6739_p0) }
 0x44a   :  { %v19070_v0 = vld [vmem:[#allocation3 + $0x19] sm:$0xff] (%p6739_p0)  ;;  %v9054_v58 = vsel (%p6739_p0), %vm137_vm3, %v19072_v11, 0.0 }
 0x44b   : > { %v15016_v35 = vpop.f32.mrb[2].mxu0  ;;  %v9053_v27 = vsel (%p6739_p0), %vm137_vm3, %v19070_v0, 0.0 }
 0x44c   : > { %v8862_v24 = vadd.f32 %v15016_v35, %v8644_v49  ;;  %v15064_v37 = vpop.f32.mrb[2].mxu1  ;;  %v8230_v26 = vpop.f32.mrb[3].mxu0  ;;  %v8731_v49 = vrot.slane %v15945_v14, 1  ;;  %v15947_v35 = vld [vmem:[#allocation3 + $0x60] sm:$0xff] }
 0x44d   : > { %v8894_v42 = vadd.f32 %v15064_v37, %v8724_v23  ;;  %v8861_v6 = vadd.f32 %v8642_v28, %v8230_v26  ;;  %v8390_v2 = vpop.f32.mrb[3].mxu1  ;;  %v15946_v23 = vld [vmem:[#allocation3 + $0x220] sm:$0x3]  ;;  %v8654_v26 = vsel %vm7320_vm5, %v8651_v9, %v8653_v25 }
 0x44e   : > { %8926 = vst.msk [vmem:[#allocation3 + $0x39] sm:$0xff] %vm137_vm3, %v8862_v24  ;;  %v8893_v17 = vadd.f32 %v8722_v59, %v8390_v2  ;;  %v8733_v28 = vrot.slane %v15946_v23, 1  ;;  %v8650_v59 = vrot.slane %v15947_v35, 1  ;;  %v15948_v24 = vld [vmem:[#allocation3 + $0x210] sm:$0xff] }
 0x44f   : > { %8958 = vst.msk [vmem:[#allocation3 + $0x1e9] sm:$0xff] %vm137_vm3, %v8894_v42  ;;  %8925 = vst.msk [vmem:[#allocation3 + $0x31] sm:$0xff] %vm137_vm3, %v8861_v6  ;;  %v8730_v37 = vrot.slane %v15948_v24, 1 }
 0x450   : > { %8957 = vst.msk [vmem:[#allocation3 + $0x1e1] sm:$0xff] %vm137_vm3, %v8893_v17  ;;  %v8734_v42 = vsel %vm7320_vm5, %v8731_v49, %v8733_v28  ;;  %v8652_v6 = vsel %vm7320_vm5, %v8650_v59, %v8651_v9  ;;  %v15955_v28 = vld [vmem:[#allocation3 + $0x98] sm:$0xff]  ;;  %v15956_v59 = vld [vmem:[#allocation3 + $0xa0] sm:$0x3] }
 0x451   : > { %v8732_v17 = vsel %vm7320_vm5, %v8730_v37, %v8731_v49  ;;  %v8661_v35 = vrot.slane %v15955_v28, 1  ;;  %v8663_v24 = vrot.slane %v15956_v59, 1  ;;  %v15957_v37 = vld [vmem:[#allocation3 + $0x90] sm:$0xff] }
 0x455   : > { %v15019_v50 = vpop.f32.mrb[4].mxu0  ;;  %v19076_v19 = vld [vmem:[#allocation3 + $0x39] sm:$0xff] (%p6739_p0) }
 0x456   : > { %v8864_v55 = vadd.f32 %v15019_v50, %v8649_v32  ;;  %v8240_v38 = vpop.f32.mrb[5].mxu0  ;;  %v8658_v32 = vrot.slane %v15950_v45, 1  ;;  %v19074_v15 = vld [vmem:[#allocation3 + $0x31] sm:$0xff] (%p6739_p0) }
 0x457   : > { %v8863_v4 = vadd.f32 %v8647_v46, %v8240_v38  ;;  %v15952_v46 = vld [vmem:[#allocation3 + $0x230] sm:$0xff] }
 0x458   : > { %8928 = vst.msk [vmem:[#allocation3 + $0x51] sm:$0xff] %vm137_vm3, %v8864_v55  ;;  %v15067_v40 = vpop.f32.mrb[4].mxu1  ;;  %v8736_v50 = vrot.slane %v15952_v46, 1  ;;  %v15953_v55 = vld [vmem:[#allocation3 + $0x238] sm:$0x3]  ;;  %v8659_v38 = vsel %vm7320_vm5, %v8656_v62, %v8658_v32 }
 0x459   : > { %v8896_v3 = vadd.f32 %v15067_v40, %v8729_v41  ;;  %8927 = vst.msk [vmem:[#allocation3 + $0x49] sm:$0xff] %vm137_vm3, %v8863_v4  ;;  %v8400_v57 = vpop.f32.mrb[5].mxu1  ;;  %v8738_v41 = vrot.slane %v15953_v55, 1  ;;  %v15954_v4 = vld [vmem:[#allocation3 + $0x228] sm:$0xff]  ;;  %v8657_v40 = vsel %vm7320_vm5, %v8655_v39, %v8656_v62 }
 0x45a   : > { %v8895_v1 = vadd.f32 %v8727_v30, %v8400_v57  ;;  %v8735_v30 = vrot.slane %v15954_v4, 1  ;;  %v15963_v4 = vld [vmem:[#allocation3 + $0x260] sm:$0xff] }
 0x45b   : > { %8960 = vst.msk [vmem:[#allocation3 + $0x201] sm:$0xff] %vm137_vm3, %v8896_v3 }
 0x45c   : > { %8959 = vst.msk [vmem:[#allocation3 + $0x1f9] sm:$0xff] %vm137_vm3, %v8895_v1  ;;  %v8739_v1 = vsel %vm7320_vm5, %v8736_v50, %v8738_v41  ;;  %v8737_v18 = vsel %vm7320_vm5, %v8735_v30, %v8736_v50  ;;  %v15961_v50 = vld [vmem:[#allocation3 + $0xb0] sm:$0xff]  ;;  %v15962_v41 = vld [vmem:[#allocation3 + $0xb8] sm:$0x3]  ;;  %v8746_v30 = vrot.slane %v15963_v4, 1 }
 0x45d   : > { %v8666_v55 = vrot.slane %v15961_v50, 1 }
 0x460   : > { %v15022_v2 = vpop.f32.mrb[6].mxu0 }
 0x461   : > { %v8866_v34 = vadd.f32 %v15022_v2, %v8654_v26  ;;  %v15070_v29 = vpop.f32.mrb[6].mxu1  ;;  %v8250_v31 = vpop.f32.mrb[7].mxu0  ;;  %v8660_v26 = vrot.slane %v15957_v37, 1  ;;  %v15959_v2 = vld [vmem:[#allocation3 + $0x250] sm:$0x3] }
 0x462   : > { %v8898_v36 = vadd.f32 %v15070_v29, %v8734_v42  ;;  %v8865_v21 = vadd.f32 %v8652_v6, %v8250_v31  ;;  %v8410_v61 = vpop.f32.mrb[7].mxu1  ;;  %v15958_v42 = vld [vmem:[#allocation3 + $0x248] sm:$0xff]  ;;  %v8664_v31 = vsel %vm7320_vm5, %v8661_v35, %v8663_v24 }
 0x463   : > { %8930 = vst.msk [vmem:[#allocation3 + $0x69] sm:$0xff] %vm137_vm3, %v8866_v34  ;;  %v8897_v10 = vadd.f32 %v8732_v17, %v8410_v61  ;;  %v8741_v6 = vrot.slane %v15958_v42, 1  ;;  %v8743_v17 = vrot.slane %v15959_v2, 1  ;;  %v15960_v34 = vld [vmem:[#allocation3 + $0x240] sm:$0xff] }
 0x464   : > { %8962 = vst.msk [vmem:[#allocation3 + $0x219] sm:$0xff] %vm137_vm3, %v8898_v36  ;;  %8929 = vst.msk [vmem:[#allocation3 + $0x61] sm:$0xff] %vm137_vm3, %v8865_v21  ;;  %v8740_v29 = vrot.slane %v15960_v34, 1  ;;  %v8662_v36 = vsel %vm7320_vm5, %v8660_v26, %v8661_v35 }
 0x465   : > { %8961 = vst.msk [vmem:[#allocation3 + $0x211] sm:$0xff] %vm137_vm3, %v8897_v10  ;;  %v8744_v61 = vsel %vm7320_vm5, %v8741_v6, %v8743_v17  ;;  %v15968_v17 = vld [vmem:[#allocation3 + $0xd0] sm:$0x3] }
 0x466   : > { %v8742_v62 = vsel %vm7320_vm5, %v8740_v29, %v8741_v6  ;;  %v15967_v6 = vld [vmem:[#allocation3 + $0xc8] sm:$0xff]  ;;  %v8673_v34 = vrot.slane %v15968_v17, 1  ;;  %v15969_v29 = vld [vmem:[#allocation3 + $0xc0] sm:$0xff] }
 0x467   : > { %v8671_v2 = vrot.slane %v15967_v6, 1 }
 0x46a   : > { %v15025_v3 = vpop.f32.mrb[8].mxu0 }
 0x46b   : > { %v8868_v57 = vadd.f32 %v15025_v3, %v8659_v38  ;;  %v8260_v22 = vpop.f32.mrb[9].mxu0  ;;  %v8668_v38 = vrot.slane %v15962_v41, 1 }
 0x46c   : > { %v8867_v9 = vadd.f32 %v8657_v40, %v8260_v22  ;;  %v15964_v40 = vld [vmem:[#allocation3 + $0x268] sm:$0x3]  ;;  %v15966_v22 = vld [vmem:[#allocation3 + $0x258] sm:$0xff] }
 0x46d   : > { %8932 = vst.msk [vmem:[#allocation3 + $0x81] sm:$0xff] %vm137_vm3, %v8868_v57  ;;  %v15073_v25 = vpop.f32.mrb[8].mxu1  ;;  %v8748_v3 = vrot.slane %v15964_v40, 1  ;;  %v15965_v57 = vld [vmem:[#allocation3 + $0xa8] sm:$0xff] }
 0x46e   : > { %v8900_v14 = vadd.f32 %v15073_v25, %v8739_v1  ;;  %8931 = vst.msk [vmem:[#allocation3 + $0x79] sm:$0xff] %vm137_vm3, %v8867_v9  ;;  %v8420_v49 = vpop.f32.mrb[9].mxu1  ;;  %v8665_v1 = vrot.slane %v15965_v57, 1  ;;  %v8745_v9 = vrot.slane %v15966_v22, 1 }
 0x46f   : > { %v8899_v23 = vadd.f32 %v8737_v18, %v8420_v49  ;;  %v8669_v18 = vsel %vm7320_vm5, %v8666_v55, %v8668_v38  ;;  %v8749_v25 = vsel %vm7320_vm5, %v8746_v30, %v8748_v3  ;;  %v15973_v3 = vld [vmem:[#allocation3 + $0xe0] sm:$0xff] }
 0x470   : > { %8964 = vst.msk [vmem:[#allocation3 + $0x231] sm:$0xff] %vm137_vm3, %v8900_v14  ;;  %v8667_v14 = vsel %vm7320_vm5, %v8665_v1, %v8666_v55  ;;  %v8676_v57 = vrot.slane %v15973_v3, 1  ;;  %v15974_v1 = vld [vmem:[#allocation3 + $0xe8] sm:$0x3] }
 0x471   : > { %8963 = vst.msk [vmem:[#allocation3 + $0x229] sm:$0xff] %vm137_vm3, %v8899_v23  ;;  %v8747_v23 = vsel %vm7320_vm5, %v8745_v9, %v8746_v30  ;;  %v8678_v22 = vrot.slane %v15974_v1, 1  ;;  %v15975_v9 = vld [vmem:[#allocation3 + $0xd8] sm:$0xff] }
 0x476   : > { %v15028_v21 = vpop.f32.mrb[10].mxu0 }
 0x477   : > { %v8870_v10 = vadd.f32 %v15028_v21, %v8664_v31  ;;  %v8270_v7 = vpop.f32.mrb[11].mxu0  ;;  %v8670_v31 = vrot.slane %v15969_v29, 1 }
 0x478   : > { %v15076_v45 = vpop.f32.mrb[10].mxu1  ;;  %v8869_v32 = vadd.f32 %v8662_v36, %v8270_v7  ;;  %v15970_v36 = vld [vmem:[#allocation3 + $0x278] sm:$0xff]  ;;  %v15972_v7 = vld [vmem:[#allocation3 + $0x270] sm:$0xff] }
 0x479   : > { %8934 = vst.msk [vmem:[#allocation3 + $0x99] sm:$0xff] %vm137_vm3, %v8870_v10  ;;  %v8902_v56 = vadd.f32 %v15076_v45, %v8744_v61  ;;  %v8430_v39 = vpop.f32.mrb[11].mxu1  ;;  %v8751_v21 = vrot.slane %v15970_v36, 1  ;;  %v15971_v61 = vld [vmem:[#allocation3 + $0x280] sm:$0x3]  ;;  %v8674_v45 = vsel %vm7320_vm5, %v8671_v2, %v8673_v34 }
 0x47a   : > { %8933 = vst.msk [vmem:[#allocation3 + $0x91] sm:$0xff] %vm137_vm3, %v8869_v32  ;;  %v8901_v46 = vadd.f32 %v8742_v62, %v8430_v39  ;;  %v8753_v10 = vrot.slane %v15971_v61, 1  ;;  %v8750_v62 = vrot.slane %v15972_v7, 1  ;;  %v8672_v32 = vsel %vm7320_vm5, %v8670_v31, %v8671_v2 }
 0x47b   : > { %8966 = vst.msk [vmem:[#allocation3 + $0x249] sm:$0xff] %vm137_vm3, %v8902_v56 }
 0x47c   : > { %8965 = vst.msk [vmem:[#allocation3 + $0x241] sm:$0xff] %vm137_vm3, %v8901_v46  ;;  %v8754_v39 = vsel %vm7320_vm5, %v8751_v21, %v8753_v10  ;;  %v8752_v55 = vsel %vm7320_vm5, %v8750_v62, %v8751_v21  ;;  %v15979_v21 = vld [vmem:[#allocation3 + $0xf8] sm:$0xff]  ;;  %v15980_v10 = vld [vmem:[#allocation3 + $0x100] sm:$0x3]  ;;  %v15981_v62 = vld [vmem:[#allocation3 + $0xf0] sm:$0xff] }
 0x47d   : > { %v8681_v61 = vrot.slane %v15979_v21, 1  ;;  %v8683_v7 = vrot.slane %v15980_v10, 1 }
 0x481   : > { %v15031_v49 = vpop.f32.mrb[12].mxu0 }
 0x482   : > { %v8872_v28 = vadd.f32 %v15031_v49, %v8669_v18  ;;  %v15079_v35 = vpop.f32.mrb[12].mxu1  ;;  %v8280_v59 = vpop.f32.mrb[13].mxu0  ;;  %v8675_v18 = vrot.slane %v15975_v9, 1  ;;  %v15977_v49 = vld [vmem:[#allocation3 + $0x298] sm:$0x3] }
 0x483   : > { %v8904_v24 = vadd.f32 %v15079_v35, %v8749_v25  ;;  %v8871_v37 = vadd.f32 %v8667_v14, %v8280_v59  ;;  %v8440_v26 = vpop.f32.mrb[13].mxu1  ;;  %v15976_v25 = vld [vmem:[#allocation3 + $0x290] sm:$0xff]  ;;  %v8679_v59 = vsel %vm7320_vm5, %v8676_v57, %v8678_v22 }
 0x484   : > { %8936 = vst.msk [vmem:[#allocation3 + $0xb1] sm:$0xff] %vm137_vm3, %v8872_v28  ;;  %v8903_v42 = vadd.f32 %v8747_v23, %v8440_v26  ;;  %v8756_v14 = vrot.slane %v15976_v25, 1  ;;  %v8758_v23 = vrot.slane %v15977_v49, 1  ;;  %v15978_v28 = vld [vmem:[#allocation3 + $0x288] sm:$0xff] }
 0x485   : > { %8968 = vst.msk [vmem:[#allocation3 + $0x261] sm:$0xff] %vm137_vm3, %v8904_v24  ;;  %8935 = vst.msk [vmem:[#allocation3 + $0xa9] sm:$0xff] %vm137_vm3, %v8871_v37  ;;  %v8755_v35 = vrot.slane %v15978_v28, 1  ;;  %v8677_v24 = vsel %vm7320_vm5, %v8675_v18, %v8676_v57 }
 0x486   : > { %8967 = vst.msk [vmem:[#allocation3 + $0x259] sm:$0xff] %vm137_vm3, %v8903_v42  ;;  %v8759_v26 = vsel %vm7320_vm5, %v8756_v14, %v8758_v23  ;;  %v15986_v23 = vld [vmem:[#allocation3 + $0x118] sm:$0x3] }
 0x487   : > { %v8757_v2 = vsel %vm7320_vm5, %v8755_v35, %v8756_v14  ;;  %v15985_v14 = vld [vmem:[#allocation3 + $0x110] sm:$0xff]  ;;  %v8688_v28 = vrot.slane %v15986_v23, 1  ;;  %v15987_v35 = vld [vmem:[#allocation3 + $0x108] sm:$0xff] }
 0x488   : > { %v8686_v49 = vrot.slane %v15985_v14, 1 }
 0x48c   : > { %v15034_v56 = vpop.f32.mrb[14].mxu0 }
 0x48d   : > { %v8874_v46 = vadd.f32 %v15034_v56, %v8674_v45  ;;  %v8290_v50 = vpop.f32.mrb[15].mxu0  ;;  %v8680_v45 = vrot.slane %v15981_v62, 1 }
 0x48e   : > { %v15082_v41 = vpop.f32.mrb[14].mxu1  ;;  %v8873_v38 = vadd.f32 %v8672_v32, %v8290_v50  ;;  %v15982_v32 = vld [vmem:[#allocation3 + $0x2a8] sm:$0xff]  ;;  %v15984_v50 = vld [vmem:[#allocation3 + $0x2a0] sm:$0xff] }
 0x48f   : > { %8938 = vst.msk [vmem:[#allocation3 + $0xc9] sm:$0xff] %vm137_vm3, %v8874_v46  ;;  %v8906_v4 = vadd.f32 %v15082_v41, %v8754_v39  ;;  %v8450_v30 = vpop.f32.mrb[15].mxu1  ;;  %v8761_v56 = vrot.slane %v15982_v32, 1  ;;  %v15983_v39 = vld [vmem:[#allocation3 + $0x2b0] sm:$0x3]  ;;  %v8684_v41 = vsel %vm7320_vm5, %v8681_v61, %v8683_v7 }
 0x490   : > { %8937 = vst.msk [vmem:[#allocation3 + $0xc1] sm:$0xff] %vm137_vm3, %v8873_v38  ;;  %v8905_v40 = vadd.f32 %v8752_v55, %v8450_v30  ;;  %v8763_v46 = vrot.slane %v15983_v39, 1  ;;  %v8760_v55 = vrot.slane %v15984_v50, 1  ;;  %v8682_v38 = vsel %vm7320_vm5, %v8680_v45, %v8681_v61 }
 0x491   : > { %8970 = vst.msk [vmem:[#allocation3 + $0x279] sm:$0xff] %vm137_vm3, %v8906_v4 }
 0x492   : > { %8969 = vst.msk [vmem:[#allocation3 + $0x271] sm:$0xff] %vm137_vm3, %v8905_v40  ;;  %v8764_v30 = vsel %vm7320_vm5, %v8761_v56, %v8763_v46  ;;  %v8762_v57 = vsel %vm7320_vm5, %v8760_v55, %v8761_v56  ;;  %v15991_v56 = vld [vmem:[#allocation3 + $0x128] sm:$0xff]  ;;  %v15992_v46 = vld [vmem:[#allocation3 + $0x130] sm:$0x3]  ;;  %v15993_v55 = vld [vmem:[#allocation3 + $0x120] sm:$0xff] }
 0x493   : > { %v8691_v39 = vrot.slane %v15991_v56, 1  ;;  %v8693_v50 = vrot.slane %v15992_v46, 1 }
 0x497   : > { %v15037_v37 = vpop.f32.mrb[16].mxu0 }
 0x498   : > { %v8876_v42 = vadd.f32 %v15037_v37, %v8679_v59  ;;  %v8300_v6 = vpop.f32.mrb[17].mxu0  ;;  %v8685_v59 = vrot.slane %v15987_v35, 1 }
 0x499   : > { %v15085_v17 = vpop.f32.mrb[16].mxu1  ;;  %v8875_v34 = vadd.f32 %v8677_v24, %v8300_v6  ;;  %v15988_v24 = vld [vmem:[#allocation3 + $0x2c0] sm:$0xff]  ;;  %v15990_v6 = vld [vmem:[#allocation3 + $0x2b8] sm:$0xff] }
 0x49a   : > { %8940 = vst.msk [vmem:[#allocation3 + $0xe1] sm:$0xff] %vm137_vm3, %v8876_v42  ;;  %v8908_v29 = vadd.f32 %v15085_v17, %v8759_v26  ;;  %v8460_v31 = vpop.f32.mrb[17].mxu1  ;;  %v8766_v37 = vrot.slane %v15988_v24, 1  ;;  %v15989_v26 = vld [vmem:[#allocation3 + $0x2c8] sm:$0x3]  ;;  %v8689_v17 = vsel %vm7320_vm5, %v8686_v49, %v8688_v28 }
 0x49b   : > { %8939 = vst.msk [vmem:[#allocation3 + $0xd9] sm:$0xff] %vm137_vm3, %v8875_v34  ;;  %v8907_v36 = vadd.f32 %v8757_v2, %v8460_v31  ;;  %v8768_v42 = vrot.slane %v15989_v26, 1  ;;  %v8765_v2 = vrot.slane %v15990_v6, 1  ;;  %v8687_v34 = vsel %vm7320_vm5, %v8685_v59, %v8686_v49  ;;  %v15998_v6 = vld [vmem:[#allocation3 + $0x138] sm:$0xff] }
 0x49c   : > { %8972 = vst.msk [vmem:[#allocation3 + $0x291] sm:$0xff] %vm137_vm3, %v8908_v29 }
 0x49d   : > { %8971 = vst.msk [vmem:[#allocation3 + $0x289] sm:$0xff] %vm137_vm3, %v8907_v36  ;;  %v8769_v31 = vsel %vm7320_vm5, %v8766_v37, %v8768_v42  ;;  %v8767_v61 = vsel %vm7320_vm5, %v8765_v2, %v8766_v37  ;;  %v15997_v37 = vld [vmem:[#allocation3 + $0x140] sm:$0xff]  ;;  %v8698_v42 = vrot.slane %v18776_v51, 1  ;;  %v8695_v2 = vrot.slane %v15998_v6, 1 }
 0x49e   : > { %v8696_v26 = vrot.slane %v15997_v37, 1  ;;  %v8708_v37 = vrot.slane %v18852_v12, 1  ;;  %v8786_v6 = vrot.slane %v18817_v16, 1 }
 0x4a2   : > { %v15040_v4 = vpop.f32.mrb[18].mxu0 }
 0x4a3   : > { %v8878_v40 = vadd.f32 %v15040_v4, %v8684_v41  ;;  %v8310_v3 = vpop.f32.mrb[19].mxu0  ;;  %v8690_v41 = vrot.slane %v15993_v55, 1 }
 0x4a4   : > { %v15088_v1 = vpop.f32.mrb[18].mxu1  ;;  %v8877_v22 = vadd.f32 %v8682_v38, %v8310_v3  ;;  %v15994_v38 = vld [vmem:[#allocation3 + $0x2d8] sm:$0xff]  ;;  %v15996_v3 = vld [vmem:[#allocation3 + $0x2d0] sm:$0xff] }
 0x4a5   : > { %8942 = vst.msk [vmem:[#allocation3 + $0xf9] sm:$0xff] %vm137_vm3, %v8878_v40  ;;  %v8910_v9 = vadd.f32 %v15088_v1, %v8764_v30  ;;  %v8470_v18 = vpop.f32.mrb[19].mxu1  ;;  %v8771_v4 = vrot.slane %v15994_v38, 1  ;;  %v15995_v30 = vld [vmem:[#allocation3 + $0x2e0] sm:$0x3]  ;;  %v8694_v1 = vsel %vm7320_vm5, %v8691_v39, %v8693_v50  ;;  %v16001_v50 = vld [vmem:[#allocation3 + $0x158] sm:$0xff] }
 0x4a6   : > { %8941 = vst.msk [vmem:[#allocation3 + $0xf1] sm:$0xff] %vm137_vm3, %v8877_v22  ;;  %v8909_v25 = vadd.f32 %v8762_v57, %v8470_v18  ;;  %v8773_v40 = vrot.slane %v15995_v30, 1  ;;  %v8770_v57 = vrot.slane %v15996_v3, 1  ;;  %v8692_v22 = vsel %vm7320_vm5, %v8690_v41, %v8691_v39  ;;  %v16002_v38 = vld [vmem:[#allocation3 + $0x150] sm:$0xff]  ;;  %v16003_v30 = vld [vmem:[#allocation3 + $0x308] sm:$0xff] }
 0x4a7   : > { %8974 = vst.msk [vmem:[#allocation3 + $0x2a9] sm:$0xff] %vm137_vm3, %v8910_v9  ;;  %v8701_v55 = vrot.slane %v16001_v50, 1  ;;  %v8703_v41 = vrot.slane %v18814_v44, 1  ;;  %v8783_v3 = vrot.slane %v18819_v43, 1 }
 0x4a8   : > { %8973 = vst.msk [vmem:[#allocation3 + $0x2a1] sm:$0xff] %vm137_vm3, %v8909_v25  ;;  %v8774_v18 = vsel %vm7320_vm5, %v8771_v4, %v8773_v40  ;;  %v8772_v49 = vsel %vm7320_vm5, %v8770_v57, %v8771_v4  ;;  %v8700_v4 = vrot.slane %v16002_v38, 1  ;;  %v8781_v40 = vrot.slane %v16003_v30, 1  ;;  %v16004_v57 = vld [vmem:[#allocation3 + $0x300] sm:$0xff]  ;;  %v13287_v30 = vld [vmem:[%s21233_s2 + $0x50] sm:$0xff] (%p6739_p0) }
 0x4ad   : > { %v15043_v29 = vpop.f32.mrb[20].mxu0 }
 0x4ae   : > { %v8880_v36 = vadd.f32 %v15043_v29, %v8689_v17  ;;  %v8320_v21 = vpop.f32.mrb[21].mxu0  ;;  %v15999_v17 = vld [vmem:[#allocation3 + $0x2f0] sm:$0xff]  ;;  %v8778_v29 = vrot.slane %v18781_v47, 1 }
 0x4af   : > { %v15091_v10 = vpop.f32.mrb[20].mxu1  ;;  %v8879_v7 = vadd.f32 %v8687_v34, %v8320_v21  ;;  %v8776_v34 = vrot.slane %v15999_v17, 1  ;;  %v8699_v21 = vsel %vm7320_vm5, %v8696_v26, %v8698_v42  ;;  %v8785_v17 = vrot.slane %v18809_v8, 1 }
 0x4b0   : > { %8944 = vst.msk [vmem:[#allocation3 + $0x111] sm:$0xff] %vm137_vm3, %v8880_v36  ;;  %v8912_v62 = vadd.f32 %v15091_v10, %v8769_v31  ;;  %v8480_v45 = vpop.f32.mrb[21].mxu1  ;;  %v16000_v31 = vld [vmem:[#allocation3 + $0x2e8] sm:$0xff] }
 0x4b1   : > { %8943 = vst.msk [vmem:[#allocation3 + $0x109] sm:$0xff] %vm137_vm3, %v8879_v7  ;;  %v8911_v32 = vadd.f32 %v8767_v61, %v8480_v45  ;;  %v8775_v36 = vrot.slane %v16000_v31, 1  ;;  %v8697_v61 = vsel %vm7320_vm5, %v8695_v2, %v8696_v26  ;;  %v8779_v7 = vsel %vm7320_vm5, %v8776_v34, %v8778_v29  ;;  %v16005_v26 = vld [vmem:[#allocation3 + $0x168] sm:$0xff] }
 0x4b2   : > { %8976 = vst.msk [vmem:[#allocation3 + $0x2c1] sm:$0xff] %vm137_vm3, %v8912_v62  ;;  %v8705_v42 = vrot.slane %v16005_v26, 1  ;;  %v8788_v2 = vrot.slane %v18857_v63, 1  ;;  %v8787_v12 = vsel %vm7320_vm5, %v8785_v17, %v8786_v6  ;;  %v8711_v63 = vrot.slane %v18838_v52, 1 }
 0x4b3   : > { %8975 = vst.msk [vmem:[#allocation3 + $0x2b9] sm:$0xff] %vm137_vm3, %v8911_v32  ;;  %v8777_v51 = vsel %vm7320_vm5, %v8775_v36, %v8776_v34 }
 0x4b4   : > { %v8789_v36 = vsel %vm7320_vm5, %v8786_v6, %v8788_v2  ;;  %v19106_v6 = vld [vmem:[#allocation3 + $0x79] sm:$0xff] (%p6739_p0) }
 0x4b8   : > { %v15046_v9 = vpop.f32.mrb[22].mxu0 }
 0x4b9   : > { %v8882_v25 = vadd.f32 %v15046_v9, %v8694_v1  ;;  %v8330_v14 = vpop.f32.mrb[23].mxu0  ;;  %v8780_v1 = vrot.slane %v16004_v57, 1  ;;  %v8702_v9 = vsel %vm7320_vm5, %v8700_v4, %v8701_v55  ;;  %v13286_v4 = vld [vmem:[%s21233_s2 + $0x48] sm:$0xff] (%p6739_p0) }
 0x4ba   : > { %v15094_v23 = vpop.f32.mrb[22].mxu1  ;;  %v8881_v28 = vadd.f32 %v8692_v22, %v8330_v14  ;;  %v8704_v22 = vsel %vm7320_vm5, %v8701_v55, %v8703_v41 }
 0x4bb   : > { %8946 = vst.msk [vmem:[#allocation3 + $0x129] sm:$0xff] %vm137_vm3, %v8882_v25  ;;  %v8914_v35 = vadd.f32 %v15094_v23, %v8774_v18  ;;  %v8490_v59 = vpop.f32.mrb[23].mxu1  ;;  %v8784_v25 = vsel %vm7320_vm5, %v8781_v40, %v8783_v3  ;;  %v8782_v44 = vsel %vm7320_vm5, %v8780_v1, %v8781_v40  ;;  %v13288_v3 = vld [vmem:[%s21233_s2 + $0x58] sm:$0xff] (%p6739_p0)  ;;  %v9056_v1 = vsel (%p6739_p0), %vm137_vm3, %v19074_v15, 0.0 }
 0x4bc   : > { %8945 = vst.msk [vmem:[#allocation3 + $0x121] sm:$0xff] %vm137_vm3, %v8881_v28  ;;  %v8913_v24 = vadd.f32 %v8772_v49, %v8490_v59  ;;  %v15270_v57 = vpack.c.bf16 (%p6739_p0), %v13288_v3, %v13287_v30 }
 0x4bd   : > { %8978 = vst.msk [vmem:[#allocation3 + $0x2d9] sm:$0xff] %vm137_vm3, %v8914_v35 }
 0x4be   : > { %8977 = vst.msk [vmem:[#allocation3 + $0x2d1] sm:$0xff] %vm137_vm3, %v8913_v24  ;;  %v8706_v24 = vrot.slane %v18800_v48, 1 }
 0x4c0   : > { %v8709_v34 = vsel %vm7320_vm5, %v8706_v24, %v8708_v37  ;;  %v8707_v29 = vsel %vm7320_vm5, %v8705_v42, %v8706_v24  ;;  %v19102_v37 = vld [vmem:[#allocation3 + $0x69] sm:$0xff] (%p6739_p0) }
 0x4c1   :  { %v9066_v17 = vsel (%p6739_p0), %vm137_vm3, %v19102_v37, 0.0 }
 0x4c3   : > { %v15049_v10 = vpop.f32.mrb[24].mxu0 }
 0x4c4   : > { %v8884_v62 = vadd.f32 %v15049_v10, %v8699_v21  ;;  %v8340_v45 = vpop.f32.mrb[25].mxu0 }
 0x4c5   : > { %v15097_v32 = vpop.f32.mrb[24].mxu1  ;;  %v8883_v56 = vadd.f32 %v8697_v61, %v8340_v45  ;;  %v8710_v45 = vrot.slane %v18831_v33, 1 }
 0x4c6   : > { %8948 = vst.msk [vmem:[#allocation3 + $0x141] sm:$0xff] %vm137_vm3, %v8884_v62  ;;  %v8916_v39 = vadd.f32 %v15097_v32, %v8779_v7  ;;  %v8500_v46 = vpop.f32.mrb[25].mxu1  ;;  %v8713_v62 = vrot.slane %v18882_v20, 1  ;;  %v8793_v32 = vrot.slane %v18885_v13, 1  ;;  %v13285_v13 = vld [vmem:[%s21233_s2 + $0x40] sm:$0xff] (%p6739_p0) }
 0x4c7   : > { %8947 = vst.msk [vmem:[#allocation3 + $0x139] sm:$0xff] %vm137_vm3, %v8883_v56  ;;  %v8915_v47 = vadd.f32 %v8777_v51, %v8500_v46  ;;  %v8791_v51 = vrot.slane %v18855_v53, 1  ;;  %v8790_v56 = vrot.slane %v18847_v5, 1  ;;  %v8712_v46 = vsel %vm7320_vm5, %v8710_v45, %v8711_v63 }
 0x4c8   : > { %8980 = vst.msk [vmem:[#allocation3 + $0x2f1] sm:$0xff] %vm137_vm3, %v8916_v39  ;;  %v8714_v39 = vsel %vm7320_vm5, %v8711_v63, %v8713_v62  ;;  %v15266_v40 = vpack.c.bf16 (%p6739_p0), %v13286_v4, %v13285_v13  ;;  %v19126_v63 = vld [vmem:[#allocation3 + $0xb1] sm:$0xff] (%p6739_p0)  ;;  %v19150_v13 = vld [vmem:[#allocation3 + $0xf9] sm:$0xff] (%p6739_p0) }
 0x4c9   : > { %8979 = vst.msk [vmem:[#allocation3 + $0x2e9] sm:$0xff] %vm137_vm3, %v8915_v47  ;;  %v8794_v50 = vsel %vm7320_vm5, %v8791_v51, %v8793_v32  ;;  %v8792_v20 = vsel %vm7320_vm5, %v8790_v56, %v8791_v51  ;;  %v19130_v51 = vld [vmem:[#allocation3 + $0xc1] sm:$0xff] (%p6739_p0)  ;;  %v9078_v56 = vsel (%p6739_p0), %vm137_vm3, %v19126_v63, 0.0 }
 0x4ca   :  { %15267 = vmatprep.subr.bf16.mxu0 (%p6739_p0), %v15266_v40  ;;  %15864 = vmatprep.subr.bf16.mxu1 (%p6739_p0), %v15266_v40 }
 0x4cb   :  { %15269 = vmatpush3.bf16.msra.mxu0 (%p6739_p0), %v15266_v40  ;;  %15868 = vmatpush3.bf16.msra.mxu1 (%p6739_p0), %v15266_v40  ;;  %v19154_v40 = vld [vmem:[#allocation3 + $0x109] sm:$0xff] (%p6739_p0) }
 0x4cc   :  { %15271 = vmatprep.subr.bf16.mxu0 (%p6739_p0), %v15270_v57  ;;  %15865 = vmatprep.subr.bf16.mxu1 (%p6739_p0), %v15270_v57 }
 0x4ce   : > { %v15052_v18 = vpop.f32.mrb[26].mxu0 }
 0x4cf   : > { %v8886_v14 = vadd.f32 %v15052_v18, %v8704_v22  ;;  %v8350_v49 = vpop.f32.mrb[27].mxu0  ;;  %v15274_v22 = vpack.c.bf16 (%p6739_p0), %v13290_v60, %v13289_v54  ;;  %v9055_v18 = vadd.f32 (%p6739_p0), %v9054_v58, %v9053_v27  ;;  %15273 = vmatpush3.bf16.msra.mxu0 (%p6739_p0), %v15270_v57  ;;  %15869 = vmatpush3.bf16.msra.mxu1 (%p6739_p0), %v15270_v57  ;;  %v9090_v57 = vsel (%p6739_p0), %vm137_vm3, %v19150_v13, 0.0  ;;  %v19158_v54 = vld [vmem:[#allocation3 + $0x111] sm:$0xff] (%p6739_p0)  ;;  %v19162_v58 = vld [vmem:[#allocation3 + $0x121] sm:$0xff] (%p6739_p0) }
 0x4d0   : > { %v15100_v23 = vpop.f32.mrb[26].mxu1  ;;  %v8885_v28 = vadd.f32 %v8702_v9, %v8350_v49  ;;  %v19084_v9 = vld [vmem:[#allocation3 + $0x49] sm:$0xff] (%p6739_p0)  ;;  %v9058_v49 = vsel (%p6739_p0), %vm137_vm3, %v19076_v19, 0.0  ;;  %v9092_v27 = vsel (%p6739_p0), %vm137_vm3, %v19154_v40, 0.0 }
 0x4d1   : > { %8950 = vst.msk [vmem:[#allocation3 + $0x159] sm:$0xff] %vm137_vm3, %v8886_v14  ;;  %v8918_v35 = vadd.f32 %v15100_v23, %v8784_v25  ;;  %v8510_v59 = vpop.f32.mrb[27].mxu1  ;;  %v13291_v25 = vld [vmem:[%s21233_s2 + $0x70] sm:$0xff] (%p6739_p0)  ;;  %v13292_v14 = vld [vmem:[%s21233_s2 + $0x78] sm:$0xff] (%p6739_p0)  ;;  %v9057_v23 = vadd.f32 (%p6739_p0), %v9056_v1, %v9055_v18  ;;  %15275 = vmatprep.subr.bf16.mxu0 (%p6739_p0), %v15274_v22  ;;  %15866 = vmatprep.subr.bf16.mxu1 (%p6739_p0), %v15274_v22 }
 0x4d2   : > { %8949 = vst.msk [vmem:[#allocation3 + $0x151] sm:$0xff] %vm137_vm3, %v8885_v28  ;;  %v8917_v43 = vadd.f32 %v8782_v44, %v8510_v59  ;;  %v19094_v44 = vld [vmem:[#allocation3 + $0x51] sm:$0xff] (%p6739_p0)  ;;  %v9060_v28 = vsel (%p6739_p0), %vm137_vm3, %v19084_v9, 0.0  ;;  %v19098_v59 = vld [vmem:[#allocation3 + $0x61] sm:$0xff] (%p6739_p0)  ;;  %v19166_v18 = vld [vmem:[#allocation3 + $0x129] sm:$0xff] (%p6739_p0) }
 0x4d3   : > { %8982 = vst.msk [vmem:[#allocation3 + $0x309] sm:$0xff] %vm137_vm3, %v8918_v35  ;;  %v15278_v35 = vpack.c.bf16 (%p6739_p0), %v13292_v14, %v13291_v25  ;;  %v9062_v24 = vsel (%p6739_p0), %vm137_vm3, %v19094_v44, 0.0  ;;  %15277 = vmatpush3.bf16.msra.mxu0 (%p6739_p0), %v15274_v22  ;;  %15870 = vmatpush3.bf16.msra.mxu1 (%p6739_p0), %v15274_v22  ;;  %v9064_v42 = vsel (%p6739_p0), %vm137_vm3, %v19098_v59, 0.0  ;;  %v9094_v22 = vsel (%p6739_p0), %vm137_vm3, %v19158_v54, 0.0 }
 0x4d4   : > { %8981 = vst.msk [vmem:[#allocation3 + $0x301] sm:$0xff] %vm137_vm3, %v8917_v43  ;;  %v9059_v43 = vadd.f32 (%p6739_p0), %v9058_v49, %v9057_v23  ;;  %v9096_v14 = vsel (%p6739_p0), %vm137_vm3, %v19162_v58, 0.0  ;;  %v19170_v49 = vld [vmem:[#allocation3 + $0x139] sm:$0xff] (%p6739_p0) }
 0x4d5   :  { %15279 = vmatprep.subr.bf16.mxu0 (%p6739_p0), %v15278_v35  ;;  %15867 = vmatprep.subr.bf16.mxu1 (%p6739_p0), %v15278_v35 }
 0x4d6   :  { %v9061_v26 = vadd.f32 (%p6739_p0), %v9060_v28, %v9059_v43  ;;  %v9098_v28 = vsel (%p6739_p0), %vm137_vm3, %v19166_v18, 0.0 }
 0x4d7   :  { %15281 = vmatpush3.bf16.msra.mxu0 (%p6739_p0), %v15278_v35  ;;  %15871 = vmatpush3.bf16.msra.mxu1 (%p6739_p0), %v15278_v35  ;;  %v19174_v35 = vld [vmem:[#allocation3 + $0x141] sm:$0xff] (%p6739_p0) }
 0x4d8   :  { %v9063_v2 = vadd.f32 (%p6739_p0), %v9062_v24, %v9061_v26  ;;  %v9100_v24 = vsel (%p6739_p0), %vm137_vm3, %v19170_v49, 0.0 }
 0x4d9   : > { %v15055_v31 = vpop.f32.mrb[28].mxu0  ;;  %v19178_v26 = vld [vmem:[#allocation3 + $0x151] sm:$0xff] (%p6739_p0) }
 0x4da   : > { %v8888_v48 = vadd.f32 %v15055_v31, %v8709_v34  ;;  %v8360_v21 = vpop.f32.mrb[29].mxu0  ;;  %v19110_v34 = vld [vmem:[#allocation3 + $0x81] sm:$0xff] (%p6739_p0)  ;;  %v9068_v31 = vsel (%p6739_p0), %vm137_vm3, %v19106_v6, 0.0 }
 0x4db   : > { %v15103_v61 = vpop.f32.mrb[28].mxu1  ;;  %v8887_v10 = vadd.f32 %v8707_v29, %v8360_v21  ;;  %v9065_v29 = vadd.f32 (%p6739_p0), %v9064_v42, %v9063_v2  ;;  %v9070_v21 = vsel (%p6739_p0), %vm137_vm3, %v19110_v34, 0.0  ;;  %v9102_v2 = vsel (%p6739_p0), %vm137_vm3, %v19174_v35, 0.0 }
 0x4dc   : > { %8952 = vst.msk [vmem:[#allocation3 + $0x171] sm:$0xff] %vm137_vm3, %v8888_v48  ;;  %v8920_v16 = vadd.f32 %v15103_v61, %v8789_v36  ;;  %v8520_v7 = vpop.f32.mrb[29].mxu1  ;;  %v19114_v36 = vld [vmem:[#allocation3 + $0x91] sm:$0xff] (%p6739_p0) }
 0x4dd   : > { %8951 = vst.msk [vmem:[#allocation3 + $0x169] sm:$0xff] %vm137_vm3, %v8887_v10  ;;  %v8919_v8 = vadd.f32 %v8787_v12, %v8520_v7  ;;  %v9067_v48 = vadd.f32 (%p6739_p0), %v9066_v17, %v9065_v29  ;;  %v19118_v12 = vld [vmem:[#allocation3 + $0x99] sm:$0xff] (%p6739_p0)  ;;  %v9072_v10 = vsel (%p6739_p0), %vm137_vm3, %v19114_v36, 0.0 }
 0x4de   : > { %8984 = vst.msk [vmem:[#allocation3 + $0x321] sm:$0xff] %vm137_vm3, %v8920_v16  ;;  %v19122_v16 = vld [vmem:[#allocation3 + $0xa9] sm:$0xff] (%p6739_p0)  ;;  %v19182_v17 = vld [vmem:[#allocation3 + $0x159] sm:$0xff] (%p6739_p0) }
 0x4df   : > { %8983 = vst.msk [vmem:[#allocation3 + $0x319] sm:$0xff] %vm137_vm3, %v8919_v8  ;;  %v9069_v61 = vadd.f32 (%p6739_p0), %v9068_v31, %v9067_v48  ;;  %v9074_v8 = vsel (%p6739_p0), %vm137_vm3, %v19118_v12, 0.0  ;;  %v9076_v45 = vsel (%p6739_p0), %vm137_vm3, %v19122_v16, 0.0  ;;  %v9104_v31 = vsel (%p6739_p0), %vm137_vm3, %v19178_v26, 0.0 }
 0x4e1   :  { %v9071_v7 = vadd.f32 (%p6739_p0), %v9070_v21, %v9069_v61  ;;  %v9106_v61 = vsel (%p6739_p0), %vm137_vm3, %v19182_v17, 0.0 }
 0x4e3   :  { %v9073_v62 = vadd.f32 (%p6739_p0), %v9072_v10, %v9071_v7  ;;  %v19190_v10 = vld [vmem:[#allocation3 + $0x171] sm:$0xff] (%p6739_p0) }
 0x4e4   : > { %v15058_v47 = vpop.f32.mrb[30].mxu0  ;;  %6741 = sbr.rel (!%p6739_p0) target bundleno = 858 (0x35a), region = 105  ;;  %v19186_v48 = vld [vmem:[#allocation3 + $0x169] sm:$0xff] (%p6739_p0) }
 0x4e5   : > { %v8890_v52 = vadd.f32 %v15058_v47, %v8714_v39  ;;  %v8370_v55 = vpop.f32.mrb[31].mxu0  ;;  %v9075_v32 = vadd.f32 (%p6739_p0), %v9074_v8, %v9073_v62  ;;  %v19134_v39 = vld [vmem:[#allocation3 + $0xc9] sm:$0xff] (%p6739_p0)  ;;  %v9080_v47 = vsel (%p6739_p0), %vm137_vm3, %v19130_v51, 0.0  ;;  %v9108_v8 = vsel (%p6739_p0), %vm137_vm3, %v19186_v48, 0.0 }
 0x4e6   : > { %v15106_v41 = vpop.f32.mrb[30].mxu1  ;;  %v8889_v38 = vadd.f32 %v8712_v46, %v8370_v55  ;;  %v9082_v55 = vsel (%p6739_p0), %vm137_vm3, %v19134_v39, 0.0 }
 0x4e7   : > { %8954 = vst.msk [vmem:[#allocation3 + $0x189] sm:$0xff] %vm137_vm3, %v8890_v52  ;;  %v8922_v33 = vadd.f32 %v15106_v41, %v8794_v50  ;;  %v8530_v53 = vpop.f32.mrb[31].mxu1  ;;  %v9077_v46 = vadd.f32 (%p6739_p0), %v9076_v45, %v9075_v32  ;;  %v19138_v50 = vld [vmem:[#allocation3 + $0xd9] sm:$0xff] (%p6739_p0)  ;;  %v9110_v32 = vsel (%p6739_p0), %vm137_vm3, %v19190_v10, 0.0 }
 0x4e8   : > { %8953 = vst.msk [vmem:[#allocation3 + $0x181] sm:$0xff] %vm137_vm3, %v8889_v38  ;;  %v8921_v5 = vadd.f32 %v8792_v20, %v8530_v53  ;;  %v19142_v20 = vld [vmem:[#allocation3 + $0xe1] sm:$0xff] (%p6739_p0)  ;;  %v9084_v38 = vsel (%p6739_p0), %vm137_vm3, %v19138_v50, 0.0 }
 0x4e9   : > { %8986 = vst.msk [vmem:[#allocation3 + $0x339] sm:$0xff] %vm137_vm3, %v8922_v33  ;;  %v9079_v52 = vadd.f32 (%p6739_p0), %v9078_v56, %v9077_v46  ;;  %v19146_v33 = vld [vmem:[#allocation3 + $0xf1] sm:$0xff] (%p6739_p0) }
 0x4ea   : > { %8985 = vst.msk [vmem:[#allocation3 + $0x331] sm:$0xff] %vm137_vm3, %v8921_v5  ;;  %v9086_v5 = vsel (%p6739_p0), %vm137_vm3, %v19142_v20, 0.0  ;;  %v9088_v30 = vsel (%p6739_p0), %vm137_vm3, %v19146_v33, 0.0 }
 0x4eb   :  { %v9081_v41 = vadd.f32 %v9080_v47, %v9079_v52  ;;  %v19202_v52 = vld [vmem:[#allocation3 + $0x1c9] sm:$0xff] }
 0x4ed   :  { %v9083_v53 = vadd.f32 %v9082_v55, %v9081_v41 }
 0x4ee   :  { %v19198_v56 = vld [vmem:[#allocation3 + $0x189] sm:$0xff] }
 0x4ef   :  { %v9085_v4 = vadd.f32 %v9084_v38, %v9083_v53  ;;  %v19194_v62 = vld [vmem:[#allocation3 + $0x181] sm:$0xff]  ;;  %v9114_v41 = vsel %vm137_vm3, %v19198_v56, 0.0  ;;  %v19206_v38 = vld [vmem:[#allocation3 + $0x1d1] sm:$0xff] }
 0x4f0   :  { %v9112_v47 = vsel %vm137_vm3, %v19194_v62, 0.0 }
 0x4f1   :  { %v9087_v3 = vadd.f32 %v9086_v5, %v9085_v4  ;;  %v9116_v5 = vsel %vm137_vm3, %v19202_v52, 0.0  ;;  %v19210_v4 = vld [vmem:[#allocation3 + $0x1e1] sm:$0xff] }
 0x4f3   :  { %v9089_v60 = vadd.f32 %v9088_v30, %v9087_v3  ;;  %v9118_v3 = vsel %vm137_vm3, %v19206_v38, 0.0 }
 0x4f5   :  { %v9091_v1 = vadd.f32 %v9090_v57, %v9089_v60  ;;  %v19214_v57 = vld [vmem:[#allocation3 + $0x1e9] sm:$0xff] }
 0x4f7   :  { %v9093_v25 = vadd.f32 %v9092_v27, %v9091_v1  ;;  %v9120_v27 = vsel %vm137_vm3, %v19210_v4, 0.0  ;;  %v19218_v1 = vld [vmem:[#allocation3 + $0x1f9] sm:$0xff] }
 0x4f9   :  { %v9095_v23 = vadd.f32 %v9094_v22, %v9093_v25  ;;  %v9122_v25 = vsel %vm137_vm3, %v19214_v57, 0.0 }
 0x4fb   :  { %v9097_v43 = vadd.f32 %v9096_v14, %v9095_v23  ;;  %v19222_v14 = vld [vmem:[#allocation3 + $0x201] sm:$0xff] }
 0x4fd   :  { %v9099_v42 = vadd.f32 %v9098_v28, %v9097_v43  ;;  %v9124_v28 = vsel %vm137_vm3, %v19218_v1, 0.0  ;;  %v19226_v43 = vld [vmem:[#allocation3 + $0x211] sm:$0xff] }
 0x4ff   :  { %v9101_v29 = vadd.f32 %v9100_v24, %v9099_v42  ;;  %v9126_v42 = vsel %vm137_vm3, %v19222_v14, 0.0 }
 0x501   :  { %v9103_v21 = vadd.f32 %v9102_v2, %v9101_v29  ;;  %v19230_v2 = vld [vmem:[#allocation3 + $0x219] sm:$0xff] }
 0x503   :  { %v9105_v7 = vadd.f32 %v9104_v31, %v9103_v21  ;;  %v9128_v31 = vsel %vm137_vm3, %v19226_v43, 0.0  ;;  %v19234_v21 = vld [vmem:[#allocation3 + $0x229] sm:$0xff] }
 0x505   :  { %v9107_v45 = vadd.f32 %v9106_v61, %v9105_v7  ;;  %v9130_v7 = vsel %vm137_vm3, %v19230_v2, 0.0 }
 0x507   :  { %v9109_v46 = vadd.f32 %v9108_v8, %v9107_v45  ;;  %v19238_v8 = vld [vmem:[#allocation3 + $0x231] sm:$0xff] }
 0x509   :  { %v9111_v55 = vadd.f32 %v9110_v32, %v9109_v46  ;;  %v9132_v32 = vsel %vm137_vm3, %v19234_v21, 0.0  ;;  %v19242_v46 = vld [vmem:[#allocation3 + $0x241] sm:$0xff] }
 0x50b   :  { %v9113_v53 = vadd.f32 %v9112_v47, %v9111_v55  ;;  %v9134_v55 = vsel %vm137_vm3, %v19238_v8, 0.0 }
 0x50d   :  { %v9115_v30 = vadd.f32 %v9114_v41, %v9113_v53  ;;  %v19246_v41 = vld [vmem:[#allocation3 + $0x249] sm:$0xff] }
 0x50f   :  { %v9117_v60 = vadd.f32 %v9116_v5, %v9115_v30  ;;  %v9136_v5 = vsel %vm137_vm3, %v19242_v46, 0.0  ;;  %v19250_v30 = vld [vmem:[#allocation3 + $0x259] sm:$0xff] }
 0x511   :  { %v9119_v22 = vadd.f32 %v9118_v3, %v9117_v60  ;;  %v9138_v60 = vsel %vm137_vm3, %v19246_v41, 0.0 }
 0x513   :  { %v9121_v23 = vadd.f32 %v9120_v27, %v9119_v22  ;;  %v19254_v27 = vld [vmem:[#allocation3 + $0x261] sm:$0xff] }
 0x515   :  { %v9123_v24 = vadd.f32 %v9122_v25, %v9121_v23  ;;  %v9140_v25 = vsel %vm137_vm3, %v19250_v30, 0.0  ;;  %v19258_v23 = vld [vmem:[#allocation3 + $0x271] sm:$0xff] }
 0x517   :  { %v9125_v29 = vadd.f32 %v9124_v28, %v9123_v24  ;;  %v9142_v24 = vsel %vm137_vm3, %v19254_v27, 0.0 }
 0x519   :  { %v9127_v61 = vadd.f32 %v9126_v42, %v9125_v29  ;;  %v19262_v42 = vld [vmem:[#allocation3 + $0x279] sm:$0xff] }
 0x51b   :  { %v9129_v45 = vadd.f32 %v9128_v31, %v9127_v61  ;;  %v9144_v31 = vsel %vm137_vm3, %v19258_v23, 0.0  ;;  %v19266_v61 = vld [vmem:[#allocation3 + $0x289] sm:$0xff] }
 0x51c   :  { %21394 = vst [vmem:[#allocation18_spill] sm:$0xff] %v19266_v61 }
 0x51d   :  { %v9131_v47 = vadd.f32 %v9130_v7, %v9129_v45  ;;  %v9146_v45 = vsel %vm137_vm3, %v19262_v42, 0.0 }
 0x51f   :  { %v9133_v53 = vadd.f32 %v9132_v32, %v9131_v47  ;;  %v19270_v32 = vld [vmem:[#allocation3 + $0x291] sm:$0xff] }
 0x520   :  { %21395 = vst [vmem:[#allocation19_spill] sm:$0xff] %v19270_v32 }
 0x521   :  { %v9135_v3 = vadd.f32 %v9134_v55, %v9133_v53  ;;  %v9148_v55 = vsel %vm137_vm3, %v19266_v61, 0.0  ;;  %v19274_v53 = vld [vmem:[#allocation3 + $0x2a1] sm:$0xff] }
 0x522   :  { %21396 = vst [vmem:[#allocation20_spill] sm:$0xff] %v19274_v53 }
 0x523   :  { %v9137_v22 = vadd.f32 %v9136_v5, %v9135_v3  ;;  %v9150_v3 = vsel %vm137_vm3, %v19270_v32, 0.0 }
 0x525   :  { %v9139_v28 = vadd.f32 %v9138_v60, %v9137_v22  ;;  %v19278_v60 = vld [vmem:[#allocation3 + $0x2a9] sm:$0xff] }
 0x526   :  { %21397 = vst [vmem:[#allocation21_spill] sm:$0xff] %v19278_v60 }
 0x527   :  { %v9141_v29 = vadd.f32 %v9140_v25, %v9139_v28  ;;  %v9152_v25 = vsel %vm137_vm3, %v19274_v53, 0.0  ;;  %v19282_v28 = vld [vmem:[#allocation3 + $0x2b9] sm:$0xff] }
 0x528   :  { %21398 = vst [vmem:[#allocation22_spill] sm:$0xff] %v19282_v28 }
 0x529   :  { %v9143_v7 = vadd.f32 %v9142_v24, %v9141_v29  ;;  %v9154_v29 = vsel %vm137_vm3, %v19278_v60, 0.0 }
 0x52b   :  { %v9145_v47 = vadd.f32 %v9144_v31, %v9143_v7  ;;  %v19286_v31 = vld [vmem:[#allocation3 + $0x2c1] sm:$0xff] }
 0x52c   :  { %21399 = vst [vmem:[#allocation23_spill] sm:$0xff] %v19286_v31 }
 0x52d   :  { %v9147_v5 = vadd.f32 %v9146_v45, %v9145_v47  ;;  %v9156_v45 = vsel %vm137_vm3, %v19282_v28, 0.0  ;;  %v19290_v47 = vld [vmem:[#allocation3 + $0x2d1] sm:$0xff] }
 0x52e   :  { %21400 = vst [vmem:[#allocation24_spill] sm:$0xff] %v19290_v47 }
 0x52f   :  { %v9149_v22 = vadd.f32 %v9148_v55, %v9147_v5  ;;  %v9158_v55 = vsel %vm137_vm3, %v19286_v31, 0.0  ;;  %v19294_v5 = vld [vmem:[#allocation3 + $0x2d9] sm:$0xff] }
 0x530   :  { %21401 = vst [vmem:[#allocation25_spill] sm:$0xff] %v19294_v5 }
 0x531   :  { %v9151_v24 = vadd.f32 %v9150_v3, %v9149_v22  ;;  %v9160_v3 = vsel %vm137_vm3, %v19290_v47, 0.0  ;;  %v19298_v22 = vld [vmem:[#allocation3 + $0x2e9] sm:$0xff] }
 0x532   :  { %21402 = vst [vmem:[#allocation26_spill] sm:$0xff] %v19298_v22 }
 0x533   :  { %v9153_v7 = vadd.f32 %v9152_v25, %v9151_v24  ;;  %v9162_v25 = vsel %vm137_vm3, %v19294_v5, 0.0  ;;  %v19302_v24 = vld [vmem:[#allocation3 + $0x2f1] sm:$0xff] }
 0x534   :  { %21403 = vst [vmem:[#allocation27_spill] sm:$0xff] %v19302_v24 }
 0x535   :  { %v9155_v32 = vadd.f32 %v9154_v29, %v9153_v7  ;;  %v9164_v29 = vsel %vm137_vm3, %v19298_v22, 0.0  ;;  %v19306_v7 = vld [vmem:[#allocation3 + $0x301] sm:$0xff] }
 0x536   :  { %21404 = vst [vmem:[#allocation28_spill] sm:$0xff] %v19306_v7 }
 0x537   :  { %v9157_v53 = vadd.f32 %v9156_v45, %v9155_v32  ;;  %v9166_v32 = vsel %vm137_vm3, %v19302_v24, 0.0  ;;  %v19310_v45 = vld [vmem:[#allocation3 + $0x309] sm:$0xff] }
 0x538   :  { %21405 = vst [vmem:[#allocation29_spill] sm:$0xff] %v19310_v45  ;;  %v9170_v5 = vsel %vm137_vm3, %v19310_v45, 0.0 }
 0x539   :  { %v9159_v60 = vadd.f32 %v9158_v55, %v9157_v53  ;;  %v9168_v53 = vsel %vm137_vm3, %v19306_v7, 0.0 }
 0x53b   :  { %v9161_v28 = vadd.f32 %v9160_v3, %v9159_v60  ;;  %v19316_v60 = vld [vmem:[#allocation3 + $0x319] sm:$0xff] }
 0x53c   :  { %21406 = vst [vmem:[#allocation30_spill] sm:$0xff] %v19316_v60 }
 0x53d   :  { %v9163_v31 = vadd.f32 %v9162_v25, %v9161_v28  ;;  %v9172_v28 = vsel %vm137_vm3, %v19316_v60, 0.0  ;;  %v19320_v25 = vld [vmem:[#allocation3 + $0x321] sm:$0xff] }
 0x53e   :  { %21407 = vst [vmem:[#allocation31_spill] sm:$0xff] %v19320_v25 }
 0x53f   :  { %v9165_v47 = vadd.f32 %v9164_v29, %v9163_v31  ;;  %v9174_v31 = vsel %vm137_vm3, %v19320_v25, 0.0  ;;  %v19324_v29 = vld [vmem:[#allocation3 + $0x331] sm:$0xff] }
 0x541   :  { %v9167_v55 = vadd.f32 %v9166_v32, %v9165_v47  ;;  %v9176_v47 = vsel %vm137_vm3, %v19324_v29, 0.0  ;;  %v19328_v32 = vld [vmem:[#allocation3 + $0x339] sm:$0xff] }
 0x543   :  { %v9169_v3 = vadd.f32 %v9168_v53, %v9167_v55 }
 0x545   :  { %v9171_v22 = vadd.f32 %v9170_v5, %v9169_v3  ;;  %v9178_v5 = vsel %vm137_vm3, %v19328_v32, 0.0 }
 0x547   :  { %v9173_v24 = vadd.f32 %v9172_v28, %v9171_v22 }
 0x549   :  { %v9175_v7 = vadd.f32 %v9174_v31, %v9173_v24 }
 0x54b   :  { %v9177_v45 = vadd.f32 %v9176_v47, %v9175_v7 }
 0x54d   :  { %v9179_v53 = vadd.f32 %v9178_v5, %v9177_v45 }
 0x54f   :  { %v9180_v55 = vrot.slane %v9179_v53, 4 }
 0x551   :  { %v9181_v3 = vadd.f32 %v9180_v55, %v9179_v53 }
 0x553   :  { %v9182_v60 = vrot.slane %v9181_v3, 2 }
 0x555   :  { %v9183_v22 = vadd.f32 %v9182_v60, %v9181_v3 }
 0x557   :  { %v9184_v28 = vrot.slane %v9183_v22, 1 }
 0x559   :  { %v9185_v61 = vadd.f32 %v9184_v28, %v9183_v22 }
 0x55b   :  { %v19332_v25 = vmul.f32 0.001953125, %v9185_v61 }
 0x55d   :  { %v19336_v24 = vsub.f32 %v19070_v0, %v19332_v25  ;;  %v19340_v31 = vsub.f32 %v19072_v11, %v19332_v25  ;;  %v19344_v7 = vsub.f32 %v19074_v15, %v19332_v25  ;;  %v19348_v45 = vsub.f32 %v19076_v19, %v19332_v25 }
 0x55e   :  { %v19352_v61 = vsub.f32 %v19084_v9, %v19332_v25  ;;  %v19362_v15 = vsub.f32 %v19094_v44, %v19332_v25  ;;  %v19368_v9 = vsub.f32 %v19098_v59, %v19332_v25  ;;  %v19377_v44 = vsub.f32 %v19102_v37, %v19332_v25 }
 0x55f   :  { %v9252_v0 = vmul.f32 %v19336_v24, %v19336_v24  ;;  %v9253_v60 = vmul.f32 %v19340_v31, %v19340_v31  ;;  %v9254_v11 = vmul.f32 %v19344_v7, %v19344_v7  ;;  %v9255_v19 = vmul.f32 %v19348_v45, %v19348_v45 }
 0x560   :  { %21408 = vst [vmem:[#allocation32_spill] sm:$0xff] %v19352_v61  ;;  %v9256_v47 = vmul.f32 %v19352_v61, %v19352_v61  ;;  %v9257_v22 = vmul.f32 %v19362_v15, %v19362_v15  ;;  %v19384_v61 = vsub.f32 %v19106_v6, %v19332_v25  ;;  %v19391_v37 = vsub.f32 %v19110_v34, %v19332_v25 }
 0x561   :  { %v9316_v5 = vsel %vm137_vm3, %v9252_v0, 0.0  ;;  %v9317_v53 = vsel %vm137_vm3, %v9253_v60, 0.0  ;;  %v9319_v55 = vsel %vm137_vm3, %v9254_v11, 0.0  ;;  %v9321_v59 = vsel %vm137_vm3, %v9255_v19, 0.0 }
 0x562   :  { %v9318_v3 = vadd.f32 %v9317_v53, %v9316_v5  ;;  %v9258_v0 = vmul.f32 %v19368_v9, %v19368_v9  ;;  %v9323_v60 = vsel %vm137_vm3, %v9256_v47, 0.0  ;;  %v9259_v5 = vmul.f32 %v19377_v44, %v19377_v44 }
 0x563   :  { %v9325_v19 = vsel %vm137_vm3, %v9257_v22, 0.0  ;;  %v19398_v6 = vsub.f32 %v19114_v36, %v19332_v25  ;;  %v19405_v34 = vsub.f32 %v19118_v12, %v19332_v25  ;;  %v19412_v36 = vsub.f32 %v19122_v16, %v19332_v25 }
 0x564   :  { %v9320_v28 = vadd.f32 %v9319_v55, %v9318_v3  ;;  %v9260_v55 = vmul.f32 %v19384_v61, %v19384_v61  ;;  %v9327_v47 = vsel %vm137_vm3, %v9258_v0, 0.0  ;;  %v9329_v22 = vsel %vm137_vm3, %v9259_v5, 0.0 }
 0x565   :  { %v19419_v12 = vsub.f32 %v19126_v63, %v19332_v25  ;;  %v19426_v16 = vsub.f32 %v19130_v51, %v19332_v25  ;;  %v19433_v63 = vsub.f32 %v19134_v39, %v19332_v25  ;;  %v19440_v51 = vsub.f32 %v19138_v50, %v19332_v25 }
 0x566   :  { %v9322_v11 = vadd.f32 %v9321_v59, %v9320_v28  ;;  %v9261_v59 = vmul.f32 %v19391_v37, %v19391_v37  ;;  %v9331_v0 = vsel %vm137_vm3, %v9260_v55, 0.0  ;;  %v19447_v39 = vsub.f32 %v19142_v20, %v19332_v25 }
 0x567   :  { %v19454_v50 = vsub.f32 %v19146_v33, %v19332_v25  ;;  %v19461_v20 = vsub.f32 %v19150_v13, %v19332_v25  ;;  %v19468_v33 = vsub.f32 %v19154_v40, %v19332_v25  ;;  %v19475_v13 = vsub.f32 %v19158_v54, %v19332_v25 }
 0x568   :  { %v9324_v53 = vadd.f32 %v9323_v60, %v9322_v11  ;;  %v9262_v60 = vmul.f32 %v19398_v6, %v19398_v6  ;;  %v9333_v5 = vsel %vm137_vm3, %v9261_v59, 0.0  ;;  %v19482_v40 = vsub.f32 %v19162_v58, %v19332_v25 }
 0x569   :  { %v19489_v54 = vsub.f32 %v19166_v18, %v19332_v25  ;;  %v19496_v58 = vsub.f32 %v19170_v49, %v19332_v25  ;;  %v19503_v18 = vsub.f32 %v19174_v35, %v19332_v25  ;;  %v19510_v49 = vsub.f32 %v19178_v26, %v19332_v25 }
 0x56a   :  { %v9326_v3 = vadd.f32 %v9325_v19, %v9324_v53  ;;  %v9263_v19 = vmul.f32 %v19405_v34, %v19405_v34  ;;  %v9335_v55 = vsel %vm137_vm3, %v9262_v60, 0.0  ;;  %v19517_v35 = vsub.f32 %v19182_v17, %v19332_v25 }
 0x56b   :  { %21409 = vst [vmem:[#allocation33_spill] sm:$0xff] %v19496_v58  ;;  %21410 = vst [vmem:[#allocation34_spill] sm:$0xff] %v19503_v18  ;;  %v19524_v26 = vsub.f32 %v19186_v48, %v19332_v25  ;;  %v19531_v17 = vsub.f32 %v19190_v10, %v19332_v25  ;;  %v19538_v48 = vsub.f32 %v19194_v62, %v19332_v25 }
 0x56c   :  { %v9328_v28 = vadd.f32 %v9327_v47, %v9326_v3  ;;  %v9264_v47 = vmul.f32 %v19412_v36, %v19412_v36  ;;  %v9337_v59 = vsel %vm137_vm3, %v9263_v19, 0.0  ;;  %21411 = vst [vmem:[#allocation35_spill] sm:$0xff] %v19510_v49  ;;  %21412 = vst [vmem:[#allocation36_spill] sm:$0xff] %v19517_v35  ;;  %v19545_v10 = vsub.f32 %v19198_v56, %v19332_v25 }
 0x56d   :  { %21413 = vst [vmem:[#allocation37_spill] sm:$0xff] %v19524_v26  ;;  %21414 = vst [vmem:[#allocation38_spill] sm:$0xff] %v19531_v17  ;;  %v19552_v62 = vsub.f32 %v19202_v52, %v19332_v25  ;;  %v19559_v56 = vsub.f32 %v19206_v38, %v19332_v25  ;;  %v19566_v52 = vsub.f32 %v19210_v4, %v19332_v25 }
 0x56e   :  { %v9330_v11 = vadd.f32 %v9329_v22, %v9328_v28  ;;  %v9265_v22 = vmul.f32 %v19419_v12, %v19419_v12  ;;  %v9339_v60 = vsel %vm137_vm3, %v9264_v47, 0.0  ;;  %21415 = vst [vmem:[#allocation39_spill] sm:$0xff] %v19538_v48  ;;  %21416 = vst [vmem:[#allocation40_spill] sm:$0xff] %v19545_v10  ;;  %v19573_v38 = vsub.f32 %v19214_v57, %v19332_v25 }
 0x56f   :  { %v19580_v4 = vsub.f32 %v19218_v1, %v19332_v25  ;;  %v19587_v57 = vsub.f32 %v19222_v14, %v19332_v25  ;;  %v19594_v1 = vsub.f32 %v19226_v43, %v19332_v25  ;;  %v19601_v14 = vsub.f32 %v19230_v2, %v19332_v25 }
 0x570   :  { %v9332_v53 = vadd.f32 %v9331_v0, %v9330_v11  ;;  %v9266_v0 = vmul.f32 %v19426_v16, %v19426_v16  ;;  %v9341_v19 = vsel %vm137_vm3, %v9265_v22, 0.0  ;;  %v19608_v43 = vsub.f32 %v19234_v21, %v19332_v25 }
 0x571   :  { %v19615_v2 = vsub.f32 %v19238_v8, %v19332_v25  ;;  %v19622_v21 = vsub.f32 %v19242_v46, %v19332_v25  ;;  %v19629_v8 = vsub.f32 %v19246_v41, %v19332_v25  ;;  %v19636_v46 = vsub.f32 %v19250_v30, %v19332_v25 }
 0x572   :  { %v9334_v3 = vadd.f32 %v9333_v5, %v9332_v53  ;;  %v9267_v5 = vmul.f32 %v19433_v63, %v19433_v63  ;;  %v9343_v47 = vsel %vm137_vm3, %v9266_v0, 0.0  ;;  %v19643_v41 = vsub.f32 %v19254_v27, %v19332_v25 }
 0x573   :  { %v19650_v30 = vsub.f32 %v19258_v23, %v19332_v25  ;;  %v19657_v27 = vsub.f32 %v19262_v42, %v19332_v25 }
 0x574   :  { %v9336_v28 = vadd.f32 %v9335_v55, %v9334_v3  ;;  %v9268_v55 = vmul.f32 %v19440_v51, %v19440_v51  ;;  %v9345_v22 = vsel %vm137_vm3, %v9267_v5, 0.0 }
 0x576   :  { %v9338_v11 = vadd.f32 %v9337_v59, %v9336_v28  ;;  %v9269_v59 = vmul.f32 %v19447_v39, %v19447_v39  ;;  %v9347_v0 = vsel %vm137_vm3, %v9268_v55, 0.0 }
 0x578   :  { %v9340_v53 = vadd.f32 %v9339_v60, %v9338_v11  ;;  %v9270_v60 = vmul.f32 %v19454_v50, %v19454_v50  ;;  %v9349_v5 = vsel %vm137_vm3, %v9269_v59, 0.0 }
 0x57a   :  { %v9342_v3 = vadd.f32 %v9341_v19, %v9340_v53  ;;  %v9271_v19 = vmul.f32 %v19461_v20, %v19461_v20  ;;  %v9351_v55 = vsel %vm137_vm3, %v9270_v60, 0.0 }
 0x57c   :  { %v9344_v28 = vadd.f32 %v9343_v47, %v9342_v3  ;;  %v9272_v47 = vmul.f32 %v19468_v33, %v19468_v33  ;;  %v9353_v59 = vsel %vm137_vm3, %v9271_v19, 0.0 }
 0x57e   :  { %v9346_v11 = vadd.f32 %v9345_v22, %v9344_v28  ;;  %v9273_v22 = vmul.f32 %v19475_v13, %v19475_v13  ;;  %v9355_v60 = vsel %vm137_vm3, %v9272_v47, 0.0 }
 0x580   :  { %v9348_v53 = vadd.f32 %v9347_v0, %v9346_v11  ;;  %v9274_v0 = vmul.f32 %v19482_v40, %v19482_v40  ;;  %v9357_v19 = vsel %vm137_vm3, %v9273_v22, 0.0 }
 0x582   :  { %v9350_v3 = vadd.f32 %v9349_v5, %v9348_v53  ;;  %v9275_v5 = vmul.f32 %v19489_v54, %v19489_v54  ;;  %v9359_v47 = vsel %vm137_vm3, %v9274_v0, 0.0 }
 0x584   :  { %v9352_v28 = vadd.f32 %v9351_v55, %v9350_v3  ;;  %v9276_v55 = vmul.f32 %v19496_v58, %v19496_v58  ;;  %v9361_v22 = vsel %vm137_vm3, %v9275_v5, 0.0 }
 0x586   :  { %v9354_v11 = vadd.f32 %v9353_v59, %v9352_v28  ;;  %v9277_v59 = vmul.f32 %v19503_v18, %v19503_v18  ;;  %v9363_v0 = vsel %vm137_vm3, %v9276_v55, 0.0 }
 0x588   :  { %v9356_v53 = vadd.f32 %v9355_v60, %v9354_v11  ;;  %v9278_v60 = vmul.f32 %v19510_v49, %v19510_v49  ;;  %v9365_v5 = vsel %vm137_vm3, %v9277_v59, 0.0 }
 0x58a   :  { %v9358_v3 = vadd.f32 %v9357_v19, %v9356_v53  ;;  %v9279_v19 = vmul.f32 %v19517_v35, %v19517_v35  ;;  %v9367_v55 = vsel %vm137_vm3, %v9278_v60, 0.0 }
 0x58c   :  { %v9360_v28 = vadd.f32 %v9359_v47, %v9358_v3  ;;  %v9280_v47 = vmul.f32 %v19524_v26, %v19524_v26  ;;  %v9369_v59 = vsel %vm137_vm3, %v9279_v19, 0.0 }
 0x58e   :  { %v9362_v11 = vadd.f32 %v9361_v22, %v9360_v28  ;;  %v9281_v22 = vmul.f32 %v19531_v17, %v19531_v17  ;;  %v9371_v60 = vsel %vm137_vm3, %v9280_v47, 0.0 }
 0x590   :  { %v9364_v53 = vadd.f32 %v9363_v0, %v9362_v11  ;;  %v9282_v0 = vmul.f32 %v19538_v48, %v19538_v48  ;;  %v9373_v19 = vsel %vm137_vm3, %v9281_v22, 0.0 }
 0x592   :  { %v9366_v3 = vadd.f32 %v9365_v5, %v9364_v53  ;;  %v9283_v5 = vmul.f32 %v19545_v10, %v19545_v10  ;;  %v9375_v47 = vsel %vm137_vm3, %v9282_v0, 0.0  ;;  %v9299_v10 = vmul.f32 %v19657_v27, %v19657_v27 }
 0x594   :  { %v9368_v28 = vadd.f32 %v9367_v55, %v9366_v3  ;;  %v9284_v55 = vmul.f32 %v19552_v62, %v19552_v62  ;;  %v9377_v22 = vsel %vm137_vm3, %v9283_v5, 0.0 }
 0x596   :  { %v9370_v11 = vadd.f32 %v9369_v59, %v9368_v28  ;;  %v9285_v59 = vmul.f32 %v19559_v56, %v19559_v56  ;;  %v9379_v0 = vsel %vm137_vm3, %v9284_v55, 0.0 }
 0x598   :  { %v9372_v53 = vadd.f32 %v9371_v60, %v9370_v11  ;;  %v9286_v60 = vmul.f32 %v19566_v52, %v19566_v52  ;;  %v9381_v5 = vsel %vm137_vm3, %v9285_v59, 0.0 }
 0x59a   :  { %v9374_v3 = vadd.f32 %v9373_v19, %v9372_v53  ;;  %v9287_v19 = vmul.f32 %v19573_v38, %v19573_v38  ;;  %v9383_v55 = vsel %vm137_vm3, %v9286_v60, 0.0 }
 0x59c   :  { %v9376_v28 = vadd.f32 %v9375_v47, %v9374_v3  ;;  %v9288_v47 = vmul.f32 %v19580_v4, %v19580_v4  ;;  %v9385_v59 = vsel %vm137_vm3, %v9287_v19, 0.0 }
 0x59e   :  { %v9378_v11 = vadd.f32 %v9377_v22, %v9376_v28  ;;  %v9289_v22 = vmul.f32 %v19587_v57, %v19587_v57  ;;  %v9387_v60 = vsel %vm137_vm3, %v9288_v47, 0.0 }
 0x5a0   :  { %v9380_v53 = vadd.f32 %v9379_v0, %v9378_v11  ;;  %v9290_v0 = vmul.f32 %v19594_v1, %v19594_v1  ;;  %v9389_v19 = vsel %vm137_vm3, %v9289_v22, 0.0 }
 0x5a2   :  { %v9382_v3 = vadd.f32 %v9381_v5, %v9380_v53  ;;  %v9291_v5 = vmul.f32 %v19601_v14, %v19601_v14  ;;  %v9391_v47 = vsel %vm137_vm3, %v9290_v0, 0.0 }
 0x5a4   :  { %v9384_v28 = vadd.f32 %v9383_v55, %v9382_v3  ;;  %v9292_v55 = vmul.f32 %v19608_v43, %v19608_v43  ;;  %v9393_v22 = vsel %vm137_vm3, %v9291_v5, 0.0 }
 0x5a6   :  { %v9386_v11 = vadd.f32 %v9385_v59, %v9384_v28  ;;  %v9293_v59 = vmul.f32 %v19615_v2, %v19615_v2  ;;  %v9395_v0 = vsel %vm137_vm3, %v9292_v55, 0.0 }
 0x5a8   :  { %v9388_v53 = vadd.f32 %v9387_v60, %v9386_v11  ;;  %v9294_v60 = vmul.f32 %v19622_v21, %v19622_v21  ;;  %v9397_v5 = vsel %vm137_vm3, %v9293_v59, 0.0 }
 0x5aa   :  { %v9390_v3 = vadd.f32 %v9389_v19, %v9388_v53  ;;  %v9295_v19 = vmul.f32 %v19629_v8, %v19629_v8  ;;  %v9399_v55 = vsel %vm137_vm3, %v9294_v60, 0.0 }
 0x5ac   :  { %v9392_v28 = vadd.f32 %v9391_v47, %v9390_v3  ;;  %v9296_v47 = vmul.f32 %v19636_v46, %v19636_v46  ;;  %v9401_v59 = vsel %vm137_vm3, %v9295_v19, 0.0 }
 0x5ae   :  { %v9394_v11 = vadd.f32 %v9393_v22, %v9392_v28  ;;  %v9297_v22 = vmul.f32 %v19643_v41, %v19643_v41  ;;  %v9403_v60 = vsel %vm137_vm3, %v9296_v47, 0.0 }
 0x5b0   :  { %v9396_v53 = vadd.f32 %v9395_v0, %v9394_v11  ;;  %v21417_v0 = vld [vmem:[#allocation18_spill] sm:$0xff]  ;;  %v9298_v11 = vmul.f32 %v19650_v30, %v19650_v30  ;;  %v9405_v19 = vsel %vm137_vm3, %v9297_v22, 0.0  ;;  %v9409_v22 = vsel %vm137_vm3, %v9299_v10, 0.0 }
 0x5b1   :  { %v19664_v23 = vsub.f32 %v21417_v0, %v19332_v25 }
 0x5b2   :  { %v9398_v3 = vadd.f32 %v9397_v5, %v9396_v53  ;;  %v21418_v53 = vld [vmem:[#allocation19_spill] sm:$0xff]  ;;  %v9407_v47 = vsel %vm137_vm3, %v9298_v11, 0.0 }
 0x5b3   :  { %v19671_v42 = vsub.f32 %v21418_v53, %v19332_v25  ;;  %v9300_v48 = vmul.f32 %v19664_v23, %v19664_v23 }
 0x5b4   :  { %v9400_v28 = vadd.f32 %v9399_v55, %v9398_v3  ;;  %v21419_v3 = vld [vmem:[#allocation20_spill] sm:$0xff] }
 0x5b5   :  { %v19678_v0 = vsub.f32 %v21419_v3, %v19332_v25  ;;  %v9301_v17 = vmul.f32 %v19671_v42, %v19671_v42  ;;  %v9411_v11 = vsel %vm137_vm3, %v9300_v48, 0.0 }
 0x5b6   :  { %v9402_v5 = vadd.f32 %v9401_v59, %v9400_v28  ;;  %v21420_v28 = vld [vmem:[#allocation21_spill] sm:$0xff] }
 0x5b7   :  { %v19685_v53 = vsub.f32 %v21420_v28, %v19332_v25  ;;  %v9302_v26 = vmul.f32 %v19678_v0, %v19678_v0  ;;  %v9413_v10 = vsel %vm137_vm3, %v9301_v17, 0.0 }
 0x5b8   :  { %v9404_v55 = vadd.f32 %v9403_v60, %v9402_v5  ;;  %v21421_v5 = vld [vmem:[#allocation22_spill] sm:$0xff] }
 0x5b9   :  { %v19692_v3 = vsub.f32 %v21421_v5, %v19332_v25  ;;  %v9303_v35 = vmul.f32 %v19685_v53, %v19685_v53  ;;  %v9415_v48 = vsel %vm137_vm3, %v9302_v26, 0.0 }
 0x5ba   :  { %v9406_v59 = vadd.f32 %v9405_v19, %v9404_v55  ;;  %v21423_v55 = vld [vmem:[#allocation23_spill] sm:$0xff] }
 0x5bb   :  { %21422 = vst [vmem:[#allocation41_spill] sm:$0xff] %v19692_v3  ;;  %v19699_v28 = vsub.f32 %v21423_v55, %v19332_v25  ;;  %v9304_v49 = vmul.f32 %v19692_v3, %v19692_v3  ;;  %v9417_v17 = vsel %vm137_vm3, %v9303_v35, 0.0 }
 0x5bc   :  { %v9408_v60 = vadd.f32 %v9407_v47, %v9406_v59  ;;  %v21425_v59 = vld [vmem:[#allocation24_spill] sm:$0xff] }
 0x5bd   :  { %21424 = vst [vmem:[#allocation42_spill] sm:$0xff] %v19699_v28  ;;  %v19706_v5 = vsub.f32 %v21425_v59, %v19332_v25  ;;  %v9305_v18 = vmul.f32 %v19699_v28, %v19699_v28  ;;  %v9419_v26 = vsel %vm137_vm3, %v9304_v49, 0.0 }
 0x5be   :  { %v9410_v19 = vadd.f32 %v9409_v22, %v9408_v60  ;;  %v21427_v60 = vld [vmem:[#allocation25_spill] sm:$0xff] }
 0x5bf   :  { %21426 = vst [vmem:[#allocation43_spill] sm:$0xff] %v19706_v5  ;;  %v19713_v55 = vsub.f32 %v21427_v60, %v19332_v25  ;;  %v9306_v58 = vmul.f32 %v19706_v5, %v19706_v5  ;;  %v9421_v35 = vsel %vm137_vm3, %v9305_v18, 0.0 }
 0x5c0   :  { %v9412_v47 = vadd.f32 %v9411_v11, %v9410_v19  ;;  %v21429_v19 = vld [vmem:[#allocation26_spill] sm:$0xff] }
 0x5c1   :  { %21428 = vst [vmem:[#allocation46_spill] sm:$0xff] %v19713_v55  ;;  %v19720_v59 = vsub.f32 %v21429_v19, %v19332_v25  ;;  %v9307_v28 = vmul.f32 %v19713_v55, %v19713_v55  ;;  %v9423_v49 = vsel %vm137_vm3, %v9306_v58, 0.0 }
 0x5c2   :  { %v9414_v22 = vadd.f32 %v9413_v10, %v9412_v47  ;;  %v21431_v47 = vld [vmem:[#allocation27_spill] sm:$0xff] }
 0x5c3   :  { %21430 = vst [vmem:[#allocation44_spill] sm:$0xff] %v19720_v59  ;;  %v19727_v60 = vsub.f32 %v21431_v47, %v19332_v25  ;;  %v9308_v5 = vmul.f32 %v19720_v59, %v19720_v59  ;;  %v9425_v18 = vsel %vm137_vm3, %v9307_v28, 0.0 }
 0x5c4   :  { %v9416_v11 = vadd.f32 %v9415_v48, %v9414_v22  ;;  %v21433_v22 = vld [vmem:[#allocation28_spill] sm:$0xff] }
 0x5c5   :  { %21432 = vst [vmem:[#allocation45_spill] sm:$0xff] %v19727_v60  ;;  %v19734_v19 = vsub.f32 %v21433_v22, %v19332_v25  ;;  %v9309_v55 = vmul.f32 %v19727_v60, %v19727_v60  ;;  %v9427_v58 = vsel %vm137_vm3, %v9308_v5, 0.0 }
 0x5c6   :  { %v9418_v10 = vadd.f32 %v9417_v17, %v9416_v11  ;;  %v21435_v11 = vld [vmem:[#allocation29_spill] sm:$0xff] }
 0x5c7   :  { %21434 = vst [vmem:[#allocation13_spill] sm:$0xff] %v19734_v19  ;;  %v19741_v47 = vsub.f32 %v21435_v11, %v19332_v25  ;;  %v9310_v59 = vmul.f32 %v19734_v19, %v19734_v19  ;;  %v9429_v28 = vsel %vm137_vm3, %v9309_v55, 0.0 }
 0x5c8   :  { %v9420_v48 = vadd.f32 %v9419_v26, %v9418_v10  ;;  %v21437_v10 = vld [vmem:[#allocation30_spill] sm:$0xff] }
 0x5c9   :  { %21436 = vst [vmem:[#allocation14_spill] sm:$0xff] %v19741_v47  ;;  %v19748_v22 = vsub.f32 %v21437_v10, %v19332_v25  ;;  %v9311_v60 = vmul.f32 %v19741_v47, %v19741_v47  ;;  %v9431_v5 = vsel %vm137_vm3, %v9310_v59, 0.0 }
 0x5ca   :  { %v9422_v17 = vadd.f32 %v9421_v35, %v9420_v48  ;;  %v21439_v48 = vld [vmem:[#allocation31_spill] sm:$0xff] }
 0x5cb   :  { %21438 = vst [vmem:[#allocation15_spill] sm:$0xff] %v19748_v22  ;;  %v19755_v11 = vsub.f32 %v21439_v48, %v19332_v25  ;;  %v9312_v10 = vmul.f32 %v19748_v22, %v19748_v22  ;;  %v9433_v55 = vsel %vm137_vm3, %v9311_v60, 0.0 }
 0x5cc   :  { %v9424_v26 = vadd.f32 %v9423_v49, %v9422_v17  ;;  %v19762_v17 = vsub.f32 %v19324_v29, %v19332_v25 }
 0x5cd   :  { %21440 = vst [vmem:[#allocation16_spill] sm:$0xff] %v19755_v11  ;;  %v9313_v48 = vmul.f32 %v19755_v11, %v19755_v11 }
 0x5ce   :  { %v9426_v35 = vadd.f32 %v9425_v18, %v9424_v26  ;;  %21441 = vst [vmem:[#allocation17_spill] sm:$0xff] %v19762_v17  ;;  %v19769_v26 = vsub.f32 %v19328_v32, %v19332_v25  ;;  %v9314_v29 = vmul.f32 %v19762_v17, %v19762_v17 }
 0x5d0   :  { %v9428_v49 = vadd.f32 %v9427_v58, %v9426_v35  ;;  %21442 = vst [vmem:[#allocation18_spill] sm:$0xff] %v19769_v26  ;;  %v9435_v35 = vsel %vm137_vm3, %v9312_v10, 0.0  ;;  %v9315_v59 = vmul.f32 %v19769_v26, %v19769_v26  ;;  %v9439_v25 = vsel %vm137_vm3, %v9314_v29, 0.0 }
 0x5d2   :  { %v9430_v18 = vadd.f32 %v9429_v28, %v9428_v49  ;;  %v9437_v28 = vsel %vm137_vm3, %v9313_v48, 0.0  ;;  %v9441_v11 = vsel %vm137_vm3, %v9315_v59, 0.0 }
 0x5d4   :  { %v9432_v58 = vadd.f32 %v9431_v5, %v9430_v18 }
 0x5d6   :  { %v9434_v47 = vadd.f32 %v9433_v55, %v9432_v58 }
 0x5d8   :  { %v9436_v49 = vadd.f32 %v9435_v35, %v9434_v47  ;;  %v19787_v47 = vld [vmem:[%s21234_s3] ss:$0 sm:$0xff] }
 0x5da   :  { %v9438_v32 = vadd.f32 %v9437_v28, %v9436_v49 }
 0x5dc   :  { %v9440_v22 = vadd.f32 %v9439_v25, %v9438_v32 }
 0x5de   :  { %v9442_v60 = vadd.f32 %v9441_v11, %v9440_v22  ;;  %v19800_v11 = vld [vmem:[%s21235_s4] ss:$0 sm:$0xff] }
 0x5e0   :  { %v9443_v5 = vrot.slane %v9442_v60, 4 }
 0x5e2   :  { %v9444_v18 = vadd.f32 %v9443_v5, %v9442_v60 }
 0x5e4   :  { %v9445_v19 = vrot.slane %v9444_v18, 2 }
 0x5e6   :  { %v9446_v17 = vadd.f32 %v9445_v19, %v9444_v18 }
 0x5e8   :  { %v9447_v3 = vrot.slane %v9446_v17, 1 }
 0x5ea   :  { %v9448_v10 = vadd.f32 %v9447_v3, %v9446_v17 }
 0x5ec   :  { %v9449_v55 = vmul.f32 0.001953125, %v9448_v10 }
 0x5ee   :  { %v9450_v58 = vadd.f32 1e-05, %v9449_v55  ;;  %v21443_v55 = vld [vmem:[#allocation32_spill] sm:$0xff] }
 0x5f0   :  { %16006 = vrsqrt.f32 %v9450_v58 }
 0x5fa   :  { %v19782_v26 = vpop.eup %16006 }
 0x5fb   :  { %v9452_v48 = vmul.f32 %v19782_v26, %v19336_v24  ;;  %v9453_v22 = vmul.f32 %v19782_v26, %v19340_v31  ;;  %v9454_v19 = vmul.f32 %v19782_v26, %v19344_v7  ;;  %v9455_v3 = vmul.f32 %v19782_v26, %v19348_v45 }
 0x5fc   :  { %v9484_v17 = vmul.f32 %v19782_v26, %v19552_v62  ;;  %v9485_v24 = vmul.f32 %v19782_v26, %v19559_v56  ;;  %v9486_v31 = vmul.f32 %v19782_v26, %v19566_v52  ;;  %v9487_v7 = vmul.f32 %v19782_v26, %v19573_v38 }
 0x5fd   :  { %v9522_v29 = vmul.f32 %v19787_v47, %v9452_v48  ;;  %v9523_v45 = vmul.f32 %v19787_v47, %v9453_v22  ;;  %v9524_v35 = vmul.f32 %v19787_v47, %v9454_v19  ;;  %v9525_v59 = vmul.f32 %v19787_v47, %v9455_v3 }
 0x5fe   :  { %v9554_v28 = vmul.f32 %v19787_v47, %v9484_v17  ;;  %v9555_v62 = vmul.f32 %v19787_v47, %v9485_v24  ;;  %v9556_v56 = vmul.f32 %v19787_v47, %v9486_v31  ;;  %v9557_v49 = vmul.f32 %v19787_v47, %v9487_v7 }
 0x5ff   :  { %v9592_v52 = vadd.f32 %v19800_v11, %v9522_v29  ;;  %v9593_v38 = vadd.f32 %v19800_v11, %v9523_v45  ;;  %v9594_v25 = vadd.f32 %v19800_v11, %v9524_v35  ;;  %v9595_v32 = vadd.f32 %v19800_v11, %v9525_v59 }
 0x600   :  { %v9624_v60 = vadd.f32 %v19800_v11, %v9554_v28  ;;  %v9625_v5 = vadd.f32 %v19800_v11, %v9555_v62  ;;  %v9626_v18 = vadd.f32 %v19800_v11, %v9556_v56  ;;  %v9627_v10 = vadd.f32 %v19800_v11, %v9557_v49  ;;  %v9777_v28 = vld [vmem:[#allocation3] sm:$0xff]  ;;  %v9778_v62 = vld [vmem:[#allocation3 + $0x8] sm:$0xff]  ;;  %v9779_v56 = vld [vmem:[#allocation3 + $0x10] sm:$0x3] }
 0x601   :  { %9656 = vst.msk [vmem:[#allocation3 + $0x19] sm:$0xff] %vm137_vm3, %v9592_v52  ;;  %9657 = vst.msk [vmem:[#allocation3 + $0x21] sm:$0xff] %vm137_vm3, %v9593_v38  ;;  %v9456_v58 = vmul.f32 %v19782_v26, %v21443_v55  ;;  %v9457_v48 = vmul.f32 %v19782_v26, %v19362_v15  ;;  %v9458_v22 = vmul.f32 %v19782_v26, %v19368_v9 }
 0x602   :  { %9658 = vst.msk [vmem:[#allocation3 + $0x31] sm:$0xff] %vm137_vm3, %v9594_v25  ;;  %9659 = vst.msk [vmem:[#allocation3 + $0x39] sm:$0xff] %vm137_vm3, %v9595_v32  ;;  %v9459_v19 = vmul.f32 %v19782_v26, %v19377_v44  ;;  %v9488_v3 = vmul.f32 %v19782_v26, %v19580_v4  ;;  %v9489_v15 = vmul.f32 %v19782_v26, %v19587_v57  ;;  %v9801_v32 = vld [vmem:[#allocation3 + $0x1b0] sm:$0xff] }
 0x603   :  { %9688 = vst.msk [vmem:[#allocation3 + $0x1c9] sm:$0xff] %vm137_vm3, %v9624_v60  ;;  %9689 = vst.msk [vmem:[#allocation3 + $0x1d1] sm:$0xff] %vm137_vm3, %v9625_v5  ;;  %v9490_v9 = vmul.f32 %v19782_v26, %v19594_v1  ;;  %v9491_v44 = vmul.f32 %v19782_v26, %v19601_v14  ;;  %v9526_v17 = vmul.f32 %v19787_v47, %v9456_v58  ;;  %v9802_v60 = vld [vmem:[#allocation3 + $0x1b8] sm:$0xff]  ;;  %v9803_v5 = vld [vmem:[#allocation3 + $0x1c0] sm:$0x3] }
 0x604   :  { %9690 = vst.msk [vmem:[#allocation3 + $0x1e1] sm:$0xff] %vm137_vm3, %v9626_v18  ;;  %9691 = vst.msk [vmem:[#allocation3 + $0x1e9] sm:$0xff] %vm137_vm3, %v9627_v10  ;;  %v9527_v24 = vmul.f32 %v19787_v47, %v9457_v48  ;;  %v9528_v31 = vmul.f32 %v19787_v47, %v9458_v22  ;;  %v9529_v7 = vmul.f32 %v19787_v47, %v9459_v19 }
 0x605   :  { %v9558_v29 = vmul.f32 %v19787_v47, %v9488_v3  ;;  %v9559_v4 = vmul.f32 %v19787_v47, %v9489_v15  ;;  %v9560_v57 = vmul.f32 %v19787_v47, %v9490_v9  ;;  %v9561_v45 = vmul.f32 %v19787_v47, %v9491_v44 }
 0x606   :  { %v9596_v1 = vadd.f32 %v19800_v11, %v9526_v17  ;;  %v9597_v14 = vadd.f32 %v19800_v11, %v9527_v24  ;;  %v9598_v35 = vadd.f32 %v19800_v11, %v9528_v31  ;;  %v9599_v59 = vadd.f32 %v19800_v11, %v9529_v7 }
 0x607   :  { %v9628_v49 = vadd.f32 %v19800_v11, %v9558_v29  ;;  %v9629_v52 = vadd.f32 %v19800_v11, %v9559_v4  ;;  %v9630_v38 = vadd.f32 %v19800_v11, %v9560_v57  ;;  %v9631_v25 = vadd.f32 %v19800_v11, %v9561_v45 }
 0x608   :  { %9660 = vst.msk [vmem:[#allocation3 + $0x49] sm:$0xff] %vm137_vm3, %v9596_v1  ;;  %9661 = vst.msk [vmem:[#allocation3 + $0x51] sm:$0xff] %vm137_vm3, %v9597_v14  ;;  %v9460_v18 = vmul.f32 %v19782_v26, %v19384_v61  ;;  %v9461_v10 = vmul.f32 %v19782_v26, %v19391_v37  ;;  %v9462_v55 = vmul.f32 %v19782_v26, %v19398_v6  ;;  %v9729_v48 = vld [vmem:[#allocation3 + $0x18] sm:$0xff]  ;;  %v9730_v22 = vld [vmem:[#allocation3 + $0x20] sm:$0xff] }
 0x609   :  { %9662 = vst.msk [vmem:[#allocation3 + $0x61] sm:$0xff] %vm137_vm3, %v9598_v35  ;;  %9663 = vst.msk [vmem:[#allocation3 + $0x69] sm:$0xff] %vm137_vm3, %v9599_v59  ;;  %v9463_v58 = vmul.f32 %v19782_v26, %v19405_v34  ;;  %v9731_v19 = vld [vmem:[#allocation3 + $0x28] sm:$0x3]  ;;  %v9492_v61 = vmul.f32 %v19782_v26, %v19608_v43  ;;  %v19886_v37 = vmul.f32 %v19782_v26, %v19615_v2  ;;  %v9874_v44 = vld [vmem:[#allocation3 + $0x30] sm:$0xff] }
 0x60a   :  { %9692 = vst.msk [vmem:[#allocation3 + $0x1f9] sm:$0xff] %vm137_vm3, %v9628_v49  ;;  %9693 = vst.msk [vmem:[#allocation3 + $0x201] sm:$0xff] %vm137_vm3, %v9629_v52  ;;  %v19890_v6 = vmul.f32 %v19782_v26, %v19622_v21  ;;  %v19894_v34 = vmul.f32 %v19782_v26, %v19629_v8  ;;  %v9825_v3 = vadd.f32 %v9777_v28, %v9729_v48  ;;  %v9875_v17 = vld [vmem:[#allocation3 + $0x38] sm:$0xff]  ;;  %v9876_v24 = vld [vmem:[#allocation3 + $0x40] sm:$0x3] }
 0x60b   :  { %9694 = vst.msk [vmem:[#allocation3 + $0x211] sm:$0xff] %vm137_vm3, %v9630_v38  ;;  %9695 = vst.msk [vmem:[#allocation3 + $0x219] sm:$0xff] %vm137_vm3, %v9631_v25  ;;  %v9826_v15 = vadd.f32 %v9778_v62, %v9730_v22  ;;  %v9827_v9 = vadd.f32 %v9779_v56, %v9731_v19  ;;  %v9530_v43 = vmul.f32 %v19787_v47, %v9460_v18  ;;  %v9753_v31 = vld [vmem:[#allocation3 + $0x1c8] sm:$0xff]  ;;  %v9754_v7 = vld [vmem:[#allocation3 + $0x1d0] sm:$0xff] }
 0x60c   :  { %v9755_v2 = vld [vmem:[#allocation3 + $0x1d8] sm:$0x3]  ;;  %v9531_v29 = vmul.f32 %v19787_v47, %v9461_v10  ;;  %v19899_v21 = vmul.f32 %v19787_v47, %v9462_v55  ;;  %v19902_v4 = vmul.f32 %v19787_v47, %v9463_v58  ;;  %v19905_v8 = vmul.f32 %v19787_v47, %v9492_v61  ;;  %v19907_v35 = vld [vmem:[#allocation3 + $0x1e0] sm:$0xff]  ;;  %v19909_v59 = vld [vmem:[#allocation3 + $0x1e8] sm:$0xff] }
 0x60d   :  { %v9922_v57 = vadd.f32 %v9874_v44, %v9825_v3  ;;  %v9923_v45 = vadd.f32 %v9875_v17, %v9826_v15  ;;  %v9924_v1 = vadd.f32 %v9876_v24, %v9827_v9  ;;  %v9849_v14 = vadd.f32 %v9801_v32, %v9753_v31  ;;  %v9900_v56 = vld [vmem:[#allocation3 + $0x1f0] sm:$0x3] }
 0x60e   :  { %v9850_v28 = vadd.f32 %v9802_v60, %v9754_v7  ;;  %v9851_v62 = vadd.f32 %v9803_v5, %v9755_v2  ;;  %v9600_v49 = vadd.f32 %v19800_v11, %v9530_v43  ;;  %v9601_v52 = vadd.f32 %v19800_v11, %v9531_v29  ;;  %v9782_v7 = vld [vmem:[#allocation3 + $0x40] sm:$0x3] }
 0x60f   :  { %v10019_v38 = vrot.slane %v9922_v57, 1  ;;  %v10020_v25 = vrot.slane %v9923_v45, 1  ;;  %v10022_v18 = vrot.slane %v9924_v1, 1  ;;  %v10164_v10 = vrot.slane %v9922_v57, 2  ;;  %v9732_v22 = vld [vmem:[#allocation3 + $0x48] sm:$0xff]  ;;  %v9733_v43 = vld [vmem:[#allocation3 + $0x50] sm:$0xff] }
 0x610   :  { %v10165_v55 = vrot.slane %v9923_v45, 2  ;;  %v10167_v58 = vrot.slane %v9924_v1, 2  ;;  %v9946_v48 = vadd.f32 %v19907_v35, %v9849_v14  ;;  %v9947_v32 = vadd.f32 %v19909_v59, %v9850_v28  ;;  %9664 = vst.msk [vmem:[#allocation3 + $0x79] sm:$0xff] %vm137_vm3, %v9600_v49  ;;  %9665 = vst.msk [vmem:[#allocation3 + $0x81] sm:$0xff] %vm137_vm3, %v9601_v52  ;;  %v9734_v31 = vld [vmem:[#allocation3 + $0x58] sm:$0x3] }
 0x611   :  { %v10021_v60 = vsel %vm7320_vm5, %v10019_v38, %v10020_v25  ;;  %v10023_v5 = vsel %vm7320_vm5, %v10020_v25, %v10022_v18  ;;  %v9948_v19 = vadd.f32 %v9900_v56, %v9851_v62  ;;  %v9828_v61 = vadd.f32 %v9874_v44, %v9732_v22  ;;  %v19921_v25 = vld [vmem:[#allocation3 + $0x60] sm:$0xff]  ;;  %v19923_v44 = vld [vmem:[#allocation3 + $0x68] sm:$0xff]  ;;  %v9879_v18 = vld [vmem:[#allocation3 + $0x70] sm:$0x3] }
 0x612   :  { %v10131_v3 = vadd.f32 %v10021_v60, %v9922_v57  ;;  %v10132_v15 = vadd.f32 %v10023_v5, %v9923_v45  ;;  %v10166_v9 = vsel %vm7609_vm6, %v10164_v10, %v10165_v55  ;;  %v10168_v24 = vsel %vm7609_vm6, %v10165_v55, %v10167_v58  ;;  %v9756_v10 = vld [vmem:[#allocation3 + $0x1f8] sm:$0xff] }
 0x613   :  { %v10059_v2 = vrot.slane %v9946_v48, 1  ;;  %v10060_v29 = vrot.slane %v9947_v32, 1  ;;  %v10062_v1 = vrot.slane %v9948_v19, 1  ;;  %v10204_v14 = vrot.slane %v9946_v48, 2 }
 0x614   :  { %v10276_v28 = vadd.f32 %v10166_v9, %v10131_v3  ;;  %v10277_v49 = vadd.f32 %v10168_v24, %v10132_v15  ;;  %v10205_v52 = vrot.slane %v9947_v32, 2  ;;  %v10207_v38 = vrot.slane %v9948_v19, 2  ;;  %v9757_v9 = vld [vmem:[#allocation3 + $0x200] sm:$0xff]  ;;  %v9806_v24 = vld [vmem:[#allocation3 + $0x1f0] sm:$0x3] }
 0x615   :  { %v10061_v57 = vsel %vm7320_vm5, %v10059_v2, %v10060_v29  ;;  %v10063_v45 = vsel %vm7320_vm5, %v10060_v29, %v10062_v1  ;;  %v9829_v62 = vadd.f32 %v9875_v17, %v9733_v43  ;;  %v9830_v56 = vadd.f32 %v9782_v7, %v9734_v31  ;;  %v9758_v7 = vld [vmem:[#allocation3 + $0x208] sm:$0x3]  ;;  %v19936_v2 = vld [vmem:[#allocation3 + $0x218] sm:$0xff] }
 0x616   :  { %v10308_v55 = vmul.f32 0.11111111, %v10276_v28  ;;  %v10309_v58 = vmul.f32 0.11111111, %v10277_v49  ;;  %v10147_v22 = vadd.f32 %v10061_v57, %v9946_v48  ;;  %v10148_v60 = vadd.f32 %v10063_v45, %v9947_v32  ;;  %v19934_v32 = vld [vmem:[#allocation3 + $0x210] sm:$0xff] }
 0x617   :  { %v10206_v5 = vsel %vm7609_vm6, %v10204_v14, %v10205_v52  ;;  %v10208_v19 = vsel %vm7609_vm6, %v10205_v52, %v10207_v38  ;;  %v9925_v3 = vadd.f32 %v19921_v25, %v9828_v61  ;;  %v9926_v15 = vadd.f32 %v19923_v44, %v9829_v62  ;;  %v9903_v28 = vld [vmem:[#allocation3 + $0x220] sm:$0x3] }
 0x618   :  { %10340 = vst.msk [vmem:[#allocation6] sm:$0xff] %vm137_vm3, %v10308_v55  ;;  %10341 = vst.msk [vmem:[#allocation6 + $0x8] sm:$0xff] %vm137_vm3, %v10309_v58  ;;  %v10292_v17 = vadd.f32 %v10206_v5, %v10147_v22  ;;  %v10293_v43 = vadd.f32 %v10208_v19, %v10148_v60  ;;  %v9927_v31 = vadd.f32 %v9879_v18, %v9830_v56 }
 0x619   :  { %v9852_v48 = vadd.f32 %v19907_v35, %v9756_v10  ;;  %v10024_v29 = vrot.slane %v9925_v3, 1  ;;  %v10025_v61 = vrot.slane %v9926_v15, 1  ;;  %v10169_v1 = vrot.slane %v9925_v3, 2 }
 0x61a   :  { %v10170_v14 = vrot.slane %v9926_v15, 2  ;;  %v10324_v49 = vmul.f32 0.11111111, %v10292_v17  ;;  %v10325_v52 = vmul.f32 0.11111111, %v10293_v43  ;;  %v10027_v38 = vrot.slane %v9927_v31, 1 }
 0x61b   :  { %v10172_v57 = vrot.slane %v9927_v31, 2  ;;  %v10026_v45 = vsel %vm7320_vm5, %v10024_v29, %v10025_v61  ;;  %v9853_v56 = vadd.f32 %v19909_v59, %v9757_v9  ;;  %v9854_v35 = vadd.f32 %v9806_v24, %v9758_v7  ;;  %v9735_v59 = vld [vmem:[#allocation3 + $0x78] sm:$0xff]  ;;  %v9736_v9 = vld [vmem:[#allocation3 + $0x80] sm:$0xff]  ;;  %v9785_v7 = vld [vmem:[#allocation3 + $0x70] sm:$0x3] }
 0x61c   :  { %v10171_v62 = vsel %vm7609_vm6, %v10169_v1, %v10170_v14  ;;  %10342 = vst.msk [vmem:[#allocation6 + $0x80] sm:$0xff] %vm137_vm3, %v10324_v49  ;;  %10343 = vst.msk [vmem:[#allocation6 + $0x88] sm:$0xff] %vm137_vm3, %v10325_v52  ;;  %v10028_v18 = vsel %vm7320_vm5, %v10025_v61, %v10027_v38  ;;  %v10133_v10 = vadd.f32 %v10026_v45, %v9925_v3  ;;  %v9737_v3 = vld [vmem:[#allocation3 + $0x88] sm:$0x3] }
 0x61d   :  { %v10173_v55 = vsel %vm7609_vm6, %v10170_v14, %v10172_v57  ;;  %v9949_v58 = vadd.f32 %v19934_v32, %v9852_v48  ;;  %v10134_v22 = vadd.f32 %v10028_v18, %v9926_v15  ;;  %v9950_v60 = vadd.f32 %v19936_v2, %v9853_v56 }
 0x61e   :  { %v9951_v5 = vadd.f32 %v9903_v28, %v9854_v35  ;;  %v9602_v19 = vadd.f32 %v19800_v11, %v19899_v21  ;;  %v10278_v24 = vadd.f32 %v10171_v62, %v10133_v10  ;;  %v9603_v31 = vadd.f32 %v19800_v11, %v19902_v4 }
 0x61f   :  { %v10064_v17 = vrot.slane %v9949_v58, 1  ;;  %v10209_v43 = vrot.slane %v9949_v58, 2  ;;  %v10379_v29 = vld [vmem:[#allocation6] sm:$0xff]  ;;  %v10380_v61 = vld [vmem:[#allocation6 + $0x8] sm:$0xff]  ;;  %v10279_v48 = vadd.f32 %v10173_v55, %v10134_v22  ;;  %v10065_v15 = vrot.slane %v9950_v60, 1 }
 0x620   :  { %v10067_v1 = vrot.slane %v9951_v5, 1  ;;  %v10210_v14 = vrot.slane %v9950_v60, 2  ;;  %9666 = vst.msk [vmem:[#allocation3 + $0x91] sm:$0xff] %vm137_vm3, %v9602_v19  ;;  %v10310_v21 = vmul.f32 0.11111111, %v10278_v24  ;;  %v10212_v4 = vrot.slane %v9951_v5, 2 }
 0x621   :  { %10412 = vst.msk [vmem:[#allocation7] sm:$0x1] %vm10411_vm7, %v10379_v29  ;;  %10479 = vst.msk [vmem:[#allocation7 + $0x4] sm:$0x1] %vm10411_vm7, %v10380_v61  ;;  %v9831_v28 = vadd.f32 %v19921_v25, %v9735_v59  ;;  %v9832_v49 = vadd.f32 %v19923_v44, %v9736_v9  ;;  %v10311_v52 = vmul.f32 0.11111111, %v10279_v48  ;;  %v10066_v38 = vsel %vm7320_vm5, %v10064_v17, %v10065_v15 }
 0x622   :  { %10429 = vst.msk [vmem:[#allocation7 - $0x1] sm:$0x4] %vm10428_vm8, %v10379_v29  ;;  %10495 = vst.msk [vmem:[#allocation7 + $0x3] sm:$0x4] %vm10428_vm8, %v10380_v61  ;;  %v10068_v57 = vsel %vm7320_vm5, %v10065_v15, %v10067_v1  ;;  %v10211_v45 = vsel %vm7609_vm6, %v10209_v43, %v10210_v14  ;;  %v10149_v62 = vadd.f32 %v10066_v38, %v9949_v58 }
 0x623   :  { %10446 = vst.msk [vmem:[#allocation7 - $0x2] sm:$0x10] %vm10445_vm9, %v10379_v29  ;;  %10511 = vst.msk [vmem:[#allocation7 + $0x2] sm:$0x10] %vm10445_vm9, %v10380_v61  ;;  %v10150_v56 = vadd.f32 %v10068_v57, %v9950_v60  ;;  %v10213_v35 = vsel %vm7609_vm6, %v10210_v14, %v10212_v4  ;;  %v9833_v18 = vadd.f32 %v9785_v7, %v9737_v3  ;;  %v10395_v10 = vld [vmem:[#allocation6 + $0x80] sm:$0xff]  ;;  %v10396_v55 = vld [vmem:[#allocation6 + $0x88] sm:$0xff] }
 0x624   :  { %10463 = vst.msk [vmem:[#allocation7 - $0x3] sm:$0x40] %vm10462_vm10, %v10379_v29  ;;  %10527 = vst.msk [vmem:[#allocation7 + $0x1] sm:$0x40] %vm10462_vm10, %v10380_v61  ;;  %v9563_v25 = vmul.f32 %v19787_v47, %v19886_v37  ;;  %v9564_v44 = vmul.f32 %v19787_v47, %v19890_v6  ;;  %v9565_v22 = vmul.f32 %v19787_v47, %v19894_v34 }
 0x625   :  { %9667 = vst.msk [vmem:[#allocation3 + $0x99] sm:$0xff] %vm137_vm3, %v9603_v31  ;;  %10345 = vst.msk [vmem:[#allocation6 + $0x10] sm:$0xff] %vm137_vm3, %v10310_v21  ;;  %v9632_v58 = vadd.f32 %v19800_v11, %v19905_v8  ;;  %v10294_v37 = vadd.f32 %v10211_v45, %v10149_v62  ;;  %v10295_v6 = vadd.f32 %v10213_v35, %v10150_v56 }
 0x626   :  { %10346 = vst.msk [vmem:[#allocation6 + $0x18] sm:$0xff] %vm137_vm3, %v10311_v52  ;;  %v9464_v34 = vmul.f32 %v19782_v26, %v19412_v36  ;;  %v9465_v8 = vmul.f32 %v19782_v26, %v19419_v12  ;;  %v9633_v60 = vadd.f32 %v19800_v11, %v9563_v25  ;;  %v9634_v5 = vadd.f32 %v19800_v11, %v9564_v44 }
 0x627   :  { %10420 = vst.msk [vmem:[#allocation7 + $0x40] sm:$0x1] %vm10411_vm7, %v10395_v10  ;;  %10487 = vst.msk [vmem:[#allocation7 + $0x44] sm:$0x1] %vm10411_vm7, %v10396_v55  ;;  %v9635_v19 = vadd.f32 %v19800_v11, %v9565_v22  ;;  %v9466_v59 = vmul.f32 %v19782_v26, %v19426_v16  ;;  %v10326_v9 = vmul.f32 0.11111111, %v10294_v37  ;;  %v9467_v36 = vmul.f32 %v19782_v26, %v19433_v63 }
 0x628   :  { %10437 = vst.msk [vmem:[#allocation7 + $0x3f] sm:$0x4] %vm10428_vm8, %v10395_v10  ;;  %10503 = vst.msk [vmem:[#allocation7 + $0x43] sm:$0x4] %vm10428_vm8, %v10396_v55  ;;  %v10327_v24 = vmul.f32 0.11111111, %v10295_v6  ;;  %v9534_v12 = vmul.f32 %v19787_v47, %v9464_v34  ;;  %v9535_v16 = vmul.f32 %v19787_v47, %v9465_v8  ;;  %v9496_v63 = vmul.f32 %v19782_v26, %v19636_v46 }
 0x629   :  { %10454 = vst.msk [vmem:[#allocation7 + $0x3e] sm:$0x10] %vm10445_vm9, %v10395_v10  ;;  %10519 = vst.msk [vmem:[#allocation7 + $0x42] sm:$0x10] %vm10445_vm9, %v10396_v55  ;;  %v19995_v17 = vld [vmem:[#allocation3 + $0x90] sm:$0xff]  ;;  %v9536_v29 = vmul.f32 %v19787_v47, %v9466_v59  ;;  %v9537_v15 = vmul.f32 %v19787_v47, %v9467_v36  ;;  %v9497_v35 = vmul.f32 %v19782_v26, %v19643_v41 }
 0x62a   :  { %10471 = vst.msk [vmem:[#allocation7 + $0x3d] sm:$0x40] %vm10462_vm10, %v10395_v10  ;;  %10535 = vst.msk [vmem:[#allocation7 + $0x41] sm:$0x40] %vm10462_vm10, %v10396_v55  ;;  %v9928_v7 = vadd.f32 %v19995_v17, %v9831_v28  ;;  %v9604_v1 = vadd.f32 %v19800_v11, %v9534_v12  ;;  %v9605_v28 = vadd.f32 %v19800_v11, %v9535_v16  ;;  %v9809_v37 = vld [vmem:[#allocation3 + $0x220] sm:$0x3] }
 0x62b   :  { %9696 = vst.msk [vmem:[#allocation3 + $0x229] sm:$0xff] %vm137_vm3, %v9632_v58  ;;  %v10543_v43 = vld [vmem:[#allocation7] sm:$0xff]  ;;  %9697 = vst.msk [vmem:[#allocation3 + $0x231] sm:$0xff] %vm137_vm3, %v9633_v60  ;;  %v9606_v46 = vadd.f32 %v19800_v11, %v9536_v29  ;;  %v9607_v56 = vadd.f32 %v19800_v11, %v9537_v15  ;;  %v9499_v10 = vmul.f32 %v19782_v26, %v19657_v27 }
 0x62c   :  { %v20000_v31 = vld [vmem:[#allocation3 + $0x98] sm:$0xff]  ;;  %v9882_v3 = vld [vmem:[#allocation3 + $0xa0] sm:$0x3]  ;;  %9698 = vst.msk [vmem:[#allocation3 + $0x241] sm:$0xff] %vm137_vm3, %v9634_v5  ;;  %9699 = vst.msk [vmem:[#allocation3 + $0x249] sm:$0xff] %vm137_vm3, %v9635_v19  ;;  %15123 = vmatprep.mubr.msk.f32.mxu0 %vm137_vm3, %v10543_v43  ;;  %v10029_v21 = vrot.slane %v9928_v7, 1  ;;  %v9567_v5 = vmul.f32 %v19787_v47, %v9497_v35 }
 0x62d   :  { %10347 = vst.msk [vmem:[#allocation6 + $0x90] sm:$0xff] %vm137_vm3, %v10326_v9  ;;  %10348 = vst.msk [vmem:[#allocation6 + $0x98] sm:$0xff] %vm137_vm3, %v10327_v24  ;;  %v9929_v61 = vadd.f32 %v20000_v31, %v9832_v49  ;;  %v9930_v48 = vadd.f32 %v9882_v3, %v9833_v18  ;;  %v10381_v14 = vld [vmem:[#allocation6 + $0x10] sm:$0xff]  ;;  %v10174_v4 = vrot.slane %v9928_v7, 2  ;;  %v10382_v52 = vld [vmem:[#allocation6 + $0x18] sm:$0xff]  ;;  %v9498_v18 = vmul.f32 %v19782_v26, %v19650_v30 }
 0x62e   :  { %10413 = vst.msk [vmem:[#allocation7 + $0x8] sm:$0x1] %vm10411_vm7, %v10381_v14  ;;  %10480 = vst.msk [vmem:[#allocation7 + $0xc] sm:$0x1] %vm10411_vm7, %v10382_v52  ;;  %v9566_v30 = vmul.f32 %v19787_v47, %v9496_v63  ;;  %v9569_v59 = vmul.f32 %v19787_v47, %v9499_v10  ;;  %v20051_v9 = vmul.f32 %v19782_v26, %v19440_v51  ;;  %v9788_v16 = vld [vmem:[#allocation3 + $0xa0] sm:$0x3] }
 0x62f   :  { %10430 = vst.msk [vmem:[#allocation7 + $0x7] sm:$0x4] %vm10428_vm8, %v10381_v14  ;;  %v10030_v49 = vrot.slane %v9929_v61, 1  ;;  %v10032_v38 = vrot.slane %v9930_v48, 1  ;;  %v10175_v57 = vrot.slane %v9929_v61, 2  ;;  %v10177_v45 = vrot.slane %v9930_v48, 2 }
 0x630   :  { %10447 = vst.msk [vmem:[#allocation7 + $0x6] sm:$0x10] %vm10445_vm9, %v10381_v14  ;;  %10512 = vst.msk [vmem:[#allocation7 + $0xa] sm:$0x10] %vm10445_vm9, %v10382_v52  ;;  %v9568_v19 = vmul.f32 %v19787_v47, %v9498_v18  ;;  %v9636_v29 = vadd.f32 %v19800_v11, %v9566_v30  ;;  %v9637_v63 = vadd.f32 %v19800_v11, %v9567_v5 }
 0x631   :  { %10464 = vst.msk [vmem:[#allocation7 + $0x5] sm:$0x40] %vm10462_vm10, %v10381_v14  ;;  %v10551_v62 = vld [vmem:[#allocation7 + $0x40] sm:$0xff]  ;;  %10528 = vst.msk [vmem:[#allocation7 + $0x9] sm:$0x40] %vm10462_vm10, %v10382_v52  ;;  %v10031_v55 = vsel %vm7320_vm5, %v10029_v21, %v10030_v49  ;;  %v10033_v25 = vsel %vm7320_vm5, %v10030_v49, %v10032_v38  ;;  %v10176_v44 = vsel %vm7609_vm6, %v10174_v4, %v10175_v57 }
 0x632   :  { %9668 = vst.msk [vmem:[#allocation3 + $0xa9] sm:$0xff] %vm137_vm3, %v9604_v1  ;;  %9669 = vst.msk [vmem:[#allocation3 + $0xb1] sm:$0xff] %vm137_vm3, %v9605_v28  ;;  %15135 = vmatprep.mubr.msk.f32.mxu1 %vm137_vm3, %v10551_v62  ;;  %v10178_v22 = vsel %vm7609_vm6, %v10175_v57, %v10177_v45  ;;  %v9759_v58 = vld [vmem:[#allocation3 + $0x228] sm:$0xff]  ;;  %v10135_v6 = vadd.f32 %v10031_v55, %v9928_v7  ;;  %v10136_v41 = vadd.f32 %v10033_v25, %v9929_v61  ;;  %v9760_v27 = vld [vmem:[#allocation3 + $0x230] sm:$0xff] }
 0x633   :  { %10496 = vst.msk [vmem:[#allocation7 + $0xb] sm:$0x4] %vm10428_vm8, %v10382_v52  ;;  %v9855_v34 = vadd.f32 %v19934_v32, %v9759_v58  ;;  %v9761_v8 = vld [vmem:[#allocation3 + $0x238] sm:$0x3]  ;;  %v20044_v60 = vld [vmem:[#allocation3 + $0x240] sm:$0xff]  ;;  %v9856_v43 = vadd.f32 %v19936_v2, %v9760_v27  ;;  %v20054_v7 = vld [vmem:[#allocation3 + $0x248] sm:$0xff]  ;;  %v9638_v61 = vadd.f32 %v19800_v11, %v9568_v19  ;;  %v9639_v57 = vadd.f32 %v19800_v11, %v9569_v59 }
 0x634   :  { %9670 = vst.msk [vmem:[#allocation3 + $0xc1] sm:$0xff] %vm137_vm3, %v9606_v46  ;;  %9671 = vst.msk [vmem:[#allocation3 + $0xc9] sm:$0xff] %vm137_vm3, %v9607_v56  ;;  %v10397_v24 = vld [vmem:[#allocation6 + $0x90] sm:$0xff]  ;;  %v10398_v32 = vld [vmem:[#allocation6 + $0x98] sm:$0xff]  ;;  %v10280_v36 = vadd.f32 %v10176_v44, %v10135_v6  ;;  %v10281_v12 = vadd.f32 %v10178_v22, %v10136_v41  ;;  %v9857_v3 = vadd.f32 %v9809_v37, %v9761_v8 }
 0x635   :  { %10421 = vst.msk [vmem:[#allocation7 + $0x48] sm:$0x1] %vm10411_vm7, %v10397_v24  ;;  %10488 = vst.msk [vmem:[#allocation7 + $0x4c] sm:$0x1] %vm10411_vm7, %v10398_v32  ;;  %v9906_v51 = vld [vmem:[#allocation3 + $0x250] sm:$0x3]  ;;  %v9952_v2 = vadd.f32 %v20044_v60, %v9855_v34  ;;  %v9953_v1 = vadd.f32 %v20054_v7, %v9856_v43  ;;  %v9469_v22 = vmul.f32 %v19782_v26, %v19447_v39 }
 0x636   :  { %10438 = vst.msk [vmem:[#allocation7 + $0x47] sm:$0x4] %vm10428_vm8, %v10397_v24  ;;  %10504 = vst.msk [vmem:[#allocation7 + $0x4b] sm:$0x4] %vm10428_vm8, %v10398_v32  ;;  %v10312_v48 = vmul.f32 0.11111111, %v10280_v36  ;;  %v9954_v14 = vadd.f32 %v9906_v51, %v9857_v3  ;;  %v9470_v59 = vmul.f32 %v19782_v26, %v19454_v50  ;;  %v9471_v39 = vmul.f32 %v19782_v26, %v19461_v20 }
 0x637   :  { %10455 = vst.msk [vmem:[#allocation7 + $0x46] sm:$0x10] %vm10445_vm9, %v10397_v24  ;;  %10520 = vst.msk [vmem:[#allocation7 + $0x4a] sm:$0x10] %vm10445_vm9, %v10398_v32  ;;  %v10313_v15 = vmul.f32 0.11111111, %v10281_v12  ;;  %v9539_v50 = vmul.f32 %v19787_v47, %v9469_v22 }
 0x638   :  { %10472 = vst.msk [vmem:[#allocation7 + $0x45] sm:$0x40] %vm10462_vm10, %v10397_v24  ;;  %10536 = vst.msk [vmem:[#allocation7 + $0x49] sm:$0x40] %vm10462_vm10, %v10398_v32  ;;  %v10069_v28 = vrot.slane %v9952_v2, 1  ;;  %v10214_v46 = vrot.slane %v9952_v2, 2 }
 0x639   :  { %v9738_v21 = vld [vmem:[#allocation3 + $0xa8] sm:$0xff]  ;;  %v9739_v52 = vld [vmem:[#allocation3 + $0xb0] sm:$0xff]  ;;  %v9740_v49 = vld [vmem:[#allocation3 + $0xb8] sm:$0x3]  ;;  %9700 = vst.msk [vmem:[#allocation3 + $0x259] sm:$0xff] %vm137_vm3, %v9636_v29  ;;  %v10070_v45 = vrot.slane %v9953_v1, 1 }
 0x63a   :  { %v10544_v4 = vld [vmem:[#allocation7 + $0x8] sm:$0xff]  ;;  %v9834_v38 = vadd.f32 %v19995_v17, %v9738_v21  ;;  %9701 = vst.msk [vmem:[#allocation3 + $0x261] sm:$0xff] %vm137_vm3, %v9637_v63  ;;  %9702 = vst.msk [vmem:[#allocation3 + $0x271] sm:$0xff] %vm137_vm3, %v9638_v61  ;;  %v10072_v62 = vrot.slane %v9954_v14, 1  ;;  %v10215_v56 = vrot.slane %v9953_v1, 2  ;;  %v10217_v35 = vrot.slane %v9954_v14, 2 }
 0x63b   :  { %15124 = vmatmul.mubr.msk.f32.vlgmr.msra.gmra.mrb[0].mxu0 %vm137_vm3, %v10544_v4  ;;  %10350 = vst.msk [vmem:[#allocation6 + $0x20] sm:$0xff] %vm137_vm3, %v10312_v48  ;;  %10351 = vst.msk [vmem:[#allocation6 + $0x28] sm:$0xff] %vm137_vm3, %v10313_v15  ;;  %v20077_v18 = vld [vmem:[#allocation3 + $0xc0] sm:$0xff]  ;;  %v9835_v17 = vadd.f32 %v20000_v31, %v9739_v52  ;;  %v9836_v10 = vadd.f32 %v9788_v16, %v9740_v49  ;;  %v20080_v55 = vld [vmem:[#allocation3 + $0xc8] sm:$0xff]  ;;  %v10071_v58 = vsel %vm7320_vm5, %v10069_v28, %v10070_v45 }
 0x63c   :  { %v9885_v25 = vld [vmem:[#allocation3 + $0xd0] sm:$0x3]  ;;  %v9931_v44 = vadd.f32 %v20077_v18, %v9834_v38  ;;  %9703 = vst.msk [vmem:[#allocation3 + $0x279] sm:$0xff] %vm137_vm3, %v9639_v57  ;;  %v10073_v37 = vsel %vm7320_vm5, %v10070_v45, %v10072_v62  ;;  %v10216_v6 = vsel %vm7609_vm6, %v10214_v46, %v10215_v56  ;;  %v10218_v41 = vsel %vm7609_vm6, %v10215_v56, %v10217_v35 }
 0x63d   :  { %v10151_v31 = vadd.f32 %v10071_v58, %v9952_v2  ;;  %v10152_v34 = vadd.f32 %v10073_v37, %v9953_v1  ;;  %v9932_v30 = vadd.f32 %v20080_v55, %v9835_v17  ;;  %v9933_v27 = vadd.f32 %v9885_v25, %v9836_v10  ;;  %v9812_v43 = vld [vmem:[#allocation3 + $0x250] sm:$0x3] }
 0x63e   :  { %v10034_v5 = vrot.slane %v9931_v44, 1  ;;  %v10179_v19 = vrot.slane %v9931_v44, 2  ;;  %v9538_v63 = vmul.f32 %v19787_v47, %v20051_v9  ;;  %v9540_v62 = vmul.f32 %v19787_v47, %v9470_v59 }
 0x63f   :  { %v10552_v8 = vld [vmem:[#allocation7 + $0x48] sm:$0xff]  ;;  %v10296_v24 = vadd.f32 %v10216_v6, %v10151_v31  ;;  %v10297_v32 = vadd.f32 %v10218_v41, %v10152_v34  ;;  %v10035_v36 = vrot.slane %v9932_v30, 1  ;;  %v10037_v12 = vrot.slane %v9933_v27, 1 }
 0x640   :  { %15136 = vmatmul.mubr.msk.f32.vlgmr.msra.gmra.mrb[0].mxu1 %vm137_vm3, %v10552_v8  ;;  %v10180_v3 = vrot.slane %v9932_v30, 2  ;;  %v10182_v51 = vrot.slane %v9933_v27, 2  ;;  %v9762_v2 = vld [vmem:[#allocation3 + $0x258] sm:$0xff]  ;;  %v9541_v17 = vmul.f32 %v19787_v47, %v9471_v39  ;;  %v9608_v10 = vadd.f32 %v19800_v11, %v9538_v63 }
 0x641   :  { %v9763_v16 = vld [vmem:[#allocation3 + $0x260] sm:$0xff]  ;;  %v9764_v29 = vld [vmem:[#allocation3 + $0x268] sm:$0x3]  ;;  %v10328_v20 = vmul.f32 0.11111111, %v10296_v24  ;;  %v10036_v1 = vsel %vm7320_vm5, %v10034_v5, %v10035_v36  ;;  %v10038_v14 = vsel %vm7320_vm5, %v10035_v36, %v10037_v12  ;;  %v20111_v46 = vld [vmem:[#allocation3 + $0x270] sm:$0xff]  ;;  %v9858_v38 = vadd.f32 %v20044_v60, %v9762_v2 }
 0x642   :  { %v10383_v61 = vld [vmem:[#allocation6 + $0x20] sm:$0xff]  ;;  %v10384_v48 = vld [vmem:[#allocation6 + $0x28] sm:$0xff]  ;;  %v10329_v15 = vmul.f32 0.11111111, %v10297_v32  ;;  %v10137_v9 = vadd.f32 %v10036_v1, %v9931_v44  ;;  %v10138_v21 = vadd.f32 %v10038_v14, %v9932_v30  ;;  %v10181_v4 = vsel %vm7609_vm6, %v10179_v19, %v10180_v3  ;;  %9672 = vst.msk [vmem:[#allocation3 + $0xd9] sm:$0xff] %vm137_vm3, %v9608_v10 }
 0x643   :  { %10414 = vst.msk [vmem:[#allocation7 + $0x10] sm:$0x1] %vm10411_vm7, %v10383_v61  ;;  %10481 = vst.msk [vmem:[#allocation7 + $0x14] sm:$0x1] %vm10411_vm7, %v10384_v48  ;;  %v10183_v28 = vsel %vm7609_vm6, %v10180_v3, %v10182_v51  ;;  %v20113_v52 = vld [vmem:[#allocation3 + $0x278] sm:$0xff]  ;;  %v9859_v57 = vadd.f32 %v20054_v7, %v9763_v16  ;;  %v9860_v45 = vadd.f32 %v9812_v43, %v9764_v29 }
 0x644   :  { %10431 = vst.msk [vmem:[#allocation7 + $0xf] sm:$0x4] %vm10428_vm8, %v10383_v61  ;;  %10497 = vst.msk [vmem:[#allocation7 + $0x13] sm:$0x4] %vm10428_vm8, %v10384_v48  ;;  %v9909_v49 = vld [vmem:[#allocation3 + $0x280] sm:$0x3]  ;;  %v10282_v56 = vadd.f32 %v10181_v4, %v10137_v9  ;;  %v10283_v35 = vadd.f32 %v10183_v28, %v10138_v21  ;;  %v9955_v25 = vadd.f32 %v20111_v46, %v9858_v38 }
 0x645   :  { %10448 = vst.msk [vmem:[#allocation7 + $0xe] sm:$0x10] %vm10445_vm9, %v10383_v61  ;;  %10513 = vst.msk [vmem:[#allocation7 + $0x12] sm:$0x10] %vm10445_vm9, %v10384_v48  ;;  %v9956_v44 = vadd.f32 %v20113_v52, %v9859_v57  ;;  %v9957_v22 = vadd.f32 %v9909_v49, %v9860_v45  ;;  %v9609_v58 = vadd.f32 %v19800_v11, %v9539_v50 }
 0x646   :  { %10465 = vst.msk [vmem:[#allocation7 + $0xd] sm:$0x40] %vm10462_vm10, %v10383_v61  ;;  %10529 = vst.msk [vmem:[#allocation7 + $0x11] sm:$0x40] %vm10462_vm10, %v10384_v48  ;;  %v10314_v37 = vmul.f32 0.11111111, %v10282_v56  ;;  %v9610_v7 = vadd.f32 %v19800_v11, %v9540_v62  ;;  %v9611_v6 = vadd.f32 %v19800_v11, %v9541_v17  ;;  %v9500_v5 = vmul.f32 %v19782_v26, %v19664_v23 }
 0x647   :  { %10352 = vst.msk [vmem:[#allocation6 + $0xa0] sm:$0xff] %vm137_vm3, %v10328_v20  ;;  %10353 = vst.msk [vmem:[#allocation6 + $0xa8] sm:$0xff] %vm137_vm3, %v10329_v15  ;;  %v10315_v60 = vmul.f32 0.11111111, %v10283_v35  ;;  %v10074_v41 = vrot.slane %v9955_v25, 1  ;;  %v10075_v31 = vrot.slane %v9956_v44, 1  ;;  %v9501_v19 = vmul.f32 %v19782_v26, %v19671_v42 }
 0x648   :  { %v10077_v34 = vrot.slane %v9957_v22, 1  ;;  %v10219_v30 = vrot.slane %v9955_v25, 2  ;;  %9673 = vst.msk [vmem:[#allocation3 + $0xe1] sm:$0xff] %vm137_vm3, %v9609_v58  ;;  %10355 = vst.msk [vmem:[#allocation6 + $0x30] sm:$0xff] %vm137_vm3, %v10314_v37  ;;  %v10220_v27 = vrot.slane %v9956_v44, 2  ;;  %v10222_v8 = vrot.slane %v9957_v22, 2 }
 0x649   :  { %10356 = vst.msk [vmem:[#allocation6 + $0x38] sm:$0xff] %vm137_vm3, %v10315_v60  ;;  %9674 = vst.msk [vmem:[#allocation3 + $0xf1] sm:$0xff] %vm137_vm3, %v9610_v7  ;;  %v10076_v39 = vsel %vm7320_vm5, %v10074_v41, %v10075_v31  ;;  %v9502_v32 = vmul.f32 %v19782_v26, %v19678_v0  ;;  %v9503_v36 = vmul.f32 %v19782_v26, %v19685_v53  ;;  %v9741_v48 = vld [vmem:[#allocation3 + $0xd8] sm:$0xff]  ;;  %v9791_v20 = vld [vmem:[#allocation3 + $0xd0] sm:$0x3] }
 0x64a   :  { %9675 = vst.msk [vmem:[#allocation3 + $0xf9] sm:$0xff] %vm137_vm3, %v9611_v6  ;;  %v10078_v24 = vsel %vm7320_vm5, %v10075_v31, %v10077_v34  ;;  %v10153_v3 = vadd.f32 %v10076_v39, %v9955_v25  ;;  %v10221_v51 = vsel %vm7609_vm6, %v10219_v30, %v10220_v27  ;;  %v10223_v42 = vsel %vm7609_vm6, %v10220_v27, %v10222_v8  ;;  %v20195_v56 = vld [vmem:[%s21234_s3] ss:$0 sm:$0xff]  ;;  %v21444_v17 = vld [vmem:[#allocation41_spill] sm:$0xff]  ;;  %v21445_v25 = vld [vmem:[#allocation42_spill] sm:$0xff] }
 0x64b   :  { %v10154_v23 = vadd.f32 %v10078_v24, %v9956_v44  ;;  %v9570_v0 = vmul.f32 %v19787_v47, %v9500_v5  ;;  %v9571_v53 = vmul.f32 %v19787_v47, %v9501_v19  ;;  %v9572_v2 = vmul.f32 %v19787_v47, %v9502_v32  ;;  %v20208_v60 = vld [vmem:[%s21235_s4] ss:$0 sm:$0xff]  ;;  %v21446_v30 = vld [vmem:[#allocation43_spill] sm:$0xff] }
 0x64c   :  { %v9573_v16 = vmul.f32 %v19787_v47, %v9503_v36  ;;  %v10298_v29 = vadd.f32 %v10221_v51, %v10153_v3  ;;  %v9472_v50 = vmul.f32 %v19782_v26, %v19468_v33  ;;  %v9473_v61 = vmul.f32 %v19782_v26, %v19475_v13  ;;  %v9815_v32 = vld [vmem:[#allocation3 + $0x280] sm:$0x3] }
 0x64d   :  { %v10545_v59 = vld [vmem:[#allocation7 + $0x10] sm:$0xff]  ;;  %v10299_v63 = vadd.f32 %v10223_v42, %v10154_v23  ;;  %v9640_v15 = vadd.f32 %v19800_v11, %v9570_v0  ;;  %v9641_v1 = vadd.f32 %v19800_v11, %v9571_v53  ;;  %v9642_v14 = vadd.f32 %v19800_v11, %v9572_v2 }
 0x64e   :  { %15126 = vmatprep.mubr.msk.f32.mxu0 %vm137_vm3, %v10545_v59  ;;  %v10399_v12 = vld [vmem:[#allocation6 + $0xa0] sm:$0xff]  ;;  %v10400_v43 = vld [vmem:[#allocation6 + $0xa8] sm:$0xff]  ;;  %v9643_v9 = vadd.f32 %v19800_v11, %v9573_v16  ;;  %v10330_v21 = vmul.f32 0.11111111, %v10298_v29  ;;  %v9837_v49 = vadd.f32 %v20077_v18, %v9741_v48  ;;  %v9474_v33 = vmul.f32 %v19782_v26, %v19482_v40 }
 0x64f   :  { %10422 = vst.msk [vmem:[#allocation7 + $0x50] sm:$0x1] %vm10411_vm7, %v10399_v12  ;;  %10489 = vst.msk [vmem:[#allocation7 + $0x54] sm:$0x1] %vm10411_vm7, %v10400_v43  ;;  %v10331_v4 = vmul.f32 0.11111111, %v10299_v63  ;;  %v9475_v11 = vmul.f32 %v19782_v26, %v19489_v54  ;;  %v9542_v18 = vmul.f32 %v19787_v47, %v9472_v50  ;;  %v9543_v40 = vmul.f32 %v19787_v47, %v9473_v61 }
 0x650   :  { %10439 = vst.msk [vmem:[#allocation7 + $0x4f] sm:$0x4] %vm10428_vm8, %v10399_v12  ;;  %10505 = vst.msk [vmem:[#allocation7 + $0x53] sm:$0x4] %vm10428_vm8, %v10400_v43  ;;  %v9742_v28 = vld [vmem:[#allocation3 + $0xe0] sm:$0xff]  ;;  %v10385_v38 = vld [vmem:[#allocation6 + $0x30] sm:$0xff]  ;;  %v9544_v35 = vmul.f32 %v20195_v56, %v9474_v33  ;;  %v9504_v10 = vmul.f32 %v19782_v26, %v21444_v17  ;;  %v9505_v44 = vmul.f32 %v19782_v26, %v21445_v25 }
 0x651   :  { %10456 = vst.msk [vmem:[#allocation7 + $0x4e] sm:$0x10] %vm10445_vm9, %v10399_v12  ;;  %10521 = vst.msk [vmem:[#allocation7 + $0x52] sm:$0x10] %vm10445_vm9, %v10400_v43  ;;  %v10386_v13 = vld [vmem:[#allocation6 + $0x38] sm:$0xff]  ;;  %v9838_v45 = vadd.f32 %v20080_v55, %v9742_v28  ;;  %v20188_v47 = vld [vmem:[#allocation3 + $0xf0] sm:$0xff]  ;;  %v9545_v37 = vmul.f32 %v20195_v56, %v9475_v11  ;;  %v9612_v7 = vadd.f32 %v20208_v60, %v9542_v18 }
 0x652   :  { %10473 = vst.msk [vmem:[#allocation7 + $0x4d] sm:$0x40] %vm10462_vm10, %v10399_v12  ;;  %10537 = vst.msk [vmem:[#allocation7 + $0x51] sm:$0x40] %vm10462_vm10, %v10400_v43  ;;  %v9743_v57 = vld [vmem:[#allocation3 + $0xe8] sm:$0x3]  ;;  %v9934_v22 = vadd.f32 %v20188_v47, %v9837_v49  ;;  %v9613_v31 = vadd.f32 %v20208_v60, %v9543_v40  ;;  %v9614_v34 = vadd.f32 %v20208_v60, %v9544_v35 }
 0x653   :  { %9704 = vst.msk [vmem:[#allocation3 + $0x289] sm:$0xff] %vm137_vm3, %v9640_v15  ;;  %9705 = vst.msk [vmem:[#allocation3 + $0x291] sm:$0xff] %vm137_vm3, %v9641_v1  ;;  %v9839_v54 = vadd.f32 %v9791_v20, %v9743_v57  ;;  %v20190_v55 = vld [vmem:[#allocation3 + $0xf8] sm:$0xff]  ;;  %v9888_v62 = vld [vmem:[#allocation3 + $0x100] sm:$0x3]  ;;  %v9506_v27 = vmul.f32 %v19782_v26, %v21446_v30  ;;  %v9615_v36 = vadd.f32 %v20208_v60, %v9545_v37 }
 0x654   :  { %9706 = vst.msk [vmem:[#allocation3 + $0x2a1] sm:$0xff] %vm137_vm3, %v9642_v14  ;;  %9707 = vst.msk [vmem:[#allocation3 + $0x2a9] sm:$0xff] %vm137_vm3, %v9643_v9  ;;  %v9935_v58 = vadd.f32 %v20190_v55, %v9838_v45  ;;  %v10039_v8 = vrot.slane %v9934_v22, 1  ;;  %v10184_v19 = vrot.slane %v9934_v22, 2  ;;  %v21447_v12 = vld [vmem:[#allocation46_spill] sm:$0xff]  ;;  %v9574_v51 = vmul.f32 %v20195_v56, %v9504_v10  ;;  %v21448_v35 = vld [vmem:[#allocation33_spill] sm:$0xff] }
 0x655   :  { %10415 = vst.msk [vmem:[#allocation7 + $0x18] sm:$0x1] %vm10411_vm7, %v10385_v38  ;;  %10482 = vst.msk [vmem:[#allocation7 + $0x1c] sm:$0x1] %vm10411_vm7, %v10386_v13  ;;  %v9936_v41 = vadd.f32 %v9888_v62, %v9839_v54  ;;  %v9507_v43 = vmul.f32 %v19782_v26, %v21447_v12  ;;  %v9575_v42 = vmul.f32 %v20195_v56, %v9505_v44  ;;  %v9794_v40 = vld [vmem:[#allocation3 + $0x100] sm:$0x3] }
 0x656   :  { %10432 = vst.msk [vmem:[#allocation7 + $0x17] sm:$0x4] %vm10428_vm8, %v10385_v38  ;;  %10498 = vst.msk [vmem:[#allocation7 + $0x1b] sm:$0x4] %vm10428_vm8, %v10386_v13  ;;  %v10040_v5 = vrot.slane %v9935_v58, 1  ;;  %v10185_v59 = vrot.slane %v9935_v58, 2  ;;  %v9576_v50 = vmul.f32 %v20195_v56, %v9506_v27  ;;  %v9644_v49 = vadd.f32 %v20208_v60, %v9574_v51 }
 0x657   :  { %10449 = vst.msk [vmem:[#allocation7 + $0x16] sm:$0x10] %vm10445_vm9, %v10385_v38  ;;  %10514 = vst.msk [vmem:[#allocation7 + $0x1a] sm:$0x10] %vm10445_vm9, %v10386_v13  ;;  %v10042_v39 = vrot.slane %v9936_v41, 1  ;;  %v10187_v24 = vrot.slane %v9936_v41, 2  ;;  %v9577_v28 = vmul.f32 %v20195_v56, %v9507_v43  ;;  %v9645_v33 = vadd.f32 %v20208_v60, %v9575_v42 }
 0x658   :  { %10466 = vst.msk [vmem:[#allocation7 + $0x15] sm:$0x40] %vm10462_vm10, %v10385_v38  ;;  %10530 = vst.msk [vmem:[#allocation7 + $0x19] sm:$0x40] %vm10462_vm10, %v10386_v13  ;;  %v10041_v3 = vsel %vm7320_vm5, %v10039_v8, %v10040_v5  ;;  %v10186_v23 = vsel %vm7609_vm6, %v10184_v19, %v10185_v59  ;;  %v9646_v54 = vadd.f32 %v20208_v60, %v9576_v50 }
 0x659   :  { %10357 = vst.msk [vmem:[#allocation6 + $0xb0] sm:$0xff] %vm137_vm3, %v10330_v21  ;;  %10358 = vst.msk [vmem:[#allocation6 + $0xb8] sm:$0xff] %vm137_vm3, %v10331_v4  ;;  %v10553_v6 = vld [vmem:[#allocation7 + $0x50] sm:$0xff]  ;;  %v10043_v0 = vsel %vm7320_vm5, %v10040_v5, %v10042_v39  ;;  %v10139_v53 = vadd.f32 %v10041_v3, %v9934_v22  ;;  %v10188_v2 = vsel %vm7609_vm6, %v10185_v59, %v10187_v24 }
 0x65a   :  { %15138 = vmatprep.mubr.msk.f32.mxu1 %vm137_vm3, %v10553_v6  ;;  %9676 = vst.msk [vmem:[#allocation3 + $0x109] sm:$0xff] %vm137_vm3, %v9612_v7  ;;  %9677 = vst.msk [vmem:[#allocation3 + $0x111] sm:$0xff] %vm137_vm3, %v9613_v31  ;;  %v9765_v16 = vld [vmem:[#allocation3 + $0x288] sm:$0xff]  ;;  %v9766_v29 = vld [vmem:[#allocation3 + $0x290] sm:$0xff]  ;;  %v10140_v15 = vadd.f32 %v10043_v0, %v9935_v58  ;;  %v9647_v62 = vadd.f32 %v20208_v60, %v9577_v28  ;;  %v20256_v17 = vmul.f32 %v19782_v26, %v21448_v35 }
 0x65b   :  { %9678 = vst.msk [vmem:[#allocation3 + $0x121] sm:$0xff] %vm137_vm3, %v9614_v34  ;;  %v9767_v63 = vld [vmem:[#allocation3 + $0x298] sm:$0x3]  ;;  %9679 = vst.msk [vmem:[#allocation3 + $0x129] sm:$0xff] %vm137_vm3, %v9615_v36  ;;  %v9861_v1 = vadd.f32 %v20111_v46, %v9765_v16  ;;  %v9862_v14 = vadd.f32 %v20113_v52, %v9766_v29  ;;  %v10284_v46 = vadd.f32 %v10186_v23, %v10139_v53  ;;  %v20241_v52 = vld [vmem:[#allocation3 + $0x2a0] sm:$0xff] }
 0x65c   :  { %v9863_v9 = vadd.f32 %v9815_v32, %v9767_v63  ;;  %v20243_v21 = vld [vmem:[#allocation3 + $0x2a8] sm:$0xff]  ;;  %v9912_v4 = vld [vmem:[#allocation3 + $0x2b0] sm:$0x3]  ;;  %v10285_v38 = vadd.f32 %v10188_v2, %v10140_v15  ;;  %9708 = vst.msk [vmem:[#allocation3 + $0x2b9] sm:$0xff] %vm137_vm3, %v9644_v49  ;;  %9709 = vst.msk [vmem:[#allocation3 + $0x2c1] sm:$0xff] %vm137_vm3, %v9645_v33 }
 0x65d   :  { %v9958_v13 = vadd.f32 %v20241_v52, %v9861_v1  ;;  %v9959_v57 = vadd.f32 %v20243_v21, %v9862_v14  ;;  %v10316_v11 = vmul.f32 0.11111111, %v10284_v46  ;;  %9710 = vst.msk [vmem:[#allocation3 + $0x2d1] sm:$0xff] %vm137_vm3, %v9646_v54  ;;  %9711 = vst.msk [vmem:[#allocation3 + $0x2d9] sm:$0xff] %vm137_vm3, %v9647_v62  ;;  %v21449_v23 = vld [vmem:[#allocation34_spill] sm:$0xff]  ;;  %v21450_v53 = vld [vmem:[#allocation35_spill] sm:$0xff] }
 0x65e   :  { %v9960_v45 = vadd.f32 %v9912_v4, %v9863_v9  ;;  %v10317_v10 = vmul.f32 0.11111111, %v10285_v38  ;;  %v9477_v51 = vmul.f32 %v19782_v26, %v21449_v23  ;;  %v9818_v0 = vld [vmem:[#allocation3 + $0x2b0] sm:$0x3]  ;;  %v9478_v2 = vmul.f32 %v19782_v26, %v21450_v53  ;;  %v21451_v16 = vld [vmem:[#allocation36_spill] sm:$0xff] }
 0x65f   :  { %v10546_v61 = vld [vmem:[#allocation7 + $0x18] sm:$0xff]  ;;  %v10079_v25 = vrot.slane %v9958_v13, 1  ;;  %v10080_v44 = vrot.slane %v9959_v57, 1  ;;  %10360 = vst.msk [vmem:[#allocation6 + $0x40] sm:$0xff] %vm137_vm3, %v10316_v11  ;;  %v10224_v37 = vrot.slane %v9958_v13, 2  ;;  %v10225_v7 = vrot.slane %v9959_v57, 2 }
 0x660   :  { %v10401_v48 = vld [vmem:[#allocation6 + $0xb0] sm:$0xff]  ;;  %v10402_v20 = vld [vmem:[#allocation6 + $0xb8] sm:$0xff]  ;;  %15127 = vmatmul.mubr.msk.f32.gmra.mrb[2].mxu0 %vm137_vm3, %v10546_v61  ;;  %v10082_v22 = vrot.slane %v9960_v45, 1  ;;  %v10227_v6 = vrot.slane %v9960_v45, 2  ;;  %10361 = vst.msk [vmem:[#allocation6 + $0x48] sm:$0xff] %vm137_vm3, %v10317_v10  ;;  %v9479_v29 = vmul.f32 %v19782_v26, %v21451_v16 }
 0x661   :  { %10423 = vst.msk [vmem:[#allocation7 + $0x58] sm:$0x1] %vm10411_vm7, %v10401_v48  ;;  %10490 = vst.msk [vmem:[#allocation7 + $0x5c] sm:$0x1] %vm10411_vm7, %v10402_v20  ;;  %v9744_v18 = vld [vmem:[#allocation3 + $0x108] sm:$0xff]  ;;  %v9745_v58 = vld [vmem:[#allocation3 + $0x110] sm:$0xff]  ;;  %v10081_v30 = vsel %vm7320_vm5, %v10079_v25, %v10080_v44  ;;  %v10226_v24 = vsel %vm7609_vm6, %v10224_v37, %v10225_v7  ;;  %v9546_v25 = vmul.f32 %v20195_v56, %v20256_v17 }
 0x662   :  { %10440 = vst.msk [vmem:[#allocation7 + $0x57] sm:$0x4] %vm10428_vm8, %v10401_v48  ;;  %10506 = vst.msk [vmem:[#allocation7 + $0x5b] sm:$0x4] %vm10428_vm8, %v10402_v20  ;;  %v9746_v41 = vld [vmem:[#allocation3 + $0x118] sm:$0x3]  ;;  %v9840_v31 = vadd.f32 %v20188_v47, %v9744_v18  ;;  %v10083_v27 = vsel %vm7320_vm5, %v10080_v44, %v10082_v22  ;;  %v9841_v8 = vadd.f32 %v20190_v55, %v9745_v58 }
 0x663   :  { %10457 = vst.msk [vmem:[#allocation7 + $0x56] sm:$0x10] %vm10445_vm9, %v10401_v48  ;;  %10522 = vst.msk [vmem:[#allocation7 + $0x5a] sm:$0x10] %vm10445_vm9, %v10402_v20  ;;  %v20260_v34 = vld [vmem:[#allocation3 + $0x120] sm:$0xff]  ;;  %v9842_v5 = vadd.f32 %v9794_v40, %v9746_v41  ;;  %v20268_v19 = vld [vmem:[#allocation3 + $0x128] sm:$0xff]  ;;  %v10155_v39 = vadd.f32 %v10081_v30, %v9958_v13  ;;  %v10156_v47 = vadd.f32 %v10083_v27, %v9959_v57 }
 0x664   :  { %10474 = vst.msk [vmem:[#allocation7 + $0x55] sm:$0x40] %vm10462_vm10, %v10401_v48  ;;  %10538 = vst.msk [vmem:[#allocation7 + $0x59] sm:$0x40] %vm10462_vm10, %v10402_v20  ;;  %v9891_v59 = vld [vmem:[#allocation3 + $0x130] sm:$0x3]  ;;  %v10228_v32 = vsel %vm7609_vm6, %v10225_v7, %v10227_v6  ;;  %v9937_v12 = vadd.f32 %v20260_v34, %v9840_v31  ;;  %v9938_v43 = vadd.f32 %v20268_v19, %v9841_v8 }
 0x665   :  { %v9939_v3 = vadd.f32 %v9891_v59, %v9842_v5  ;;  %v10300_v55 = vadd.f32 %v10226_v24, %v10155_v39  ;;  %v10301_v42 = vadd.f32 %v10228_v32, %v10156_v47  ;;  %v9768_v20 = vld [vmem:[#allocation3 + $0x2b8] sm:$0xff]  ;;  %v9769_v15 = vld [vmem:[#allocation3 + $0x2c0] sm:$0xff]  ;;  %v9770_v33 = vld [vmem:[#allocation3 + $0x2c8] sm:$0x3]  ;;  %v9547_v58 = vmul.f32 %v20195_v56, %v9477_v51 }
 0x666   :  { %v10044_v63 = vrot.slane %v9937_v12, 1  ;;  %v10045_v50 = vrot.slane %v9938_v43, 1  ;;  %v10189_v48 = vrot.slane %v9937_v12, 2  ;;  %v10190_v9 = vrot.slane %v9938_v43, 2  ;;  %v10387_v4 = vld [vmem:[#allocation6 + $0x40] sm:$0xff]  ;;  %v20285_v57 = vld [vmem:[#allocation3 + $0x2d0] sm:$0xff] }
 0x667   :  { %v10047_v61 = vrot.slane %v9939_v3, 1  ;;  %v10332_v1 = vmul.f32 0.11111111, %v10300_v55  ;;  %v10333_v14 = vmul.f32 0.11111111, %v10301_v42  ;;  %v10192_v46 = vrot.slane %v9939_v3, 2 }
 0x668   :  { %v10046_v28 = vsel %vm7320_vm5, %v10044_v63, %v10045_v50  ;;  %v9864_v38 = vadd.f32 %v20241_v52, %v9768_v20  ;;  %v9865_v13 = vadd.f32 %v20243_v21, %v9769_v15  ;;  %v10388_v45 = vld [vmem:[#allocation6 + $0x48] sm:$0xff]  ;;  %10416 = vst.msk [vmem:[#allocation7 + $0x20] sm:$0x1] %vm10411_vm7, %v10387_v4  ;;  %v10191_v52 = vsel %vm7609_vm6, %v10189_v48, %v10190_v9  ;;  %v20295_v40 = vld [vmem:[#allocation3 + $0x2d8] sm:$0xff]  ;;  %v9915_v54 = vld [vmem:[#allocation3 + $0x2e0] sm:$0x3] }
 0x669   :  { %v10048_v49 = vsel %vm7320_vm5, %v10045_v50, %v10047_v61  ;;  %10433 = vst.msk [vmem:[#allocation7 + $0x1f] sm:$0x4] %vm10428_vm8, %v10387_v4  ;;  %v10141_v11 = vadd.f32 %v10046_v28, %v9937_v12  ;;  %v10193_v21 = vsel %vm7609_vm6, %v10190_v9, %v10192_v46  ;;  %10499 = vst.msk [vmem:[#allocation7 + $0x23] sm:$0x4] %vm10428_vm8, %v10388_v45  ;;  %v21452_v42 = vld [vmem:[#allocation44_spill] sm:$0xff]  ;;  %v21454_v50 = vld [vmem:[#allocation13_spill] sm:$0xff] }
 0x66a   :  { %10450 = vst.msk [vmem:[#allocation7 + $0x1e] sm:$0x10] %vm10445_vm9, %v10387_v4  ;;  %v10142_v18 = vadd.f32 %v10048_v49, %v9938_v43  ;;  %10515 = vst.msk [vmem:[#allocation7 + $0x22] sm:$0x10] %vm10445_vm9, %v10388_v45  ;;  %v9866_v62 = vadd.f32 %v9818_v0, %v9770_v33  ;;  %v9961_v35 = vadd.f32 %v20285_v57, %v9864_v38  ;;  %v21455_v48 = vld [vmem:[#allocation14_spill] sm:$0xff] }
 0x66b   :  { %v10554_v36 = vld [vmem:[#allocation7 + $0x58] sm:$0xff]  ;;  %10467 = vst.msk [vmem:[#allocation7 + $0x1d] sm:$0x40] %vm10462_vm10, %v10387_v4  ;;  %10531 = vst.msk [vmem:[#allocation7 + $0x21] sm:$0x40] %vm10462_vm10, %v10388_v45  ;;  %v9962_v10 = vadd.f32 %v20295_v40, %v9865_v13  ;;  %v10286_v44 = vadd.f32 %v10191_v52, %v10141_v11  ;;  %v9548_v37 = vmul.f32 %v20195_v56, %v9478_v2  ;;  %v21457_v9 = vld [vmem:[#allocation38_spill] sm:$0xff] }
 0x66c   :  { %15139 = vmatmul.mubr.msk.f32.gmra.mrb[2].mxu1 %vm137_vm3, %v10554_v36  ;;  %10362 = vst.msk [vmem:[#allocation6 + $0xc0] sm:$0xff] %vm137_vm3, %v10332_v1  ;;  %10363 = vst.msk [vmem:[#allocation6 + $0xc8] sm:$0xff] %vm137_vm3, %v10333_v14  ;;  %v10287_v22 = vadd.f32 %v10193_v21, %v10142_v18  ;;  %v9963_v7 = vadd.f32 %v9915_v54, %v9866_v62  ;;  %v10084_v6 = vrot.slane %v9961_v35, 1  ;;  %v10229_v31 = vrot.slane %v9961_v35, 2  ;;  %v21456_v1 = vld [vmem:[#allocation37_spill] sm:$0xff]  ;;  %v21459_v18 = vld [vmem:[#allocation40_spill] sm:$0xff] }
 0x66d   :  { %10483 = vst.msk [vmem:[#allocation7 + $0x24] sm:$0x1] %vm10411_vm7, %v10388_v45  ;;  %v10085_v41 = vrot.slane %v9962_v10, 1  ;;  %v10318_v30 = vmul.f32 0.11111111, %v10286_v44  ;;  %v10230_v8 = vrot.slane %v9962_v10, 2  ;;  %v9549_v5 = vmul.f32 %v20195_v56, %v9479_v29 }
 0x66e   :  { %v10319_v27 = vmul.f32 0.11111111, %v10287_v22  ;;  %v10087_v39 = vrot.slane %v9963_v7, 1  ;;  %v10232_v47 = vrot.slane %v9963_v7, 2  ;;  %v9616_v17 = vadd.f32 %v20208_v60, %v9546_v25  ;;  %v21453_v29 = vld [vmem:[#allocation45_spill] sm:$0xff]  ;;  %v21458_v45 = vld [vmem:[#allocation39_spill] sm:$0xff] }
 0x66f   :  { %v10086_v59 = vsel %vm7320_vm5, %v10084_v6, %v10085_v41  ;;  %10365 = vst.msk [vmem:[#allocation6 + $0x50] sm:$0xff] %vm137_vm3, %v10318_v30  ;;  %v10231_v32 = vsel %vm7609_vm6, %v10229_v31, %v10230_v8  ;;  %v9617_v36 = vadd.f32 %v20208_v60, %v9547_v58  ;;  %v9618_v12 = vadd.f32 %v20208_v60, %v9548_v37  ;;  %v9797_v44 = vld [vmem:[#allocation3 + $0x130] sm:$0x3]  ;;  %v21460_v31 = vld [vmem:[#allocation15_spill] sm:$0xff] }
 0x670   :  { %10366 = vst.msk [vmem:[#allocation6 + $0x58] sm:$0xff] %vm137_vm3, %v10319_v27  ;;  %v10157_v24 = vadd.f32 %v10086_v59, %v9961_v35  ;;  %v10088_v23 = vsel %vm7320_vm5, %v10085_v41, %v10087_v39  ;;  %v10233_v51 = vsel %vm7609_vm6, %v10230_v8, %v10232_v47  ;;  %v9619_v55 = vadd.f32 %v20208_v60, %v9549_v5  ;;  %v21461_v27 = vld [vmem:[#allocation16_spill] sm:$0xff]  ;;  %v21462_v5 = vld [vmem:[#allocation17_spill] sm:$0xff] }
 0x671   :  { %9680 = vst.msk [vmem:[#allocation3 + $0x139] sm:$0xff] %vm137_vm3, %v9616_v17  ;;  %v9508_v0 = vmul.f32 %v19782_v26, %v21452_v42  ;;  %v10158_v2 = vadd.f32 %v10088_v23, %v9962_v10  ;;  %9681 = vst.msk [vmem:[#allocation3 + $0x141] sm:$0xff] %vm137_vm3, %v9617_v36  ;;  %v9509_v63 = vmul.f32 %v19782_v26, %v21453_v29 }
 0x672   :  { %v10302_v16 = vadd.f32 %v10231_v32, %v10157_v24  ;;  %9682 = vst.msk [vmem:[#allocation3 + $0x151] sm:$0xff] %vm137_vm3, %v9618_v12  ;;  %v9510_v61 = vmul.f32 %v19782_v26, %v21454_v50  ;;  %9683 = vst.msk [vmem:[#allocation3 + $0x159] sm:$0xff] %vm137_vm3, %v9619_v55  ;;  %v9511_v20 = vmul.f32 %v19782_v26, %v21455_v48 }
 0x673   :  { %v10403_v43 = vld [vmem:[#allocation6 + $0xc0] sm:$0xff]  ;;  %v10404_v3 = vld [vmem:[#allocation6 + $0xc8] sm:$0xff]  ;;  %v9578_v15 = vmul.f32 %v20195_v56, %v9508_v0  ;;  %v9480_v14 = vmul.f32 %v19782_v26, %v21456_v1  ;;  %v9481_v46 = vmul.f32 %v19782_v26, %v21457_v9  ;;  %v10303_v4 = vadd.f32 %v10233_v51, %v10158_v2 }
 0x674   :  { %v10547_v53 = vld [vmem:[#allocation7 + $0x20] sm:$0xff]  ;;  %10424 = vst.msk [vmem:[#allocation7 + $0x60] sm:$0x1] %vm10411_vm7, %v10403_v43  ;;  %10491 = vst.msk [vmem:[#allocation7 + $0x64] sm:$0x1] %vm10411_vm7, %v10404_v3  ;;  %v9579_v49 = vmul.f32 %v20195_v56, %v9509_v63  ;;  %v9580_v33 = vmul.f32 %v20195_v56, %v9510_v61  ;;  %v9581_v38 = vmul.f32 %v20195_v56, %v9511_v20 }
 0x675   :  { %10441 = vst.msk [vmem:[#allocation7 + $0x5f] sm:$0x4] %vm10428_vm8, %v10403_v43  ;;  %10507 = vst.msk [vmem:[#allocation7 + $0x63] sm:$0x4] %vm10428_vm8, %v10404_v3  ;;  %15129 = vmatprep.mubr.msk.f32.mxu0 %vm137_vm3, %v10547_v53  ;;  %v10334_v28 = vmul.f32 0.11111111, %v10302_v16  ;;  %v9648_v13 = vadd.f32 %v20208_v60, %v9578_v15  ;;  %v9482_v11 = vmul.f32 %v19782_v26, %v21458_v45 }
 0x676   :  { %10458 = vst.msk [vmem:[#allocation7 + $0x5e] sm:$0x10] %vm10445_vm9, %v10403_v43  ;;  %10523 = vst.msk [vmem:[#allocation7 + $0x62] sm:$0x10] %vm10445_vm9, %v10404_v3  ;;  %v9483_v52 = vmul.f32 %v19782_v26, %v21459_v18  ;;  %v10335_v21 = vmul.f32 0.11111111, %v10303_v4  ;;  %v9649_v54 = vadd.f32 %v20208_v60, %v9579_v49  ;;  %v9650_v62 = vadd.f32 %v20208_v60, %v9580_v33 }
 0x677   :  { %10475 = vst.msk [vmem:[#allocation7 + $0x5d] sm:$0x40] %vm10462_vm10, %v10403_v43  ;;  %10539 = vst.msk [vmem:[#allocation7 + $0x61] sm:$0x40] %vm10462_vm10, %v10404_v3  ;;  %v9550_v35 = vmul.f32 %v20195_v56, %v9480_v14  ;;  %v10389_v10 = vld [vmem:[#allocation6 + $0x50] sm:$0xff]  ;;  %v10390_v25 = vld [vmem:[#allocation6 + $0x58] sm:$0xff]  ;;  %v9651_v22 = vadd.f32 %v20208_v60, %v9581_v38  ;;  %v9551_v58 = vmul.f32 %v20195_v56, %v9481_v46 }
 0x678   :  { %10367 = vst.msk [vmem:[#allocation6 + $0xd0] sm:$0xff] %vm137_vm3, %v10334_v28  ;;  %9712 = vst.msk [vmem:[#allocation3 + $0x2e9] sm:$0xff] %vm137_vm3, %v9648_v13  ;;  %v9552_v37 = vmul.f32 %v20195_v56, %v9482_v11  ;;  %v9553_v7 = vmul.f32 %v20195_v56, %v9483_v52  ;;  %v9747_v6 = vld [vmem:[#allocation3 + $0x138] sm:$0xff]  ;;  %v9512_v30 = vmul.f32 %v19782_v26, %v21460_v31  ;;  %v9748_v47 = vld [vmem:[#allocation3 + $0x140] sm:$0xff] }
 0x679   :  { %10417 = vst.msk [vmem:[#allocation7 + $0x28] sm:$0x1] %vm10411_vm7, %v10389_v10  ;;  %10484 = vst.msk [vmem:[#allocation7 + $0x2c] sm:$0x1] %vm10411_vm7, %v10390_v25  ;;  %v9620_v41 = vadd.f32 %v20208_v60, %v9550_v35  ;;  %v9513_v8 = vmul.f32 %v19782_v26, %v21461_v27  ;;  %v9514_v59 = vmul.f32 %v19782_v26, %v21462_v5  ;;  %v9749_v17 = vld [vmem:[#allocation3 + $0x148] sm:$0x3] }
 0x67a   :  { %10434 = vst.msk [vmem:[#allocation7 + $0x27] sm:$0x4] %vm10428_vm8, %v10389_v10  ;;  %10500 = vst.msk [vmem:[#allocation7 + $0x2b] sm:$0x4] %vm10428_vm8, %v10390_v25  ;;  %v9843_v24 = vadd.f32 %v20260_v34, %v9747_v6  ;;  %v9621_v32 = vadd.f32 %v20208_v60, %v9551_v58  ;;  %v9622_v36 = vadd.f32 %v20208_v60, %v9552_v37  ;;  %v9892_v23 = vld [vmem:[#allocation3 + $0x150] sm:$0xff]  ;;  %v20386_v51 = vld [vmem:[#allocation3 + $0x158] sm:$0xff] }
 0x67b   :  { %10451 = vst.msk [vmem:[#allocation7 + $0x26] sm:$0x10] %vm10445_vm9, %v10389_v10  ;;  %10516 = vst.msk [vmem:[#allocation7 + $0x2a] sm:$0x10] %vm10445_vm9, %v10390_v25  ;;  %v9623_v12 = vadd.f32 %v20208_v60, %v9553_v7  ;;  %v9844_v43 = vadd.f32 %v20268_v19, %v9748_v47  ;;  %v9845_v3 = vadd.f32 %v9797_v44, %v9749_v17  ;;  %v9894_v55 = vld [vmem:[#allocation3 + $0x160] sm:$0x3] }
 0x67c   :  { %10468 = vst.msk [vmem:[#allocation7 + $0x25] sm:$0x40] %vm10462_vm10, %v10389_v10  ;;  %10532 = vst.msk [vmem:[#allocation7 + $0x29] sm:$0x40] %vm10462_vm10, %v10390_v25  ;;  %v21463_v34 = vld [vmem:[#allocation18_spill] sm:$0xff]  ;;  %v9582_v0 = vmul.f32 %v20195_v56, %v9512_v30  ;;  %v9940_v53 = vadd.f32 %v9892_v23, %v9843_v24  ;;  %v9583_v19 = vmul.f32 %v20195_v56, %v9513_v8 }
 0x67d   :  { %10368 = vst.msk [vmem:[#allocation6 + $0xd8] sm:$0xff] %vm137_vm3, %v10335_v21  ;;  %9713 = vst.msk [vmem:[#allocation3 + $0x2f1] sm:$0xff] %vm137_vm3, %v9649_v54  ;;  %v9515_v42 = vmul.f32 %v19782_v26, %v21463_v34  ;;  %v9584_v2 = vmul.f32 %v20195_v56, %v9514_v59  ;;  %v9941_v16 = vadd.f32 %v20386_v51, %v9844_v43  ;;  %v9821_v20 = vld [vmem:[#allocation3 + $0x2e0] sm:$0x3] }
 0x67e   :  { %9714 = vst.msk [vmem:[#allocation3 + $0x301] sm:$0xff] %vm137_vm3, %v9650_v62  ;;  %v10555_v39 = vld [vmem:[#allocation7 + $0x60] sm:$0xff]  ;;  %9715 = vst.msk [vmem:[#allocation3 + $0x309] sm:$0xff] %vm137_vm3, %v9651_v22  ;;  %v9942_v29 = vadd.f32 %v9894_v55, %v9845_v3  ;;  %v9652_v26 = vadd.f32 %v20208_v60, %v9582_v0  ;;  %v10049_v61 = vrot.slane %v9940_v53, 1  ;;  %v10194_v48 = vrot.slane %v9940_v53, 2 }
 0x67f   :  { %15141 = vmatprep.mubr.msk.f32.mxu1 %vm137_vm3, %v10555_v39  ;;  %9684 = vst.msk [vmem:[#allocation3 + $0x169] sm:$0xff] %vm137_vm3, %v9620_v41  ;;  %9685 = vst.msk [vmem:[#allocation3 + $0x171] sm:$0xff] %vm137_vm3, %v9621_v32  ;;  %v9585_v63 = vmul.f32 %v20195_v56, %v9515_v42  ;;  %v10405_v50 = vld [vmem:[#allocation6 + $0xd0] sm:$0xff]  ;;  %v9653_v15 = vadd.f32 %v20208_v60, %v9583_v19  ;;  %v9654_v1 = vadd.f32 %v20208_v60, %v9584_v2  ;;  %v9771_v4 = vld [vmem:[#allocation3 + $0x2e8] sm:$0xff] }
 0x680   :  { %9686 = vst.msk [vmem:[#allocation3 + $0x181] sm:$0xff] %vm137_vm3, %v9622_v36  ;;  %9687 = vst.msk [vmem:[#allocation3 + $0x189] sm:$0xff] %vm137_vm3, %v9623_v12  ;;  %v10050_v14 = vrot.slane %v9941_v16, 1  ;;  %v10052_v56 = vrot.slane %v9942_v29, 1  ;;  %v10195_v9 = vrot.slane %v9941_v16, 2  ;;  %v10197_v46 = vrot.slane %v9942_v29, 2 }
 0x681   :  { %10425 = vst.msk [vmem:[#allocation7 + $0x68] sm:$0x1] %vm10411_vm7, %v10405_v50  ;;  %v9867_v38 = vadd.f32 %v20285_v57, %v9771_v4  ;;  %v9655_v13 = vadd.f32 %v20208_v60, %v9585_v63  ;;  %v9800_v22 = vld [vmem:[#allocation3 + $0x160] sm:$0x3] }
 0x682   :  { %10442 = vst.msk [vmem:[#allocation7 + $0x67] sm:$0x4] %vm10428_vm8, %v10405_v50  ;;  %v10051_v45 = vsel %vm7320_vm5, %v10049_v61, %v10050_v14  ;;  %v10053_v57 = vsel %vm7320_vm5, %v10050_v14, %v10052_v56  ;;  %v10196_v60 = vsel %vm7609_vm6, %v10194_v48, %v10195_v9  ;;  %v10198_v11 = vsel %vm7609_vm6, %v10195_v9, %v10197_v46 }
 0x683   :  { %10459 = vst.msk [vmem:[#allocation7 + $0x66] sm:$0x10] %vm10445_vm9, %v10405_v50  ;;  %v10548_v28 = vld [vmem:[#allocation7 + $0x28] sm:$0xff]  ;;  %v10143_v54 = vadd.f32 %v10051_v45, %v9940_v53  ;;  %v10144_v62 = vadd.f32 %v10053_v57, %v9941_v16 }
 0x684   :  { %10476 = vst.msk [vmem:[#allocation7 + $0x65] sm:$0x40] %vm10462_vm10, %v10405_v50  ;;  %v10406_v49 = vld [vmem:[#allocation6 + $0xd8] sm:$0xff]  ;;  %v9772_v33 = vld [vmem:[#allocation3 + $0x2f0] sm:$0xff]  ;;  %15130 = vmatmul.mubr.msk.f32.gmra.mrb[4].mxu0 %vm137_vm3, %v10548_v28 }
 0x685   :  { %9716 = vst.msk [vmem:[#allocation3 + $0x319] sm:$0xff] %vm137_vm3, %v9652_v26  ;;  %9717 = vst.msk [vmem:[#allocation3 + $0x321] sm:$0xff] %vm137_vm3, %v9653_v15  ;;  %v9773_v18 = vld [vmem:[#allocation3 + $0x2f8] sm:$0x3]  ;;  %v9916_v52 = vld [vmem:[#allocation3 + $0x300] sm:$0xff]  ;;  %v9868_v35 = vadd.f32 %v20295_v40, %v9772_v33  ;;  %v10288_v41 = vadd.f32 %v10196_v60, %v10143_v54  ;;  %v10289_v31 = vadd.f32 %v10198_v11, %v10144_v62 }
 0x686   :  { %9718 = vst.msk [vmem:[#allocation3 + $0x331] sm:$0xff] %vm137_vm3, %v9654_v1  ;;  %v9917_v21 = vld [vmem:[#allocation3 + $0x308] sm:$0xff]  ;;  %v9869_v10 = vadd.f32 %v9821_v20, %v9773_v18  ;;  %v9918_v25 = vld [vmem:[#allocation3 + $0x310] sm:$0x3]  ;;  %9719 = vst.msk [vmem:[#allocation3 + $0x339] sm:$0xff] %vm137_vm3, %v9655_v13  ;;  %v9964_v58 = vadd.f32 %v9916_v52, %v9867_v38 }
 0x687   :  { %10492 = vst.msk [vmem:[#allocation7 + $0x6c] sm:$0x1] %vm10411_vm7, %v10406_v49  ;;  %v9750_v44 = vld [vmem:[#allocation3 + $0x168] sm:$0xff]  ;;  %v9751_v37 = vld [vmem:[#allocation3 + $0x170] sm:$0xff]  ;;  %v9752_v7 = vld [vmem:[#allocation3 + $0x178] sm:$0x3]  ;;  %v9965_v30 = vadd.f32 %v9917_v21, %v9868_v35 }
 0x688   :  { %10508 = vst.msk [vmem:[#allocation7 + $0x6b] sm:$0x4] %vm10428_vm8, %v10406_v49  ;;  %v9846_v6 = vadd.f32 %v9892_v23, %v9750_v44  ;;  %v9966_v27 = vadd.f32 %v9918_v25, %v9869_v10  ;;  %v9895_v8 = vld [vmem:[#allocation3 + $0x180] sm:$0xff]  ;;  %v9896_v5 = vld [vmem:[#allocation3 + $0x188] sm:$0xff]  ;;  %v10089_v59 = vrot.slane %v9964_v58, 1  ;;  %v10234_v39 = vrot.slane %v9964_v58, 2 }
 0x689   :  { %10524 = vst.msk [vmem:[#allocation7 + $0x6a] sm:$0x10] %vm10445_vm9, %v10406_v49  ;;  %v9847_v40 = vadd.f32 %v20386_v51, %v9751_v37  ;;  %v9848_v47 = vadd.f32 %v9800_v22, %v9752_v7  ;;  %v9897_v17 = vld [vmem:[#allocation3 + $0x190] sm:$0x3]  ;;  %v10320_v24 = vmul.f32 0.11111111, %v10288_v41 }
 0x68a   :  { %10540 = vst.msk [vmem:[#allocation7 + $0x69] sm:$0x40] %vm10462_vm10, %v10406_v49  ;;  %v10321_v32 = vmul.f32 0.11111111, %v10289_v31  ;;  %v10090_v36 = vrot.slane %v9965_v30, 1  ;;  %v10092_v12 = vrot.slane %v9966_v27, 1  ;;  %v9943_v55 = vadd.f32 %v9895_v8, %v9846_v6 }
 0x68b   :  { %v10235_v43 = vrot.slane %v9965_v30, 2  ;;  %v10237_v3 = vrot.slane %v9966_v27, 2  ;;  %v9944_v23 = vadd.f32 %v9896_v5, %v9847_v40  ;;  %10370 = vst.msk [vmem:[#allocation6 + $0x60] sm:$0xff] %vm137_vm3, %v10320_v24  ;;  %v9945_v53 = vadd.f32 %v9897_v17, %v9848_v47  ;;  %v9824_v61 = vld [vmem:[#allocation3 + $0x310] sm:$0x3] }
 0x68c   :  { %v9774_v34 = vld [vmem:[#allocation3 + $0x318] sm:$0xff]  ;;  %10371 = vst.msk [vmem:[#allocation6 + $0x68] sm:$0xff] %vm137_vm3, %v10321_v32  ;;  %v10091_v0 = vsel %vm7320_vm5, %v10089_v59, %v10090_v36  ;;  %v10093_v51 = vsel %vm7320_vm5, %v10090_v36, %v10092_v12  ;;  %v9775_v26 = vld [vmem:[#allocation3 + $0x320] sm:$0xff]  ;;  %v9776_v50 = vld [vmem:[#allocation3 + $0x328] sm:$0x3]  ;;  %v10054_v48 = vrot.slane %v9943_v55, 1 }
 0x68d   :  { %v9870_v19 = vadd.f32 %v9916_v52, %v9774_v34  ;;  %v10159_v2 = vadd.f32 %v10091_v0, %v9964_v58  ;;  %v10160_v16 = vadd.f32 %v10093_v51, %v9965_v30  ;;  %v10236_v29 = vsel %vm7609_vm6, %v10234_v39, %v10235_v43  ;;  %v9919_v4 = vld [vmem:[#allocation3 + $0x330] sm:$0xff]  ;;  %v9920_v28 = vld [vmem:[#allocation3 + $0x338] sm:$0xff]  ;;  %v9921_v45 = vld [vmem:[#allocation3 + $0x340] sm:$0x3] }
 0x68e   :  { %v10238_v63 = vsel %vm7609_vm6, %v10235_v43, %v10237_v3  ;;  %v10055_v20 = vrot.slane %v9944_v23, 1  ;;  %v10057_v15 = vrot.slane %v9945_v53, 1  ;;  %v10199_v1 = vrot.slane %v9943_v55, 2 }
 0x68f   :  { %v10304_v14 = vadd.f32 %v10236_v29, %v10159_v2  ;;  %v10305_v56 = vadd.f32 %v10238_v63, %v10160_v16  ;;  %v10200_v9 = vrot.slane %v9944_v23, 2  ;;  %v10202_v46 = vrot.slane %v9945_v53, 2  ;;  %v20488_v2 = vld [vmem:[%s21233_s2 + $0x88] sm:$0xff]  ;;  %v20493_v16 = vld [vmem:[%s21233_s2 + $0x90] sm:$0xff]  ;;  %v20498_v29 = vld [vmem:[%s21233_s2 + $0x98] sm:$0xff] }
 0x690   :  { %v10056_v49 = vsel %vm7320_vm5, %v10054_v48, %v10055_v20  ;;  %v10058_v33 = vsel %vm7320_vm5, %v10055_v20, %v10057_v15  ;;  %v9871_v38 = vadd.f32 %v9917_v21, %v9775_v26  ;;  %v9872_v13 = vadd.f32 %v9824_v61, %v9776_v50  ;;  %21465 = vst [vmem:[#allocation20_spill] sm:$0xff] %v20488_v2  ;;  %v20503_v63 = vld [vmem:[%s21233_s2 + $0xa0] sm:$0xff]  ;;  %v20508_v26 = vld [vmem:[%s21233_s2 + $0xa8] sm:$0xff]  ;;  %v20513_v50 = vld [vmem:[%s21233_s2 + $0xb0] sm:$0xff] }
 0x691   :  { %v10556_v42 = vld [vmem:[#allocation7 + $0x68] sm:$0xff]  ;;  %v10336_v57 = vmul.f32 0.11111111, %v10304_v14  ;;  %v10337_v60 = vmul.f32 0.11111111, %v10305_v56  ;;  %v10145_v11 = vadd.f32 %v10056_v49, %v9943_v55  ;;  %v10146_v18 = vadd.f32 %v10058_v33, %v9944_v23  ;;  %21466 = vst [vmem:[#allocation21_spill] sm:$0xff] %v20493_v16 }
 0x692   :  { %15142 = vmatmul.mubr.msk.f32.gmra.mrb[4].mxu1 %vm137_vm3, %v10556_v42  ;;  %v10201_v52 = vsel %vm7609_vm6, %v10199_v1, %v10200_v9  ;;  %v10203_v54 = vsel %vm7609_vm6, %v10200_v9, %v10202_v46  ;;  %v9967_v62 = vadd.f32 %v9919_v4, %v9870_v19  ;;  %v9968_v35 = vadd.f32 %v9920_v28, %v9871_v38  ;;  %v10391_v10 = vld [vmem:[#allocation6 + $0x60] sm:$0xff]  ;;  %v20518_v61 = vld [vmem:[%s21233_s2 + $0xb8] sm:$0xff] }
 0x693   :  { %v10392_v25 = vld [vmem:[#allocation6 + $0x68] sm:$0xff]  ;;  %10372 = vst.msk [vmem:[#allocation6 + $0xe0] sm:$0xff] %vm137_vm3, %v10336_v57  ;;  %10373 = vst.msk [vmem:[#allocation6 + $0xe8] sm:$0xff] %vm137_vm3, %v10337_v60  ;;  %v10290_v44 = vadd.f32 %v10201_v52, %v10145_v11  ;;  %v10291_v21 = vadd.f32 %v10203_v54, %v10146_v18  ;;  %v9969_v22 = vadd.f32 %v9921_v45, %v9872_v13  ;;  %v20483_v19 = vld [vmem:[%s21233_s2 + $0x80] sm:$0xff] }
 0x694   :  { %10418 = vst.msk [vmem:[#allocation7 + $0x30] sm:$0x1] %vm10411_vm7, %v10391_v10  ;;  %10485 = vst.msk [vmem:[#allocation7 + $0x34] sm:$0x1] %vm10411_vm7, %v10392_v25  ;;  %v10094_v58 = vrot.slane %v9967_v62, 1  ;;  %v10095_v37 = vrot.slane %v9968_v35, 1 }
 0x695   :  { %10435 = vst.msk [vmem:[#allocation7 + $0x2f] sm:$0x4] %vm10428_vm8, %v10391_v10  ;;  %10501 = vst.msk [vmem:[#allocation7 + $0x33] sm:$0x4] %vm10428_vm8, %v10392_v25  ;;  %v10239_v7 = vrot.slane %v9967_v62, 2  ;;  %v10240_v6 = vrot.slane %v9968_v35, 2 }
 0x696   :  { %10452 = vst.msk [vmem:[#allocation7 + $0x2e] sm:$0x10] %vm10445_vm9, %v10391_v10  ;;  %10517 = vst.msk [vmem:[#allocation7 + $0x32] sm:$0x10] %vm10445_vm9, %v10392_v25  ;;  %v10322_v41 = vmul.f32 0.11111111, %v10290_v44  ;;  %v10096_v8 = vsel %vm7320_vm5, %v10094_v58, %v10095_v37 }
 0x697   :  { %10469 = vst.msk [vmem:[#allocation7 + $0x2d] sm:$0x40] %vm10462_vm10, %v10391_v10  ;;  %10533 = vst.msk [vmem:[#allocation7 + $0x31] sm:$0x40] %vm10462_vm10, %v10392_v25  ;;  %v10323_v31 = vmul.f32 0.11111111, %v10291_v21  ;;  %v10241_v5 = vsel %vm7609_vm6, %v10239_v7, %v10240_v6  ;;  %v10161_v39 = vadd.f32 %v10096_v8, %v9967_v62 }
 0x698   :  { %v10097_v30 = vrot.slane %v9969_v22, 1  ;;  %v10242_v27 = vrot.slane %v9969_v22, 2  ;;  %10375 = vst.msk [vmem:[#allocation6 + $0x70] sm:$0xff] %vm137_vm3, %v10322_v41  ;;  %21464 = vst [vmem:[#allocation19_spill] sm:$0xff] %v20483_v19 }
 0x699   :  { %10376 = vst.msk [vmem:[#allocation6 + $0x78] sm:$0xff] %vm137_vm3, %v10323_v31  ;;  %v10306_v17 = vadd.f32 %v10241_v5, %v10161_v39 }
 0x69a   :  { %v10098_v59 = vsel %vm7320_vm5, %v10095_v37, %v10097_v30  ;;  %v10243_v40 = vsel %vm7609_vm6, %v10240_v6, %v10242_v27  ;;  %v10407_v24 = vld [vmem:[#allocation6 + $0xe0] sm:$0xff]  ;;  %v10408_v32 = vld [vmem:[#allocation6 + $0xe8] sm:$0xff] }
 0x69b   :  { %v10162_v47 = vadd.f32 %v10098_v59, %v9968_v35  ;;  %10426 = vst.msk [vmem:[#allocation7 + $0x70] sm:$0x1] %vm10411_vm7, %v10407_v24  ;;  %10493 = vst.msk [vmem:[#allocation7 + $0x74] sm:$0x1] %vm10411_vm7, %v10408_v32  ;;  %v10338_v43 = vmul.f32 0.11111111, %v10306_v17 }
 0x69c   :  { %10443 = vst.msk [vmem:[#allocation7 + $0x6f] sm:$0x4] %vm10428_vm8, %v10407_v24  ;;  %10509 = vst.msk [vmem:[#allocation7 + $0x73] sm:$0x4] %vm10428_vm8, %v10408_v32 }
 0x69d   :  { %v10307_v36 = vadd.f32 %v10243_v40, %v10162_v47  ;;  %10460 = vst.msk [vmem:[#allocation7 + $0x6e] sm:$0x10] %vm10445_vm9, %v10407_v24  ;;  %10525 = vst.msk [vmem:[#allocation7 + $0x72] sm:$0x10] %vm10445_vm9, %v10408_v32 }
 0x69e   :  { %v10549_v12 = vld [vmem:[#allocation7 + $0x30] sm:$0xff]  ;;  %10477 = vst.msk [vmem:[#allocation7 + $0x6d] sm:$0x40] %vm10462_vm10, %v10407_v24  ;;  %10541 = vst.msk [vmem:[#allocation7 + $0x71] sm:$0x40] %vm10462_vm10, %v10408_v32 }
 0x69f   :  { %15132 = vmatprep.mubr.msk.f32.mxu0 %vm137_vm3, %v10549_v12  ;;  %v10339_v3 = vmul.f32 0.11111111, %v10307_v36  ;;  %10377 = vst.msk [vmem:[#allocation6 + $0xf0] sm:$0xff] %vm137_vm3, %v10338_v43  ;;  %v10393_v55 = vld [vmem:[#allocation6 + $0x70] sm:$0xff] }
 0x6a0   :  { %v10394_v23 = vld [vmem:[#allocation6 + $0x78] sm:$0xff]  ;;  %10419 = vst.msk [vmem:[#allocation7 + $0x38] sm:$0x1] %vm10411_vm7, %v10393_v55 }
 0x6a1   :  { %10378 = vst.msk [vmem:[#allocation6 + $0xf8] sm:$0xff] %vm137_vm3, %v10339_v3 }
 0x6a2   :  { %10436 = vst.msk [vmem:[#allocation7 + $0x37] sm:$0x4] %vm10428_vm8, %v10393_v55  ;;  %10502 = vst.msk [vmem:[#allocation7 + $0x3b] sm:$0x4] %vm10428_vm8, %v10394_v23 }
 0x6a3   :  { %10453 = vst.msk [vmem:[#allocation7 + $0x36] sm:$0x10] %vm10445_vm9, %v10393_v55  ;;  %10518 = vst.msk [vmem:[#allocation7 + $0x3a] sm:$0x10] %vm10445_vm9, %v10394_v23 }
 0x6a4   :  { %10470 = vst.msk [vmem:[#allocation7 + $0x35] sm:$0x40] %vm10462_vm10, %v10393_v55  ;;  %10534 = vst.msk [vmem:[#allocation7 + $0x39] sm:$0x40] %vm10462_vm10, %v10394_v23 }
 0x6a5   :  { %10486 = vst.msk [vmem:[#allocation7 + $0x3c] sm:$0x1] %vm10411_vm7, %v10394_v23  ;;  %v10557_v34 = vld [vmem:[#allocation7 + $0x70] sm:$0xff] }
 0x6a6   :  { %15144 = vmatprep.mubr.msk.f32.mxu1 %vm137_vm3, %v10557_v34  ;;  %v10409_v42 = vld [vmem:[#allocation6 + $0xf0] sm:$0xff] }
 0x6a7   :  { %10427 = vst.msk [vmem:[#allocation7 + $0x78] sm:$0x1] %vm10411_vm7, %v10409_v42 }
 0x6a8   :  { %v10410_v0 = vld [vmem:[#allocation6 + $0xf8] sm:$0xff]  ;;  %10444 = vst.msk [vmem:[#allocation7 + $0x77] sm:$0x4] %vm10428_vm8, %v10409_v42 }
 0x6a9   :  { %10461 = vst.msk [vmem:[#allocation7 + $0x76] sm:$0x10] %vm10445_vm9, %v10409_v42  ;;  %10526 = vst.msk [vmem:[#allocation7 + $0x7a] sm:$0x10] %vm10445_vm9, %v10410_v0 }
 0x6aa   :  { %10478 = vst.msk [vmem:[#allocation7 + $0x75] sm:$0x40] %vm10462_vm10, %v10409_v42  ;;  %10542 = vst.msk [vmem:[#allocation7 + $0x79] sm:$0x40] %vm10462_vm10, %v10410_v0 }
 0x6ab   :  { %10494 = vst.msk [vmem:[#allocation7 + $0x7c] sm:$0x1] %vm10411_vm7, %v10410_v0 }
 0x6ac   :  { %v10550_v51 = vld [vmem:[#allocation7 + $0x38] sm:$0xff]  ;;  %10510 = vst.msk [vmem:[#allocation7 + $0x7b] sm:$0x4] %vm10428_vm8, %v10410_v0 }
 0x6ad   :  { %15133 = vmatmul.mubr.msk.f32.gmra.mrb[6].mxu0 %vm137_vm3, %v10550_v51 }
 0x6b3   :  { %v10558_v53 = vld [vmem:[#allocation7 + $0x78] sm:$0xff] }
 0x6b4   :  { %15145 = vmatmul.mubr.msk.f32.gmra.mrb[6].mxu1 %vm137_vm3, %v10558_v53 }
 0x70e   :  { %v15125_v48 = vpop.f32.mrb[0].mxu0 }
 0x70f   :  { %10754 = vst.msk [vmem:[#allocation4 + $0x21] sm:$0xff] %vm137_vm3, %v15125_v48  ;;  %v10673_v20 = vpop.f32.mrb[1].mxu0 }
 0x710   :  { %10753 = vst.msk [vmem:[#allocation4 + $0x11] sm:$0xff] %vm137_vm3, %v10673_v20 }
 0x713   :  { %v15137_v15 = vpop.f32.mrb[0].mxu1 }
 0x714   :  { %10762 = vst.msk [vmem:[#allocation4 + $0xc1] sm:$0xff] %vm137_vm3, %v15137_v15  ;;  %v10713_v1 = vpop.f32.mrb[1].mxu1 }
 0x715   :  { %10761 = vst.msk [vmem:[#allocation4 + $0xb1] sm:$0xff] %vm137_vm3, %v10713_v1 }
 0x733   :  { %v15128_v14 = vpop.f32.mrb[2].mxu0 }
 0x734   :  { %10756 = vst.msk [vmem:[#allocation4 + $0x41] sm:$0xff] %vm137_vm3, %v15128_v14  ;;  %v10683_v56 = vpop.f32.mrb[3].mxu0 }
 0x735   :  { %10755 = vst.msk [vmem:[#allocation4 + $0x31] sm:$0xff] %vm137_vm3, %v10683_v56 }
 0x73f   :  { %v15140_v9 = vpop.f32.mrb[2].mxu1 }
 0x740   :  { %10764 = vst.msk [vmem:[#allocation4 + $0xe1] sm:$0xff] %vm137_vm3, %v15140_v9  ;;  %v10723_v46 = vpop.f32.mrb[3].mxu1 }
 0x741   :  { %10763 = vst.msk [vmem:[#allocation4 + $0xd1] sm:$0xff] %vm137_vm3, %v10723_v46 }
 0x757   :  { %v15131_v4 = vpop.f32.mrb[4].mxu0 }
 0x758   :  { %10758 = vst.msk [vmem:[#allocation4 + $0x61] sm:$0xff] %vm137_vm3, %v15131_v4  ;;  %v10693_v28 = vpop.f32.mrb[5].mxu0 }
 0x759   :  { %10757 = vst.msk [vmem:[#allocation4 + $0x51] sm:$0xff] %vm137_vm3, %v10693_v28 }
 0x765   :  { %v15143_v49 = vpop.f32.mrb[4].mxu1 }
 0x766   :  { %10766 = vst.msk [vmem:[#allocation4 + $0x101] sm:$0xff] %vm137_vm3, %v15143_v49  ;;  %v10733_v33 = vpop.f32.mrb[5].mxu1 }
 0x767   :  { %10765 = vst.msk [vmem:[#allocation4 + $0xf1] sm:$0xff] %vm137_vm3, %v10733_v33 }
 0x780   :  { %v15134_v38 = vpop.f32.mrb[6].mxu0 }
 0x781   :  { %10760 = vst.msk [vmem:[#allocation4 + $0x81] sm:$0xff] %vm137_vm3, %v15134_v38  ;;  %v10703_v13 = vpop.f32.mrb[7].mxu0 }
 0x782   :  { %10759 = vst.msk [vmem:[#allocation4 + $0x71] sm:$0xff] %vm137_vm3, %v10703_v13 }
 0x787   :  { %v15146_v45 = vpop.f32.mrb[6].mxu1 }
 0x788   :  { %10768 = vst.msk [vmem:[#allocation4 + $0x121] sm:$0xff] %vm137_vm3, %v15146_v45  ;;  %v10743_v57 = vpop.f32.mrb[7].mxu1 }
 0x789   :  { %10767 = vst.msk [vmem:[#allocation4 + $0x111] sm:$0xff] %vm137_vm3, %v10743_v57 }
 0x78a LB: > { %v21467_v19 = vld [vmem:[#allocation19_spill] sm:$0xff]  ;;  %v21468_v2 = vld [vmem:[#allocation20_spill] sm:$0xff]  ;;  %v21469_v16 = vld [vmem:[#allocation21_spill] sm:$0xff]  ;;  %v15290_v44 = vpack.c.bf16 %v20508_v26, %v20503_v63  ;;  %v20563_v6 = vpack.c.bf16 %v20518_v61, %v20513_v50  ;;  %s10783_s16 = sadd.s32 1, %s16062_s16   ;;  %s16062_s16 = sphi %s20536_s16, %s10783_s16  }
 0x78b   : > { %v15282_v60 = vpack.c.bf16 %v21468_v2, %v21467_v19  ;;  %v15286_v11 = vpack.c.bf16 %v20498_v29, %v21469_v16  ;;  %v20545_v18 = vld [vmem:[#allocation4 + $0x10] sm:$0xff]  ;;  %v20547_v52 = vld [vmem:[#allocation4 + $0x18] sm:$0x3]  ;;  %v10816_v54 = vld [vmem:[#allocation4] sm:$0xff]  ;;  %p10780_p1 = scmp.ge.s32.totalorder %s10783_s16, 9  }
 0x78c   : > { %v10817_v62 = vld [vmem:[#allocation4 + $0x8] sm:$0x3]  ;;  %v10848_v35 = vadd.f32 %v10816_v54, %v20545_v18  ;;  %v20550_v10 = vld [vmem:[#allocation4 + $0x20] sm:$0xff]  ;;  %v20555_v22 = vld [vmem:[#allocation4 + $0xb0] sm:$0xff]  ;;  %vm12052_vm11 = vcmask (%p10780_p1), 519168  }
 0x78d   : > { %v10882_v25 = vld [vmem:[#allocation4 + $0x28] sm:$0x3]  ;;  %15283 = vmatprep.subr.bf16.mxu0 %v15282_v60  ;;  %15872 = vmatprep.subr.bf16.mxu1 %v15282_v60  ;;  %v10849_v21 = vadd.f32 %v10817_v62, %v20547_v52  ;;  %v20557_v58 = vld [vmem:[#allocation4 + $0xb8] sm:$0x3]  ;;  %v10832_v37 = vld [vmem:[#allocation4 + $0xa0] sm:$0xff]  ;;  %v10850_v7 = vadd.f32 %v20550_v10, %v20545_v18 }
 0x78e   : > { %15285 = vmatpush3.bf16.msra.mxu0 %v15282_v60  ;;  %15876 = vmatpush3.bf16.msra.mxu1 %v15282_v60  ;;  %v10913_v41 = vadd.f32 %v20550_v10, %v10848_v35  ;;  %v10833_v31 = vld [vmem:[#allocation4 + $0xa8] sm:$0x3]  ;;  %v10864_v30 = vadd.f32 %v10832_v37, %v20555_v22  ;;  %v20567_v27 = vld [vmem:[#allocation4 + $0xc0] sm:$0xff]  ;;  %v10819_v40 = vld [vmem:[#allocation4 + $0x18] sm:$0x3] }
 0x78f   : > { %v10898_v8 = vld [vmem:[#allocation4 + $0xc8] sm:$0x3]  ;;  %15287 = vmatprep.subr.bf16.mxu0 %v15286_v11  ;;  %15873 = vmatprep.subr.bf16.mxu1 %v15286_v11  ;;  %v10914_v5 = vadd.f32 %v10882_v25, %v10849_v21  ;;  %v10865_v59 = vadd.f32 %v10833_v31, %v20557_v58  ;;  %v20572_v47 = vld [vmem:[#allocation4 + $0x30] sm:$0xff]  ;;  %v10866_v17 = vadd.f32 %v20567_v27, %v20555_v22  ;;  %v10884_v43 = vld [vmem:[#allocation4 + $0x38] sm:$0x3] }
 0x790   : > { %v20570_v39 = vld [vmem:[#allocation4 + $0x28] sm:$0x3]  ;;  %v10977_v24 = vrot.slane %v10913_v41, 1  ;;  %v11057_v32 = vrot.slane %v10913_v41, 2  ;;  %v10929_v36 = vadd.f32 %v20567_v27, %v10864_v30  ;;  %v10915_v42 = vadd.f32 %v20572_v47, %v10850_v7  ;;  %v10835_v0 = vld [vmem:[#allocation4 + $0xb8] sm:$0x3] }
 0x791   : > { %v10851_v12 = vadd.f32 %v10819_v40, %v20570_v39  ;;  %v20578_v3 = vld [vmem:[#allocation4 + $0xc8] sm:$0x3]  ;;  %v10978_v55 = vrot.slane %v10914_v5, 1  ;;  %v11058_v23 = vrot.slane %v10914_v5, 2  ;;  %v10930_v34 = vadd.f32 %v10898_v8, %v10865_v59  ;;  %v20582_v15 = vld [vmem:[#allocation4 + $0xd0] sm:$0xff]  ;;  %v13341_v29 = vld [vmem:[%s21233_s2 + $0xe0] sm:$0xff] (%p10780_p1) }
 0x792   : > { %15289 = vmatpush3.bf16.msra.mxu0 %v15286_v11  ;;  %15877 = vmatpush3.bf16.msra.mxu1 %v15286_v11  ;;  %v11001_v51 = vrot.slane %v10929_v36, 1  ;;  %v11081_v53 = vrot.slane %v10929_v36, 2  ;;  %v10867_v20 = vadd.f32 %v10835_v0, %v20578_v3  ;;  %v10980_v4 = vrot.slane %v10915_v42, 1  ;;  %v10900_v33 = vld [vmem:[#allocation4 + $0xd8] sm:$0x3]  ;;  %v13342_v63 = vld [vmem:[%s21233_s2 + $0xe8] sm:$0xff] (%p10780_p1) }
 0x793   : > { %v10916_v48 = vadd.f32 %v10884_v43, %v10851_v12  ;;  %15291 = vmatprep.subr.bf16.mxu0 %v15290_v44  ;;  %15874 = vmatprep.subr.bf16.mxu1 %v15290_v44  ;;  %v10979_v1 = vsel %vm7320_vm5, %v10977_v24, %v10978_v55  ;;  %v11059_v14 = vsel %vm7609_vm6, %v11057_v32, %v11058_v23  ;;  %v11002_v56 = vrot.slane %v10930_v34, 1  ;;  %v20590_v62 = vld [vmem:[#allocation4 + $0x38] sm:$0x3]  ;;  %v10821_v35 = vld [vmem:[#allocation4 + $0x28] sm:$0x3]  ;;  %v20602_v12 = vld [vmem:[#allocation4 + $0xe0] sm:$0xff] }
 0x794   : > { %v11082_v9 = vrot.slane %v10930_v34, 2  ;;  %v11041_v46 = vadd.f32 %v10979_v1, %v10913_v41  ;;  %v11060_v49 = vrot.slane %v10915_v42, 2  ;;  %v10931_v57 = vadd.f32 %v20582_v15, %v10866_v17  ;;  %v20595_v41 = vld [vmem:[#allocation4 + $0x40] sm:$0xff]  ;;  %v20597_v31 = vld [vmem:[#allocation4 + $0xd8] sm:$0x3] }
 0x795   : > { %v10981_v28 = vrot.slane %v10916_v48, 1  ;;  %v11003_v38 = vsel %vm7320_vm5, %v11001_v51, %v11002_v56  ;;  %v11061_v45 = vrot.slane %v10916_v48, 2  ;;  %v10932_v37 = vadd.f32 %v10900_v33, %v10867_v20  ;;  %v10886_v40 = vld [vmem:[#allocation4 + $0x48] sm:$0x3]  ;;  %v20620_v33 = vld [vmem:[#allocation4 + $0x50] sm:$0xff] }
 0x796   : > { %v11083_v13 = vsel %vm7609_vm6, %v11081_v53, %v11082_v9  ;;  %15293 = vmatpush3.bf16.msra.mxu0 %v15290_v44  ;;  %15878 = vmatpush3.bf16.msra.mxu1 %v15290_v44  ;;  %v11121_v60 = vadd.f32 %v11059_v14, %v11041_v46  ;;  %v11049_v11 = vadd.f32 %v11003_v38, %v10929_v36  ;;  %v11004_v7 = vrot.slane %v10931_v57, 1  ;;  %v10837_v44 = vld [vmem:[#allocation4 + $0xc8] sm:$0x3]  ;;  %v10888_v38 = vld [vmem:[#allocation4 + $0x58] sm:$0x3] }
 0x797   : > { %v10982_v54 = vsel %vm7320_vm5, %v10980_v4, %v10981_v28  ;;  %15295 = vmatprep.subr.bf16.mxu0 %v20563_v6  ;;  %15875 = vmatprep.subr.bf16.mxu1 %v20563_v6  ;;  %v11062_v21 = vsel %vm7609_vm6, %v11060_v49, %v11061_v45  ;;  %v11084_v5 = vrot.slane %v10931_v57, 2  ;;  %v10852_v59 = vadd.f32 %v20572_v47, %v20550_v10  ;;  %v20613_v20 = vld [vmem:[#allocation4 + $0x48] sm:$0x3] }
 0x798   : > { %v11042_v25 = vadd.f32 %v10982_v54, %v10915_v42  ;;  %v11137_v30 = vmul.f32 0.11111111, %v11121_v60  ;;  %v11129_v8 = vadd.f32 %v11083_v13, %v11049_v11  ;;  %v11005_v24 = vrot.slane %v10932_v37, 1  ;;  %v10902_v42 = vld [vmem:[#allocation4 + $0xe8] sm:$0x3] }
 0x799   : > { %v11085_v32 = vrot.slane %v10932_v37, 2  ;;  %v10853_v36 = vadd.f32 %v10821_v35, %v20590_v62  ;;  %v10917_v55 = vadd.f32 %v20595_v41, %v10852_v59  ;;  %v10868_v23 = vadd.f32 %v20582_v15, %v20567_v27  ;;  %v20623_v11 = vld [vmem:[#allocation4 + $0xe8] sm:$0x3]  ;;  %v10839_v54 = vld [vmem:[#allocation4 + $0xd8] sm:$0x3] }
 0x79a   : > { %v11122_v17 = vadd.f32 %v11062_v21, %v11042_v25  ;;  %15297 = vmatpush3.bf16.msra.mxu0 %v20563_v6  ;;  %15879 = vmatpush3.bf16.msra.mxu1 %v20563_v6  ;;  %v11145_v43 = vmul.f32 0.11111111, %v11129_v8  ;;  %v10869_v34 = vadd.f32 %v10837_v44, %v20597_v31  ;;  %v11006_v51 = vsel %vm7320_vm5, %v11004_v7, %v11005_v24  ;;  %v10823_v6 = vld [vmem:[#allocation4 + $0x38] sm:$0x3]  ;;  %v20711_v19 = vld [vmem:[#allocation4 + $0x128] sm:$0x3] }
 0x79b   : > { %15163 = vmatprep.mubr.msk.f32.mxu0 %vm137_vm3, %v11137_v30  ;;  %v11086_v53 = vsel %vm7609_vm6, %v11084_v5, %v11085_v32  ;;  %v10918_v48 = vadd.f32 %v10886_v40, %v10853_v36  ;;  %v11050_v1 = vadd.f32 %v11006_v51, %v10931_v57  ;;  %v10983_v14 = vrot.slane %v10917_v55, 1  ;;  %v20628_v5 = vld [vmem:[#allocation4 + $0xf0] sm:$0xff]  ;;  %v10904_v59 = vld [vmem:[#allocation4 + $0xf8] sm:$0x3] }
 0x79c   : > { %v11138_v0 = vmul.f32 0.11111111, %v11122_v17  ;;  %15175 = vmatprep.mubr.msk.f32.mxu1 %vm137_vm3, %v11145_v43  ;;  %v11063_v56 = vrot.slane %v10917_v55, 2  ;;  %v10933_v9 = vadd.f32 %v20602_v12, %v10868_v23  ;;  %v10934_v28 = vadd.f32 %v10902_v42, %v10869_v34 }
 0x79d   : > { %v10984_v46 = vrot.slane %v10918_v48, 1  ;;  %v11064_v4 = vrot.slane %v10918_v48, 2  ;;  %v10854_v49 = vadd.f32 %v20595_v41, %v20572_v47  ;;  %v11130_v13 = vadd.f32 %v11086_v53, %v11050_v1  ;;  %v20637_v53 = vld [vmem:[#allocation4 + $0x58] sm:$0x3]  ;;  %v10825_v48 = vld [vmem:[#allocation4 + $0x48] sm:$0x3] }
 0x79e   : > { %15164 = vmatmul.mubr.msk.f32.vlgmr.msra.gmra.mrb[0].mxu0 %vm137_vm3, %v11138_v0  ;;  %v11007_v45 = vrot.slane %v10933_v9, 1  ;;  %v11087_v60 = vrot.slane %v10933_v9, 2  ;;  %v10855_v57 = vadd.f32 %v10823_v6, %v20613_v20  ;;  %v11008_v21 = vrot.slane %v10934_v28, 1 }
 0x79f   : > { %v10985_v35 = vsel %vm7320_vm5, %v10983_v14, %v10984_v46  ;;  %v11065_v25 = vsel %vm7609_vm6, %v11063_v56, %v11064_v4  ;;  %v11088_v37 = vrot.slane %v10934_v28, 2  ;;  %v11146_v7 = vmul.f32 0.11111111, %v11130_v13  ;;  %v20642_v46 = vld [vmem:[#allocation4 + $0x60] sm:$0xff]  ;;  %v20645_v13 = vld [vmem:[#allocation4 + $0xf8] sm:$0x3] }
 0x7a0   : > { %v11043_v44 = vadd.f32 %v10985_v35, %v10917_v55  ;;  %v10919_v30 = vadd.f32 %v20620_v33, %v10854_v49  ;;  %v10920_v8 = vadd.f32 %v10888_v38, %v10855_v57  ;;  %v11009_v40 = vsel %vm7320_vm5, %v11007_v45, %v11008_v21  ;;  %v10841_v45 = vld [vmem:[#allocation4 + $0xe8] sm:$0x3] }
 0x7a1   : > { %v11089_v17 = vsel %vm7609_vm6, %v11087_v60, %v11088_v37  ;;  %v10870_v24 = vadd.f32 %v20602_v12, %v20582_v15  ;;  %v10871_v32 = vadd.f32 %v10839_v54, %v20623_v11  ;;  %15176 = vmatmul.mubr.msk.f32.vlgmr.msra.gmra.mrb[0].mxu1 %vm137_vm3, %v11146_v7  ;;  %v11051_v43 = vadd.f32 %v11009_v40, %v10933_v9  ;;  %v10890_v9 = vld [vmem:[#allocation4 + $0x68] sm:$0x3] }
 0x7a2   : > { %v11123_v36 = vadd.f32 %v11065_v25, %v11043_v44  ;;  %v10986_v55 = vrot.slane %v10919_v30, 1  ;;  %v10987_v23 = vrot.slane %v10920_v8, 1  ;;  %v11066_v34 = vrot.slane %v10919_v30, 2  ;;  %v20649_v25 = vld [vmem:[#allocation4 + $0x100] sm:$0xff] }
 0x7a3   : > { %v11067_v42 = vrot.slane %v10920_v8, 2  ;;  %v10935_v0 = vadd.f32 %v20628_v5, %v10870_v24  ;;  %v10936_v51 = vadd.f32 %v10904_v59, %v10871_v32  ;;  %v11131_v1 = vadd.f32 %v11089_v17, %v11051_v43  ;;  %v20658_v24 = vld [vmem:[#allocation4 + $0x68] sm:$0x3]  ;;  %v10827_v32 = vld [vmem:[#allocation4 + $0x58] sm:$0x3] }
 0x7a4   : > { %v11139_v6 = vmul.f32 0.11111111, %v11123_v36  ;;  %v10988_v14 = vsel %vm7320_vm5, %v10986_v55, %v10987_v23  ;;  %v10856_v56 = vadd.f32 %v20620_v33, %v20595_v41  ;;  %v10857_v35 = vadd.f32 %v10825_v48, %v20637_v53 }
 0x7a5   : > { %v11044_v4 = vadd.f32 %v10988_v14, %v10919_v30  ;;  %v11068_v28 = vsel %vm7609_vm6, %v11066_v34, %v11067_v42  ;;  %v11010_v49 = vrot.slane %v10935_v0, 1  ;;  %v11011_v38 = vrot.slane %v10936_v51, 1  ;;  %v10906_v30 = vld [vmem:[#allocation4 + $0x108] sm:$0x3] }
 0x7a6   : > { %15166 = vmatprep.mubr.msk.f32.mxu0 %vm137_vm3, %v11139_v6  ;;  %v11147_v60 = vmul.f32 0.11111111, %v11131_v1  ;;  %v11090_v57 = vrot.slane %v10935_v0, 2  ;;  %v11091_v54 = vrot.slane %v10936_v51, 2  ;;  %v10921_v7 = vadd.f32 %v20642_v46, %v10856_v56  ;;  %v20661_v6 = vld [vmem:[#allocation4 + $0x70] sm:$0xff] }
 0x7a7   : > { %v11124_v21 = vadd.f32 %v11068_v28, %v11044_v4  ;;  %v11012_v37 = vsel %vm7320_vm5, %v11010_v49, %v11011_v38  ;;  %v10872_v44 = vadd.f32 %v20628_v5, %v20602_v12  ;;  %v10922_v40 = vadd.f32 %v10890_v9, %v10857_v35  ;;  %v20667_v4 = vld [vmem:[#allocation4 + $0x108] sm:$0x3]  ;;  %v10843_v28 = vld [vmem:[#allocation4 + $0xf8] sm:$0x3] }
 0x7a8   : > { %15178 = vmatprep.mubr.msk.f32.mxu1 %vm137_vm3, %v11147_v60  ;;  %v11052_v8 = vadd.f32 %v11012_v37, %v10935_v0  ;;  %v11092_v59 = vsel %vm7609_vm6, %v11090_v57, %v11091_v54  ;;  %v10873_v17 = vadd.f32 %v10841_v45, %v20645_v13  ;;  %v10989_v43 = vrot.slane %v10921_v7, 1  ;;  %v10892_v0 = vld [vmem:[#allocation4 + $0x78] sm:$0x3]  ;;  %v20672_v37 = vld [vmem:[#allocation4 + $0x110] sm:$0xff] }
 0x7a9   : > { %v11140_v36 = vmul.f32 0.11111111, %v11124_v21  ;;  %v11069_v55 = vrot.slane %v10921_v7, 2  ;;  %v10937_v23 = vadd.f32 %v20649_v25, %v10872_v44  ;;  %v10990_v42 = vrot.slane %v10922_v40, 1 }
 0x7aa   : > { %v11132_v34 = vadd.f32 %v11092_v59, %v11052_v8  ;;  %v11070_v51 = vrot.slane %v10922_v40, 2  ;;  %v10938_v48 = vadd.f32 %v10906_v30, %v10873_v17  ;;  %v10858_v56 = vadd.f32 %v20642_v46, %v20620_v33  ;;  %v10908_v59 = vld [vmem:[#allocation4 + $0x118] sm:$0x3]  ;;  %v10829_v17 = vld [vmem:[#allocation4 + $0x68] sm:$0x3] }
 0x7ab   : > { %15167 = vmatmul.mubr.msk.f32.gmra.mrb[2].mxu0 %vm137_vm3, %v11140_v36  ;;  %v11013_v1 = vrot.slane %v10937_v23, 1  ;;  %v11093_v14 = vrot.slane %v10937_v23, 2  ;;  %v10859_v9 = vadd.f32 %v10827_v32, %v20658_v24  ;;  %v10991_v38 = vsel %vm7320_vm5, %v10989_v43, %v10990_v42  ;;  %v20679_v40 = vld [vmem:[#allocation4 + $0x78] sm:$0x3] }
 0x7ac   : > { %v11148_v49 = vmul.f32 0.11111111, %v11132_v34  ;;  %v11071_v45 = vsel %vm7609_vm6, %v11069_v55, %v11070_v51  ;;  %v11014_v60 = vrot.slane %v10938_v48, 1  ;;  %v11045_v57 = vadd.f32 %v10991_v38, %v10921_v7  ;;  %v20688_v38 = vld [vmem:[#allocation4 + $0x118] sm:$0x3] }
 0x7ad   : > { %v11094_v54 = vrot.slane %v10938_v48, 2  ;;  %v10923_v35 = vadd.f32 %v20661_v6, %v10858_v56  ;;  %v10924_v21 = vadd.f32 %v10892_v0, %v10859_v9  ;;  %v10874_v30 = vadd.f32 %v20649_v25, %v20628_v5  ;;  %v20685_v0 = vld [vmem:[#allocation4 + $0x80] sm:$0xff] }
 0x7ae   : > { %15179 = vmatmul.mubr.msk.f32.gmra.mrb[2].mxu1 %vm137_vm3, %v11148_v49  ;;  %v11015_v44 = vsel %vm7320_vm5, %v11013_v1, %v11014_v60  ;;  %v10875_v8 = vadd.f32 %v10843_v28, %v20667_v4  ;;  %v10860_v7 = vadd.f32 %v20661_v6, %v20642_v46  ;;  %v11125_v32 = vadd.f32 %v11071_v45, %v11045_v57  ;;  %v10894_v1 = vld [vmem:[#allocation4 + $0x88] sm:$0x3] }
 0x7af   : > { %v11053_v36 = vadd.f32 %v11015_v44, %v10937_v23  ;;  %v11095_v43 = vsel %vm7609_vm6, %v11093_v14, %v11094_v54  ;;  %v10992_v55 = vrot.slane %v10923_v35, 1  ;;  %v10993_v34 = vrot.slane %v10924_v21, 1  ;;  %v10845_v45 = vld [vmem:[#allocation4 + $0x108] sm:$0x3] }
 0x7b0   : > { %v11072_v42 = vrot.slane %v10923_v35, 2  ;;  %v11073_v51 = vrot.slane %v10924_v21, 2  ;;  %v10939_v48 = vadd.f32 %v20672_v37, %v10874_v30  ;;  %v11141_v56 = vmul.f32 0.11111111, %v11125_v32 }
 0x7b1   : > { %v11133_v9 = vadd.f32 %v11095_v43, %v11053_v36  ;;  %v10940_v28 = vadd.f32 %v10908_v59, %v10875_v8  ;;  %v10861_v49 = vadd.f32 %v10829_v17, %v20679_v40  ;;  %v10994_v23 = vsel %vm7320_vm5, %v10992_v55, %v10993_v34  ;;  %v20697_v36 = vld [vmem:[#allocation4 + $0x120] sm:$0xff]  ;;  %v10910_v43 = vld [vmem:[#allocation4 + $0x128] sm:$0x3] }
 0x7b2   : > { %v11074_v14 = vsel %vm7609_vm6, %v11072_v42, %v11073_v51  ;;  %v11016_v60 = vrot.slane %v10939_v48, 1  ;;  %v11096_v57 = vrot.slane %v10939_v48, 2  ;;  %15169 = vmatprep.mubr.msk.f32.mxu0 %vm137_vm3, %v11141_v56  ;;  %v11046_v21 = vadd.f32 %v10994_v23, %v10923_v35  ;;  %v20702_v42 = vld [vmem:[#allocation4 + $0x88] sm:$0x3]  ;;  %v10831_v51 = vld [vmem:[#allocation4 + $0x78] sm:$0x3] }
 0x7b3   : > { %v11149_v54 = vmul.f32 0.11111111, %v11133_v9  ;;  %v11017_v44 = vrot.slane %v10940_v28, 1  ;;  %v11097_v30 = vrot.slane %v10940_v28, 2  ;;  %v10925_v32 = vadd.f32 %v20685_v0, %v10860_v7 }
 0x7b4   : > { %v10926_v8 = vadd.f32 %v10894_v1, %v10861_v49  ;;  %v10876_v59 = vadd.f32 %v20672_v37, %v20649_v25  ;;  %v10877_v17 = vadd.f32 %v10845_v45, %v20688_v38  ;;  %v11126_v55 = vadd.f32 %v11074_v14, %v11046_v21  ;;  %v10895_v1 = vld [vmem:[#allocation4 + $0x90] sm:$0xff]  ;;  %v10896_v21 = vld [vmem:[#allocation4 + $0x98] sm:$0x3] }
 0x7b5   : > { %15181 = vmatprep.mubr.msk.f32.mxu1 %vm137_vm3, %v11149_v54  ;;  %v11018_v34 = vsel %vm7320_vm5, %v11016_v60, %v11017_v44  ;;  %v11098_v35 = vsel %vm7609_vm6, %v11096_v57, %v11097_v30  ;;  %v10862_v7 = vadd.f32 %v20685_v0, %v20661_v6  ;;  %v10995_v9 = vrot.slane %v10925_v32, 1 }
 0x7b6   : > { %v11054_v56 = vadd.f32 %v11018_v34, %v10939_v48  ;;  %v10996_v28 = vrot.slane %v10926_v8, 1  ;;  %v11075_v49 = vrot.slane %v10925_v32, 2  ;;  %v11142_v45 = vmul.f32 0.11111111, %v11126_v55 }
 0x7b7   : > { %v11076_v23 = vrot.slane %v10926_v8, 2  ;;  %v10941_v54 = vadd.f32 %v20697_v36, %v10876_v59  ;;  %v10942_v14 = vadd.f32 %v10910_v43, %v10877_v17  ;;  %v10863_v44 = vadd.f32 %v10831_v51, %v20702_v42  ;;  %v10847_v43 = vld [vmem:[#allocation4 + $0x118] sm:$0x3] }
 0x7b8   : > { %v11134_v60 = vadd.f32 %v11098_v35, %v11054_v56  ;;  %v10997_v57 = vsel %vm7320_vm5, %v10995_v9, %v10996_v28  ;;  %v10927_v30 = vadd.f32 %v10895_v1, %v10862_v7  ;;  %15170 = vmatmul.mubr.msk.f32.gmra.mrb[4].mxu0 %vm137_vm3, %v11142_v45  ;;  %v10912_v45 = vld [vmem:[#allocation4 + $0x138] sm:$0x3] }
 0x7b9   : > { %v11047_v2 = vadd.f32 %v10997_v57, %v10925_v32  ;;  %v11077_v48 = vsel %vm7609_vm6, %v11075_v49, %v11076_v23  ;;  %v11019_v34 = vrot.slane %v10941_v54, 1  ;;  %v11020_v16 = vrot.slane %v10942_v14, 1  ;;  %v10911_v49 = vld [vmem:[#allocation4 + $0x130] sm:$0xff] }
 0x7ba   : > { %v11150_v8 = vmul.f32 0.11111111, %v11134_v60  ;;  %v11099_v55 = vrot.slane %v10941_v54, 2  ;;  %v11100_v59 = vrot.slane %v10942_v14, 2  ;;  %v10928_v17 = vadd.f32 %v10896_v21, %v10863_v44 }
 0x7bb   : > { %v11127_v35 = vadd.f32 %v11077_v48, %v11047_v2  ;;  %v11021_v56 = vsel %vm7320_vm5, %v11019_v34, %v11020_v16  ;;  %v10998_v9 = vrot.slane %v10927_v30, 1  ;;  %v11078_v51 = vrot.slane %v10927_v30, 2 }
 0x7bc   : > { %15182 = vmatmul.mubr.msk.f32.gmra.mrb[4].mxu1 %vm137_vm3, %v11150_v8  ;;  %v11055_v7 = vadd.f32 %v11021_v56, %v10941_v54  ;;  %v11101_v32 = vsel %vm7609_vm6, %v11099_v55, %v11100_v59  ;;  %v10999_v1 = vrot.slane %v10928_v17, 1  ;;  %v11079_v28 = vrot.slane %v10928_v17, 2 }
 0x7bd   : > { %v11143_v23 = vmul.f32 0.11111111, %v11127_v35  ;;  %v10878_v14 = vadd.f32 %v20697_v36, %v20672_v37  ;;  %v10879_v21 = vadd.f32 %v10847_v43, %v20711_v19 }
 0x7be   : > { %v11135_v2 = vadd.f32 %v11101_v32, %v11055_v7  ;;  %v11000_v16 = vsel %vm7320_vm5, %v10998_v9, %v10999_v1  ;;  %v11080_v60 = vsel %vm7609_vm6, %v11078_v51, %v11079_v28  ;;  %v11381_v7 = vrot.slane %v20550_v10, 1 }
 0x7bf   : > { %15172 = vmatprep.mubr.msk.f32.mxu0 %vm137_vm3, %v11143_v23  ;;  %v11048_v54 = vadd.f32 %v11000_v16, %v10927_v30  ;;  %v10943_v57 = vadd.f32 %v10911_v49, %v10878_v14  ;;  %v10944_v44 = vadd.f32 %v10912_v45, %v10879_v21  ;;  %v11382_v32 = vrot.slane %v20570_v39, 1 }
 0x7c0   : > { %v11151_v48 = vmul.f32 0.11111111, %v11135_v2  ;;  %v11378_v1 = vrot.slane %v20545_v18, 1  ;;  %v11379_v28 = vrot.slane %v20547_v52, 1  ;;  %v11405_v45 = vrot.slane %v20567_v27, 1 }
 0x7c1   : > { %v11128_v34 = vadd.f32 %v11080_v60, %v11048_v54  ;;  %v11022_v8 = vrot.slane %v10943_v57, 1  ;;  %v11023_v55 = vrot.slane %v10944_v44, 1  ;;  %v11102_v59 = vrot.slane %v10943_v57, 2 }
 0x7c2   : > { %15184 = vmatprep.mubr.msk.f32.mxu1 %vm137_vm3, %v11151_v48  ;;  %v11103_v17 = vrot.slane %v10944_v44, 2  ;;  %v11383_v49 = vsel %vm7320_vm5, %v11381_v7, %v11382_v32  ;;  %v11406_v23 = vrot.slane %v20578_v3, 1  ;;  %v11380_v14 = vsel %vm7320_vm5, %v11378_v1, %v11379_v28 }
 0x7c3   : > { %v11144_v35 = vmul.f32 0.11111111, %v11128_v34  ;;  %v11024_v43 = vsel %vm7320_vm5, %v11022_v8, %v11023_v55  ;;  %v11402_v2 = vrot.slane %v20555_v22, 1  ;;  %v11403_v16 = vrot.slane %v20557_v58, 1 }
 0x7c4   : > { %v11056_v56 = vadd.f32 %v11024_v43, %v10943_v57  ;;  %v11104_v9 = vsel %vm7609_vm6, %v11102_v59, %v11103_v17  ;;  %v11407_v18 = vsel %vm7320_vm5, %v11405_v45, %v11406_v23  ;;  %v11387_v22 = vrot.slane %v20595_v41, 1 }
 0x7c5   : > { %15173 = vmatmul.mubr.msk.f32.gmra.mrb[6].mxu0 %vm137_vm3, %v11144_v35  ;;  %v11404_v52 = vsel %vm7320_vm5, %v11402_v2, %v11403_v16  ;;  %v11388_v58 = vrot.slane %v20613_v20, 1  ;;  %v11384_v44 = vrot.slane %v20572_v47, 1  ;;  %v11385_v48 = vrot.slane %v20590_v62, 1 }
 0x7c6   : > { %v11136_v51 = vadd.f32 %v11104_v9, %v11056_v56  ;;  %v11411_v34 = vrot.slane %v20602_v12, 1  ;;  %v11412_v8 = vrot.slane %v20623_v11, 1  ;;  %v11408_v59 = vrot.slane %v20582_v15, 1 }
 0x7c7   : > { %v11389_v55 = vsel %vm7320_vm5, %v11387_v22, %v11388_v58  ;;  %v11409_v17 = vrot.slane %v20597_v31, 1  ;;  %v11386_v41 = vsel %vm7320_vm5, %v11384_v44, %v11385_v48  ;;  %v11393_v31 = vrot.slane %v20642_v46, 1  ;;  %v13339_v48 = vld [vmem:[%s21233_s2 + $0xd0] sm:$0xff] (%p10780_p1) }
 0x7c8   : > { %v11152_v30 = vmul.f32 0.11111111, %v11136_v51  ;;  %v11413_v43 = vsel %vm7320_vm5, %v11411_v34, %v11412_v8  ;;  %v11394_v51 = vrot.slane %v20658_v24, 1  ;;  %v11391_v7 = vrot.slane %v20637_v53, 1  ;;  %v13340_v8 = vld [vmem:[%s21233_s2 + $0xd8] sm:$0xff] (%p10780_p1) }
 0x7c9   : > { %v11410_v62 = vsel %vm7320_vm5, %v11408_v59, %v11409_v17  ;;  %v11417_v32 = vrot.slane %v20649_v25, 1  ;;  %v11418_v1 = vrot.slane %v20667_v4, 1  ;;  %v11415_v45 = vrot.slane %v20645_v13, 1 }
 0x7ca   : > { %15185 = vmatmul.mubr.msk.f32.gmra.mrb[6].mxu1 %vm137_vm3, %v11152_v30  ;;  %v11390_v30 = vrot.slane %v20620_v33, 1  ;;  %v11395_v28 = vsel %vm7320_vm5, %v11393_v31, %v11394_v51  ;;  %v11399_v13 = vrot.slane %v20685_v0, 1  ;;  %v11400_v16 = vrot.slane %v20702_v42, 1 }
 0x7cb   : > { %v11419_v24 = vsel %vm7320_vm5, %v11417_v32, %v11418_v1  ;;  %v11421_v0 = vrot.slane %v20688_v38, 1  ;;  %v13338_v38 = vld [vmem:[%s21233_s2 + $0xc8] sm:$0xff] (%p10780_p1) }
 0x7cc   : > { %v11392_v23 = vsel %vm7320_vm5, %v11390_v30, %v11391_v7 }
 0x871   : > { %v15165_v21 = vpop.f32.mrb[0].mxu0 }
 0x872   : > { %v11443_v10 = vadd.f32 %v15165_v21, %v11383_v49  ;;  %v11267_v60 = vpop.f32.mrb[1].mxu0  ;;  %v11414_v49 = vrot.slane %v20628_v5, 1 }
 0x873   : > { %v11442_v39 = vadd.f32 %v11380_v14, %v11267_v60  ;;  %v11397_v60 = vrot.slane %v20679_v40, 1 }
 0x874   : > { %11459 = vst.msk [vmem:[#allocation4 + $0x21] sm:$0xff] %vm137_vm3, %v11443_v10  ;;  %v15177_v27 = vpop.f32.mrb[0].mxu1  ;;  %v11416_v53 = vsel %vm7320_vm5, %v11414_v49, %v11415_v45  ;;  %v11396_v10 = vrot.slane %v20661_v6, 1 }
 0x875   : > { %11458 = vst.msk [vmem:[#allocation4 + $0x11] sm:$0xff] %vm137_vm3, %v11442_v39  ;;  %v11451_v3 = vadd.f32 %v15177_v27, %v11407_v18  ;;  %v11307_v54 = vpop.f32.mrb[1].mxu1  ;;  %v11401_v39 = vsel %vm7320_vm5, %v11399_v13, %v11400_v16  ;;  %v11423_v18 = vrot.slane %v20697_v36, 1 }
 0x876   : > { %v11450_v57 = vadd.f32 %v11404_v52, %v11307_v54  ;;  %v11424_v52 = vrot.slane %v20711_v19, 1  ;;  %v11398_v27 = vsel %vm7320_vm5, %v11396_v10, %v11397_v60  ;;  %v11420_v54 = vrot.slane %v20672_v37, 1  ;;  %v13337_v37 = vld [vmem:[%s21233_s2 + $0xc0] sm:$0xff] (%p10780_p1) }
 0x877   : > { %11467 = vst.msk [vmem:[#allocation4 + $0xc1] sm:$0xff] %vm137_vm3, %v11451_v3  ;;  %v15298_v34 = vpack.c.bf16 (%p10780_p1), %v13338_v38, %v13337_v37 }
 0x878   : > { %11466 = vst.msk [vmem:[#allocation4 + $0xb1] sm:$0xff] %vm137_vm3, %v11450_v57  ;;  %v11425_v6 = vsel %vm7320_vm5, %v11423_v18, %v11424_v52  ;;  %v11422_v40 = vsel %vm7320_vm5, %v11420_v54, %v11421_v0 }
 0x879   :  { %15299 = vmatprep.subr.bf16.mxu0 (%p10780_p1), %v15298_v34  ;;  %15880 = vmatprep.subr.bf16.mxu1 (%p10780_p1), %v15298_v34 }
 0x87a   :  { %15301 = vmatpush3.bf16.msra.mxu0 (%p10780_p1), %v15298_v34  ;;  %15884 = vmatpush3.bf16.msra.mxu1 (%p10780_p1), %v15298_v34 }
 0x87b   :  { %v20814_v50 = vld [vmem:[#allocation4 + $0x21] sm:$0xff] (%p10780_p1) }
 0x87c   :  { %v20812_v26 = vld [vmem:[#allocation4 + $0x11] sm:$0xff] (%p10780_p1) }
 0x87d   :  { %v11494_v17 = vsel (%p10780_p1), %vm137_vm3, %v20812_v26, 0.0 }
 0x87e   : > { %v15168_v35 = vpop.f32.mrb[2].mxu0 }
 0x87f   : > { %v11445_v20 = vadd.f32 %v15168_v35, %v11389_v55  ;;  %v11277_v56 = vpop.f32.mrb[3].mxu0  ;;  %v15302_v55 = vpack.c.bf16 (%p10780_p1), %v13340_v8, %v13339_v48  ;;  %v11482_v49 = vld [vmem:[#allocation4 + $0xb1] sm:$0xff] (%p10780_p1) }
 0x880   : > { %v11444_v47 = vadd.f32 %v11386_v41, %v11277_v56  ;;  %v11495_v41 = vsel (%p10780_p1), %vm137_vm3, %v20814_v50, 0.0 }
 0x881   : > { %11461 = vst.msk [vmem:[#allocation4 + $0x41] sm:$0xff] %vm137_vm3, %v11445_v20  ;;  %v15180_v12 = vpop.f32.mrb[2].mxu1  ;;  %15303 = vmatprep.subr.bf16.mxu0 (%p10780_p1), %v15302_v55  ;;  %15881 = vmatprep.subr.bf16.mxu1 (%p10780_p1), %v15302_v55  ;;  %v15306_v20 = vpack.c.bf16 (%p10780_p1), %v13342_v63, %v13341_v29  ;;  %v11496_v56 = vadd.f32 (%p10780_p1), %v11495_v41, %v11494_v17 }
 0x882   : > { %v11453_v11 = vadd.f32 %v15180_v12, %v11413_v43  ;;  %11460 = vst.msk [vmem:[#allocation4 + $0x31] sm:$0xff] %vm137_vm3, %v11444_v47  ;;  %v11317_v9 = vpop.f32.mrb[3].mxu1  ;;  %v13343_v47 = vld [vmem:[%s21233_s2 + $0xf0] sm:$0xff] (%p10780_p1)  ;;  %15305 = vmatpush3.bf16.msra.mxu0 (%p10780_p1), %v15302_v55  ;;  %15885 = vmatpush3.bf16.msra.mxu1 (%p10780_p1), %v15302_v55 }
 0x883   : > { %v11452_v15 = vadd.f32 %v11410_v62, %v11317_v9  ;;  %v13344_v62 = vld [vmem:[%s21233_s2 + $0xf8] sm:$0xff] (%p10780_p1)  ;;  %15307 = vmatprep.subr.bf16.mxu0 (%p10780_p1), %v15306_v20  ;;  %15882 = vmatprep.subr.bf16.mxu1 (%p10780_p1), %v15306_v20 }
 0x884   : > { %11469 = vst.msk [vmem:[#allocation4 + $0xe1] sm:$0xff] %vm137_vm3, %v11453_v11  ;;  %v15310_v31 = vpack.c.bf16 (%p10780_p1), %v13344_v62, %v13343_v47 }
 0x885   : > { %11468 = vst.msk [vmem:[#allocation4 + $0xd1] sm:$0xff] %vm137_vm3, %v11452_v15 }
 0x886   :  { %15309 = vmatpush3.bf16.msra.mxu0 (%p10780_p1), %v15306_v20  ;;  %15886 = vmatpush3.bf16.msra.mxu1 (%p10780_p1), %v15306_v20 }
 0x887   :  { %15311 = vmatprep.subr.bf16.mxu0 (%p10780_p1), %v15310_v31  ;;  %15883 = vmatprep.subr.bf16.mxu1 (%p10780_p1), %v15310_v31 }
 0x888   :  { %v20818_v59 = vld [vmem:[#allocation4 + $0x41] sm:$0xff] (%p10780_p1) }
 0x889   :  { %v20816_v61 = vld [vmem:[#allocation4 + $0x31] sm:$0xff] (%p10780_p1)  ;;  %v11499_v12 = vsel (%p10780_p1), %vm137_vm3, %v20818_v59, 0.0 }
 0x88a   :  { %v11497_v35 = vsel (%p10780_p1), %vm137_vm3, %v20816_v61, 0.0  ;;  %15313 = vmatpush3.bf16.msra.mxu0 (%p10780_p1), %v15310_v31  ;;  %15887 = vmatpush3.bf16.msra.mxu1 (%p10780_p1), %v15310_v31 }
 0x88b   : > { %v15171_v14 = vpop.f32.mrb[4].mxu0  ;;  %v11498_v9 = vadd.f32 (%p10780_p1), %v11497_v35, %v11496_v56 }
 0x88c   : > { %v11447_v46 = vadd.f32 %v15171_v14, %v11395_v28  ;;  %v11287_v21 = vpop.f32.mrb[5].mxu0  ;;  %v11483_v14 = vld [vmem:[#allocation4 + $0xc1] sm:$0xff] (%p10780_p1) }
 0x88d   : > { %v11446_v33 = vadd.f32 %v11392_v23, %v11287_v21  ;;  %v11500_v30 = vadd.f32 (%p10780_p1), %v11499_v12, %v11498_v9  ;;  %v11484_v21 = vld [vmem:[#allocation4 + $0xd1] sm:$0xff] (%p10780_p1) }
 0x88e   : > { %11463 = vst.msk [vmem:[#allocation4 + $0x61] sm:$0xff] %vm137_vm3, %v11447_v46 }
 0x88f   : > { %v15183_v25 = vpop.f32.mrb[4].mxu1  ;;  %11462 = vst.msk [vmem:[#allocation4 + $0x51] sm:$0xff] %vm137_vm3, %v11446_v33 }
 0x890   : > { %v11455_v4 = vadd.f32 %v15183_v25, %v11419_v24  ;;  %v11327_v2 = vpop.f32.mrb[5].mxu1  ;;  %v11509_v24 = vsel (%p10780_p1), %vm137_vm3, %v11482_v49, 0.0  ;;  %v11485_v25 = vld [vmem:[#allocation4 + $0xe1] sm:$0xff] (%p10780_p1) }
 0x891   : > { %v11454_v5 = vadd.f32 %v11416_v53, %v11327_v2  ;;  %v11511_v53 = vsel (%p10780_p1), %vm137_vm3, %v11483_v14, 0.0  ;;  %v11513_v2 = vsel (%p10780_p1), %vm137_vm3, %v11484_v21, 0.0  ;;  %v11515_v16 = vsel (%p10780_p1), %vm137_vm3, %v11485_v25, 0.0 }
 0x892   : > { %11471 = vst.msk [vmem:[#allocation4 + $0x101] sm:$0xff] %vm137_vm3, %v11455_v4 }
 0x893   : > { %11470 = vst.msk [vmem:[#allocation4 + $0xf1] sm:$0xff] %vm137_vm3, %v11454_v5 }
 0x895   :  { %v20836_v11 = vld [vmem:[#allocation4 + $0x61] sm:$0xff] (%p10780_p1) }
 0x896   :  { %v20826_v43 = vld [vmem:[#allocation4 + $0x51] sm:$0xff] (%p10780_p1)  ;;  %v11503_v7 = vsel (%p10780_p1), %vm137_vm3, %v20836_v11, 0.0 }
 0x897   :  { %v11501_v15 = vsel (%p10780_p1), %vm137_vm3, %v20826_v43, 0.0 }
 0x898   : > { %v15174_v3 = vpop.f32.mrb[6].mxu0  ;;  %v11502_v1 = vadd.f32 (%p10780_p1), %v11501_v15, %v11500_v30 }
 0x899   : > { %v11449_v42 = vadd.f32 %v15174_v3, %v11401_v39  ;;  %v11297_v57 = vpop.f32.mrb[7].mxu0  ;;  %v11487_v10 = vld [vmem:[#allocation4 + $0x101] sm:$0xff] (%p10780_p1) }
 0x89a   : > { %v11448_v22 = vadd.f32 %v11398_v27, %v11297_v57  ;;  %v11504_v45 = vadd.f32 (%p10780_p1), %v11503_v7, %v11502_v1  ;;  %v11486_v5 = vld [vmem:[#allocation4 + $0xf1] sm:$0xff] (%p10780_p1)  ;;  %v11519_v27 = vsel (%p10780_p1), %vm137_vm3, %v11487_v10, 0.0 }
 0x89b   : > { %11465 = vst.msk [vmem:[#allocation4 + $0x81] sm:$0xff] %vm137_vm3, %v11449_v42  ;;  %10782 = sbr.rel (!%p10780_p1) target bundleno = 1930 (0x78a), region = 116  ;;  %v11517_v39 = vsel (%p10780_p1), %vm137_vm3, %v11486_v5, 0.0 }
 0x89c   : > { %11464 = vst.msk [vmem:[#allocation4 + $0x71] sm:$0xff] %vm137_vm3, %v11448_v22 }
 0x89d   : > { %v15186_v36 = vpop.f32.mrb[6].mxu1 }
 0x89e   : > { %v11457_v19 = vadd.f32 %v15186_v36, %v11425_v6  ;;  %v11337_v58 = vpop.f32.mrb[7].mxu1 }
 0x89f   : > { %v11456_v44 = vadd.f32 %v11422_v40, %v11337_v58 }
 0x8a0   : > { %11473 = vst.msk [vmem:[#allocation4 + $0x121] sm:$0xff] %vm137_vm3, %v11457_v19 }
 0x8a1   : > { %11472 = vst.msk [vmem:[#allocation4 + $0x111] sm:$0xff] %vm137_vm3, %v11456_v44 }
 0x8a2   :  { %v11481_v32 = vld [vmem:[#allocation4 + $0x81] sm:$0xff] }
 0x8a3   :  { %v11480_v51 = vld [vmem:[#allocation4 + $0x71] sm:$0xff]  ;;  %v11507_v23 = vsel %vm137_vm3, %v11481_v32, 0.0 }
 0x8a4   :  { %v11505_v28 = vsel %vm137_vm3, %v11480_v51, 0.0 }
 0x8a5   :  { %v11506_v46 = vadd.f32 %v11505_v28, %v11504_v45 }
 0x8a7   :  { %v11508_v33 = vadd.f32 %v11507_v23, %v11506_v46  ;;  %v11489_v3 = vld [vmem:[#allocation4 + $0x121] sm:$0xff] }
 0x8a8   :  { %v11488_v18 = vld [vmem:[#allocation4 + $0x111] sm:$0xff]  ;;  %v11523_v57 = vsel %vm137_vm3, %v11489_v3, 0.0 }
 0x8a9   :  { %v11510_v4 = vadd.f32 %v11509_v24, %v11508_v33  ;;  %v11521_v0 = vsel %vm137_vm3, %v11488_v18, 0.0 }
 0x8ab   :  { %v11512_v13 = vadd.f32 %v11511_v53, %v11510_v4 }
 0x8ad   :  { %v11514_v60 = vadd.f32 %v11513_v2, %v11512_v13 }
 0x8af   :  { %v11516_v52 = vadd.f32 %v11515_v16, %v11514_v60 }
 0x8b1   :  { %v11518_v54 = vadd.f32 %v11517_v39, %v11516_v52 }
 0x8b3   :  { %v11520_v42 = vadd.f32 %v11519_v27, %v11518_v54 }
 0x8b5   :  { %v11522_v22 = vadd.f32 %v11521_v0, %v11520_v42 }
 0x8b7   :  { %v11524_v6 = vadd.f32 %v11523_v57, %v11522_v22 }
 0x8b9   :  { %v11525_v40 = vrot.slane %v11524_v6, 4 }
 0x8bb   :  { %v11526_v36 = vadd.f32 %v11525_v40, %v11524_v6 }
 0x8bd   :  { %v11527_v19 = vrot.slane %v11526_v36, 2 }
 0x8bf   :  { %v11528_v58 = vadd.f32 %v11527_v19, %v11526_v36 }
 0x8c1   :  { %v11529_v44 = vrot.slane %v11528_v58, 1 }
 0x8c3   :  { %v11530_v37 = vadd.f32 %v11529_v44, %v11528_v58 }
 0x8c5   :  { %v11532_v38 = vmul.f32 0.0078125, %v11530_v37 }
 0x8c7   :  { %v20853_v48 = vsub.f32 %v20812_v26, %v11532_v38  ;;  %v20856_v34 = vsub.f32 %v20814_v50, %v11532_v38  ;;  %v20859_v8 = vsub.f32 %v20816_v61, %v11532_v38  ;;  %v20862_v55 = vsub.f32 %v20818_v59, %v11532_v38 }
 0x8c8   :  { %v20865_v29 = vsub.f32 %v20826_v43, %v11532_v38  ;;  %v20874_v50 = vsub.f32 %v20836_v11, %v11532_v38  ;;  %v20878_v59 = vsub.f32 %v11480_v51, %v11532_v38  ;;  %v20885_v47 = vsub.f32 %v11481_v32, %v11532_v38 }
 0x8c9   :  { %v11549_v63 = vmul.f32 %v20853_v48, %v20853_v48  ;;  %v11550_v17 = vmul.f32 %v20856_v34, %v20856_v34  ;;  %v11551_v26 = vmul.f32 %v20859_v8, %v20859_v8  ;;  %v11552_v61 = vmul.f32 %v20862_v55, %v20862_v55 }
 0x8ca   :  { %v11553_v41 = vmul.f32 %v20865_v29, %v20865_v29  ;;  %v11554_v62 = vmul.f32 %v20874_v50, %v20874_v50  ;;  %v11541_v9 = vsub.f32 %v11482_v49, %v11532_v38  ;;  %v11555_v15 = vmul.f32 %v20878_v59, %v20878_v59 }
 0x8cb   :  { %v11565_v35 = vsel %vm137_vm3, %v11549_v63, 0.0  ;;  %v11566_v20 = vsel %vm137_vm3, %v11550_v17, 0.0  ;;  %v11568_v43 = vsel %vm137_vm3, %v11551_v26, 0.0  ;;  %v11570_v12 = vsel %vm137_vm3, %v11552_v61, 0.0 }
 0x8cc   :  { %v11567_v56 = vadd.f32 %v11566_v20, %v11565_v35  ;;  %v11572_v31 = vsel %vm137_vm3, %v11553_v41, 0.0  ;;  %v11542_v30 = vsub.f32 %v11483_v14, %v11532_v38  ;;  %v11556_v7 = vmul.f32 %v20885_v47, %v20885_v47 }
 0x8cd   :  { %v11574_v32 = vsel %vm137_vm3, %v11554_v62, 0.0  ;;  %v11543_v28 = vsub.f32 %v11484_v21, %v11532_v38  ;;  %v11557_v45 = vmul.f32 %v11541_v9, %v11541_v9  ;;  %v11576_v23 = vsel %vm137_vm3, %v11555_v15, 0.0 }
 0x8ce   :  { %v11569_v11 = vadd.f32 %v11568_v43, %v11567_v56  ;;  %v11544_v24 = vsub.f32 %v11485_v25, %v11532_v38  ;;  %v11558_v49 = vmul.f32 %v11542_v30, %v11542_v30  ;;  %v11578_v33 = vsel %vm137_vm3, %v11556_v7, 0.0  ;;  %v13335_v56 = vld [vmem:[%s21234_s3 + $0x1] ss:$0 sm:$0xff] }
 0x8cf   :  { %v20898_v4 = vsub.f32 %v11486_v5, %v11532_v38  ;;  %v11559_v2 = vmul.f32 %v11543_v28, %v11543_v28  ;;  %v11580_v14 = vsel %vm137_vm3, %v11557_v45, 0.0  ;;  %v20901_v16 = vsub.f32 %v11487_v10, %v11532_v38 }
 0x8d0   :  { %v11571_v51 = vadd.f32 %v11570_v12, %v11569_v11  ;;  %v11560_v60 = vmul.f32 %v11544_v24, %v11544_v24  ;;  %v11582_v21 = vsel %vm137_vm3, %v11558_v49, 0.0  ;;  %v20904_v52 = vsub.f32 %v11488_v18, %v11532_v38 }
 0x8d1   :  { %v11561_v25 = vmul.f32 %v20898_v4, %v20898_v4  ;;  %v11584_v27 = vsel %vm137_vm3, %v11559_v2, 0.0  ;;  %v20909_v5 = vsub.f32 %v11489_v3, %v11532_v38  ;;  %v11562_v0 = vmul.f32 %v20901_v16, %v20901_v16 }
 0x8d2   :  { %v11573_v1 = vadd.f32 %v11572_v31, %v11571_v51  ;;  %v11586_v10 = vsel %vm137_vm3, %v11560_v60, 0.0  ;;  %v11563_v57 = vmul.f32 %v20904_v52, %v20904_v52  ;;  %v13336_v31 = vld [vmem:[%s21235_s4 + $0x1] ss:$0 sm:$0xff] }
 0x8d3   :  { %v11588_v18 = vsel %vm137_vm3, %v11561_v25, 0.0  ;;  %v11564_v6 = vmul.f32 %v20909_v5, %v20909_v5  ;;  %v11590_v40 = vsel %vm137_vm3, %v11562_v0, 0.0 }
 0x8d4   :  { %v11575_v46 = vadd.f32 %v11574_v32, %v11573_v1  ;;  %v11592_v3 = vsel %vm137_vm3, %v11563_v57, 0.0 }
 0x8d5   :  { %v11594_v58 = vsel %vm137_vm3, %v11564_v6, 0.0 }
 0x8d6   :  { %v11577_v53 = vadd.f32 %v11576_v23, %v11575_v46 }
 0x8d8   :  { %v11579_v13 = vadd.f32 %v11578_v33, %v11577_v53 }
 0x8da   :  { %v11581_v39 = vadd.f32 %v11580_v14, %v11579_v13 }
 0x8dc   :  { %v11583_v54 = vadd.f32 %v11582_v21, %v11581_v39 }
 0x8de   :  { %v11585_v42 = vadd.f32 %v11584_v27, %v11583_v54 }
 0x8e0   :  { %v11587_v22 = vadd.f32 %v11586_v10, %v11585_v42 }
 0x8e2   :  { %v11589_v36 = vadd.f32 %v11588_v18, %v11587_v22 }
 0x8e4   :  { %v11591_v19 = vadd.f32 %v11590_v40, %v11589_v36 }
 0x8e6   :  { %v11593_v44 = vadd.f32 %v11592_v3, %v11591_v19  ;;  %v11706_v3 = vld [vmem:[#allocation4] sm:$0xff] }
 0x8e8   :  { %v11595_v37 = vadd.f32 %v11594_v58, %v11593_v44  ;;  %v11714_v44 = vld [vmem:[#allocation4 + $0xa0] sm:$0xff] }
 0x8ea   :  { %v11596_v38 = vrot.slane %v11595_v37, 4 }
 0x8ec   :  { %v11597_v63 = vadd.f32 %v11596_v38, %v11595_v37 }
 0x8ee   :  { %v11598_v17 = vrot.slane %v11597_v63, 2 }
 0x8f0   :  { %v11599_v26 = vadd.f32 %v11598_v17, %v11597_v63 }
 0x8f2   :  { %v11600_v61 = vrot.slane %v11599_v26, 1 }
 0x8f4   :  { %v11601_v41 = vadd.f32 %v11600_v61, %v11599_v26 }
 0x8f6   :  { %v11602_v35 = vmul.f32 0.0078125, %v11601_v41 }
 0x8f8   :  { %v11603_v20 = vadd.f32 1e-05, %v11602_v35 }
 0x8fa   :  { %16014 = vrsqrt.f32 %v11603_v20 }
 0x904   :  { %v16015_v43 = vpop.eup %16014 }
 0x905   :  { %v11605_v62 = vmul.f32 %v16015_v43, %v20853_v48  ;;  %v11606_v12 = vmul.f32 %v16015_v43, %v20856_v34  ;;  %v11607_v11 = vmul.f32 %v16015_v43, %v20859_v8  ;;  %v11608_v15 = vmul.f32 %v16015_v43, %v20862_v55 }
 0x906   :  { %v11613_v51 = vmul.f32 %v16015_v43, %v11541_v9  ;;  %v11614_v7 = vmul.f32 %v16015_v43, %v11542_v30  ;;  %v11615_v32 = vmul.f32 %v16015_v43, %v11543_v28  ;;  %v11616_v1 = vmul.f32 %v16015_v43, %v11544_v24 }
 0x907   :  { %v11627_v45 = vmul.f32 %v13335_v56, %v11605_v62  ;;  %v11628_v23 = vmul.f32 %v13335_v56, %v11606_v12  ;;  %v11629_v46 = vmul.f32 %v13335_v56, %v11607_v11  ;;  %v11630_v49 = vmul.f32 %v13335_v56, %v11608_v15 }
 0x908   :  { %v11635_v33 = vmul.f32 %v13335_v56, %v11613_v51  ;;  %v11636_v48 = vmul.f32 %v13335_v56, %v11614_v7  ;;  %v11637_v53 = vmul.f32 %v13335_v56, %v11615_v32  ;;  %v11638_v34 = vmul.f32 %v13335_v56, %v11616_v1 }
 0x909   :  { %v11649_v2 = vadd.f32 %v13336_v31, %v11627_v45  ;;  %v11650_v8 = vadd.f32 %v13336_v31, %v11628_v23  ;;  %v11651_v14 = vadd.f32 %v13336_v31, %v11629_v46  ;;  %v11652_v55 = vadd.f32 %v13336_v31, %v11630_v49 }
 0x90a   :  { %v11657_v13 = vadd.f32 %v13336_v31, %v11635_v33  ;;  %v11658_v60 = vadd.f32 %v13336_v31, %v11636_v48  ;;  %v11659_v21 = vadd.f32 %v13336_v31, %v11637_v53  ;;  %v11660_v39 = vadd.f32 %v13336_v31, %v11638_v34 }
 0x90b   :  { %11665 = vst.msk [vmem:[#allocation4 + $0x11] sm:$0xff] %vm137_vm3, %v11649_v2  ;;  %11666 = vst.msk [vmem:[#allocation4 + $0x21] sm:$0xff] %vm137_vm3, %v11650_v8  ;;  %v11609_v9 = vmul.f32 %v16015_v43, %v20865_v29  ;;  %v11610_v30 = vmul.f32 %v16015_v43, %v20874_v50  ;;  %v11611_v28 = vmul.f32 %v16015_v43, %v20878_v59 }
 0x90c   :  { %11667 = vst.msk [vmem:[#allocation4 + $0x31] sm:$0xff] %vm137_vm3, %v11651_v14  ;;  %11668 = vst.msk [vmem:[#allocation4 + $0x41] sm:$0xff] %vm137_vm3, %v11652_v55  ;;  %v11612_v24 = vmul.f32 %v16015_v43, %v20885_v47  ;;  %v11617_v25 = vmul.f32 %v16015_v43, %v20898_v4  ;;  %v11618_v27 = vmul.f32 %v16015_v43, %v20901_v16  ;;  %v11707_v4 = vld [vmem:[#allocation4 + $0x8] sm:$0x3] }
 0x90d   :  { %11673 = vst.msk [vmem:[#allocation4 + $0xb1] sm:$0xff] %vm137_vm3, %v11657_v13  ;;  %11674 = vst.msk [vmem:[#allocation4 + $0xc1] sm:$0xff] %vm137_vm3, %v11658_v60  ;;  %v11619_v29 = vmul.f32 %v16015_v43, %v20904_v52  ;;  %v11620_v50 = vmul.f32 %v16015_v43, %v20909_v5  ;;  %v11631_v54 = vmul.f32 %v13335_v56, %v11609_v9  ;;  %v11715_v5 = vld [vmem:[#allocation4 + $0xa8] sm:$0x3] }
 0x90e   :  { %11675 = vst.msk [vmem:[#allocation4 + $0xd1] sm:$0xff] %vm137_vm3, %v11659_v21  ;;  %11676 = vst.msk [vmem:[#allocation4 + $0xe1] sm:$0xff] %vm137_vm3, %v11660_v39  ;;  %v11632_v59 = vmul.f32 %v13335_v56, %v11610_v30  ;;  %v11633_v0 = vmul.f32 %v13335_v56, %v11611_v28  ;;  %v11634_v47 = vmul.f32 %v13335_v56, %v11612_v24 }
 0x90f   :  { %v11639_v10 = vmul.f32 %v13335_v56, %v11617_v25  ;;  %v11640_v42 = vmul.f32 %v13335_v56, %v11618_v27  ;;  %v11641_v57 = vmul.f32 %v13335_v56, %v11619_v29  ;;  %v11642_v18 = vmul.f32 %v13335_v56, %v11620_v50 }
 0x910   :  { %v11653_v22 = vadd.f32 %v13336_v31, %v11631_v54  ;;  %v11654_v6 = vadd.f32 %v13336_v31, %v11632_v59  ;;  %v11655_v40 = vadd.f32 %v13336_v31, %v11633_v0  ;;  %v11656_v36 = vadd.f32 %v13336_v31, %v11634_v47 }
 0x911   :  { %v11661_v19 = vadd.f32 %v13336_v31, %v11639_v10  ;;  %v11662_v16 = vadd.f32 %v13336_v31, %v11640_v42  ;;  %v11663_v58 = vadd.f32 %v13336_v31, %v11641_v57  ;;  %v11664_v52 = vadd.f32 %v13336_v31, %v11642_v18 }
 0x912   :  { %11669 = vst.msk [vmem:[#allocation4 + $0x51] sm:$0xff] %vm137_vm3, %v11653_v22  ;;  %11670 = vst.msk [vmem:[#allocation4 + $0x61] sm:$0xff] %vm137_vm3, %v11654_v6  ;;  %v11690_v37 = vld [vmem:[#allocation4 + $0x10] sm:$0xff]  ;;  %v11691_v38 = vld [vmem:[#allocation4 + $0x18] sm:$0x3] }
 0x913   :  { %11671 = vst.msk [vmem:[#allocation4 + $0x71] sm:$0xff] %vm137_vm3, %v11655_v40  ;;  %11672 = vst.msk [vmem:[#allocation4 + $0x81] sm:$0xff] %vm137_vm3, %v11656_v36  ;;  %v11692_v63 = vld [vmem:[#allocation4 + $0x30] sm:$0xff]  ;;  %v11693_v17 = vld [vmem:[#allocation4 + $0x38] sm:$0x3]  ;;  %v11722_v41 = vadd.f32 %v11706_v3, %v11690_v37  ;;  %v11723_v35 = vadd.f32 %v11707_v4, %v11691_v38 }
 0x914   :  { %11677 = vst.msk [vmem:[#allocation4 + $0xf1] sm:$0xff] %vm137_vm3, %v11661_v19  ;;  %11678 = vst.msk [vmem:[#allocation4 + $0x101] sm:$0xff] %vm137_vm3, %v11662_v16  ;;  %v11708_v26 = vld [vmem:[#allocation4 + $0x20] sm:$0xff]  ;;  %v11709_v61 = vld [vmem:[#allocation4 + $0x28] sm:$0x3] }
 0x915   :  { %11679 = vst.msk [vmem:[#allocation4 + $0x111] sm:$0xff] %vm137_vm3, %v11663_v58  ;;  %11680 = vst.msk [vmem:[#allocation4 + $0x121] sm:$0xff] %vm137_vm3, %v11664_v52  ;;  %v11724_v20 = vadd.f32 %v11708_v26, %v11692_v63  ;;  %v11725_v43 = vadd.f32 %v11709_v61, %v11693_v17  ;;  %v11740_v56 = vld [vmem:[#allocation4 + $0x28] sm:$0x3]  ;;  %v11741_v62 = vld [vmem:[#allocation4 + $0x40] sm:$0xff]  ;;  %v11755_v11 = vadd.f32 %v11722_v41, %v11708_v26 }
 0x916   :  { %v11742_v12 = vld [vmem:[#allocation4 + $0x48] sm:$0x3]  ;;  %v11756_v15 = vadd.f32 %v11740_v56, %v11723_v35  ;;  %v11698_v31 = vld [vmem:[#allocation4 + $0xb0] sm:$0xff]  ;;  %v11699_v51 = vld [vmem:[#allocation4 + $0xb8] sm:$0x3] }
 0x917   :  { %v11700_v7 = vld [vmem:[#allocation4 + $0xd0] sm:$0xff]  ;;  %v11757_v32 = vadd.f32 %v11741_v62, %v11724_v20  ;;  %v11758_v1 = vadd.f32 %v11742_v12, %v11725_v43  ;;  %v11701_v45 = vld [vmem:[#allocation4 + $0xd8] sm:$0x3]  ;;  %v11716_v23 = vld [vmem:[#allocation4 + $0xc0] sm:$0xff]  ;;  %v11730_v49 = vadd.f32 %v11714_v44, %v11698_v31  ;;  %v11731_v33 = vadd.f32 %v11715_v5, %v11699_v51 }
 0x918   :  { %v11717_v46 = vld [vmem:[#allocation4 + $0xc8] sm:$0x3]  ;;  %v11787_v48 = vrot.slane %v11755_v11, 1  ;;  %v11788_v53 = vrot.slane %v11756_v15, 1  ;;  %v11827_v34 = vrot.slane %v11755_v11, 2  ;;  %v11828_v2 = vrot.slane %v11756_v15, 2 }
 0x919   :  { %v11748_v8 = vld [vmem:[#allocation4 + $0xc8] sm:$0x3]  ;;  %v11790_v14 = vrot.slane %v11757_v32, 1  ;;  %v11791_v55 = vrot.slane %v11758_v1, 1  ;;  %v11830_v13 = vrot.slane %v11757_v32, 2  ;;  %v11831_v60 = vrot.slane %v11758_v1, 2 }
 0x91a   :  { %v11749_v21 = vld [vmem:[#allocation4 + $0xe0] sm:$0xff]  ;;  %v11789_v39 = vsel %vm7320_vm5, %v11787_v48, %v11788_v53  ;;  %v11829_v9 = vsel %vm7609_vm6, %v11827_v34, %v11828_v2  ;;  %v11732_v30 = vadd.f32 %v11716_v23, %v11700_v7  ;;  %v11733_v28 = vadd.f32 %v11717_v46, %v11701_v45  ;;  %v11750_v24 = vld [vmem:[#allocation4 + $0xe8] sm:$0x3]  ;;  %v11694_v25 = vld [vmem:[#allocation4 + $0x50] sm:$0xff] }
 0x91b   :  { %v11792_v27 = vsel %vm7320_vm5, %v11790_v14, %v11791_v55  ;;  %v11819_v29 = vadd.f32 %v11789_v39, %v11755_v11  ;;  %v11832_v50 = vsel %vm7609_vm6, %v11830_v13, %v11831_v60  ;;  %v11763_v54 = vadd.f32 %v11730_v49, %v11716_v23  ;;  %v11695_v42 = vld [vmem:[#allocation4 + $0x58] sm:$0x3]  ;;  %v11696_v6 = vld [vmem:[#allocation4 + $0x70] sm:$0xff]  ;;  %v11711_v36 = vld [vmem:[#allocation4 + $0x48] sm:$0x3] }
 0x91c   :  { %v11820_v59 = vadd.f32 %v11792_v27, %v11757_v32  ;;  %v11764_v0 = vadd.f32 %v11748_v8, %v11731_v33  ;;  %v11765_v47 = vadd.f32 %v11749_v21, %v11732_v30  ;;  %v11766_v10 = vadd.f32 %v11750_v24, %v11733_v28  ;;  %v11697_v40 = vld [vmem:[#allocation4 + $0x78] sm:$0x3]  ;;  %v11713_v3 = vld [vmem:[#allocation4 + $0x68] sm:$0x3]  ;;  %v11712_v44 = vld [vmem:[#allocation4 + $0x60] sm:$0xff] }
 0x91d   :  { %v11859_v57 = vadd.f32 %v11829_v9, %v11819_v29  ;;  %v11799_v18 = vrot.slane %v11763_v54, 1  ;;  %v11839_v22 = vrot.slane %v11763_v54, 2  ;;  %v11726_v4 = vadd.f32 %v11741_v62, %v11694_v25  ;;  %v11744_v5 = vld [vmem:[#allocation4 + $0x68] sm:$0x3]  ;;  %v11702_v26 = vld [vmem:[#allocation4 + $0xf0] sm:$0xff]  ;;  %v11745_v31 = vld [vmem:[#allocation4 + $0x80] sm:$0xff] }
 0x91e   :  { %v11860_v19 = vadd.f32 %v11832_v50, %v11820_v59  ;;  %v11800_v16 = vrot.slane %v11764_v0, 1  ;;  %v11802_v58 = vrot.slane %v11765_v47, 1  ;;  %v11803_v52 = vrot.slane %v11766_v10, 1  ;;  %v11703_v43 = vld [vmem:[#allocation4 + $0xf8] sm:$0x3]  ;;  %v11704_v49 = vld [vmem:[#allocation4 + $0x110] sm:$0xff] }
 0x91f   :  { %v11867_v37 = vmul.f32 0.11111111, %v11859_v57  ;;  %v11840_v38 = vrot.slane %v11764_v0, 2  ;;  %v11842_v63 = vrot.slane %v11765_v47, 2  ;;  %v11843_v17 = vrot.slane %v11766_v10, 2  ;;  %v11720_v48 = vld [vmem:[#allocation4 + $0x100] sm:$0xff] }
 0x920   :  { %v11868_v61 = vmul.f32 0.11111111, %v11860_v19  ;;  %v11801_v41 = vsel %vm7320_vm5, %v11799_v18, %v11800_v16  ;;  %v11804_v35 = vsel %vm7320_vm5, %v11802_v58, %v11803_v52  ;;  %v11727_v20 = vadd.f32 %v11711_v36, %v11695_v42  ;;  %v11719_v56 = vld [vmem:[#allocation4 + $0xe8] sm:$0x3]  ;;  %v11705_v33 = vld [vmem:[#allocation4 + $0x118] sm:$0x3] }
 0x921   :  { %11875 = vst.msk [vmem:[#allocation8] sm:$0xff] %vm137_vm3, %v11867_v37  ;;  %v11823_v62 = vadd.f32 %v11801_v41, %v11763_v54  ;;  %v11824_v12 = vadd.f32 %v11804_v35, %v11765_v47  ;;  %v11841_v11 = vsel %vm7609_vm6, %v11839_v22, %v11840_v38  ;;  %v11844_v15 = vsel %vm7609_vm6, %v11842_v63, %v11843_v17  ;;  %v11746_v51 = vld [vmem:[#allocation4 + $0x88] sm:$0x3]  ;;  %v11753_v50 = vld [vmem:[#allocation4 + $0x120] sm:$0xff] }
 0x922   :  { %11878 = vst.msk [vmem:[#allocation8 + $0x8] sm:$0xff] %vm137_vm3, %v11868_v61  ;;  %v11728_v7 = vadd.f32 %v11712_v44, %v11696_v6  ;;  %v11729_v32 = vadd.f32 %v11713_v3, %v11697_v40  ;;  %v11759_v1 = vadd.f32 %v11726_v4, %v11712_v44  ;;  %v11760_v45 = vadd.f32 %v11744_v5, %v11727_v20  ;;  %v11721_v13 = vld [vmem:[#allocation4 + $0x108] sm:$0x3] }
 0x923   :  { %v11863_v23 = vadd.f32 %v11841_v11, %v11823_v62  ;;  %v11864_v46 = vadd.f32 %v11844_v15, %v11824_v12  ;;  %v11734_v53 = vadd.f32 %v11749_v21, %v11702_v26  ;;  %v11735_v34 = vadd.f32 %v11719_v56, %v11703_v43  ;;  %v11752_v60 = vld [vmem:[#allocation4 + $0x108] sm:$0x3] }
 0x924   :  { %v11761_v2 = vadd.f32 %v11745_v31, %v11728_v7  ;;  %v11762_v8 = vadd.f32 %v11746_v51, %v11729_v32  ;;  %v11793_v14 = vrot.slane %v11759_v1, 1  ;;  %v11794_v55 = vrot.slane %v11760_v45, 1  ;;  %v11754_v47 = vld [vmem:[#allocation4 + $0x128] sm:$0x3] }
 0x925   :  { %v11871_v39 = vmul.f32 0.11111111, %v11863_v23  ;;  %v11872_v9 = vmul.f32 0.11111111, %v11864_v46  ;;  %v11833_v30 = vrot.slane %v11759_v1, 2  ;;  %v11834_v28 = vrot.slane %v11760_v45, 2 }
 0x926   :  { %v11795_v24 = vsel %vm7320_vm5, %v11793_v14, %v11794_v55  ;;  %v11796_v25 = vrot.slane %v11761_v2, 1  ;;  %v11797_v27 = vrot.slane %v11762_v8, 1  ;;  %v11836_v29 = vrot.slane %v11761_v2, 2  ;;  %v21039_v14 = vld [vmem:[%s21233_s2 + $0x120] sm:$0xff]  ;;  %v21044_v55 = vld [vmem:[%s21233_s2 + $0x128] sm:$0xff] }
 0x927   :  { %11876 = vst.msk [vmem:[#allocation8 + $0x20] sm:$0xff] %vm137_vm3, %v11871_v39  ;;  %11879 = vst.msk [vmem:[#allocation8 + $0x28] sm:$0xff] %vm137_vm3, %v11872_v9  ;;  %v11821_v21 = vadd.f32 %v11795_v24, %v11759_v1  ;;  %v11835_v54 = vsel %vm7609_vm6, %v11833_v30, %v11834_v28  ;;  %v11837_v59 = vrot.slane %v11762_v8, 2  ;;  %v11736_v0 = vadd.f32 %v11720_v48, %v11704_v49  ;;  %v21034_v8 = vld [vmem:[%s21233_s2 + $0x118] sm:$0xff] }
 0x928   :  { %v11886_v10 = vld [vmem:[#allocation8] sm:$0xff]  ;;  %v11798_v42 = vsel %vm7320_vm5, %v11796_v25, %v11797_v27  ;;  %v11737_v57 = vadd.f32 %v11721_v13, %v11705_v33  ;;  %v11767_v18 = vadd.f32 %v11734_v53, %v11720_v48  ;;  %v11768_v22 = vadd.f32 %v11752_v60, %v11735_v34  ;;  %v21024_v34 = vld [vmem:[%s21233_s2 + $0x108] sm:$0xff]  ;;  %v21049_v13 = vld [vmem:[%s21233_s2 + $0x130] sm:$0xff] }
 0x929   :  { %v11887_v6 = vld [vmem:[#allocation8 + $0x8] sm:$0xff]  ;;  %11894 = vst.msk [vmem:[#allocation9] sm:$0x1] %vm10411_vm7, %v11886_v10  ;;  %v11822_v40 = vadd.f32 %v11798_v42, %v11761_v2  ;;  %v11838_v36 = vsel %vm7609_vm6, %v11836_v29, %v11837_v59  ;;  %v11861_v3 = vadd.f32 %v11835_v54, %v11821_v21  ;;  %v11769_v4 = vadd.f32 %v11753_v50, %v11736_v0  ;;  %v21019_v53 = vld [vmem:[%s21233_s2 + $0x100] sm:$0xff]  ;;  %v21029_v2 = vld [vmem:[%s21233_s2 + $0x110] sm:$0xff] }
 0x92a   :  { %11902 = vst.msk [vmem:[#allocation9 - $0x1] sm:$0x4] %vm10428_vm8, %v11886_v10  ;;  %11903 = vst.msk [vmem:[#allocation9 + $0x3] sm:$0x4] %vm10428_vm8, %v11887_v6  ;;  %v11770_v19 = vadd.f32 %v11754_v47, %v11737_v57  ;;  %v11805_v16 = vrot.slane %v11767_v18, 1  ;;  %v11806_v58 = vrot.slane %v11768_v22, 1 }
 0x92b   :  { %11910 = vst.msk [vmem:[#allocation9 - $0x2] sm:$0x10] %vm10445_vm9, %v11886_v10  ;;  %11911 = vst.msk [vmem:[#allocation9 + $0x2] sm:$0x10] %vm10445_vm9, %v11887_v6  ;;  %v11845_v52 = vrot.slane %v11767_v18, 2  ;;  %v11862_v44 = vadd.f32 %v11838_v36, %v11822_v40  ;;  %v11808_v37 = vrot.slane %v11769_v4, 1 }
 0x92c   :  { %11918 = vst.msk [vmem:[#allocation9 - $0x3] sm:$0x40] %vm10462_vm10, %v11886_v10  ;;  %11919 = vst.msk [vmem:[#allocation9 + $0x1] sm:$0x40] %vm10462_vm10, %v11887_v6  ;;  %v11869_v5 = vmul.f32 0.11111111, %v11861_v3  ;;  %v11807_v63 = vsel %vm7320_vm5, %v11805_v16, %v11806_v58 }
 0x92d   :  { %11895 = vst.msk [vmem:[#allocation9 + $0x4] sm:$0x1] %vm10411_vm7, %v11887_v6  ;;  %v11846_v38 = vrot.slane %v11768_v22, 2  ;;  %v11809_v17 = vrot.slane %v11770_v19, 1  ;;  %v11848_v26 = vrot.slane %v11769_v4, 2  ;;  %v11849_v61 = vrot.slane %v11770_v19, 2 }
 0x92e   :  { %v11870_v41 = vmul.f32 0.11111111, %v11862_v44  ;;  %11881 = vst.msk [vmem:[#allocation8 + $0x10] sm:$0xff] %vm137_vm3, %v11869_v5  ;;  %v11825_v35 = vadd.f32 %v11807_v63, %v11767_v18  ;;  %v11890_v43 = vld [vmem:[#allocation8 + $0x20] sm:$0xff]  ;;  %v11891_v56 = vld [vmem:[#allocation8 + $0x28] sm:$0xff]  ;;  %v21054_v60 = vld [vmem:[%s21233_s2 + $0x138] sm:$0xff] }
 0x92f   :  { %v11847_v20 = vsel %vm7609_vm6, %v11845_v52, %v11846_v38  ;;  %v11810_v62 = vsel %vm7320_vm5, %v11808_v37, %v11809_v17  ;;  %v11850_v12 = vsel %vm7609_vm6, %v11848_v26, %v11849_v61  ;;  %11898 = vst.msk [vmem:[#allocation9 + $0x10] sm:$0x1] %vm10411_vm7, %v11890_v43  ;;  %11899 = vst.msk [vmem:[#allocation9 + $0x14] sm:$0x1] %vm10411_vm7, %v11891_v56  ;;  %s21064_s2 = smov 0  }
 0x930   :  { %11906 = vst.msk [vmem:[#allocation9 + $0xf] sm:$0x4] %vm10428_vm8, %v11890_v43  ;;  %11907 = vst.msk [vmem:[#allocation9 + $0x13] sm:$0x4] %vm10428_vm8, %v11891_v56  ;;  %v11826_v11 = vadd.f32 %v11810_v62, %v11769_v4  ;;  %v11865_v15 = vadd.f32 %v11847_v20, %v11825_v35 }
 0x931   :  { %11914 = vst.msk [vmem:[#allocation9 + $0xe] sm:$0x10] %vm10445_vm9, %v11890_v43  ;;  %11915 = vst.msk [vmem:[#allocation9 + $0x12] sm:$0x10] %vm10445_vm9, %v11891_v56 }
 0x932   :  { %11922 = vst.msk [vmem:[#allocation9 + $0xd] sm:$0x40] %vm10462_vm10, %v11890_v43  ;;  %11923 = vst.msk [vmem:[#allocation9 + $0x11] sm:$0x40] %vm10462_vm10, %v11891_v56  ;;  %v11866_v51 = vadd.f32 %v11850_v12, %v11826_v11  ;;  %v11873_v7 = vmul.f32 0.11111111, %v11865_v15 }
 0x933   :  { %11884 = vst.msk [vmem:[#allocation8 + $0x18] sm:$0xff] %vm137_vm3, %v11870_v41 }
 0x934   :  { %v16010_v31 = vld [vmem:[#allocation9] sm:$0xff]   ;;  %v11874_v32 = vmul.f32 0.11111111, %v11866_v51  ;;  %11882 = vst.msk [vmem:[#allocation8 + $0x30] sm:$0xff] %vm137_vm3, %v11873_v7 }
 0x935   :  { %15203 = vmatprep.mubr.msk.f32.mxu0 %vm137_vm3, %v16010_v31  ;;  %v11888_v1 = vld [vmem:[#allocation8 + $0x10] sm:$0xff] }
 0x936   :  { %11896 = vst.msk [vmem:[#allocation9 + $0x8] sm:$0x1] %vm10411_vm7, %v11888_v1 }
 0x937   :  { %11904 = vst.msk [vmem:[#allocation9 + $0x7] sm:$0x4] %vm10428_vm8, %v11888_v1 }
 0x938   :  { %11912 = vst.msk [vmem:[#allocation9 + $0x6] sm:$0x10] %vm10445_vm9, %v11888_v1 }
 0x939   :  { %11920 = vst.msk [vmem:[#allocation9 + $0x5] sm:$0x40] %vm10462_vm10, %v11888_v1  ;;  %v16011_v45 = vld [vmem:[#allocation9 + $0x10] sm:$0xff]  }
 0x93a   :  { %11885 = vst.msk [vmem:[#allocation8 + $0x38] sm:$0xff] %vm137_vm3, %v11874_v32  ;;  %v11889_v23 = vld [vmem:[#allocation8 + $0x18] sm:$0xff]  ;;  %15206 = vmatprep.mubr.msk.f32.mxu1 %vm137_vm3, %v16011_v45 }
 0x93b   :  { %11897 = vst.msk [vmem:[#allocation9 + $0xc] sm:$0x1] %vm10411_vm7, %v11889_v23  ;;  %v11892_v46 = vld [vmem:[#allocation8 + $0x30] sm:$0xff] }
 0x93c   :  { %11905 = vst.msk [vmem:[#allocation9 + $0xb] sm:$0x4] %vm10428_vm8, %v11889_v23  ;;  %11908 = vst.msk [vmem:[#allocation9 + $0x17] sm:$0x4] %vm10428_vm8, %v11892_v46 }
 0x93d   :  { %11913 = vst.msk [vmem:[#allocation9 + $0xa] sm:$0x10] %vm10445_vm9, %v11889_v23  ;;  %11916 = vst.msk [vmem:[#allocation9 + $0x16] sm:$0x10] %vm10445_vm9, %v11892_v46 }
 0x93e   :  { %11921 = vst.msk [vmem:[#allocation9 + $0x9] sm:$0x40] %vm10462_vm10, %v11889_v23  ;;  %11924 = vst.msk [vmem:[#allocation9 + $0x15] sm:$0x40] %vm10462_vm10, %v11892_v46 }
 0x93f   :  { %11900 = vst.msk [vmem:[#allocation9 + $0x18] sm:$0x1] %vm10411_vm7, %v11892_v46 }
 0x941   :  { %v11893_v49 = vld [vmem:[#allocation8 + $0x38] sm:$0xff] }
 0x942   :  { %11901 = vst.msk [vmem:[#allocation9 + $0x1c] sm:$0x1] %vm10411_vm7, %v11893_v49 }
 0x943   :  { %11909 = vst.msk [vmem:[#allocation9 + $0x1b] sm:$0x4] %vm10428_vm8, %v11893_v49 }
 0x944   :  { %11917 = vst.msk [vmem:[#allocation9 + $0x1a] sm:$0x10] %vm10445_vm9, %v11893_v49 }
 0x945   :  { %11925 = vst.msk [vmem:[#allocation9 + $0x19] sm:$0x40] %vm10462_vm10, %v11893_v49  ;;  %v16012_v33 = vld [vmem:[#allocation9 + $0x8] sm:$0xff]  }
 0x946   :  { %15204 = vmatmul.mubr.msk.f32.vlgmr.msra.gmra.mrb[0].mxu0 %vm137_vm3, %v16012_v33 }
 0x94c   :  { %v16013_v48 = vld [vmem:[#allocation9 + $0x18] sm:$0xff]  }
 0x94d   :  { %15207 = vmatmul.mubr.msk.f32.vlgmr.msra.gmra.mrb[0].mxu1 %vm137_vm3, %v16013_v48 }
 0xa19   :  { %v15205_v39 = vpop.f32.mrb[0].mxu0 }
 0xa1a   :  { %v12044_v9 = vcombine.high %v15205_v39, %v15205_v39  ;;  %12055 = vst.msk [vmem:[#allocation5 + $0x19] sm:$0xf] %vm12052_vm11, %v15205_v39  ;;  %v12020_v30 = vpop.f32.mrb[1].mxu0 }
 0xa1b   :  { %v12043_v28 = vcombine.high %v12020_v30, %v12020_v30  ;;  %12053 = vst.msk [vmem:[#allocation5 + $0x9] sm:$0xf] %vm12052_vm11, %v12020_v30 }
 0xa1c   :  { %12056 = vst.msk [vmem:[#allocation5 + $0x21] sm:$0xf] %vm12052_vm11, %v12044_v9 }
 0xa1d   :  { %12054 = vst.msk [vmem:[#allocation5 + $0x11] sm:$0xf] %vm12052_vm11, %v12043_v28 }
 0xa20   :  { %v15208_v24 = vpop.f32.mrb[0].mxu1 }
 0xa21   :  { %v12046_v25 = vcombine.high %v15208_v24, %v15208_v24  ;;  %12059 = vst.msk [vmem:[#allocation5 + $0x49] sm:$0xf] %vm12052_vm11, %v15208_v24  ;;  %v12030_v27 = vpop.f32.mrb[1].mxu1 }
 0xa22   :  { %v12045_v29 = vcombine.high %v12030_v27, %v12030_v27  ;;  %12057 = vst.msk [vmem:[#allocation5 + $0x39] sm:$0xf] %vm12052_vm11, %v12030_v27 }
 0xa23   :  { %12060 = vst.msk [vmem:[#allocation5 + $0x51] sm:$0xf] %vm12052_vm11, %v12046_v25 }
 0xa24   :  { %12058 = vst.msk [vmem:[#allocation5 + $0x41] sm:$0xf] %vm12052_vm11, %v12045_v29 }
 0xa25 LB: > { %v15314_v50 = vpack.c.bf16 %v21024_v34, %v21019_v53  ;;  %v15318_v21 = vpack.c.bf16 %v21034_v8, %v21029_v2  ;;  %v21073_v54 = vld [vmem:[#allocation5 + $0x8] sm:$0x3f]  ;;  %v21075_v59 = vld [vmem:[#allocation5 + $0x10] sm:$0x3f]  ;;  %v12084_v0 = vld [vmem:[#allocation5] sm:$0x3f]  ;;  %v15322_v36 = vpack.c.bf16 %v21044_v55, %v21039_v14  ;;  %v15326_v52 = vpack.c.bf16 %v21054_v60, %v21049_v13  ;;  %s16066_s2 = sphi %s21064_s2, %s12075_s2  }
 0xa26   : > { %v12085_v47 = vld [vmem:[#allocation5 + $0x8] sm:$0x3f]  ;;  %v12092_v10 = vadd.f32 %v12084_v0, %v21073_v54  ;;  %v12101_v42 = vld [vmem:[#allocation5 + $0x10] sm:$0x3f]  ;;  %v12102_v57 = vld [vmem:[#allocation5 + $0x18] sm:$0x3f] }
 0xa27   : > { %15315 = vmatprep.subr.bf16.mxu0 %v15314_v50  ;;  %15888 = vmatprep.subr.bf16.mxu1 %v15314_v50  ;;  %v12093_v18 = vadd.f32 %v12085_v47, %v21075_v59  ;;  %v12088_v40 = vld [vmem:[#allocation5 + $0x30] sm:$0x3f]  ;;  %v21089_v37 = vld [vmem:[#allocation5 + $0x18] sm:$0x3f]  ;;  %v21091_v38 = vld [vmem:[#allocation5 + $0x20] sm:$0x3f] }
 0xa28   : > { %15317 = vmatpush3.bf16.msra.mxu0 %v15314_v50  ;;  %15892 = vmatpush3.bf16.msra.mxu1 %v15314_v50  ;;  %v12109_v3 = vadd.f32 %v12101_v42, %v12092_v10  ;;  %v12106_v58 = vld [vmem:[#allocation5 + $0x48] sm:$0x3f]  ;;  %v12086_v63 = vld [vmem:[#allocation5 + $0x10] sm:$0x3f]  ;;  %v12087_v41 = vld [vmem:[#allocation5 + $0x18] sm:$0x3f] }
 0xa29   : > { %v21079_v22 = vld [vmem:[#allocation5 + $0x38] sm:$0x3f]  ;;  %15319 = vmatprep.subr.bf16.mxu0 %v15318_v21  ;;  %15889 = vmatprep.subr.bf16.mxu1 %v15318_v21  ;;  %v12110_v44 = vadd.f32 %v12102_v57, %v12093_v18  ;;  %v12094_v35 = vadd.f32 %v12086_v63, %v21089_v37  ;;  %v12103_v20 = vld [vmem:[#allocation5 + $0x20] sm:$0x3f]  ;;  %v12095_v12 = vadd.f32 %v12087_v41, %v21091_v38  ;;  %v12104_v11 = vld [vmem:[#allocation5 + $0x28] sm:$0x3f] }
 0xa2a   : > { %v12089_v4 = vld [vmem:[#allocation5 + $0x38] sm:$0x3f]  ;;  %v12096_v19 = vadd.f32 %v12088_v40, %v21079_v22  ;;  %v12125_v17 = vrot.slane %v12109_v3, 1  ;;  %v12149_v26 = vrot.slane %v12109_v3, 2  ;;  %v21095_v46 = vld [vmem:[#allocation5 + $0x48] sm:$0x3f] }
 0xa2b   : > { %v21081_v6 = vld [vmem:[#allocation5 + $0x40] sm:$0x3f]  ;;  %v12126_v43 = vrot.slane %v12110_v44, 1  ;;  %v12150_v56 = vrot.slane %v12110_v44, 2  ;;  %v12111_v7 = vadd.f32 %v12103_v20, %v12094_v35  ;;  %v12112_v23 = vadd.f32 %v12104_v11, %v12095_v12  ;;  %v21097_v30 = vld [vmem:[#allocation5 + $0x50] sm:$0x3f] }
 0xa2c   : > { %v12105_v16 = vld [vmem:[#allocation5 + $0x40] sm:$0x3f]  ;;  %v12097_v5 = vadd.f32 %v12089_v4, %v21081_v6  ;;  %15321 = vmatpush3.bf16.msra.mxu0 %v15318_v21  ;;  %15893 = vmatpush3.bf16.msra.mxu1 %v15318_v21  ;;  %v12141_v15 = vadd.f32 %v12125_v17, %v12109_v3  ;;  %v12091_v28 = vld [vmem:[#allocation5 + $0x48] sm:$0x3f]  ;;  %v12107_v50 = vld [vmem:[#allocation5 + $0x50] sm:$0x3f] }
 0xa2d   : > { %v12113_v61 = vadd.f32 %v12105_v16, %v12096_v19  ;;  %15323 = vmatprep.subr.bf16.mxu0 %v15322_v36  ;;  %15890 = vmatprep.subr.bf16.mxu1 %v15322_v36  ;;  %v12142_v32 = vadd.f32 %v12126_v43, %v12110_v44  ;;  %v12090_v49 = vld [vmem:[#allocation5 + $0x40] sm:$0x3f]  ;;  %v12127_v39 = vrot.slane %v12111_v7, 1  ;;  %v12151_v9 = vrot.slane %v12111_v7, 2  ;;  %v12108_v42 = vld [vmem:[#allocation5 + $0x58] sm:$0x3f] }
 0xa2e   : > { %v12114_v62 = vadd.f32 %v12106_v58, %v12097_v5  ;;  %v12165_v33 = vadd.f32 %v12149_v26, %v12141_v15  ;;  %v12128_v27 = vrot.slane %v12112_v23, 1  ;;  %v12152_v29 = vrot.slane %v12112_v23, 2  ;;  %s12075_s2 = sadd.s32 1, %s16066_s2  }
 0xa2f   : > { %v12129_v31 = vrot.slane %v12113_v61, 1  ;;  %v12153_v51 = vrot.slane %v12113_v61, 2  ;;  %v12166_v24 = vadd.f32 %v12150_v56, %v12142_v32  ;;  %v12143_v47 = vadd.f32 %v12127_v39, %v12111_v7  ;;  %p12072_p2 = scmp.ge.s32.totalorder %s12075_s2, 9  }
 0xa30   : > { %v12130_v1 = vrot.slane %v12114_v62, 1  ;;  %v12154_v45 = vrot.slane %v12114_v62, 2  ;;  %15325 = vmatpush3.bf16.msra.mxu0 %v15322_v36  ;;  %15894 = vmatpush3.bf16.msra.mxu1 %v15322_v36  ;;  %v12173_v21 = vmul.f32 0.11111111, %v12165_v33  ;;  %v12098_v10 = vadd.f32 %v12090_v49, %v21095_v46  ;;  %v12517_v55 = vld [vmem:[%s21236_s5 + $0x20] sm:$0xff] (%p12072_p2)  ;;  %v12518_v13 = vld [vmem:[%s21236_s5 + $0x28] sm:$0xff] (%p12072_p2) }
 0xa31   : > { %v12145_v48 = vadd.f32 %v12129_v31, %v12113_v61  ;;  %15327 = vmatprep.subr.bf16.mxu0 %v15326_v52  ;;  %15891 = vmatprep.subr.bf16.mxu1 %v15326_v52  ;;  %v12174_v57 = vmul.f32 0.11111111, %v12166_v24  ;;  %v12144_v40 = vadd.f32 %v12128_v27, %v12112_v23  ;;  %v12099_v3 = vadd.f32 %v12091_v28, %v21097_v30  ;;  %v12520_v49 = vld [vmem:[%s21236_s5 + $0x38] sm:$0xff] (%p12072_p2)  ;;  %s16071_s22 = smov (%p12072_p2), [#allocation10]  }
 0xa32   : > { %v12146_v25 = vadd.f32 %v12130_v1, %v12114_v62  ;;  %v12167_v19 = vadd.f32 %v12151_v9, %v12143_v47  ;;  %v12115_v16 = vadd.f32 %v12107_v50, %v12098_v10  ;;  %v12306_v7 = vcombine.high %v21073_v54, %v21073_v54  ;;  %s12612_s23 = sshll.u32 (%p12072_p2), %s16071_s22, 4  ;;  %s12613_s23 = int_to_ptr.vmem [resolvable:$true] %s12612_s23 }
 0xa33   : > { %v12169_v0 = vadd.f32 %v12153_v51, %v12145_v48  ;;  %v12189_v58 = vcombine.low %v12173_v21, %v12174_v57  ;;  %v12168_v5 = vadd.f32 %v12152_v29, %v12144_v40  ;;  %v12116_v36 = vadd.f32 %v12108_v42, %v12099_v3  ;;  %s16020_s24 = scalar_lea.vmem (%p12072_p2), %s12613_s23, 32  ;;  %p16025_p4 = scmp.lt.s32.totalorder (%p12072_p2), %s12613_s23, %s12613_s23 }
 0xa34   : > { %v12170_v18 = vadd.f32 %v12154_v45, %v12146_v25  ;;  %15329 = vmatpush3.bf16.msra.mxu0 %v15326_v52  ;;  %15895 = vmatpush3.bf16.msra.mxu1 %v15326_v52  ;;  %v12175_v63 = vmul.f32 0.11111111, %v12167_v19  ;;  %v12131_v17 = vrot.slane %v12115_v16, 1  ;;  %v12155_v26 = vrot.slane %v12115_v16, 2  ;;  %p16021_p3 = scmp.ne.s32.totalorder (%p12072_p2), %s12613_s23, %s16020_s24  ;;  %p16026_p5 = scmp.lt.s32.totalorder (%p12072_p2), %s16020_s24, %s16020_s24 }
 0xa35   : > { %v12177_v4 = vmul.f32 0.11111111, %v12169_v0  ;;  %15225 = vmatprep.mubr.msk.f32.mxu0 %vm137_vm3, %v12189_v58  ;;  %v12176_v41 = vmul.f32 0.11111111, %v12168_v5  ;;  %v12132_v35 = vrot.slane %v12116_v36, 1  ;;  %v12156_v20 = vrot.slane %v12116_v36, 2 }
 0xa36   : > { %v12178_v44 = vmul.f32 0.11111111, %v12170_v18  ;;  %v12147_v43 = vadd.f32 %v12131_v17, %v12115_v16  ;;  %v12308_v51 = vcombine.high %v21089_v37, %v21089_v37  ;;  %v12309_v32 = vcombine.high %v21091_v38, %v21091_v38  ;;  %p16027_p6 = por (%p12072_p2), %p16026_p5, %p16025_p4 }
 0xa37   : > { %v12190_v56 = vcombine.low %v12175_v63, %v12176_v41  ;;  %v12148_v62 = vadd.f32 %v12132_v35, %v12116_v36  ;;  %vm12314_vm12 = vcmask 1042432   ;;  %vm12315_vm13 = vcmask 1046532  }
 0xa38   : > { %v12191_v61 = vcombine.low %v12177_v4, %v12178_v44  ;;  %v12171_v12 = vadd.f32 %v12155_v26, %v12147_v43  ;;  %v12307_v1 = vcombine.high %v21075_v59, %v21075_v59  ;;  %v13363_v45 = vrot.slane %v21089_v37, 9  ;;  %vm21114_vm14 = vmor %vm12314_vm12, %vm12315_vm13  ;;  %p16028_p7 = pnand (%p12072_p2), %p16027_p6, %p16021_p3 }
 0xa39   : > { %15226 = vmatmul.mubr.msk.f32.vlgmr.msra.gmra.mrb[0].mxu0 %vm137_vm3, %v12190_v56  ;;  %v12172_v11 = vadd.f32 %v12156_v20, %v12148_v62  ;;  %v12327_v23 = vrot.slane %v12308_v51, 5  ;;  %v13361_v33 = vrot.slane %v21073_v54, 9  ;;  %v12319_v48 = vrot.slane %v12306_v7, 5  ;;  %v12513_v56 = vld [vmem:[%s21236_s5] sm:$0xff] (%p12072_p2)  ;;  %v12514_v62 = vld [vmem:[%s21236_s5 + $0x8] sm:$0xff] (%p12072_p2) }
 0xa3a   : > { %15228 = vmatprep.mubr.msk.f32.mxu1 %vm137_vm3, %v12191_v61  ;;  %v12179_v15 = vmul.f32 0.11111111, %v12171_v12  ;;  %v13364_v39 = vrot.slane %v21091_v38, 9  ;;  %v12331_v9 = vrot.slane %v12309_v32, 5  ;;  %v12312_v28 = vcombine.high %v21095_v46, %v21095_v46  ;;  %v12515_v12 = vld [vmem:[%s21236_s5 + $0x10] sm:$0xff] (%p12072_p2) }
 0xa3b   : > { %v12180_v52 = vmul.f32 0.11111111, %v12172_v11  ;;  %v13362_v24 = vrot.slane %v21075_v59, 9  ;;  %v12323_v25 = vrot.slane %v12307_v1, 5  ;;  %v12310_v37 = vcombine.high %v21079_v22, %v21079_v22 }
 0xa3c   : > { %v12328_v27 = vsel %vm21114_vm14, %v13363_v45, %v12327_v23  ;;  %v12313_v29 = vcombine.high %v21097_v30, %v21097_v30  ;;  %v12320_v54 = vsel %vm21114_vm14, %v13361_v33, %v12319_v48  ;;  %v12311_v38 = vcombine.high %v21081_v6, %v21081_v6  ;;  %v12519_v23 = vld [vmem:[%s21236_s5 + $0x30] sm:$0xff] (%p12072_p2) }
 0xa3d   : > { %v12192_v31 = vcombine.low %v12179_v15, %v12180_v52  ;;  %v12332_v59 = vsel %vm21114_vm14, %v13364_v39, %v12331_v9  ;;  %v13367_v21 = vrot.slane %v21095_v46, 9  ;;  %v12343_v0 = vrot.slane %v12312_v28, 5  ;;  %v12516_v52 = vld [vmem:[%s21236_s5 + $0x18] sm:$0xff] (%p12072_p2) }
 0xa3e   : > { %v13365_v47 = vrot.slane %v21079_v22, 9  ;;  %v12324_v18 = vsel %vm21114_vm14, %v13362_v24, %v12323_v25  ;;  %v12335_v40 = vrot.slane %v12310_v37, 5  ;;  %v13368_v3 = vrot.slane %v21097_v30, 9 }
 0xa3f   : > { %15229 = vmatmul.mubr.msk.f32.vlgmr.msra.gmra.mrb[0].mxu1 %vm137_vm3, %v12192_v31  ;;  %v12347_v4 = vrot.slane %v12313_v29, 5  ;;  %v13366_v46 = vrot.slane %v21081_v6, 9  ;;  %v12339_v44 = vrot.slane %v12311_v38, 5  ;;  %v12344_v22 = vsel %vm21114_vm14, %v13367_v21, %v12343_v0 }
 0xa40   : > { %v12336_v30 = vsel %vm21114_vm14, %v13365_v47, %v12335_v40  ;;  %v16069_v11 = vmov (%p12072_p2), 0.0|0.0   ;;  %v15331_v15 = vpack.c.bf16 (%p12072_p2), %v12514_v62, %v12513_v56  ;;  %vm16070_vm15 = vmmov (%p12072_p2), 0  }
 0xa41   : > { %v12348_v63 = vsel %vm21114_vm14, %v13368_v3, %v12347_v4  ;;  %v12340_v61 = vsel %vm21114_vm14, %v13366_v46, %v12339_v44  ;;  %15330 = vmatprep.subr.bf16.mxu0 (%p12072_p2), %v16069_v11  ;;  %v21472_v53 = vmov (%p12072_p2), 0.0   ;;  %v15334_v34 = vpack.c.bf16 (%p12072_p2), %v12516_v52, %v12515_v12 }
 0xa42   :  { %15247 = vmatprep.mubr.msk.f32.mxu0 (%p12072_p2), %vm16070_vm15, %v21472_v53  ;;  %15332 = vmatpush3.bf16.msra.mxu0 (%p12072_p2), %v15331_v15  ;;  %v15337_v32 = vpack.c.bf16 (%p12072_p2), %v12518_v13, %v12517_v55  ;;  %v15340_v28 = vpack.c.bf16 (%p12072_p2), %v12520_v49, %v12519_v23  ;;  %v13371_v23 = vld [vmem:[%s21234_s3 + $0x2] ss:$0 sm:$0xff] (%p12072_p2)  ;;  %vm12530_vm0 = vcmask (%p12072_p2), 1041409   ;;  %vm12604_vm1 = vcmask (%p12072_p2), 74752  }
 0xa43   :  { %15333 = vmatprep.subr.bf16.mxu0 (%p12072_p2), %v16069_v11 }
 0xa46   :  { %15335 = vmatpush3.bf16.msra.mxu0 (%p12072_p2), %v15334_v34 }
 0xa47   :  { %15336 = vmatprep.subr.bf16.mxu0 (%p12072_p2), %v16069_v11 }
 0xa4a   :  { %15338 = vmatpush3.bf16.msra.mxu0 (%p12072_p2), %v15337_v32 }
 0xa4b   :  { %15339 = vmatprep.subr.bf16.mxu0 (%p12072_p2), %v16069_v11 }
 0xa4e   :  { %15341 = vmatpush3.bf16.msra.mxu0 (%p12072_p2), %v15340_v28 }
 0xb0c   : > { %v15227_v50 = vpop.f32.mrb[0].mxu0 }
 0xb0d   : > { %v12291_v10 = vcombine.high %v15227_v50, %v15227_v50  ;;  %v12359_v42 = vadd.f32 %v15227_v50, %v12328_v27  ;;  %v12267_v57 = vpop.f32.mrb[1].mxu0 }
 0xb0e   : > { %v12290_v19 = vcombine.high %v12267_v57, %v12267_v57  ;;  %v12357_v16 = vadd.f32 %v12320_v54, %v12267_v57 }
 0xb0f   : > { %v12360_v58 = vadd.f32 %v12332_v59, %v12291_v10  ;;  %12367 = vst.msk [vmem:[#allocation5 + $0x19] sm:$0xf] %vm12052_vm11, %v12359_v42 }
 0xb10   : > { %v12358_v5 = vadd.f32 %v12324_v18, %v12290_v19  ;;  %12365 = vst.msk [vmem:[#allocation5 + $0x9] sm:$0xf] %vm12052_vm11, %v12357_v16 }
 0xb11   : > { %12368 = vst.msk [vmem:[#allocation5 + $0x21] sm:$0xf] %vm12052_vm11, %v12360_v58 }
 0xb12   : > { %v15230_v36 = vpop.f32.mrb[0].mxu1  ;;  %12366 = vst.msk [vmem:[#allocation5 + $0x11] sm:$0xf] %vm12052_vm11, %v12358_v5 }
 0xb13   : > { %v12293_v17 = vcombine.high %v15230_v36, %v15230_v36  ;;  %v12363_v6 = vadd.f32 %v15230_v36, %v12344_v22  ;;  %v12277_v26 = vpop.f32.mrb[1].mxu1 }
 0xb14   : > { %v12292_v41 = vcombine.high %v12277_v26, %v12277_v26  ;;  %v12361_v35 = vadd.f32 %v12336_v30, %v12277_v26 }
 0xb15   : > { %v12364_v20 = vadd.f32 %v12348_v63, %v12293_v17  ;;  %12371 = vst.msk [vmem:[#allocation5 + $0x49] sm:$0xf] %vm12052_vm11, %v12363_v6 }
 0xb16   : > { %v12362_v43 = vadd.f32 %v12340_v61, %v12292_v41  ;;  %12369 = vst.msk [vmem:[#allocation5 + $0x39] sm:$0xf] %vm12052_vm11, %v12361_v35  ;;  %v12375_v14 = vld [vmem:[#allocation5 + $0x19] sm:$0xf] (%p12072_p2) }
 0xb17   : > { %12372 = vst.msk [vmem:[#allocation5 + $0x51] sm:$0xf] %vm12052_vm11, %v12364_v20  ;;  %12074 = sbr.rel (!%p12072_p2) target bundleno = 2597 (0xa25), region = 127  ;;  %v12373_v2 = vld [vmem:[#allocation5 + $0x9] sm:$0xf] (%p12072_p2)  ;;  %v12388_v7 = vsel (%p12072_p2), %vm12052_vm11, %v12375_v14, 0.0 }
 0xb18   : > { %12370 = vst.msk [vmem:[#allocation5 + $0x41] sm:$0xf] %vm12052_vm11, %v12362_v43  ;;  %v12376_v60 = vld [vmem:[#allocation5 + $0x21] sm:$0xf] (%p12072_p2)  ;;  %v12385_v31 = vsel (%p12072_p2), %vm12052_vm11, %v12373_v2, 0.0 }
 0xb19   :  { %v12374_v8 = vld [vmem:[#allocation5 + $0x11] sm:$0xf] (%p12072_p2)  ;;  %v12390_v33 = vsel (%p12072_p2), %vm12052_vm11, %v12376_v60, 0.0 }
 0xb1a   :  { %v12386_v51 = vsel (%p12072_p2), %vm12052_vm11, %v12374_v8, 0.0 }
 0xb1b   :  { %v12387_v45 = vadd.f32 (%p12072_p2), %v12386_v51, %v12385_v31 }
 0xb1c   :  { %v12379_v24 = vld [vmem:[#allocation5 + $0x49] sm:$0xf] (%p12072_p2) }
 0xb1d   :  { %v12377_v1 = vld [vmem:[#allocation5 + $0x39] sm:$0xf] (%p12072_p2)  ;;  %v12389_v39 = vadd.f32 (%p12072_p2), %v12388_v7, %v12387_v45  ;;  %v12396_v54 = vsel (%p12072_p2), %vm12052_vm11, %v12379_v24, 0.0 }
 0xb1e   :  { %v12392_v9 = vsel %vm12052_vm11, %v12377_v1, 0.0  ;;  %v12380_v27 = vld [vmem:[#allocation5 + $0x51] sm:$0xf] }
 0xb1f   :  { %v12378_v48 = vld [vmem:[#allocation5 + $0x41] sm:$0xf]  ;;  %v12391_v25 = vadd.f32 %v12390_v33, %v12389_v39  ;;  %v12398_v50 = vsel %vm12052_vm11, %v12380_v27, 0.0 }
 0xb20   :  { %v12394_v37 = vsel %vm12052_vm11, %v12378_v48, 0.0 }
 0xb21   :  { %v12393_v29 = vadd.f32 %v12392_v9, %v12391_v25  ;;  %v13372_v9 = vld [vmem:[%s21235_s4 + $0x2] ss:$0 sm:$0xff] }
 0xb23   :  { %v12395_v38 = vadd.f32 %v12394_v37, %v12393_v29 }
 0xb25   :  { %v12397_v59 = vadd.f32 %v12396_v54, %v12395_v38 }
 0xb27   :  { %v12399_v21 = vadd.f32 %v12398_v50, %v12397_v59 }
 0xb29   :  { %v12400_v0 = vrot.slane %v12399_v21, 4 }
 0xb2b   :  { %v12401_v47 = vadd.f32 %v12400_v0, %v12399_v21 }
 0xb2d   :  { %v12402_v10 = vrot.slane %v12401_v47, 2 }
 0xb2f   :  { %v12403_v42 = vadd.f32 %v12402_v10, %v12401_v47 }
 0xb31   :  { %v12404_v57 = vrot.slane %v12403_v42, 1 }
 0xb33   :  { %v12405_v18 = vadd.f32 %v12404_v57, %v12403_v42 }
 0xb35   :  { %v12407_v40 = vmul.f32 0.03125, %v12405_v18 }
 0xb37   :  { %v12408_v3 = vsub.f32 %v12373_v2, %v12407_v40  ;;  %v12409_v4 = vsub.f32 %v12374_v8, %v12407_v40  ;;  %v12410_v19 = vsub.f32 %v12375_v14, %v12407_v40  ;;  %v12411_v16 = vsub.f32 %v12376_v60, %v12407_v40 }
 0xb38   :  { %v12412_v58 = vsub.f32 %v12377_v1, %v12407_v40  ;;  %v12413_v46 = vsub.f32 %v12378_v48, %v12407_v40  ;;  %v12414_v36 = vsub.f32 %v12379_v24, %v12407_v40  ;;  %v12415_v41 = vsub.f32 %v12380_v27, %v12407_v40 }
 0xb39   :  { %v12416_v44 = vmul.f32 %v12408_v3, %v12408_v3  ;;  %v12417_v22 = vmul.f32 %v12409_v4, %v12409_v4  ;;  %v12418_v5 = vmul.f32 %v12410_v19, %v12410_v19  ;;  %v12419_v30 = vmul.f32 %v12411_v16, %v12411_v16 }
 0xb3a   :  { %v12420_v63 = vmul.f32 %v12412_v58, %v12412_v58  ;;  %v12421_v35 = vmul.f32 %v12413_v46, %v12413_v46  ;;  %v12422_v56 = vmul.f32 %v12414_v36, %v12414_v36  ;;  %v12423_v11 = vmul.f32 %v12415_v41, %v12415_v41 }
 0xb3b   :  { %v12424_v17 = vsel %vm12052_vm11, %v12416_v44, 0.0  ;;  %v12425_v6 = vsel %vm12052_vm11, %v12417_v22, 0.0  ;;  %v12427_v26 = vsel %vm12052_vm11, %v12418_v5, 0.0  ;;  %v12429_v20 = vsel %vm12052_vm11, %v12419_v30, 0.0 }
 0xb3c   :  { %v12426_v61 = vadd.f32 %v12425_v6, %v12424_v17  ;;  %v12431_v62 = vsel %vm12052_vm11, %v12420_v63, 0.0  ;;  %v12433_v15 = vsel %vm12052_vm11, %v12421_v35, 0.0  ;;  %v12435_v53 = vsel %vm12052_vm11, %v12422_v56, 0.0 }
 0xb3d   :  { %v12437_v2 = vsel %vm12052_vm11, %v12423_v11, 0.0 }
 0xb3e   :  { %v12428_v43 = vadd.f32 %v12427_v26, %v12426_v61 }
 0xb40   :  { %v12430_v12 = vadd.f32 %v12429_v20, %v12428_v43 }
 0xb42   :  { %v12432_v52 = vadd.f32 %v12431_v62, %v12430_v12 }
 0xb44   :  { %v12434_v34 = vadd.f32 %v12433_v15, %v12432_v52 }
 0xb46   :  { %v12436_v8 = vadd.f32 %v12435_v53, %v12434_v34 }
 0xb48   :  { %v12438_v14 = vadd.f32 %v12437_v2, %v12436_v8 }
 0xb4a   :  { %v12439_v55 = vrot.slane %v12438_v14, 4 }
 0xb4c   :  { %v12440_v13 = vadd.f32 %v12439_v55, %v12438_v14  ;;  %v13373_v55 = vld [vmem:[%s21237_s6] ss:$0 sm:$0xff] }
 0xb4e   :  { %v12441_v60 = vrot.slane %v12440_v13, 2 }
 0xb50   :  { %v12442_v31 = vadd.f32 %v12441_v60, %v12440_v13 }
 0xb52   :  { %v12443_v51 = vrot.slane %v12442_v31, 1 }
 0xb54   :  { %v12444_v7 = vadd.f32 %v12443_v51, %v12442_v31 }
 0xb56   :  { %v12445_v32 = vmul.f32 0.03125, %v12444_v7 }
 0xb58   :  { %v12446_v1 = vadd.f32 1e-05, %v12445_v32 }
 0xb5a   :  { %16018 = vrsqrt.f32 %v12446_v1 }
 0xb64   :  { %v16019_v45 = vpop.eup %16018 }
 0xb65   :  { %v12448_v49 = vmul.f32 %v16019_v45, %v12408_v3  ;;  %v12449_v33 = vmul.f32 %v16019_v45, %v12409_v4  ;;  %v12450_v48 = vmul.f32 %v16019_v45, %v12410_v19  ;;  %v12451_v39 = vmul.f32 %v16019_v45, %v12411_v16 }
 0xb66   :  { %v12452_v28 = vmul.f32 %v16019_v45, %v12412_v58  ;;  %v12453_v24 = vmul.f32 %v16019_v45, %v12413_v46  ;;  %v12454_v25 = vmul.f32 %v16019_v45, %v12414_v36  ;;  %v12455_v37 = vmul.f32 %v16019_v45, %v12415_v41 }
 0xb67   :  { %v12462_v27 = vmul.f32 %v13371_v23, %v12448_v49  ;;  %v12463_v29 = vmul.f32 %v13371_v23, %v12449_v33  ;;  %v12464_v54 = vmul.f32 %v13371_v23, %v12450_v48  ;;  %v12465_v38 = vmul.f32 %v13371_v23, %v12451_v39 }
 0xb68   :  { %v12466_v50 = vmul.f32 %v13371_v23, %v12452_v28  ;;  %v12467_v59 = vmul.f32 %v13371_v23, %v12453_v24  ;;  %v12468_v21 = vmul.f32 %v13371_v23, %v12454_v25  ;;  %v12469_v0 = vmul.f32 %v13371_v23, %v12455_v37 }
 0xb69   :  { %v12476_v47 = vadd.f32 %v13372_v9, %v12462_v27  ;;  %v12477_v10 = vadd.f32 %v13372_v9, %v12463_v29  ;;  %v12478_v42 = vadd.f32 %v13372_v9, %v12464_v54  ;;  %v12479_v57 = vadd.f32 %v13372_v9, %v12465_v38 }
 0xb6a   :  { %v12480_v18 = vadd.f32 %v13372_v9, %v12466_v50  ;;  %v12481_v40 = vadd.f32 %v13372_v9, %v12467_v59  ;;  %v12482_v3 = vadd.f32 %v13372_v9, %v12468_v21  ;;  %v12483_v4 = vadd.f32 %v13372_v9, %v12469_v0 }
 0xb6b   :  { %v12484_v19 = vsel %vm12052_vm11, %v12476_v47, 0.0  ;;  %v12485_v16 = vsel %vm12052_vm11, %v12477_v10, 0.0  ;;  %v12487_v58 = vsel %vm12052_vm11, %v12478_v42, 0.0  ;;  %v12489_v30 = vsel %vm12052_vm11, %v12479_v57, 0.0 }
 0xb6c   :  { %v12486_v46 = vadd.f32 %v12485_v16, %v12484_v19  ;;  %v12497_v44 = vsel %vm12052_vm11, %v12480_v18, 0.0  ;;  %v12498_v22 = vsel %vm12052_vm11, %v12481_v40, 0.0  ;;  %v12500_v5 = vsel %vm12052_vm11, %v12482_v3, 0.0 }
 0xb6d   :  { %v12499_v36 = vadd.f32 %v12498_v22, %v12497_v44  ;;  %v12502_v17 = vsel %vm12052_vm11, %v12483_v4, 0.0 }
 0xb6e   :  { %v12488_v63 = vadd.f32 %v12487_v58, %v12486_v46 }
 0xb6f   :  { %v12501_v6 = vadd.f32 %v12500_v5, %v12499_v36 }
 0xb70   :  { %v12490_v26 = vadd.f32 %v12489_v30, %v12488_v63 }
 0xb71   :  { %v12503_v61 = vadd.f32 %v12502_v17, %v12501_v6 }
 0xb72   :  { %v12491_v41 = vrot.slane %v12490_v26, 4 }
 0xb73   :  { %v12504_v35 = vrot.slane %v12503_v61, 4 }
 0xb74   :  { %v12492_v20 = vadd.f32 %v12491_v41, %v12490_v26 }
 0xb75   :  { %v12505_v43 = vadd.f32 %v12504_v35, %v12503_v61 }
 0xb76   :  { %v12493_v56 = vrot.slane %v12492_v20, 2 }
 0xb77   :  { %v12506_v62 = vrot.slane %v12505_v43, 2 }
 0xb78   :  { %v12494_v12 = vadd.f32 %v12493_v56, %v12492_v20 }
 0xb79   :  { %v12507_v11 = vadd.f32 %v12506_v62, %v12505_v43 }
 0xb7a   :  { %v12495_v15 = vrot.slane %v12494_v12, 1 }
 0xb7b   :  { %v12508_v52 = vrot.slane %v12507_v11, 1 }
 0xb7c   :  { %v12496_v53 = vadd.f32 %v12495_v15, %v12494_v12 }
 0xb7d   :  { %v12509_v34 = vadd.f32 %v12508_v52, %v12507_v11 }
 0xb7e   :  { %v12511_v2 = vmul.f32 0.0625, %v12496_v53 }
 0xb7f   :  { %v12512_v8 = vmul.f32 0.0625, %v12509_v34 }
 0xb81   :  { %v12531_v14 = vsel %vm12530_vm0, %v12512_v8, %v12511_v2 }
 0xb82   :  { %15248 = vmatmul.mubr.msk.f32.vlgmr.msra.gmra.mrb[0].mxu0 %vm137_vm3, %v12531_v14 }
 0xc55   :  { %v12600_v13 = vpop.f32.mrb[0].mxu0 }
 0xc56   :  { %v12601_v60 = vadd.f32 %v13373_v55, %v12600_v13  ;;  %v15249_v31 = vpop.f32.mrb[1].mxu0 }
 0xc58   :  { %12605 = vst.msk [vmem:[#allocation10] sm:$0x3] %vm12604_vm1, %v12601_v60 }
 0xc59   :  { %16031 = shalt.err (!%p16028_p7)
}
 0xc5a   :  { %s16032_s27 = scalar_lea.hbm %s21238_s7, 32 }
 0xc5b   :  { %p16033_p8 = scmp.ne.s32.totalorder %s21238_s7, %s16032_s27  ;;  %p16036_p9 = scmp.lt.u32.totalorder %s16032_s27, %s21238_s7 }
 0xc5d   :  { %p16038_p10 = pnand %p16036_p9, %p16033_p8 }
 0xc5f   :  { %16041 = shalt.err (!%p16038_p10)
}
 0xc60   :  { %12615 = dma.vmem_to_hbm [thread:$0]  %s12613_s23, 32, %s21238_s7, [#allocation11]  }
 0xc61   :  { %16054 = dma.done.wait [#allocation11], 32  }
 0xc62   :  { %16055 = vsyncadd [#allocation11], 4294967264 }
 0xc63   :  { %12619 = vsyncpa [#allocation11], 1 }

</bundles_post_ra>
